<compile_context>
chip_gen: v7x
topology: tpu7x:2x2x1
jax: 0.10.0
libtpu: 0.0.40
codegen_flags: <defaults>
</compile_context>

<pallas_src>
import math

import jax
import jax.numpy as jnp
from jax.experimental import pallas as pl
from jax.experimental.pallas import tpu as pltpu

# ---------------- configuration (mirrors OrbitalNetwork.__init__) ----------------
LMAX = 2
NUM_BASIS = 10          # self.number_of_basis
FC_HIDDEN = 100         # fc_neurons = [10, 100]
FC_PAD = 128            # zero-padded hidden width (lane-aligned; math unchanged)
MAX_RADIUS = 2.5
MUL = 8                 # hidden multiplicity (module default 25, kept small)
NUM_NEIGHBORS = 3.0
NUM_NODES = 4           # self.num_nodes (per-graph), used in final .div(sqrt(num_nodes))
C_IN = 4                # irreps_node_input = "4x0e"
C_S = math.sin(math.pi / 8.0)
C_X = math.cos(math.pi / 8.0)

# irrep layouts: tuple of (l, mul)
IN0_LAYOUT = ((0, C_IN),)
MID0_LAYOUT = ((0, C_IN), (1, C_IN), (2, C_IN))
HIDDEN_LAYOUT = ((0, MUL), (1, MUL), (2, MUL))
GATEIN_LAYOUT = ((0, 3 * MUL), (1, MUL), (2, MUL))   # feats + gates + gated (pre-Gate)
OUT_LAYOUT = ((0, 4), (1, 2), (2, 2))                # irreps_out = "4x0e + 2x1o + 2x2e"

LAYER_CFGS = [
    dict(in_layout=IN0_LAYOUT, mid_layout=MID0_LAYOUT, out_layout=GATEIN_LAYOUT, gate_mul=MUL),
    dict(in_layout=HIDDEN_LAYOUT, mid_layout=HIDDEN_LAYOUT, out_layout=GATEIN_LAYOUT, gate_mul=MUL),
    dict(in_layout=HIDDEN_LAYOUT, mid_layout=HIDDEN_LAYOUT, out_layout=OUT_LAYOUT, gate_mul=None),
]  # = 2 gated convolutions + 1 output convolution (e3nn MessagePassing structure)

OUT_F = sum(m * (2 * l + 1) for l, m in OUT_LAYOUT)   # 20
OUT_PAD = 128                                         # lane-dense output width
OUT_ROWS = 8                                          # sublane-dense output rows


def layout_dim(layout):
    return sum(mul * (2 * l + 1) for l, mul in layout)


def layout_offsets(layout):
    offs, o = [], 0
    for l, mul in layout:
        offs.append(o)
        o += mul * (2 * l + 1)
    return offs


def weight_numel(in_layout):
    # uvu tensor-product weights per edge (3 path families for scalar-only input, 7 otherwise)
    return (3 if len(in_layout) == 1 else 7) * in_layout[0][1]


# ---------------- parameter construction (plain-JAX glue) ----------------
def block_linear(key, in_layout, out_layout):
    """Dense [Fin, Fout] matrix for a per-l e3nn-style linear (x*attr) @ W / sqrt(fan_in),
    same weight for every m (kron(I_{2l+1}, W) given the m-major layout)."""
    Fin, Fout = layout_dim(in_layout), layout_dim(out_layout)
    W = jnp.zeros((Fin, Fout), jnp.float32)
    in_offs, out_offs = layout_offsets(in_layout), layout_offsets(out_layout)
    keys = jax.random.split(key, len(in_layout) * len(out_layout))
    k = 0
    for (li, mi), oi in zip(in_layout, in_offs):
        for (lo, mo), oo in zip(out_layout, out_offs):
            if li == lo:
                w = jax.random.normal(keys[k], (mi, mo), jnp.float32) / math.sqrt(mi)
                blk = jnp.kron(jnp.eye(2 * li + 1, dtype=jnp.float32), w)
                W = W.at[oi:oi + mi * (2 * li + 1), oo:oo + mo * (2 * lo + 1)].set(blk)
            k += 1
    return W


def init_params(key):
    params = []
    for i, cfg in enumerate(LAYER_CFGS):
        k = jax.random.fold_in(key, i)
        k1, k2, k3, k4, k5 = jax.random.split(k, 5)
        P = weight_numel(cfg["in_layout"])
        # zero-padded radial FC weights (hidden 100 -> 128): math identical, lane-aligned.
        wfc1 = jnp.zeros((NUM_BASIS, FC_PAD), jnp.float32).at[:, :FC_HIDDEN].set(
            jax.random.normal(k1, (NUM_BASIS, FC_HIDDEN), jnp.float32))
        wfc2 = jnp.zeros((FC_PAD, P), jnp.float32).at[:FC_HIDDEN, :].set(
            jax.random.normal(k2, (FC_HIDDEN, P), jnp.float32))
        params.append(dict(
            wfc1=wfc1,
            wfc2=wfc2,
            wlin1=block_linear(k3, cfg["in_layout"], cfg["in_layout"]),
            wsc=block_linear(k4, cfg["in_layout"], cfg["out_layout"]),
            wlin2=block_linear(k5, cfg["mid_layout"], cfg["out_layout"]),
        ))
    return params


# ---------------- glue-side weight packing (fold constants, bake replication, fuse) ----------
def pack_weights(params):
    def rep(k, mu):
        # [mu, k*mu] m-major replication: column m*mu+u picks source column u
        return jnp.tile(jnp.eye(mu, dtype=jnp.float32), (1, k))

    # (a) radial FC hoisted across layers: one first-layer slab, fan-in scale folded in
    wfc1_all = jnp.concatenate(
        [p["wfc1"] * (1.0 / math.sqrt(NUM_BASIS)) for p in params], axis=1
    ).astype(jnp.bfloat16)                                            # [10, 3*128]

    # (b) block-diagonal second FC slab whose columns already carry the m-replication
    #     and every per-path normalization constant.
    s3, s5, s2 = math.sqrt(3.0), math.sqrt(5.0), math.sqrt(2.0)
    blocks = []
    for p, cfg in zip(params, LAYER_CFGS):
        mu = cfg["in_layout"][0][1]
        w2 = p["wfc2"] * (1.0 / math.sqrt(FC_HIDDEN))
        cols = [w2[:, k * mu:(k + 1) * mu] for k in range(w2.shape[1] // mu)]
        if len(cfg["in_layout"]) == 1:       # scalar-only input: paths 0x0->0, 0x1->1, 0x2->2
            exp = [cols[0], cols[1] @ rep(3, mu), cols[2] @ rep(5, mu)]
        else:                                # paths A..G (see kernel)
            exp = [cols[0] / s3, cols[1] / (s3 * s3), cols[2] / (s5 * s3),
                   (cols[3] @ rep(3, mu)) / s2, (cols[4] @ rep(3, mu)) / s2,
                   (cols[5] @ rep(5, mu)) / s2, (cols[6] @ rep(5, mu)) / s2]
        blocks.append(jnp.concatenate(exp, axis=1))
    pexp_tot = sum(b.shape[1] for b in blocks)
    wfc2_all = jnp.zeros((len(params) * FC_PAD, pexp_tot), jnp.float32)
    col = 0
    for li, b in enumerate(blocks):
        wfc2_all = wfc2_all.at[li * FC_PAD:(li + 1) * FC_PAD, col:col + b.shape[1]].set(b)
        col += b.shape[1]
    wfc2_all = wfc2_all.astype(jnp.bfloat16)                          # [384, 340]

    # (c) per-layer fused node linear: [wlin1 | wlin1_l0@rep3 | wlin1_l0@rep5 | C_S*wsc]
    #     and wlin2 pre-scaled by C_X / sqrt(num_neighbors).
    w1sc, wl2 = [], []
    for p, cfg in zip(params, LAYER_CFGS):
        mu = cfg["in_layout"][0][1]
        w1 = p["wlin1"]
        w1sc.append(jnp.concatenate(
            [w1, w1[:, :mu] @ rep(3, mu), w1[:, :mu] @ rep(5, mu), C_S * p["wsc"]],
            axis=1).astype(jnp.bfloat16))
        wl2.append((p["wlin2"] * (C_X / math.sqrt(NUM_NEIGHBORS))).astype(jnp.bfloat16))
    return wfc1_all, wfc2_all, w1sc, wl2


# ---------------- fused Pallas kernel: edge feats + 3 conv layers + gate + pool -------------
def _fused_forward_kernel(edge_ref, node_ref, boht_ref,
                          wfc1_ref, wfc2_ref,
                          w1sc0_ref, w1sc1_ref, w1sc2_ref,
                          wl20_ref, wl21_ref, wl22_ref,
                          out_ref):
    w1sc_refs = (w1sc0_ref, w1sc1_ref, w1sc2_ref)
    wl2_refs = (wl20_ref, wl21_ref, wl22_ref)
    f32, bf16 = jnp.float32, jnp.bfloat16
    E = edge_ref.shape[0]
    N = node_ref.shape[0]
    B = out_ref.shape[0]

    # ---- edge attributes: spherical harmonics (component norm.) + radial embedding ----
    ed = edge_ref[...]                                # [E, 4] = (vec_x, vec_y, vec_z, mask)
    ex, ey, ez, mask = ed[:, 0:1], ed[:, 1:2], ed[:, 2:3], ed[:, 3:4]
    r2 = ex * ex + ey * ey + ez * ez
    inv_r = jax.lax.rsqrt(jnp.maximum(r2, 1e-24))     # EUP rsqrt; self-edges masked to 0 anyway
    r = r2 * inv_r
    xn, yn, zn = ex * inv_r, ey * inv_r, ez * inv_r
    s3c, s5c = math.sqrt(3.0), math.sqrt(5.0)
    Y0 = mask
    # l=1 and l=2 components packed as one [E, 8] slab (mask folded in)
    yl = jnp.concatenate(
        [s3c * xn, s3c * yn, s3c * zn,
         s5c * s3c * xn * zn, s5c * s3c * xn * yn,
         s5c * (yn * yn - 0.5 * (xn * xn + zn * zn)),
         s5c * s3c * yn * zn, s5c * (s3c / 2.0) * (zn * zn - xn * xn)], axis=-1) * mask

    # soft_one_hot_linspace(r, 0, max_radius, 10, basis='cosine', cutoff=True) * sqrt(10)
    step = MAX_RADIUS / (NUM_BASIS + 1)
    idx = (jax.lax.broadcasted_iota(jnp.int32, (1, NUM_BASIS), 1) + 1).astype(f32)
    diff = (r - idx * step) / step
    emb = jnp.where((diff > -1.0) & (diff < 1.0), jnp.cos(0.5 * math.pi * diff), 0.0)
    emb = emb * (math.sqrt(float(NUM_BASIS)) * mask)

    # ---- radial FC for ALL layers: 2 matmuls + 1 silu (fan-in scales, path constants
    #      and m-replication baked into the weight slabs in glue) ----
    h = jax.nn.silu(jnp.dot(emb.astype(bf16), wfc1_ref[...],
                            preferred_element_type=f32))              # [E, 3*FC_PAD]
    wall = jnp.dot(h.astype(bf16), wfc2_ref[...],
                   preferred_element_type=f32)                        # [E, sum Pexp]

    # ---- constant 0/1 matrices (gather / sh-replication / m-fold / gate-replication)
    #      built once from iota compares; replication & m-contraction then run on the
    #      otherwise-idle MXU instead of broadcast/concat shuffles on the VPU/XLU ----
    def sh_rep(mu, l):
        # [8, (2l+1)*mu]: yl @ R picks the l-block of yl and replicates each sh col mu times
        base = 0 if l == 1 else 3
        m = jax.lax.broadcasted_iota(jnp.int32, (8, (2 * l + 1) * mu), 0)
        c = jax.lax.broadcasted_iota(jnp.int32, (8, (2 * l + 1) * mu), 1)
        return ((c >= (m - base) * mu) & (c < (m - base + 1) * mu)).astype(f32)

    def mu_rep(k, mu):
        # [mu, k*mu]: g @ R tiles the mu columns k times (m-major)
        u = jax.lax.broadcasted_iota(jnp.int32, (mu, k * mu), 0)
        c = jax.lax.broadcasted_iota(jnp.int32, (mu, k * mu), 1)
        hit = c == u
        for m in range(1, k):
            hit = hit | (c == u + m * mu)
        return hit.astype(f32)

    def mu_fold(k, mu):
        # [k*mu, mu]: p @ F sums the k m-blocks (l⊗l→0 contraction over m)
        rI = jax.lax.broadcasted_iota(jnp.int32, (k * mu, mu), 0)
        u = jax.lax.broadcasted_iota(jnp.int32, (k * mu, mu), 1)
        hit = rI == u
        for m in range(1, k):
            hit = hit | (rI == u + m * mu)
        return hit.astype(f32)

    # src gather: edge e = src*N + dst  ->  G[e, i] = 1 iff src(e) == i
    eI = jax.lax.broadcasted_iota(jnp.int32, (E, N), 0)
    nI = jax.lax.broadcasted_iota(jnp.int32, (E, N), 1)
    G = ((eI >= nI * N) & (eI < (nI + 1) * N)).astype(f32)

    mus = sorted({cfg["in_layout"][0][1] for cfg in LAYER_CFGS})
    y1rep = {m: jnp.dot(yl, sh_rep(m, 1), preferred_element_type=f32) for m in mus}
    y2rep = {m: jnp.dot(yl, sh_rep(m, 2), preferred_element_type=f32) for m in mus}
    fold3 = mu_fold(3, MUL)
    fold5 = mu_fold(5, MUL)
    grep3 = mu_rep(3, MUL)
    grep5 = mu_rep(5, MUL)

    # ---- equivariant convolution layers ----
    nd = node_ref[...]                                 # [N, 8] = (x | z | pad)
    feats = nd[:, 0:C_IN]
    attr = nd[:, C_IN:C_IN + 1]                        # "1x0e" node attribute

    woff = 0
    for li, cfg in enumerate(LAYER_CFGS):
        in_layout = cfg["in_layout"]
        scalar_only = len(in_layout) == 1
        mu = in_layout[0][1]
        fin = layout_dim(in_layout)
        fout = layout_dim(cfg["out_layout"])
        Y1r, Y2r = y1rep[mu], y2rep[mu]

        # fused [wlin1 | x0-rep3 | x0-rep5 | C_S*wsc] linear: one bf16 MXU call
        xa = feats * attr
        t = jnp.dot(xa.astype(bf16), w1sc_refs[li][...], preferred_element_type=f32)
        gcols = fin + 8 * mu
        sc_out = t[:, gcols:gcols + fout]                              # [N, Fout]
        xs = jnp.dot(G, t[:, :gcols], preferred_element_type=f32)      # src gather -> [E, *]

        x0 = xs[:, 0:mu]
        x0r3 = xs[:, fin:fin + 3 * mu]
        x0r5 = xs[:, fin + 3 * mu:gcols]

        if scalar_only:
            w0 = wall[:, woff:woff + mu]
            w1r = wall[:, woff + mu:woff + 4 * mu]
            w2r = wall[:, woff + 4 * mu:woff + 9 * mu]
            woff += 9 * mu
            out0 = w0 * x0 * Y0
            out1 = w1r * x0r3 * Y1r
            out2 = w2r * x0r5 * Y2r
        else:
            x1 = xs[:, mu:4 * mu]
            x2 = xs[:, 4 * mu:9 * mu]
            wA = wall[:, woff:woff + mu]
            wB = wall[:, woff + mu:woff + 2 * mu]
            wC = wall[:, woff + 2 * mu:woff + 3 * mu]
            wDr = wall[:, woff + 3 * mu:woff + 6 * mu]
            wEr = wall[:, woff + 6 * mu:woff + 9 * mu]
            wFr = wall[:, woff + 9 * mu:woff + 14 * mu]
            wGr = wall[:, woff + 14 * mu:woff + 19 * mu]
            woff += 19 * mu
            p1 = x1 * Y1r
            p2 = x2 * Y2r
            d1 = jnp.dot(p1, fold3, preferred_element_type=f32)        # l=1 ⊗ l=1 -> 0
            d2 = jnp.dot(p2, fold5, preferred_element_type=f32)        # l=2 ⊗ l=2 -> 0
            out0 = wA * (x0 * Y0) + wB * d1 + wC * d2
            out1 = wDr * (x0r3 * Y1r) + wEr * (x1 * Y0)
            out2 = wFr * (x0r5 * Y2r) + wGr * (x2 * Y0)

        msg = jnp.concatenate([out0, out1, out2], axis=-1)             # [E, Fmid]

        # scatter-sum over dst: tree reduction over contiguous src blocks (log2(N) adds)
        cur, size = msg, E
        while size > N:
            size //= 2
            cur = cur[0:size, :] + cur[size:2 * size, :]
        agg = cur                                                      # [N, Fmid]

        conv = jnp.dot((agg * attr).astype(bf16), wl2_refs[li][...],
                       preferred_element_type=f32)                     # [N, Fout]
        y = sc_out + conv       # C_S / C_X / 1/sqrt(num_neighbors) folded into weights

        g = cfg["gate_mul"]
        if g is not None:       # e3nn Gate (silu scalars, sigmoid gates); f32 VPU/EUP math
            g1r = jnp.dot(jax.nn.sigmoid(y[:, g:2 * g]), grep3, preferred_element_type=f32)
            g2r = jnp.dot(jax.nn.sigmoid(y[:, 2 * g:3 * g]), grep5, preferred_element_type=f32)
            feats = jnp.concatenate(
                [jax.nn.silu(y[:, 0:g]), y[:, 3 * g:6 * g] * g1r, y[:, 6 * g:11 * g] * g2r],
                axis=-1)
        else:
            feats = y

    # ---- graph pooling fused in: scatter(out, batch) / sqrt(num_nodes) (scale folded) ----
    pooled = jnp.dot(boht_ref[...], feats.astype(bf16), preferred_element_type=f32)  # [8, 20]
    out_ref[...] = jnp.concatenate(
        [pooled, jnp.zeros((B, OUT_PAD - OUT_F), f32)], axis=-1)       # [8, 128] dense store


# ---------------- full forward pass ----------------
def orbital_network_forward(params, data, num_graphs):
    pos, x, z = data["pos"], data["x"], data["z"]
    N = pos.shape[0]
    assert N % 8 == 0 and (N & (N - 1)) == 0, "kernel assumes N a power of two >= 8"
    assert num_graphs <= OUT_ROWS
    batch = data.get("batch", jnp.zeros((N,), jnp.int32))

    # preprocess: dense masked all-pairs radius graph (glue); edge e = src*N + dst.
    ii = jnp.repeat(jnp.arange(N), N)          # edge_src
    jj = jnp.tile(jnp.arange(N), N)            # edge_dst
    vec = pos[ii] - pos[jj]                    # edge_vec
    dist2 = jnp.sum(vec * vec, axis=-1)
    mask = (ii != jj) & (dist2 < MAX_RADIUS * MAX_RADIUS) & (batch[ii] == batch[jj])
    edge = jnp.concatenate([vec, mask.astype(jnp.float32)[:, None]], axis=1)   # [E, 4]

    node = jnp.concatenate([x, z, jnp.zeros((N, 8 - C_IN - 1), jnp.float32)], axis=1)  # [N, 8]

    boht = jax.nn.one_hot(batch, num_graphs, dtype=jnp.float32).T               # [B, N]
    boht = jnp.zeros((OUT_ROWS, N), jnp.float32).at[:num_graphs].set(boht)
    boht = (boht * (1.0 / math.sqrt(float(NUM_NODES)))).astype(jnp.bfloat16)    # pooling slab

    wfc1_all, wfc2_all, w1sc, wl2 = pack_weights(params)

    vmem = pl.BlockSpec(memory_space=pltpu.MemorySpace.VMEM)
    out_padded = pl.pallas_call(
        _fused_forward_kernel,
        out_shape=jax.ShapeDtypeStruct((OUT_ROWS, OUT_PAD), jnp.float32),
        in_specs=[vmem] * 11,
        out_specs=vmem,
        compiler_params=pltpu.CompilerParams(vmem_limit_bytes=32 * 1024 * 1024),
    )(edge, node, boht, wfc1_all, wfc2_all,
      w1sc[0], w1sc[1], w1sc[2], wl2[0], wl2[1], wl2[2])
    return out_padded[:num_graphs, :OUT_F]                                      # [B, 20]


if __name__ == "__main__":
    key = jax.random.PRNGKey(0)
    kparams, kdata = jax.random.split(key)
    params = init_params(kparams)

    N = 8
    k1, k2 = jax.random.split(kdata)
    data = {
        "pos": jax.random.normal(k1, (N, 3), jnp.float32),
        "x": jax.random.normal(k2, (N, C_IN), jnp.float32),          # "4x0e" node inputs
        "z": jnp.ones((N, 1), jnp.float32),                          # "1x0e" node attr
        "batch": jnp.array([0, 0, 0, 0, 1, 1, 1, 1], dtype=jnp.int32),
    }
    out = orbital_network_forward(params, data, num_graphs=2)        # [2, 20]
    jax.block_until_ready(out)
    assert out.shape == (2, OUT_F)
    assert bool(jnp.all(jnp.isfinite(out)))
    print("KERNEL_OK")
</pallas_src>

<mosaic_0001>
module attributes {stable_mosaic.version = 11 : i64} {
  func.func @_fused_forward_kernel(%arg0: memref<64x4xf32, #tpu.memory_space<vmem>>, %arg1: memref<8x8xf32, #tpu.memory_space<vmem>>, %arg2: memref<8x8xbf16, #tpu.memory_space<vmem>>, %arg3: memref<10x384xbf16, #tpu.memory_space<vmem>>, %arg4: memref<384x340xbf16, #tpu.memory_space<vmem>>, %arg5: memref<4x124xbf16, #tpu.memory_space<vmem>>, %arg6: memref<72x224xbf16, #tpu.memory_space<vmem>>, %arg7: memref<72x156xbf16, #tpu.memory_space<vmem>>, %arg8: memref<36x88xbf16, #tpu.memory_space<vmem>>, %arg9: memref<72x88xbf16, #tpu.memory_space<vmem>>, %arg10: memref<72x20xbf16, #tpu.memory_space<vmem>>, %arg11: memref<8x128xf32, #tpu.memory_space<vmem>>) attributes {dimension_semantics = [], scalar_prefetch = 0 : i64, scratch_operands = 0 : i64, tpu.core_type = #tpu.core_type<tc>} {
    %c0 = arith.constant 0 : index
    %c0_0 = arith.constant 0 : index
    %0 = vector.load %arg0[%c0, %c0_0] : memref<64x4xf32, #tpu.memory_space<vmem>>, vector<64x4xf32>
    %1 = vector.extract_strided_slice %0 {offsets = [0, 0], sizes = [64, 1], strides = [1, 1]} : vector<64x4xf32> to vector<64x1xf32>
    %2 = vector.extract_strided_slice %0 {offsets = [0, 1], sizes = [64, 1], strides = [1, 1]} : vector<64x4xf32> to vector<64x1xf32>
    %3 = vector.extract_strided_slice %0 {offsets = [0, 2], sizes = [64, 1], strides = [1, 1]} : vector<64x4xf32> to vector<64x1xf32>
    %4 = vector.extract_strided_slice %0 {offsets = [0, 3], sizes = [64, 1], strides = [1, 1]} : vector<64x4xf32> to vector<64x1xf32>
    %5 = arith.mulf %1, %1 : vector<64x1xf32>
    %6 = arith.mulf %2, %2 : vector<64x1xf32>
    %7 = arith.addf %5, %6 : vector<64x1xf32>
    %8 = arith.mulf %3, %3 : vector<64x1xf32>
    %9 = arith.addf %7, %8 : vector<64x1xf32>
    %cst = arith.constant 1.000000e-24 : f32
    %10 = vector.broadcast %cst : f32 to vector<64x1xf32>
    %11 = arith.maximumf %9, %10 : vector<64x1xf32>
    %12 = math.rsqrt %11 : vector<64x1xf32>
    %13 = arith.mulf %9, %12 : vector<64x1xf32>
    %14 = arith.mulf %1, %12 : vector<64x1xf32>
    %15 = arith.mulf %2, %12 : vector<64x1xf32>
    %16 = arith.mulf %3, %12 : vector<64x1xf32>
    %cst_1 = arith.constant 1.73205078 : f32
    %17 = vector.broadcast %cst_1 : f32 to vector<64x1xf32>
    %18 = arith.mulf %17, %14 : vector<64x1xf32>
    %cst_2 = arith.constant 1.73205078 : f32
    %19 = vector.broadcast %cst_2 : f32 to vector<64x1xf32>
    %20 = arith.mulf %19, %15 : vector<64x1xf32>
    %cst_3 = arith.constant 1.73205078 : f32
    %21 = vector.broadcast %cst_3 : f32 to vector<64x1xf32>
    %22 = arith.mulf %21, %16 : vector<64x1xf32>
    %cst_4 = arith.constant 3.87298346 : f32
    %23 = vector.broadcast %cst_4 : f32 to vector<64x1xf32>
    %24 = arith.mulf %23, %14 : vector<64x1xf32>
    %25 = arith.mulf %24, %16 : vector<64x1xf32>
    %cst_5 = arith.constant 3.87298346 : f32
    %26 = vector.broadcast %cst_5 : f32 to vector<64x1xf32>
    %27 = arith.mulf %26, %14 : vector<64x1xf32>
    %28 = arith.mulf %27, %15 : vector<64x1xf32>
    %29 = arith.mulf %15, %15 : vector<64x1xf32>
    %30 = arith.mulf %14, %14 : vector<64x1xf32>
    %31 = arith.mulf %16, %16 : vector<64x1xf32>
    %32 = arith.addf %30, %31 : vector<64x1xf32>
    %cst_6 = arith.constant 5.000000e-01 : f32
    %33 = vector.broadcast %cst_6 : f32 to vector<64x1xf32>
    %34 = arith.mulf %33, %32 : vector<64x1xf32>
    %35 = arith.subf %29, %34 : vector<64x1xf32>
    %cst_7 = arith.constant 2.23606801 : f32
    %36 = vector.broadcast %cst_7 : f32 to vector<64x1xf32>
    %37 = arith.mulf %36, %35 : vector<64x1xf32>
    %cst_8 = arith.constant 3.87298346 : f32
    %38 = vector.broadcast %cst_8 : f32 to vector<64x1xf32>
    %39 = arith.mulf %38, %15 : vector<64x1xf32>
    %40 = arith.mulf %39, %16 : vector<64x1xf32>
    %41 = arith.mulf %16, %16 : vector<64x1xf32>
    %42 = arith.mulf %14, %14 : vector<64x1xf32>
    %43 = arith.subf %41, %42 : vector<64x1xf32>
    %cst_9 = arith.constant 1.93649173 : f32
    %44 = vector.broadcast %cst_9 : f32 to vector<64x1xf32>
    %45 = arith.mulf %44, %43 : vector<64x1xf32>
    %46 = tpu.concatenate %18, %20, %22, %25, %28, %37, %40, %45 in 1 : vector<64x1xf32>, vector<64x1xf32>, vector<64x1xf32>, vector<64x1xf32>, vector<64x1xf32>, vector<64x1xf32>, vector<64x1xf32>, vector<64x1xf32> -> vector<64x8xf32>
    %47 = vector.broadcast %4 : vector<64x1xf32> to vector<64x8xf32>
    %48 = arith.mulf %46, %47 : vector<64x8xf32>
    %49 = tpu.iota {dimensions = array<i32: 1>} : vector<1x10xi32>
    %c1_i32 = arith.constant 1 : i32
    %50 = vector.broadcast %c1_i32 : i32 to vector<1x10xi32>
    %51 = arith.addi %49, %50 : vector<1x10xi32>
    %52 = arith.sitofp %51 : vector<1x10xi32> to vector<1x10xf32>
    %cst_10 = arith.constant 0.227272734 : f32
    %53 = vector.broadcast %cst_10 : f32 to vector<1x10xf32>
    %54 = arith.mulf %52, %53 : vector<1x10xf32>
    %55 = vector.broadcast %13 : vector<64x1xf32> to vector<64x10xf32>
    %56 = vector.broadcast %54 : vector<1x10xf32> to vector<64x10xf32>
    %57 = arith.subf %55, %56 : vector<64x10xf32>
    %cst_11 = arith.constant 0.227272734 : f32
    %58 = vector.broadcast %cst_11 : f32 to vector<64x10xf32>
    %59 = arith.divf %57, %58 : vector<64x10xf32>
    %cst_12 = arith.constant -1.000000e+00 : f32
    %60 = vector.broadcast %cst_12 : f32 to vector<64x10xf32>
    %61 = arith.cmpf ogt, %59, %60 : vector<64x10xf32>
    %cst_13 = arith.constant 1.000000e+00 : f32
    %62 = vector.broadcast %cst_13 : f32 to vector<64x10xf32>
    %63 = arith.cmpf olt, %59, %62 : vector<64x10xf32>
    %64 = arith.andi %61, %63 : vector<64x10xi1>
    %cst_14 = arith.constant 1.57079637 : f32
    %65 = vector.broadcast %cst_14 : f32 to vector<64x10xf32>
    %66 = arith.mulf %65, %59 : vector<64x10xf32>
    %67 = math.cos %66 : vector<64x10xf32>
    %cst_15 = arith.constant 0.000000e+00 : f32
    %68 = vector.broadcast %cst_15 : f32 to vector<64x10xf32>
    %69 = arith.select %64, %67, %68 : vector<64x10xi1>, vector<64x10xf32>
    %cst_16 = arith.constant 3.1622777 : f32
    %70 = vector.broadcast %cst_16 : f32 to vector<64x1xf32>
    %71 = arith.mulf %70, %4 : vector<64x1xf32>
    %72 = vector.broadcast %71 : vector<64x1xf32> to vector<64x10xf32>
    %73 = arith.mulf %69, %72 : vector<64x10xf32>
    %74 = arith.truncf %73 : vector<64x10xf32> to vector<64x10xbf16>
    %c0_17 = arith.constant 0 : index
    %c0_18 = arith.constant 0 : index
    %75 = vector.load %arg3[%c0_17, %c0_18] : memref<10x384xbf16, #tpu.memory_space<vmem>>, vector<10x384xbf16>
    %cst_19 = arith.constant dense<0.000000e+00> : vector<64x384xf32>
    %76 = tpu.matmul %74, %75, %cst_19 {dimension_numbers = #tpu.dot_dimension_numbers<[1], [0], [0], [1], [0, 0, 1, 1], [], []>} : vector<64x10xbf16>, vector<10x384xbf16>, vector<64x384xf32> -> vector<64x384xf32>
    %77 = arith.negf %76 : vector<64x384xf32>
    %78 = math.exp %77 : vector<64x384xf32>
    %cst_20 = arith.constant 1.000000e+00 : f32
    %79 = vector.broadcast %cst_20 : f32 to vector<64x384xf32>
    %80 = arith.addf %79, %78 : vector<64x384xf32>
    %81 = arith.divf %79, %80 : vector<64x384xf32>
    %82 = arith.mulf %76, %81 : vector<64x384xf32>
    %83 = arith.truncf %82 : vector<64x384xf32> to vector<64x384xbf16>
    %c0_21 = arith.constant 0 : index
    %c0_22 = arith.constant 0 : index
    %84 = vector.load %arg4[%c0_21, %c0_22] : memref<384x340xbf16, #tpu.memory_space<vmem>>, vector<384x340xbf16>
    %cst_23 = arith.constant dense<0.000000e+00> : vector<64x340xf32>
    %85 = tpu.matmul %83, %84, %cst_23 {dimension_numbers = #tpu.dot_dimension_numbers<[1], [0], [0], [1], [0, 0, 1, 1], [], []>} : vector<64x384xbf16>, vector<384x340xbf16>, vector<64x340xf32> -> vector<64x340xf32>
    %86 = tpu.iota {dimensions = array<i32: 0>} : vector<64x8xi32>
    %87 = tpu.iota {dimensions = array<i32: 1>} : vector<64x8xi32>
    %c8_i32 = arith.constant 8 : i32
    %88 = vector.broadcast %c8_i32 : i32 to vector<64x8xi32>
    %89 = arith.muli %87, %88 : vector<64x8xi32>
    %90 = arith.cmpi sge, %86, %89 : vector<64x8xi32>
    %c1_i32_24 = arith.constant 1 : i32
    %91 = vector.broadcast %c1_i32_24 : i32 to vector<64x8xi32>
    %92 = arith.addi %87, %91 : vector<64x8xi32>
    %c8_i32_25 = arith.constant 8 : i32
    %93 = vector.broadcast %c8_i32_25 : i32 to vector<64x8xi32>
    %94 = arith.muli %92, %93 : vector<64x8xi32>
    %95 = arith.cmpi slt, %86, %94 : vector<64x8xi32>
    %96 = arith.andi %90, %95 : vector<64x8xi1>
    %97 = arith.extui %96 : vector<64x8xi1> to vector<64x8xi32>
    %98 = arith.sitofp %97 : vector<64x8xi32> to vector<64x8xf32>
    %99 = tpu.iota {dimensions = array<i32: 0>} : vector<8x12xi32>
    %100 = tpu.iota {dimensions = array<i32: 1>} : vector<8x12xi32>
    %c0_i32 = arith.constant 0 : i32
    %101 = vector.broadcast %c0_i32 : i32 to vector<8x12xi32>
    %102 = arith.subi %99, %101 : vector<8x12xi32>
    %c4_i32 = arith.constant 4 : i32
    %103 = vector.broadcast %c4_i32 : i32 to vector<8x12xi32>
    %104 = arith.muli %102, %103 : vector<8x12xi32>
    %105 = arith.cmpi sge, %100, %104 : vector<8x12xi32>
    %c0_i32_26 = arith.constant 0 : i32
    %106 = vector.broadcast %c0_i32_26 : i32 to vector<8x12xi32>
    %107 = arith.subi %99, %106 : vector<8x12xi32>
    %c1_i32_27 = arith.constant 1 : i32
    %108 = vector.broadcast %c1_i32_27 : i32 to vector<8x12xi32>
    %109 = arith.addi %107, %108 : vector<8x12xi32>
    %c4_i32_28 = arith.constant 4 : i32
    %110 = vector.broadcast %c4_i32_28 : i32 to vector<8x12xi32>
    %111 = arith.muli %109, %110 : vector<8x12xi32>
    %112 = arith.cmpi slt, %100, %111 : vector<8x12xi32>
    %113 = arith.andi %105, %112 : vector<8x12xi1>
    %114 = arith.extui %113 : vector<8x12xi1> to vector<8x12xi32>
    %115 = arith.sitofp %114 : vector<8x12xi32> to vector<8x12xf32>
    %cst_29 = arith.constant dense<0.000000e+00> : vector<64x12xf32>
    %116 = tpu.matmul %48, %115, %cst_29 {dimension_numbers = #tpu.dot_dimension_numbers<[1], [0], [0], [1], [0, 0, 1, 1], [], []>} : vector<64x8xf32>, vector<8x12xf32>, vector<64x12xf32> -> vector<64x12xf32>
    %117 = tpu.iota {dimensions = array<i32: 0>} : vector<8x24xi32>
    %118 = tpu.iota {dimensions = array<i32: 1>} : vector<8x24xi32>
    %c0_i32_30 = arith.constant 0 : i32
    %119 = vector.broadcast %c0_i32_30 : i32 to vector<8x24xi32>
    %120 = arith.subi %117, %119 : vector<8x24xi32>
    %c8_i32_31 = arith.constant 8 : i32
    %121 = vector.broadcast %c8_i32_31 : i32 to vector<8x24xi32>
    %122 = arith.muli %120, %121 : vector<8x24xi32>
    %123 = arith.cmpi sge, %118, %122 : vector<8x24xi32>
    %c0_i32_32 = arith.constant 0 : i32
    %124 = vector.broadcast %c0_i32_32 : i32 to vector<8x24xi32>
    %125 = arith.subi %117, %124 : vector<8x24xi32>
    %c1_i32_33 = arith.constant 1 : i32
    %126 = vector.broadcast %c1_i32_33 : i32 to vector<8x24xi32>
    %127 = arith.addi %125, %126 : vector<8x24xi32>
    %c8_i32_34 = arith.constant 8 : i32
    %128 = vector.broadcast %c8_i32_34 : i32 to vector<8x24xi32>
    %129 = arith.muli %127, %128 : vector<8x24xi32>
    %130 = arith.cmpi slt, %118, %129 : vector<8x24xi32>
    %131 = arith.andi %123, %130 : vector<8x24xi1>
    %132 = arith.extui %131 : vector<8x24xi1> to vector<8x24xi32>
    %133 = arith.sitofp %132 : vector<8x24xi32> to vector<8x24xf32>
    %cst_35 = arith.constant dense<0.000000e+00> : vector<64x24xf32>
    %134 = tpu.matmul %48, %133, %cst_35 {dimension_numbers = #tpu.dot_dimension_numbers<[1], [0], [0], [1], [0, 0, 1, 1], [], []>} : vector<64x8xf32>, vector<8x24xf32>, vector<64x24xf32> -> vector<64x24xf32>
    %135 = tpu.iota {dimensions = array<i32: 0>} : vector<8x20xi32>
    %136 = tpu.iota {dimensions = array<i32: 1>} : vector<8x20xi32>
    %c3_i32 = arith.constant 3 : i32
    %137 = vector.broadcast %c3_i32 : i32 to vector<8x20xi32>
    %138 = arith.subi %135, %137 : vector<8x20xi32>
    %c4_i32_36 = arith.constant 4 : i32
    %139 = vector.broadcast %c4_i32_36 : i32 to vector<8x20xi32>
    %140 = arith.muli %138, %139 : vector<8x20xi32>
    %141 = arith.cmpi sge, %136, %140 : vector<8x20xi32>
    %c3_i32_37 = arith.constant 3 : i32
    %142 = vector.broadcast %c3_i32_37 : i32 to vector<8x20xi32>
    %143 = arith.subi %135, %142 : vector<8x20xi32>
    %c1_i32_38 = arith.constant 1 : i32
    %144 = vector.broadcast %c1_i32_38 : i32 to vector<8x20xi32>
    %145 = arith.addi %143, %144 : vector<8x20xi32>
    %c4_i32_39 = arith.constant 4 : i32
    %146 = vector.broadcast %c4_i32_39 : i32 to vector<8x20xi32>
    %147 = arith.muli %145, %146 : vector<8x20xi32>
    %148 = arith.cmpi slt, %136, %147 : vector<8x20xi32>
    %149 = arith.andi %141, %148 : vector<8x20xi1>
    %150 = arith.extui %149 : vector<8x20xi1> to vector<8x20xi32>
    %151 = arith.sitofp %150 : vector<8x20xi32> to vector<8x20xf32>
    %cst_40 = arith.constant dense<0.000000e+00> : vector<64x20xf32>
    %152 = tpu.matmul %48, %151, %cst_40 {dimension_numbers = #tpu.dot_dimension_numbers<[1], [0], [0], [1], [0, 0, 1, 1], [], []>} : vector<64x8xf32>, vector<8x20xf32>, vector<64x20xf32> -> vector<64x20xf32>
    %153 = tpu.iota {dimensions = array<i32: 0>} : vector<8x40xi32>
    %154 = tpu.iota {dimensions = array<i32: 1>} : vector<8x40xi32>
    %c3_i32_41 = arith.constant 3 : i32
    %155 = vector.broadcast %c3_i32_41 : i32 to vector<8x40xi32>
    %156 = arith.subi %153, %155 : vector<8x40xi32>
    %c8_i32_42 = arith.constant 8 : i32
    %157 = vector.broadcast %c8_i32_42 : i32 to vector<8x40xi32>
    %158 = arith.muli %156, %157 : vector<8x40xi32>
    %159 = arith.cmpi sge, %154, %158 : vector<8x40xi32>
    %c3_i32_43 = arith.constant 3 : i32
    %160 = vector.broadcast %c3_i32_43 : i32 to vector<8x40xi32>
    %161 = arith.subi %153, %160 : vector<8x40xi32>
    %c1_i32_44 = arith.constant 1 : i32
    %162 = vector.broadcast %c1_i32_44 : i32 to vector<8x40xi32>
    %163 = arith.addi %161, %162 : vector<8x40xi32>
    %c8_i32_45 = arith.constant 8 : i32
    %164 = vector.broadcast %c8_i32_45 : i32 to vector<8x40xi32>
    %165 = arith.muli %163, %164 : vector<8x40xi32>
    %166 = arith.cmpi slt, %154, %165 : vector<8x40xi32>
    %167 = arith.andi %159, %166 : vector<8x40xi1>
    %168 = arith.extui %167 : vector<8x40xi1> to vector<8x40xi32>
    %169 = arith.sitofp %168 : vector<8x40xi32> to vector<8x40xf32>
    %cst_46 = arith.constant dense<0.000000e+00> : vector<64x40xf32>
    %170 = tpu.matmul %48, %169, %cst_46 {dimension_numbers = #tpu.dot_dimension_numbers<[1], [0], [0], [1], [0, 0, 1, 1], [], []>} : vector<64x8xf32>, vector<8x40xf32>, vector<64x40xf32> -> vector<64x40xf32>
    %171 = tpu.iota {dimensions = array<i32: 0>} : vector<24x8xi32>
    %172 = tpu.iota {dimensions = array<i32: 1>} : vector<24x8xi32>
    %173 = arith.cmpi eq, %171, %172 : vector<24x8xi32>
    %c8_i32_47 = arith.constant 8 : i32
    %174 = vector.broadcast %c8_i32_47 : i32 to vector<24x8xi32>
    %175 = arith.addi %172, %174 : vector<24x8xi32>
    %176 = arith.cmpi eq, %171, %175 : vector<24x8xi32>
    %177 = arith.ori %173, %176 : vector<24x8xi1>
    %c16_i32 = arith.constant 16 : i32
    %178 = vector.broadcast %c16_i32 : i32 to vector<24x8xi32>
    %179 = arith.addi %172, %178 : vector<24x8xi32>
    %180 = arith.cmpi eq, %171, %179 : vector<24x8xi32>
    %181 = arith.ori %177, %180 : vector<24x8xi1>
    %182 = arith.extui %181 : vector<24x8xi1> to vector<24x8xi32>
    %183 = arith.sitofp %182 : vector<24x8xi32> to vector<24x8xf32>
    %184 = tpu.iota {dimensions = array<i32: 0>} : vector<40x8xi32>
    %185 = tpu.iota {dimensions = array<i32: 1>} : vector<40x8xi32>
    %186 = arith.cmpi eq, %184, %185 : vector<40x8xi32>
    %c8_i32_48 = arith.constant 8 : i32
    %187 = vector.broadcast %c8_i32_48 : i32 to vector<40x8xi32>
    %188 = arith.addi %185, %187 : vector<40x8xi32>
    %189 = arith.cmpi eq, %184, %188 : vector<40x8xi32>
    %190 = arith.ori %186, %189 : vector<40x8xi1>
    %c16_i32_49 = arith.constant 16 : i32
    %191 = vector.broadcast %c16_i32_49 : i32 to vector<40x8xi32>
    %192 = arith.addi %185, %191 : vector<40x8xi32>
    %193 = arith.cmpi eq, %184, %192 : vector<40x8xi32>
    %194 = arith.ori %190, %193 : vector<40x8xi1>
    %c24_i32 = arith.constant 24 : i32
    %195 = vector.broadcast %c24_i32 : i32 to vector<40x8xi32>
    %196 = arith.addi %185, %195 : vector<40x8xi32>
    %197 = arith.cmpi eq, %184, %196 : vector<40x8xi32>
    %198 = arith.ori %194, %197 : vector<40x8xi1>
    %c32_i32 = arith.constant 32 : i32
    %199 = vector.broadcast %c32_i32 : i32 to vector<40x8xi32>
    %200 = arith.addi %185, %199 : vector<40x8xi32>
    %201 = arith.cmpi eq, %184, %200 : vector<40x8xi32>
    %202 = arith.ori %198, %201 : vector<40x8xi1>
    %203 = arith.extui %202 : vector<40x8xi1> to vector<40x8xi32>
    %204 = arith.sitofp %203 : vector<40x8xi32> to vector<40x8xf32>
    %205 = tpu.iota {dimensions = array<i32: 0>} : vector<8x24xi32>
    %206 = tpu.iota {dimensions = array<i32: 1>} : vector<8x24xi32>
    %207 = arith.cmpi eq, %206, %205 : vector<8x24xi32>
    %c8_i32_50 = arith.constant 8 : i32
    %208 = vector.broadcast %c8_i32_50 : i32 to vector<8x24xi32>
    %209 = arith.addi %205, %208 : vector<8x24xi32>
    %210 = arith.cmpi eq, %206, %209 : vector<8x24xi32>
    %211 = arith.ori %207, %210 : vector<8x24xi1>
    %c16_i32_51 = arith.constant 16 : i32
    %212 = vector.broadcast %c16_i32_51 : i32 to vector<8x24xi32>
    %213 = arith.addi %205, %212 : vector<8x24xi32>
    %214 = arith.cmpi eq, %206, %213 : vector<8x24xi32>
    %215 = arith.ori %211, %214 : vector<8x24xi1>
    %216 = arith.extui %215 : vector<8x24xi1> to vector<8x24xi32>
    %217 = arith.sitofp %216 : vector<8x24xi32> to vector<8x24xf32>
    %218 = tpu.iota {dimensions = array<i32: 0>} : vector<8x40xi32>
    %219 = tpu.iota {dimensions = array<i32: 1>} : vector<8x40xi32>
    %220 = arith.cmpi eq, %219, %218 : vector<8x40xi32>
    %c8_i32_52 = arith.constant 8 : i32
    %221 = vector.broadcast %c8_i32_52 : i32 to vector<8x40xi32>
    %222 = arith.addi %218, %221 : vector<8x40xi32>
    %223 = arith.cmpi eq, %219, %222 : vector<8x40xi32>
    %224 = arith.ori %220, %223 : vector<8x40xi1>
    %c16_i32_53 = arith.constant 16 : i32
    %225 = vector.broadcast %c16_i32_53 : i32 to vector<8x40xi32>
    %226 = arith.addi %218, %225 : vector<8x40xi32>
    %227 = arith.cmpi eq, %219, %226 : vector<8x40xi32>
    %228 = arith.ori %224, %227 : vector<8x40xi1>
    %c24_i32_54 = arith.constant 24 : i32
    %229 = vector.broadcast %c24_i32_54 : i32 to vector<8x40xi32>
    %230 = arith.addi %218, %229 : vector<8x40xi32>
    %231 = arith.cmpi eq, %219, %230 : vector<8x40xi32>
    %232 = arith.ori %228, %231 : vector<8x40xi1>
    %c32_i32_55 = arith.constant 32 : i32
    %233 = vector.broadcast %c32_i32_55 : i32 to vector<8x40xi32>
    %234 = arith.addi %218, %233 : vector<8x40xi32>
    %235 = arith.cmpi eq, %219, %234 : vector<8x40xi32>
    %236 = arith.ori %232, %235 : vector<8x40xi1>
    %237 = arith.extui %236 : vector<8x40xi1> to vector<8x40xi32>
    %238 = arith.sitofp %237 : vector<8x40xi32> to vector<8x40xf32>
    %c0_56 = arith.constant 0 : index
    %c0_57 = arith.constant 0 : index
    %239 = vector.load %arg1[%c0_56, %c0_57] : memref<8x8xf32, #tpu.memory_space<vmem>>, vector<8x8xf32>
    %240 = vector.extract_strided_slice %239 {offsets = [0, 0], sizes = [8, 4], strides = [1, 1]} : vector<8x8xf32> to vector<8x4xf32>
    %241 = vector.extract_strided_slice %239 {offsets = [0, 4], sizes = [8, 1], strides = [1, 1]} : vector<8x8xf32> to vector<8x1xf32>
    %242 = vector.broadcast %241 : vector<8x1xf32> to vector<8x4xf32>
    %243 = arith.mulf %240, %242 : vector<8x4xf32>
    %244 = arith.truncf %243 : vector<8x4xf32> to vector<8x4xbf16>
    %c0_58 = arith.constant 0 : index
    %c0_59 = arith.constant 0 : index
    %245 = vector.load %arg5[%c0_58, %c0_59] : memref<4x124xbf16, #tpu.memory_space<vmem>>, vector<4x124xbf16>
    %cst_60 = arith.constant dense<0.000000e+00> : vector<8x124xf32>
    %246 = tpu.matmul %244, %245, %cst_60 {dimension_numbers = #tpu.dot_dimension_numbers<[1], [0], [0], [1], [0, 0, 1, 1], [], []>} : vector<8x4xbf16>, vector<4x124xbf16>, vector<8x124xf32> -> vector<8x124xf32>
    %247 = vector.extract_strided_slice %246 {offsets = [0, 36], sizes = [8, 88], strides = [1, 1]} : vector<8x124xf32> to vector<8x88xf32>
    %248 = vector.extract_strided_slice %246 {offsets = [0, 0], sizes = [8, 36], strides = [1, 1]} : vector<8x124xf32> to vector<8x36xf32>
    %cst_61 = arith.constant dense<0.000000e+00> : vector<64x36xf32>
    %249 = tpu.matmul %98, %248, %cst_61 {dimension_numbers = #tpu.dot_dimension_numbers<[1], [0], [0], [1], [0, 0, 1, 1], [], []>} : vector<64x8xf32>, vector<8x36xf32>, vector<64x36xf32> -> vector<64x36xf32>
    %250 = vector.extract_strided_slice %249 {offsets = [0, 0], sizes = [64, 4], strides = [1, 1]} : vector<64x36xf32> to vector<64x4xf32>
    %251 = vector.extract_strided_slice %249 {offsets = [0, 4], sizes = [64, 12], strides = [1, 1]} : vector<64x36xf32> to vector<64x12xf32>
    %252 = vector.extract_strided_slice %249 {offsets = [0, 16], sizes = [64, 20], strides = [1, 1]} : vector<64x36xf32> to vector<64x20xf32>
    %253 = vector.extract_strided_slice %85 {offsets = [0, 0], sizes = [64, 4], strides = [1, 1]} : vector<64x340xf32> to vector<64x4xf32>
    %254 = vector.extract_strided_slice %85 {offsets = [0, 4], sizes = [64, 12], strides = [1, 1]} : vector<64x340xf32> to vector<64x12xf32>
    %255 = vector.extract_strided_slice %85 {offsets = [0, 16], sizes = [64, 20], strides = [1, 1]} : vector<64x340xf32> to vector<64x20xf32>
    %256 = arith.mulf %253, %250 : vector<64x4xf32>
    %257 = vector.broadcast %4 : vector<64x1xf32> to vector<64x4xf32>
    %258 = arith.mulf %256, %257 : vector<64x4xf32>
    %259 = arith.mulf %254, %251 : vector<64x12xf32>
    %260 = arith.mulf %259, %116 : vector<64x12xf32>
    %261 = arith.mulf %255, %252 : vector<64x20xf32>
    %262 = arith.mulf %261, %152 : vector<64x20xf32>
    %263 = tpu.concatenate %258, %260, %262 in 1 : vector<64x4xf32>, vector<64x12xf32>, vector<64x20xf32> -> vector<64x36xf32>
    %264 = vector.extract_strided_slice %263 {offsets = [0, 0], sizes = [32, 36], strides = [1, 1]} : vector<64x36xf32> to vector<32x36xf32>
    %265 = vector.extract_strided_slice %263 {offsets = [32, 0], sizes = [32, 36], strides = [1, 1]} : vector<64x36xf32> to vector<32x36xf32>
    %266 = arith.addf %264, %265 : vector<32x36xf32>
    %267 = vector.extract_strided_slice %266 {offsets = [0, 0], sizes = [16, 36], strides = [1, 1]} : vector<32x36xf32> to vector<16x36xf32>
    %268 = vector.extract_strided_slice %266 {offsets = [16, 0], sizes = [16, 36], strides = [1, 1]} : vector<32x36xf32> to vector<16x36xf32>
    %269 = arith.addf %267, %268 : vector<16x36xf32>
    %270 = vector.extract_strided_slice %269 {offsets = [0, 0], sizes = [8, 36], strides = [1, 1]} : vector<16x36xf32> to vector<8x36xf32>
    %271 = vector.extract_strided_slice %269 {offsets = [8, 0], sizes = [8, 36], strides = [1, 1]} : vector<16x36xf32> to vector<8x36xf32>
    %272 = arith.addf %270, %271 : vector<8x36xf32>
    %273 = vector.broadcast %241 : vector<8x1xf32> to vector<8x36xf32>
    %274 = arith.mulf %272, %273 : vector<8x36xf32>
    %275 = arith.truncf %274 : vector<8x36xf32> to vector<8x36xbf16>
    %c0_62 = arith.constant 0 : index
    %c0_63 = arith.constant 0 : index
    %276 = vector.load %arg8[%c0_62, %c0_63] : memref<36x88xbf16, #tpu.memory_space<vmem>>, vector<36x88xbf16>
    %cst_64 = arith.constant dense<0.000000e+00> : vector<8x88xf32>
    %277 = tpu.matmul %275, %276, %cst_64 {dimension_numbers = #tpu.dot_dimension_numbers<[1], [0], [0], [1], [0, 0, 1, 1], [], []>} : vector<8x36xbf16>, vector<36x88xbf16>, vector<8x88xf32> -> vector<8x88xf32>
    %278 = arith.addf %247, %277 : vector<8x88xf32>
    %279 = vector.extract_strided_slice %278 {offsets = [0, 8], sizes = [8, 8], strides = [1, 1]} : vector<8x88xf32> to vector<8x8xf32>
    %280 = arith.negf %279 : vector<8x8xf32>
    %281 = math.exp %280 : vector<8x8xf32>
    %cst_65 = arith.constant 1.000000e+00 : f32
    %282 = vector.broadcast %cst_65 : f32 to vector<8x8xf32>
    %283 = arith.addf %282, %281 : vector<8x8xf32>
    %284 = arith.divf %282, %283 : vector<8x8xf32>
    %cst_66 = arith.constant dense<0.000000e+00> : vector<8x24xf32>
    %285 = tpu.matmul %284, %217, %cst_66 {dimension_numbers = #tpu.dot_dimension_numbers<[1], [0], [0], [1], [0, 0, 1, 1], [], []>} : vector<8x8xf32>, vector<8x24xf32>, vector<8x24xf32> -> vector<8x24xf32>
    %286 = vector.extract_strided_slice %278 {offsets = [0, 16], sizes = [8, 8], strides = [1, 1]} : vector<8x88xf32> to vector<8x8xf32>
    %287 = arith.negf %286 : vector<8x8xf32>
    %288 = math.exp %287 : vector<8x8xf32>
    %cst_67 = arith.constant 1.000000e+00 : f32
    %289 = vector.broadcast %cst_67 : f32 to vector<8x8xf32>
    %290 = arith.addf %289, %288 : vector<8x8xf32>
    %291 = arith.divf %289, %290 : vector<8x8xf32>
    %cst_68 = arith.constant dense<0.000000e+00> : vector<8x40xf32>
    %292 = tpu.matmul %291, %238, %cst_68 {dimension_numbers = #tpu.dot_dimension_numbers<[1], [0], [0], [1], [0, 0, 1, 1], [], []>} : vector<8x8xf32>, vector<8x40xf32>, vector<8x40xf32> -> vector<8x40xf32>
    %293 = vector.extract_strided_slice %278 {offsets = [0, 0], sizes = [8, 8], strides = [1, 1]} : vector<8x88xf32> to vector<8x8xf32>
    %294 = arith.negf %293 : vector<8x8xf32>
    %295 = math.exp %294 : vector<8x8xf32>
    %cst_69 = arith.constant 1.000000e+00 : f32
    %296 = vector.broadcast %cst_69 : f32 to vector<8x8xf32>
    %297 = arith.addf %296, %295 : vector<8x8xf32>
    %298 = arith.divf %296, %297 : vector<8x8xf32>
    %299 = arith.mulf %293, %298 : vector<8x8xf32>
    %300 = vector.extract_strided_slice %278 {offsets = [0, 24], sizes = [8, 24], strides = [1, 1]} : vector<8x88xf32> to vector<8x24xf32>
    %301 = arith.mulf %300, %285 : vector<8x24xf32>
    %302 = vector.extract_strided_slice %278 {offsets = [0, 48], sizes = [8, 40], strides = [1, 1]} : vector<8x88xf32> to vector<8x40xf32>
    %303 = arith.mulf %302, %292 : vector<8x40xf32>
    %304 = tpu.concatenate %299, %301, %303 in 1 : vector<8x8xf32>, vector<8x24xf32>, vector<8x40xf32> -> vector<8x72xf32>
    %305 = vector.broadcast %241 : vector<8x1xf32> to vector<8x72xf32>
    %306 = arith.mulf %304, %305 : vector<8x72xf32>
    %307 = arith.truncf %306 : vector<8x72xf32> to vector<8x72xbf16>
    %c0_70 = arith.constant 0 : index
    %c0_71 = arith.constant 0 : index
    %308 = vector.load %arg6[%c0_70, %c0_71] : memref<72x224xbf16, #tpu.memory_space<vmem>>, vector<72x224xbf16>
    %cst_72 = arith.constant dense<0.000000e+00> : vector<8x224xf32>
    %309 = tpu.matmul %307, %308, %cst_72 {dimension_numbers = #tpu.dot_dimension_numbers<[1], [0], [0], [1], [0, 0, 1, 1], [], []>} : vector<8x72xbf16>, vector<72x224xbf16>, vector<8x224xf32> -> vector<8x224xf32>
    %310 = vector.extract_strided_slice %309 {offsets = [0, 136], sizes = [8, 88], strides = [1, 1]} : vector<8x224xf32> to vector<8x88xf32>
    %311 = vector.extract_strided_slice %309 {offsets = [0, 0], sizes = [8, 136], strides = [1, 1]} : vector<8x224xf32> to vector<8x136xf32>
    %cst_73 = arith.constant dense<0.000000e+00> : vector<64x136xf32>
    %312 = tpu.matmul %98, %311, %cst_73 {dimension_numbers = #tpu.dot_dimension_numbers<[1], [0], [0], [1], [0, 0, 1, 1], [], []>} : vector<64x8xf32>, vector<8x136xf32>, vector<64x136xf32> -> vector<64x136xf32>
    %313 = vector.extract_strided_slice %312 {offsets = [0, 0], sizes = [64, 8], strides = [1, 1]} : vector<64x136xf32> to vector<64x8xf32>
    %314 = vector.extract_strided_slice %312 {offsets = [0, 72], sizes = [64, 24], strides = [1, 1]} : vector<64x136xf32> to vector<64x24xf32>
    %315 = vector.extract_strided_slice %312 {offsets = [0, 96], sizes = [64, 40], strides = [1, 1]} : vector<64x136xf32> to vector<64x40xf32>
    %316 = vector.extract_strided_slice %312 {offsets = [0, 8], sizes = [64, 24], strides = [1, 1]} : vector<64x136xf32> to vector<64x24xf32>
    %317 = vector.extract_strided_slice %312 {offsets = [0, 32], sizes = [64, 40], strides = [1, 1]} : vector<64x136xf32> to vector<64x40xf32>
    %318 = vector.extract_strided_slice %85 {offsets = [0, 36], sizes = [64, 8], strides = [1, 1]} : vector<64x340xf32> to vector<64x8xf32>
    %319 = vector.extract_strided_slice %85 {offsets = [0, 44], sizes = [64, 8], strides = [1, 1]} : vector<64x340xf32> to vector<64x8xf32>
    %320 = vector.extract_strided_slice %85 {offsets = [0, 52], sizes = [64, 8], strides = [1, 1]} : vector<64x340xf32> to vector<64x8xf32>
    %321 = vector.extract_strided_slice %85 {offsets = [0, 60], sizes = [64, 24], strides = [1, 1]} : vector<64x340xf32> to vector<64x24xf32>
    %322 = vector.extract_strided_slice %85 {offsets = [0, 84], sizes = [64, 24], strides = [1, 1]} : vector<64x340xf32> to vector<64x24xf32>
    %323 = vector.extract_strided_slice %85 {offsets = [0, 108], sizes = [64, 40], strides = [1, 1]} : vector<64x340xf32> to vector<64x40xf32>
    %324 = vector.extract_strided_slice %85 {offsets = [0, 148], sizes = [64, 40], strides = [1, 1]} : vector<64x340xf32> to vector<64x40xf32>
    %325 = arith.mulf %316, %134 : vector<64x24xf32>
    %326 = arith.mulf %317, %170 : vector<64x40xf32>
    %cst_74 = arith.constant dense<0.000000e+00> : vector<64x8xf32>
    %327 = tpu.matmul %325, %183, %cst_74 {dimension_numbers = #tpu.dot_dimension_numbers<[1], [0], [0], [1], [0, 0, 1, 1], [], []>} : vector<64x24xf32>, vector<24x8xf32>, vector<64x8xf32> -> vector<64x8xf32>
    %cst_75 = arith.constant dense<0.000000e+00> : vector<64x8xf32>
    %328 = tpu.matmul %326, %204, %cst_75 {dimension_numbers = #tpu.dot_dimension_numbers<[1], [0], [0], [1], [0, 0, 1, 1], [], []>} : vector<64x40xf32>, vector<40x8xf32>, vector<64x8xf32> -> vector<64x8xf32>
    %329 = vector.broadcast %4 : vector<64x1xf32> to vector<64x8xf32>
    %330 = arith.mulf %313, %329 : vector<64x8xf32>
    %331 = arith.mulf %318, %330 : vector<64x8xf32>
    %332 = arith.mulf %319, %327 : vector<64x8xf32>
    %333 = arith.addf %331, %332 : vector<64x8xf32>
    %334 = arith.mulf %320, %328 : vector<64x8xf32>
    %335 = arith.addf %333, %334 : vector<64x8xf32>
    %336 = arith.mulf %314, %134 : vector<64x24xf32>
    %337 = arith.mulf %321, %336 : vector<64x24xf32>
    %338 = vector.broadcast %4 : vector<64x1xf32> to vector<64x24xf32>
    %339 = arith.mulf %316, %338 : vector<64x24xf32>
    %340 = arith.mulf %322, %339 : vector<64x24xf32>
    %341 = arith.addf %337, %340 : vector<64x24xf32>
    %342 = arith.mulf %315, %170 : vector<64x40xf32>
    %343 = arith.mulf %323, %342 : vector<64x40xf32>
    %344 = vector.broadcast %4 : vector<64x1xf32> to vector<64x40xf32>
    %345 = arith.mulf %317, %344 : vector<64x40xf32>
    %346 = arith.mulf %324, %345 : vector<64x40xf32>
    %347 = arith.addf %343, %346 : vector<64x40xf32>
    %348 = tpu.concatenate %335, %341, %347 in 1 : vector<64x8xf32>, vector<64x24xf32>, vector<64x40xf32> -> vector<64x72xf32>
    %349 = vector.extract_strided_slice %348 {offsets = [0, 0], sizes = [32, 72], strides = [1, 1]} : vector<64x72xf32> to vector<32x72xf32>
    %350 = vector.extract_strided_slice %348 {offsets = [32, 0], sizes = [32, 72], strides = [1, 1]} : vector<64x72xf32> to vector<32x72xf32>
    %351 = arith.addf %349, %350 : vector<32x72xf32>
    %352 = vector.extract_strided_slice %351 {offsets = [0, 0], sizes = [16, 72], strides = [1, 1]} : vector<32x72xf32> to vector<16x72xf32>
    %353 = vector.extract_strided_slice %351 {offsets = [16, 0], sizes = [16, 72], strides = [1, 1]} : vector<32x72xf32> to vector<16x72xf32>
    %354 = arith.addf %352, %353 : vector<16x72xf32>
    %355 = vector.extract_strided_slice %354 {offsets = [0, 0], sizes = [8, 72], strides = [1, 1]} : vector<16x72xf32> to vector<8x72xf32>
    %356 = vector.extract_strided_slice %354 {offsets = [8, 0], sizes = [8, 72], strides = [1, 1]} : vector<16x72xf32> to vector<8x72xf32>
    %357 = arith.addf %355, %356 : vector<8x72xf32>
    %358 = vector.broadcast %241 : vector<8x1xf32> to vector<8x72xf32>
    %359 = arith.mulf %357, %358 : vector<8x72xf32>
    %360 = arith.truncf %359 : vector<8x72xf32> to vector<8x72xbf16>
    %c0_76 = arith.constant 0 : index
    %c0_77 = arith.constant 0 : index
    %361 = vector.load %arg9[%c0_76, %c0_77] : memref<72x88xbf16, #tpu.memory_space<vmem>>, vector<72x88xbf16>
    %cst_78 = arith.constant dense<0.000000e+00> : vector<8x88xf32>
    %362 = tpu.matmul %360, %361, %cst_78 {dimension_numbers = #tpu.dot_dimension_numbers<[1], [0], [0], [1], [0, 0, 1, 1], [], []>} : vector<8x72xbf16>, vector<72x88xbf16>, vector<8x88xf32> -> vector<8x88xf32>
    %363 = arith.addf %310, %362 : vector<8x88xf32>
    %364 = vector.extract_strided_slice %363 {offsets = [0, 8], sizes = [8, 8], strides = [1, 1]} : vector<8x88xf32> to vector<8x8xf32>
    %365 = arith.negf %364 : vector<8x8xf32>
    %366 = math.exp %365 : vector<8x8xf32>
    %cst_79 = arith.constant 1.000000e+00 : f32
    %367 = vector.broadcast %cst_79 : f32 to vector<8x8xf32>
    %368 = arith.addf %367, %366 : vector<8x8xf32>
    %369 = arith.divf %367, %368 : vector<8x8xf32>
    %cst_80 = arith.constant dense<0.000000e+00> : vector<8x24xf32>
    %370 = tpu.matmul %369, %217, %cst_80 {dimension_numbers = #tpu.dot_dimension_numbers<[1], [0], [0], [1], [0, 0, 1, 1], [], []>} : vector<8x8xf32>, vector<8x24xf32>, vector<8x24xf32> -> vector<8x24xf32>
    %371 = vector.extract_strided_slice %363 {offsets = [0, 16], sizes = [8, 8], strides = [1, 1]} : vector<8x88xf32> to vector<8x8xf32>
    %372 = arith.negf %371 : vector<8x8xf32>
    %373 = math.exp %372 : vector<8x8xf32>
    %cst_81 = arith.constant 1.000000e+00 : f32
    %374 = vector.broadcast %cst_81 : f32 to vector<8x8xf32>
    %375 = arith.addf %374, %373 : vector<8x8xf32>
    %376 = arith.divf %374, %375 : vector<8x8xf32>
    %cst_82 = arith.constant dense<0.000000e+00> : vector<8x40xf32>
    %377 = tpu.matmul %376, %238, %cst_82 {dimension_numbers = #tpu.dot_dimension_numbers<[1], [0], [0], [1], [0, 0, 1, 1], [], []>} : vector<8x8xf32>, vector<8x40xf32>, vector<8x40xf32> -> vector<8x40xf32>
    %378 = vector.extract_strided_slice %363 {offsets = [0, 0], sizes = [8, 8], strides = [1, 1]} : vector<8x88xf32> to vector<8x8xf32>
    %379 = arith.negf %378 : vector<8x8xf32>
    %380 = math.exp %379 : vector<8x8xf32>
    %cst_83 = arith.constant 1.000000e+00 : f32
    %381 = vector.broadcast %cst_83 : f32 to vector<8x8xf32>
    %382 = arith.addf %381, %380 : vector<8x8xf32>
    %383 = arith.divf %381, %382 : vector<8x8xf32>
    %384 = arith.mulf %378, %383 : vector<8x8xf32>
    %385 = vector.extract_strided_slice %363 {offsets = [0, 24], sizes = [8, 24], strides = [1, 1]} : vector<8x88xf32> to vector<8x24xf32>
    %386 = arith.mulf %385, %370 : vector<8x24xf32>
    %387 = vector.extract_strided_slice %363 {offsets = [0, 48], sizes = [8, 40], strides = [1, 1]} : vector<8x88xf32> to vector<8x40xf32>
    %388 = arith.mulf %387, %377 : vector<8x40xf32>
    %389 = tpu.concatenate %384, %386, %388 in 1 : vector<8x8xf32>, vector<8x24xf32>, vector<8x40xf32> -> vector<8x72xf32>
    %390 = vector.broadcast %241 : vector<8x1xf32> to vector<8x72xf32>
    %391 = arith.mulf %389, %390 : vector<8x72xf32>
    %392 = arith.truncf %391 : vector<8x72xf32> to vector<8x72xbf16>
    %c0_84 = arith.constant 0 : index
    %c0_85 = arith.constant 0 : index
    %393 = vector.load %arg7[%c0_84, %c0_85] : memref<72x156xbf16, #tpu.memory_space<vmem>>, vector<72x156xbf16>
    %cst_86 = arith.constant dense<0.000000e+00> : vector<8x156xf32>
    %394 = tpu.matmul %392, %393, %cst_86 {dimension_numbers = #tpu.dot_dimension_numbers<[1], [0], [0], [1], [0, 0, 1, 1], [], []>} : vector<8x72xbf16>, vector<72x156xbf16>, vector<8x156xf32> -> vector<8x156xf32>
    %395 = vector.extract_strided_slice %394 {offsets = [0, 136], sizes = [8, 20], strides = [1, 1]} : vector<8x156xf32> to vector<8x20xf32>
    %396 = vector.extract_strided_slice %394 {offsets = [0, 0], sizes = [8, 136], strides = [1, 1]} : vector<8x156xf32> to vector<8x136xf32>
    %cst_87 = arith.constant dense<0.000000e+00> : vector<64x136xf32>
    %397 = tpu.matmul %98, %396, %cst_87 {dimension_numbers = #tpu.dot_dimension_numbers<[1], [0], [0], [1], [0, 0, 1, 1], [], []>} : vector<64x8xf32>, vector<8x136xf32>, vector<64x136xf32> -> vector<64x136xf32>
    %398 = vector.extract_strided_slice %397 {offsets = [0, 0], sizes = [64, 8], strides = [1, 1]} : vector<64x136xf32> to vector<64x8xf32>
    %399 = vector.extract_strided_slice %397 {offsets = [0, 72], sizes = [64, 24], strides = [1, 1]} : vector<64x136xf32> to vector<64x24xf32>
    %400 = vector.extract_strided_slice %397 {offsets = [0, 96], sizes = [64, 40], strides = [1, 1]} : vector<64x136xf32> to vector<64x40xf32>
    %401 = vector.extract_strided_slice %397 {offsets = [0, 8], sizes = [64, 24], strides = [1, 1]} : vector<64x136xf32> to vector<64x24xf32>
    %402 = vector.extract_strided_slice %397 {offsets = [0, 32], sizes = [64, 40], strides = [1, 1]} : vector<64x136xf32> to vector<64x40xf32>
    %403 = vector.extract_strided_slice %85 {offsets = [0, 188], sizes = [64, 8], strides = [1, 1]} : vector<64x340xf32> to vector<64x8xf32>
    %404 = vector.extract_strided_slice %85 {offsets = [0, 196], sizes = [64, 8], strides = [1, 1]} : vector<64x340xf32> to vector<64x8xf32>
    %405 = vector.extract_strided_slice %85 {offsets = [0, 204], sizes = [64, 8], strides = [1, 1]} : vector<64x340xf32> to vector<64x8xf32>
    %406 = vector.extract_strided_slice %85 {offsets = [0, 212], sizes = [64, 24], strides = [1, 1]} : vector<64x340xf32> to vector<64x24xf32>
    %407 = vector.extract_strided_slice %85 {offsets = [0, 236], sizes = [64, 24], strides = [1, 1]} : vector<64x340xf32> to vector<64x24xf32>
    %408 = vector.extract_strided_slice %85 {offsets = [0, 260], sizes = [64, 40], strides = [1, 1]} : vector<64x340xf32> to vector<64x40xf32>
    %409 = vector.extract_strided_slice %85 {offsets = [0, 300], sizes = [64, 40], strides = [1, 1]} : vector<64x340xf32> to vector<64x40xf32>
    %410 = arith.mulf %401, %134 : vector<64x24xf32>
    %411 = arith.mulf %402, %170 : vector<64x40xf32>
    %cst_88 = arith.constant dense<0.000000e+00> : vector<64x8xf32>
    %412 = tpu.matmul %410, %183, %cst_88 {dimension_numbers = #tpu.dot_dimension_numbers<[1], [0], [0], [1], [0, 0, 1, 1], [], []>} : vector<64x24xf32>, vector<24x8xf32>, vector<64x8xf32> -> vector<64x8xf32>
    %cst_89 = arith.constant dense<0.000000e+00> : vector<64x8xf32>
    %413 = tpu.matmul %411, %204, %cst_89 {dimension_numbers = #tpu.dot_dimension_numbers<[1], [0], [0], [1], [0, 0, 1, 1], [], []>} : vector<64x40xf32>, vector<40x8xf32>, vector<64x8xf32> -> vector<64x8xf32>
    %414 = vector.broadcast %4 : vector<64x1xf32> to vector<64x8xf32>
    %415 = arith.mulf %398, %414 : vector<64x8xf32>
    %416 = arith.mulf %403, %415 : vector<64x8xf32>
    %417 = arith.mulf %404, %412 : vector<64x8xf32>
    %418 = arith.addf %416, %417 : vector<64x8xf32>
    %419 = arith.mulf %405, %413 : vector<64x8xf32>
    %420 = arith.addf %418, %419 : vector<64x8xf32>
    %421 = arith.mulf %399, %134 : vector<64x24xf32>
    %422 = arith.mulf %406, %421 : vector<64x24xf32>
    %423 = vector.broadcast %4 : vector<64x1xf32> to vector<64x24xf32>
    %424 = arith.mulf %401, %423 : vector<64x24xf32>
    %425 = arith.mulf %407, %424 : vector<64x24xf32>
    %426 = arith.addf %422, %425 : vector<64x24xf32>
    %427 = arith.mulf %400, %170 : vector<64x40xf32>
    %428 = arith.mulf %408, %427 : vector<64x40xf32>
    %429 = vector.broadcast %4 : vector<64x1xf32> to vector<64x40xf32>
    %430 = arith.mulf %402, %429 : vector<64x40xf32>
    %431 = arith.mulf %409, %430 : vector<64x40xf32>
    %432 = arith.addf %428, %431 : vector<64x40xf32>
    %433 = tpu.concatenate %420, %426, %432 in 1 : vector<64x8xf32>, vector<64x24xf32>, vector<64x40xf32> -> vector<64x72xf32>
    %434 = vector.extract_strided_slice %433 {offsets = [0, 0], sizes = [32, 72], strides = [1, 1]} : vector<64x72xf32> to vector<32x72xf32>
    %435 = vector.extract_strided_slice %433 {offsets = [32, 0], sizes = [32, 72], strides = [1, 1]} : vector<64x72xf32> to vector<32x72xf32>
    %436 = arith.addf %434, %435 : vector<32x72xf32>
    %437 = vector.extract_strided_slice %436 {offsets = [0, 0], sizes = [16, 72], strides = [1, 1]} : vector<32x72xf32> to vector<16x72xf32>
    %438 = vector.extract_strided_slice %436 {offsets = [16, 0], sizes = [16, 72], strides = [1, 1]} : vector<32x72xf32> to vector<16x72xf32>
    %439 = arith.addf %437, %438 : vector<16x72xf32>
    %440 = vector.extract_strided_slice %439 {offsets = [0, 0], sizes = [8, 72], strides = [1, 1]} : vector<16x72xf32> to vector<8x72xf32>
    %441 = vector.extract_strided_slice %439 {offsets = [8, 0], sizes = [8, 72], strides = [1, 1]} : vector<16x72xf32> to vector<8x72xf32>
    %442 = arith.addf %440, %441 : vector<8x72xf32>
    %443 = vector.broadcast %241 : vector<8x1xf32> to vector<8x72xf32>
    %444 = arith.mulf %442, %443 : vector<8x72xf32>
    %445 = arith.truncf %444 : vector<8x72xf32> to vector<8x72xbf16>
    %c0_90 = arith.constant 0 : index
    %c0_91 = arith.constant 0 : index
    %446 = vector.load %arg10[%c0_90, %c0_91] : memref<72x20xbf16, #tpu.memory_space<vmem>>, vector<72x20xbf16>
    %cst_92 = arith.constant dense<0.000000e+00> : vector<8x20xf32>
    %447 = tpu.matmul %445, %446, %cst_92 {dimension_numbers = #tpu.dot_dimension_numbers<[1], [0], [0], [1], [0, 0, 1, 1], [], []>} : vector<8x72xbf16>, vector<72x20xbf16>, vector<8x20xf32> -> vector<8x20xf32>
    %448 = arith.addf %395, %447 : vector<8x20xf32>
    %c0_93 = arith.constant 0 : index
    %c0_94 = arith.constant 0 : index
    %449 = vector.load %arg2[%c0_93, %c0_94] : memref<8x8xbf16, #tpu.memory_space<vmem>>, vector<8x8xbf16>
    %450 = arith.truncf %448 : vector<8x20xf32> to vector<8x20xbf16>
    %cst_95 = arith.constant dense<0.000000e+00> : vector<8x20xf32>
    %451 = tpu.matmul %449, %450, %cst_95 {dimension_numbers = #tpu.dot_dimension_numbers<[1], [0], [0], [1], [0, 0, 1, 1], [], []>} : vector<8x8xbf16>, vector<8x20xbf16>, vector<8x20xf32> -> vector<8x20xf32>
    %cst_96 = arith.constant 0.000000e+00 : f32
    %452 = vector.broadcast %cst_96 : f32 to vector<8x108xf32>
    %453 = tpu.concatenate %451, %452 in 1 : vector<8x20xf32>, vector<8x108xf32> -> vector<8x128xf32>
    %c0_97 = arith.constant 0 : index
    %c0_98 = arith.constant 0 : index
    %454 = vector.load %arg11[%c0_97, %c0_98] : memref<8x128xf32, #tpu.memory_space<vmem>>, vector<8x128xf32>
    tpu.vector_store %arg11[%c0_97, %c0_98], %453 {strides = array<i32>} : memref<8x128xf32, #tpu.memory_space<vmem>>, vector<8x128xf32>,
    return
  }
}

</mosaic_0001>

<bundles_post_ra>
// kernel: tpu_custom_call.1
= control target key start
LH: loop header
LB: loop body
LE: loop exit
PB: predicated region body
PF: predicated region fallthrough
CT: control target
= control target key end

     0   :  { %s8194_s25 = smov 126   ;;  %s8195_s26 = smov 127   ;;  %v12316_v8 = vmov 0   ;;  %s12303_s0 = inlined_call_operand.vmem [shape: f32[64,4], index: 0, kind: input, shape index: {}]   ;;  %s12304_s1 = inlined_call_operand.vmem [shape: f32[8,8], index: 1, kind: input, shape index: {}]   ;;  %s12305_s2 = inlined_call_operand.vmem [shape: bf16[8,8], index: 2, kind: input, shape index: {}]   ;;  %s12306_s3 = inlined_call_operand.vmem [shape: bf16[10,384], index: 3, kind: input, shape index: {}]   ;;  %s12307_s4 = inlined_call_operand.vmem [shape: bf16[384,340], index: 4, kind: input, shape index: {}]   ;;  %s12308_s5 = inlined_call_operand.vmem [shape: bf16[4,124], index: 5, kind: input, shape index: {}]   ;;  %s12309_s6 = inlined_call_operand.vmem [shape: bf16[72,224], index: 6, kind: input, shape index: {}]   ;;  %s12310_s7 = inlined_call_operand.vmem [shape: bf16[72,156], index: 7, kind: input, shape index: {}]   ;;  %s12311_s8 = inlined_call_operand.vmem [shape: bf16[36,88], index: 8, kind: input, shape index: {}]   ;;  %s12312_s9 = inlined_call_operand.vmem [shape: bf16[72,88], index: 9, kind: input, shape index: {}]   ;;  %s12313_s10 = inlined_call_operand.vmem [shape: bf16[72,20], index: 10, kind: input, shape index: {}]   ;;  %s12314_s11 = inlined_call_operand.hbm [shape: f32[8,128], index: 11, kind: output, shape index: {}]  }
   0x1   :  { %v8300_v0 = vld [vmem:[%s12303_s0] sm:$0xff]  ;;  %v8305_v1 = vld [vmem:[%s12303_s0 + $0x8] sm:$0xff]  ;;  %v8312_v3 = vld [vmem:[%s12303_s0 + $0x18] sm:$0xff]  ;;  %7862 = vset.pattern.permute.xlu0 %v12316_v8  ;;  %7863 = vset.pattern.permute.xlu1 %v12316_v8 }
   0x2   :  { %v48_v2 = vmul.f32 %v8300_v0, %v8300_v0  ;;  %v8317_v4 = vld [vmem:[%s12303_s0 + $0x10] sm:$0xff]  ;;  %v49_v5 = vmul.f32 %v8305_v1, %v8305_v1  ;;  %v51_v6 = vmul.f32 %v8312_v3, %v8312_v3  ;;  %v8334_v9 = vld [vmem:[%s12303_s0 + $0x28] sm:$0xff]  ;;  %v8339_v10 = vld [vmem:[%s12303_s0 + $0x20] sm:$0xff]  ;;  %1881 = vmatprep.mubr.bf16.mxu0 %v12316_v8 }
   0x3   :  { %v50_v7 = vmul.f32 %v8317_v4, %v8317_v4  ;;  %v53_v11 = vmul.f32 %v8334_v9, %v8334_v9  ;;  %v52_v12 = vmul.f32 %v8339_v10, %v8339_v10  ;;  %v8353_v13 = vld [vmem:[%s12303_s0 + $0x38] sm:$0xff]  ;;  %v8358_v14 = vld [vmem:[%s12303_s0 + $0x30] sm:$0xff] }
   0x4   :  { %96 = vrot.lane.b32.xlu1 %v48_v2, %s8194_s25  ;;  %64 = vrot.lane.b32.xlu0 %v48_v2, %s8195_s26  ;;  %v55_v15 = vmul.f32 %v8353_v13, %v8353_v13  ;;  %v54_v16 = vmul.f32 %v8358_v14, %v8358_v14 }
   0x8   :  { %98 = vrot.lane.b32.xlu1 %v49_v5, %s8194_s25  ;;  %66 = vrot.lane.b32.xlu0 %v49_v5, %s8195_s26 }
   0xc   :  { %70 = vrot.lane.b32.xlu1 %v51_v6, %s8195_s26  ;;  %68 = vrot.lane.b32.xlu0 %v50_v7, %s8195_s26 }
  0x10   :  { %102 = vrot.lane.b32.xlu1 %v51_v6, %s8194_s25  ;;  %100 = vrot.lane.b32.xlu0 %v50_v7, %s8194_s25 }
  0x14   :  { %74 = vrot.lane.b32.xlu1 %v53_v11, %s8195_s26  ;;  %72 = vrot.lane.b32.xlu0 %v52_v12, %s8195_s26 }
  0x18   :  { %106 = vrot.lane.b32.xlu1 %v53_v11, %s8194_s25  ;;  %104 = vrot.lane.b32.xlu0 %v52_v12, %s8194_s25 }
  0x1c   :  { %78 = vrot.lane.b32.xlu1 %v55_v15, %s8195_s26  ;;  %76 = vrot.lane.b32.xlu0 %v54_v16, %s8195_s26 }
  0x20   :  { %110 = vrot.lane.b32.xlu1 %v55_v15, %s8194_s25  ;;  %108 = vrot.lane.b32.xlu0 %v54_v16, %s8194_s25 }
  0x21   :  { %16 = vsyncpa [#allocation3], 0  ;;  %s8198_s16 = smov 2   ;;  %s8199_s17 = smov 1  }
  0x22   :  { %s8206_s15 = smov 3   ;;  %s8207_s20 = smov 4  }
  0x23   :  { %s8208_s24 = smov 5   ;;  %s8215_s21 = smov 76  }
  0x24   :  { %s8216_s22 = smov 84   ;;  %s8218_s23 = smov 92  }
  0x25   :  { %s8219_s18 = smov 8   ;;  %s8222_s19 = smov 120  }
  0x26   :  { %s8229_s27 = smov 52   ;;  %s8230_s28 = smov 88  }
  0x27   :  { %s8231_s29 = smov 112  }
  0x76   :  { %v97_v17 = vpop.permute.xlu1 %96  ;;  %v65_v18 = vpop.permute.xlu0 %64 }
  0x77   :  { %v88_v19 = vadd.f32 %v65_v18, %v48_v2  ;;  %v1750_v18 = vmul.f32 3.1622777, %v8305_v1 }
  0x79   :  { %v120_v20 = vadd.f32 %v97_v17, %v88_v19  ;;  %v1749_v19 = vmul.f32 3.1622777, %v8300_v0 }
  0x7a   :  { %v99_v21 = vpop.permute.xlu1 %98  ;;  %v67_v22 = vpop.permute.xlu0 %66 }
  0x7b   :  { %v128_v23 = vmax.f32 %v120_v20, 1e-24  ;;  %v89_v24 = vadd.f32 %v67_v22, %v49_v5  ;;  %v1751_v22 = vmul.f32 3.1622777, %v8317_v4 }
  0x7d   :  { %8008 = vrsqrt.f32 %v128_v23  ;;  %v121_v25 = vadd.f32 %v99_v21, %v89_v24  ;;  %v1753_v21 = vmul.f32 3.1622777, %v8339_v10  ;;  %v1755_v23 = vmul.f32 3.1622777, %v8358_v14 }
  0x7e   :  { %v71_v26 = vpop.permute.xlu1 %70  ;;  %v69_v27 = vpop.permute.xlu0 %68  ;;  %v1752_v24 = vmul.f32 3.1622777, %v8312_v3 }
  0x7f   :  { %v129_v28 = vmax.f32 %v121_v25, 1e-24  ;;  %v91_v29 = vadd.f32 %v71_v26, %v51_v6  ;;  %v90_v30 = vadd.f32 %v69_v27, %v50_v7  ;;  %v1756_v26 = vmul.f32 3.1622777, %v8353_v13 }
  0x81   :  { %8010 = vrsqrt.f32 %v129_v28 }
  0x82   :  { %v103_v31 = vpop.permute.xlu1 %102  ;;  %v101_v32 = vpop.permute.xlu0 %100 }
  0x83   :  { %v123_v33 = vadd.f32 %v103_v31, %v91_v29  ;;  %v122_v34 = vadd.f32 %v101_v32, %v90_v30 }
  0x85   :  { %v131_v35 = vmax.f32 %v123_v33, 1e-24  ;;  %v130_v36 = vmax.f32 %v122_v34, 1e-24 }
  0x86   :  { %v75_v37 = vpop.permute.xlu1 %74  ;;  %v73_v38 = vpop.permute.xlu0 %72 }
  0x87   :  { %v8372_v39 = vpop.eup %8008  ;;  %8012 = vrsqrt.f32 %v131_v35  ;;  %v93_v40 = vadd.f32 %v75_v37, %v53_v11  ;;  %v92_v42 = vadd.f32 %v73_v38, %v52_v12 }
  0x88   :  { %8014 = vrsqrt.f32 %v130_v36  ;;  %v144_v41 = vmul.f32 %v8372_v39, %v120_v20  ;;  %v8197_v20 = vmov 3  }
  0x8a   :  { %v107_v43 = vpop.permute.xlu1 %106  ;;  %830 = vperm.xlu0 %7862, %v144_v41   ;;  %v105_v44 = vpop.permute.xlu0 %104 }
  0x8b   :  { %v8375_v45 = vpop.eup %8010  ;;  %v125_v46 = vadd.f32 %v107_v43, %v93_v40  ;;  %v124_v47 = vadd.f32 %v105_v44, %v92_v42 }
  0x8c   :  { %v145_v48 = vmul.f32 %v8375_v45, %v121_v25  ;;  %v1754_v25 = vmul.f32 3.1622777, %v8334_v9  ;;  %v8425_v9 = vmul.f32 %v8372_v39, %v8300_v0  ;;  %v8437_v14 = vmul.f32 %v8375_v45, %v8305_v1 }
  0x8d   :  { %v133_v49 = vmax.f32 %v125_v46, 1e-24  ;;  %v132_v50 = vmax.f32 %v124_v47, 1e-24 }
  0x8e   :  { %v79_v51 = vpop.permute.xlu1 %78  ;;  %835 = vperm.xlu1 %7863, %v145_v48   ;;  %v77_v52 = vpop.permute.xlu0 %76  ;;  %12490 = vst [vmem:[#allocation6_spill] sm:$0xff] %v8425_v9  ;;  %v8433_v13 = vmul.f32 %v8425_v9, %v8425_v9  ;;  %12492 = vst [vmem:[#allocation8_spill] sm:$0xff] %v8437_v14  ;;  %v8445_v0 = vmul.f32 %v8437_v14, %v8437_v14 }
  0x8f   :  { %8016 = vrsqrt.f32 %v133_v49  ;;  %v95_v53 = vadd.f32 %v79_v51, %v55_v15  ;;  %v94_v55 = vadd.f32 %v77_v52, %v54_v16 }
  0x90   :  { %8018 = vrsqrt.f32 %v132_v50  ;;  %12491 = vst [vmem:[#allocation7_spill] sm:$0xff] %v8433_v13  ;;  %12493 = vst [vmem:[#allocation9_spill] sm:$0xff] %v8445_v0 }
  0x91   :  { %v8378_v54 = vpop.eup %8012 }
  0x92   :  { %v8380_v56 = vpop.eup %8014  ;;  %v147_v57 = vmul.f32 %v8378_v54, %v123_v33  ;;  %v111_v58 = vpop.permute.xlu1 %110  ;;  %v8461_v28 = vmul.f32 %v8378_v54, %v8312_v3  ;;  %v12315_v3 = vlaneseq }
  0x93   :  { %v109_v59 = vpop.permute.xlu0 %108  ;;  %v146_v60 = vmul.f32 %v8380_v56, %v122_v34  ;;  %v127_v61 = vadd.f32 %v111_v58, %v95_v53  ;;  %v8449_v27 = vmul.f32 %v8380_v56, %v8317_v4 }
  0x94   :  { %v126_v62 = vadd.f32 %v109_v59, %v94_v55  ;;  %845 = vperm.xlu0 %7862, %v147_v57   ;;  %12496 = vst [vmem:[#allocation12_spill] sm:$0xff] %v8461_v28  ;;  %v8467_v4 = vmul.f32 %v8461_v28, %v8461_v28  ;;  %v8481_v31 = vand.u32 127, %v12315_v3 }
  0x95   :  { %v135_v63 = vmax.f32 %v127_v61, 1e-24  ;;  %840 = vperm.xlu1 %7863, %v146_v60   ;;  %12494 = vst [vmem:[#allocation10_spill] sm:$0xff] %v8449_v27  ;;  %v8457_v1 = vmul.f32 %v8449_v27, %v8449_v27 }
  0x96   :  { %v134_v2 = vmax.f32 %v126_v62, 1e-24  ;;  %12497 = vst [vmem:[#allocation13_spill] sm:$0xff] %v8467_v4  ;;  %12500 = vst [vmem:[#allocation16_spill] sm:$0xff] %v8481_v31  ;;  %v8484_v32 = vadd.s32 1, %v8481_v31 }
  0x97   :  { %8020 = vrsqrt.f32 %v135_v63  ;;  %12495 = vst [vmem:[#allocation11_spill] sm:$0xff] %v8457_v1 }
  0x98   :  { %8022 = vrsqrt.f32 %v134_v2  ;;  %12501 = vst [vmem:[#allocation17_spill] sm:$0xff] %v8484_v32 }
  0x99   :  { %v8384_v5 = vpop.eup %8016 }
  0x9a   :  { %v8019_v6 = vpop.eup %8018  ;;  %v149_v7 = vmul.f32 %v8384_v5, %v125_v46 }
  0x9b   :  { %v148_v11 = vmul.f32 %v8019_v6, %v124_v47  ;;  %v8470_v29 = vmul.f32 %v8019_v6, %v8339_v10  ;;  %v826_v10 = vcvt.s32.f32 %v8484_v32 }
  0x9c   :  { %855 = vperm.xlu0 %7862, %v149_v7  }
  0x9d   :  { %850 = vperm.xlu1 %7863, %v148_v11   ;;  %12498 = vst [vmem:[#allocation14_spill] sm:$0xff] %v8470_v29  ;;  %v8476_v30 = vmul.f32 %v8470_v29, %v8470_v29  ;;  %v8487_v33 = vmul.f32 0.22727273, %v826_v10 }
  0x9f   :  { %12499 = vst [vmem:[#allocation15_spill] sm:$0xff] %v8476_v30 }
  0xa1   :  { %v8387_v12 = vpop.eup %8020 }
  0xa2   :  { %12489 = vst [vmem:[#allocation5_spill] sm:$0xff] %v8387_v12  ;;  %v8389_v15 = vpop.eup %8022  ;;  %v151_v16 = vmul.f32 %v8387_v12, %v127_v61 }
  0xa3   :  { %v150_v17 = vmul.f32 %v8389_v15, %v126_v62 }
  0xa4   :  { %865 = vperm.xlu0 %7862, %v151_v16  }
  0xa5   :  { %860 = vperm.xlu1 %7863, %v150_v17  }
  0xa8   :  { %7865 = vset.pattern.permute.xlu0 %v8197_v20 }
  0xa9   :  { %7864 = vset.pattern.permute.xlu1 %v8197_v20  ;;  %1764 = vperm.xlu0 %7865, %v1750_v18   ;;  %v12326_v20 = vmov 2475754826  }
  0xaa   :  { %1759 = vperm.xlu1 %7864, %v1749_v19  }
  0xad   :  { %1779 = vperm.xlu0 %7865, %v1753_v21  }
  0xae   :  { %1769 = vperm.xlu1 %7864, %v1751_v22   ;;  %v12332_v22 = vmov 2131351028  }
  0xb1   :  { %1789 = vperm.xlu0 %7865, %v1755_v23  }
  0xb2   :  { %1774 = vperm.xlu1 %7864, %v1752_v24   ;;  %v12329_v24 = vmov 2102212464  }
  0xb5   :  { %200 = vrot.lane.b32.xlu0 %v8372_v39, %s8198_s16 }
  0xb6   :  { %1784 = vperm.xlu1 %7864, %v1754_v25  }
  0xb9   :  { %204 = vrot.lane.b32.xlu0 %v8380_v56, %s8198_s16 }
  0xba   :  { %1794 = vperm.xlu1 %7864, %v1756_v26  }
  0xbd   :  { %208 = vrot.lane.b32.xlu0 %v8019_v6, %s8198_s16 }
  0xbe   :  { %202 = vrot.lane.b32.xlu1 %v8375_v45, %s8198_s16 }
  0xc1   :  { %212 = vrot.lane.b32.xlu0 %v8389_v15, %s8198_s16 }
  0xc2   :  { %206 = vrot.lane.b32.xlu1 %v8378_v54, %s8198_s16 }
  0xc5   :  { %168 = vrot.lane.b32.xlu0 %v8372_v39, %s8199_s17 }
  0xc6   :  { %210 = vrot.lane.b32.xlu1 %v8384_v5, %s8198_s16 }
  0xc9   :  { %172 = vrot.lane.b32.xlu0 %v8380_v56, %s8199_s17 }
  0xca   :  { %214 = vrot.lane.b32.xlu1 %v8387_v12, %s8198_s16 }
  0xcd   :  { %176 = vrot.lane.b32.xlu0 %v8019_v6, %s8199_s17 }
  0xce   :  { %170 = vrot.lane.b32.xlu1 %v8375_v45, %s8199_s17 }
  0xd1   :  { %180 = vrot.lane.b32.xlu0 %v8389_v15, %s8199_s17 }
  0xd2   :  { %174 = vrot.lane.b32.xlu1 %v8378_v54, %s8199_s17 }
  0xd5   :  { %512 = vrot.lane.b32.xlu0 %v8433_v13, %s8198_s16 }
  0xd6   :  { %178 = vrot.lane.b32.xlu1 %v8384_v5, %s8199_s17 }
  0xd9   :  { %514 = vrot.lane.b32.xlu0 %v8445_v0, %s8198_s16  ;;  %v12517_v0 = vmov 2102212464  }
  0xda   :  { %182 = vrot.lane.b32.xlu1 %v8387_v12, %s8199_s17 }
  0xdd   :  { %516 = vrot.lane.b32.xlu0 %v8457_v1, %s8198_s16 }
  0xe1   :  { %518 = vrot.lane.b32.xlu0 %v8467_v4, %s8198_s16 }
  0xe5   :  { %520 = vrot.lane.b32.xlu0 %v8476_v30, %s8198_s16 }
 0x109   :  { %v831_v34 = vpop.permute.xlu0 %830 }
 0x10a   :  { %v868_v35 = vsub.f32 %v831_v34, %v8487_v33  ;;  %v12324_v34 = vmov 683565275  }
 0x10c   :  { %v8490_v36 = vmul.f32 4.4, %v868_v35 }
 0x10d   :  { %v836_v37 = vpop.permute.xlu1 %835 }
 0x10e   :  { %v8493_v38 = vmul.f32 1.5707964, %v8490_v36  ;;  %v869_v39 = vsub.f32 %v836_v37, %v8487_v33  ;;  %v12322_v37 = vmov 920167782  }
 0x110   :  { %v920_v40 = vand.u32 2139095040, %v8493_v38  ;;  %v8497_v41 = vmul.f32 4.4, %v869_v39  ;;  %v12319_v56 = vand.u32 2147483647, %v8493_v38  ;;  %vm919_vm14 = vcmp.lt.s32.totalorder %v8493_v38, 0 }
 0x111   :  { %v12511_v1 = vand.u32 2147483647, %v8493_v38 }
 0x112   :  { %v921_v42 = vshrl.u32 %v920_v40, 23  ;;  %v8500_v43 = vmul.f32 1.5707964, %v8497_v41  ;;  %v924_v62 = vand.u32 8388607, %v12319_v56 }
 0x113   :  { %v846_v51 = vpop.permute.xlu0 %845 }
 0x114   :  { %v6993_v44 = vadd.s32 4294967169, %v921_v42  ;;  %v1023_v45 = vand.u32 2139095040, %v8500_v43  ;;  %v841_v46 = vpop.permute.xlu1 %840  ;;  %v871_v55 = vsub.f32 %v846_v51, %v8487_v33  ;;  %v12318_v63 = vand.u32 2147483647, %v8500_v43 }
 0x115   :  { %v870_v47 = vsub.f32 %v841_v46, %v8487_v33  ;;  %v925_v16 = vor.u32 8388608, %v924_v62 }
 0x116   :  { %v927_v48 = vadd.s32 1, %v6993_v44  ;;  %v1024_v49 = vshrl.u32 %v1023_v45, 23  ;;  %v8512_v60 = vmul.f32 4.4, %v871_v55  ;;  %v1027_v17 = vand.u32 8388607, %v12318_v63 }
 0x117   :  { %v8504_v50 = vmul.f32 4.4, %v870_v47  ;;  %v12320_v45 = vmov 1326507024  }
 0x118   :  { %vm928_vm0 = vcmp.gt.s32.totalorder %v927_v48, 0  ;;  %v6997_v53 = vadd.s32 4294967169, %v1024_v49  ;;  %12502 = vst [vmem:[#allocation18_spill] sm:$0xff] %v8512_v60  ;;  %v8519_v11 = vmul.f32 1.5707964, %v8512_v60  ;;  %v1028_v3 = vor.u32 8388608, %v1027_v17 }
 0x119   :  { %v929_v52 = vsel %vm928_vm0, %v927_v48, 0  ;;  %v8507_v54 = vmul.f32 1.5707964, %v8504_v50 }
 0x11a   :  { %v931_v57 = vand.u32 31, %v929_v52  ;;  %v1030_v58 = vadd.s32 1, %v6997_v53  ;;  %v930_v26 = vshrl.u32 %v929_v52, 5  ;;  %v1229_v48 = vand.u32 2139095040, %v8519_v11 }
 0x11b   :  { %v1126_v59 = vand.u32 2139095040, %v8507_v54  ;;  %v856_v19 = vpop.permute.xlu0 %855 }
 0x11c   :  { %v851_v61 = vpop.permute.xlu1 %850  ;;  %v932_v2 = vsub.s32 32, %v931_v57  ;;  %vm1031_vm1 = vcmp.gt.s32.totalorder %v1030_v58, 0  ;;  %v934_v35 = vshll.u32 %v12324_v34, %v931_v57  ;;  %v937_v42 = vshll.u32 %v12326_v20, %v931_v57 }
 0x11d   :  { %v1127_v6 = vshrl.u32 %v1126_v59, 23  ;;  %v872_v7 = vsub.f32 %v851_v61, %v8487_v33  ;;  %v1032_v18 = vsel %vm1031_vm1, %v1030_v58, 0  ;;  %v940_v44 = vshll.u32 %v12332_v22, %v931_v57 }
 0x11e   :  { %v935_v21 = vshrl.u32 %v12326_v20, %v932_v2  ;;  %v938_v23 = vshrl.u32 %v12332_v22, %v932_v2  ;;  %v941_v25 = vshrl.u32 %v12329_v24, %v932_v2  ;;  %v944_v39 = vshrl.u32 %v12322_v37, %v932_v2 }
 0x11f   :  { %v7001_v10 = vadd.s32 4294967169, %v1127_v6  ;;  %v8528_v40 = vmul.f32 4.4, %v872_v7  ;;  %v947_v46 = vshrl.u32 %v12320_v45, %v932_v2  ;;  %v8533_v47 = vand.u32 31, %v1032_v18 }
 0x120   :  { %v873_v49 = vsub.f32 %v856_v19, %v8487_v33  ;;  %v943_v51 = vshll.u32 %v12329_v24, %v931_v57  ;;  %v936_v52 = vor.u32 %v935_v21, %v934_v35  ;;  %v939_v53 = vor.u32 %v938_v23, %v937_v42 }
 0x121   :  { %12503 = vst [vmem:[#allocation19_spill] sm:$0xff] %v8528_v40  ;;  %v942_v55 = vor.u32 %v941_v25, %v940_v44  ;;  %v946_v58 = vshll.u32 %v12322_v37, %v931_v57  ;;  %v1133_v59 = vadd.s32 1, %v7001_v10  ;;  %v8540_v62 = vmul.f32 1.5707964, %v8528_v40 }
 0x122   :  { %v945_v61 = vor.u32 %v944_v39, %v943_v51  ;;  %v965_v7 = vshll.u32 %v925_v16, 8  ;;  %v1230_v8 = vshrl.u32 %v1229_v48, 23  ;;  %v8542_v63 = vmul.f32 4.4, %v873_v49 }
 0x123   :  { %v948_v6 = vor.u32 %v947_v46, %v946_v58  ;;  %vm949_vm2 = vcmp.lt.s32.totalorder %v930_v26, 1  ;;  %vm952_vm3 = vcmp.lt.s32.totalorder %v930_v26, 4  ;;  %v1035_v19 = vsub.s32 32, %v8533_v47 }
 0x124   :  { %12504 = vst [vmem:[#allocation20_spill] sm:$0xff] %v8542_v63  ;;  %v933_v21 = vshrl.u32 %v12324_v34, %v932_v2  ;;  %v954_v23 = vsel %vm952_vm3, %v942_v55, 2102212464  ;;  %v957_v25 = vsel %vm949_vm2, %v936_v52, %v939_v53  ;;  %vm1134_vm4 = vcmp.gt.s32.totalorder %v1133_v59, 0  ;;  %v861_v58 = vpop.permute.xlu1 %860 }
 0x125   :  { %vm951_vm5 = vcmp.lt.s32.totalorder %v930_v26, 3  ;;  %v958_v57 = vsel %vm952_vm3, %v945_v61, 920167782  ;;  %v961_v10 = vsel %vm949_vm2, %v939_v53, %v942_v55  ;;  %v1332_v35 = vand.u32 2139095040, %v8540_v62 }
 0x126   :  { %vm950_vm6 = vcmp.lt.s32.totalorder %v930_v26, 2  ;;  %v959_v16 = vsel %vm951_vm5, %v942_v55, %v958_v57  ;;  %v962_v17 = vsel %vm952_vm3, %v948_v6, 1326507024  ;;  %v953_v39 = vsel %vm949_vm2, %v933_v21, %v936_v52 }
 0x127   :  { %v955_v42 = vsel %vm951_vm5, %v939_v53, %v954_v23  ;;  %v960_v44 = vsel %vm950_vm6, %v957_v25, %v959_v16  ;;  %v963_v46 = vsel %vm951_vm5, %v945_v61, %v962_v17  ;;  %v8548_v48 = vsel %vm1134_vm4, %v1133_v59, 0  ;;  %v8565_v59 = vpop.permute.xlu0 %865 }
 0x128   :  { %v964_v2 = vsel %vm950_vm6, %v961_v10, %v963_v46  ;;  %v8551_v49 = vmul.u32.u64.low %v965_v7, %v960_v44  ;;  %v8552_v51 = vmul.u32.u64.high %v965_v7, %v960_v44, %v8551_v49  ;;  %v8558_v37 = vshll.u32 %v1028_v3, 8 }
 0x129   :  { %v8555_v56 = vmul.u32.u64.low %v965_v7, %v964_v2  ;;  %v8556_v45 = vmul.u32.u64.high %v965_v7, %v964_v2, %v8555_v56  ;;  %v8560_v55 = vshrl.u32 %v1032_v18, 5  ;;  %v7005_v52 = vadd.s32 4294967169, %v1230_v8 }
 0x12a   :  { %v8563_v53 = vmul.f32 1.5707964, %v8542_v63  ;;  %v956_v61 = vsel %vm950_vm6, %v953_v39, %v955_v42  ;;  %v8569_v6 = vand.u32 31, %v8548_v48  ;;  %v1333_v21 = vshrl.u32 %v1332_v35, 23  ;;  %v1760_v63 = vpop.permute.xlu1 %1759 }
 0x12b   :  { %v1037_v23 = vshll.u32 %v12324_v34, %v8533_v47  ;;  %v1038_v3 = vshrl.u32 %v12326_v20, %v1035_v19  ;;  %v874_v56 = vsub.f32 %v861_v58, %v8487_v33  ;;  %v975_v8 = vadd.s32 1, %v8552_v51 }
 0x12c   :  { %v1040_v18 = vshll.u32 %v12326_v20, %v8533_v47  ;;  %v1041_v25 = vshrl.u32 %v12332_v22, %v1035_v19  ;;  %v875_v26 = vsub.f32 %v8565_v59, %v8487_v33  ;;  %v972_v57 = vmul.u32 %v965_v7, %v956_v61 }
 0x12d   :  { %vm974_vm7 = vc.u32 %v8556_v45, %v8551_v49  ;;  %v1039_v10 = vor.u32 %v1038_v3, %v1037_v23  ;;  %v1043_v17 = vshll.u32 %v12332_v22, %v8533_v47  ;;  %v1044_v39 = vshrl.u32 %v12329_v24, %v1035_v19 }
 0x12e   :  { %v976_v35 = vsel %vm974_vm7, %v975_v8, %v8552_v51  ;;  %v1042_v16 = vor.u32 %v1041_v25, %v1040_v18  ;;  %v7009_v42 = vadd.s32 4294967169, %v1333_v21  ;;  %v1046_v46 = vshll.u32 %v12329_v24, %v8533_v47 }
 0x12f   :  { %v977_v44 = vadd.s32 %v976_v35, %v972_v57  ;;  %v12505_v2 = vmov 920167782   ;;  %v8590_v7 = vmul.f32 4.4, %v874_v56  ;;  %v1045_v58 = vor.u32 %v1044_v39, %v1043_v17 }
 0x130   :  { %v1047_v33 = vshrl.u32 %v12505_v2, %v1035_v19  ;;  %v1049_v59 = vshll.u32 %v12505_v2, %v8533_v47  ;;  %v12507_v51 = vmov 1326507024   ;;  %v1036_v3 = vshrl.u32 %v12324_v34, %v1035_v19 }
 0x131   :  { %12506 = vst [vmem:[#allocation21_spill] sm:$0xff] %v8590_v7  ;;  %v1050_v61 = vshrl.u32 %v12507_v51, %v1035_v19  ;;  %v978_v23 = vadd.s32 536870912, %v977_v44  ;;  %vm1052_vm8 = vcmp.lt.s32.totalorder %v8560_v55, 1  ;;  %vm1054_vm9 = vcmp.lt.s32.totalorder %v8560_v55, 3 }
 0x132   :  { %v1048_v8 = vor.u32 %v1047_v33, %v1046_v46  ;;  %vm1055_vm10 = vcmp.lt.s32.totalorder %v8560_v55, 4  ;;  %v1060_v18 = vsel %vm1052_vm8, %v1039_v10, %v1042_v16  ;;  %v1064_v35 = vsel %vm1052_vm8, %v1042_v16, %v1045_v58 }
 0x133   :  { %v1051_v21 = vor.u32 %v1050_v61, %v1049_v59  ;;  %v8599_v56 = vshrl.u32 %v978_v23, 30  ;;  %v1057_v25 = vsel %vm1055_vm10, %v1045_v58, 2102212464  ;;  %v1339_v47 = vadd.s32 1, %v7009_v42 }
 0x134   :  { %v1061_v57 = vsel %vm1055_vm10, %v1048_v8, 920167782  ;;  %vm1053_vm11 = vcmp.lt.s32.totalorder %v8560_v55, 2  ;;  %v1056_v46 = vsel %vm1052_vm8, %v1036_v3, %v1039_v10  ;;  %v1058_v61 = vsel %vm1054_vm9, %v1042_v16, %v1057_v25 }
 0x135   :  { %v1062_v17 = vsel %vm1054_vm9, %v1045_v58, %v1061_v57  ;;  %v1065_v39 = vsel %vm1055_vm10, %v1051_v21, 1326507024  ;;  %v980_v19 = vshll.u32 %v8599_v56, 30  ;;  %v8613_v42 = vmul.f32 1.5707964, %v8590_v7 }
 0x136   :  { %v1063_v33 = vsel %vm1053_vm11, %v1060_v18, %v1062_v17  ;;  %v1066_v59 = vsel %vm1054_vm9, %v1048_v8, %v1065_v39  ;;  %vm1340_vm12 = vcmp.gt.s32.totalorder %v1339_v47, 0  ;;  %v12328_v16 = vand.u32 2147483647, %v8507_v54 }
 0x137   :  { %v1067_v23 = vsel %vm1053_vm11, %v1064_v35, %v1066_v59  ;;  %v8608_v34 = vmul.u32.u64.low %v8558_v37, %v1063_v33  ;;  %v8609_v20 = vmul.u32.u64.high %v8558_v37, %v1063_v33, %v8608_v34  ;;  %v8615_v58 = vsub.s32 %v977_v44, %v980_v19 }
 0x138   :  { %v8618_v10 = vmul.u32.u64.low %v8558_v37, %v1067_v23  ;;  %v8619_v3 = vmul.u32.u64.high %v8558_v37, %v1067_v23, %v8618_v10  ;;  %v8623_v8 = vsub.s32 32, %v8569_v6  ;;  %v8625_v21 = vadd.s32 1, %v7005_v52 }
 0x139   :  { %v983_v18 = vsub.s32 0, %v8615_v58  ;;  %v1059_v25 = vsel %vm1053_vm11, %v1056_v46, %v1058_v61  ;;  %v8631_v44 = vshrl.u32 %v8548_v48, 5  ;;  %v8634_v35 = vmul.f32 4.4, %v875_v26 }
 0x13a   :  { %v1078_v17 = vadd.s32 1, %v8609_v20  ;;  %v8637_v39 = vsel %vm1340_vm12, %v1339_v47, 0  ;;  %v1538_v19 = vand.u32 2139095040, %v8613_v42  ;;  %v973_v52 = vadd.s32 %v8551_v49, %v8556_v45 }
 0x13b   :  { %12508 = vst [vmem:[#allocation22_spill] sm:$0xff] %v8634_v35  ;;  %v6994_v33 = vmin.u32 %v983_v18, %v8615_v58  ;;  %v1003_v55 = vsub.s32 4, %v8599_v56  ;;  %v1075_v48 = vmul.u32 %v8558_v37, %v1059_v25  ;;  %vm1077_vm13 = vc.u32 %v8619_v3, %v8608_v34 }
 0x13c   :  { %v1130_v26 = vand.u32 8388607, %v12328_v16  ;;  %v1079_v47 = vsel %vm1077_vm13, %v1078_v17, %v8609_v20  ;;  %v1144_v59 = vshrl.u32 %v12332_v22, %v8623_v8  ;;  %v1147_v45 = vshrl.u32 %v12329_v24, %v8623_v8 }
 0x13d   :  { %v985_v46 = vclz %v6994_v33  ;;  %v1080_v49 = vadd.s32 %v1079_v47, %v1075_v48  ;;  %v12509_v61 = vmov 2475754826   ;;  %v1149_v37 = vshll.u32 %v12329_v24, %v8569_v6 }
 0x13e   :  { %v1141_v23 = vshrl.u32 %v12509_v61, %v8623_v8  ;;  %v1150_v10 = vshrl.u32 %v12505_v2, %v8623_v8  ;;  %v1143_v20 = vshll.u32 %v12509_v61, %v8569_v6  ;;  %v1146_v25 = vshll.u32 %v12332_v22, %v8569_v6 }
 0x13f   :  { %v6995_v18 = vadd.s32 4294967294, %v985_v46  ;;  %v1153_v17 = vshrl.u32 %v12507_v51, %v8623_v8  ;;  %v1081_v33 = vadd.s32 536870912, %v1080_v49  ;;  %v12510_v48 = vmov 683565275  }
 0x140   :  { %v1140_v47 = vshll.u32 %v12510_v48, %v8569_v6  ;;  %v1151_v16 = vor.u32 %v1150_v10, %v1149_v37  ;;  %v1152_v24 = vshll.u32 %v12505_v2, %v8569_v6  ;;  %v1131_v46 = vor.u32 8388608, %v1130_v26 }
 0x141   :  { %vm6996_vm15 = vcmp.lt.s32.totalorder %v6995_v18, 0  ;;  %v1145_v57 = vor.u32 %v1144_v59, %v1143_v20  ;;  %v1148_v32 = vor.u32 %v1147_v45, %v1146_v25  ;;  %vm1237_vm0 = vcmp.gt.s32.totalorder %v8625_v21, 0 }
 0x142   :  { %v988_v22 = vsel %vm6996_vm15, 0, %v6995_v18  ;;  %v8672_v31 = vshrl.u32 %v1081_v33, 30  ;;  %v1142_v30 = vor.u32 %v1141_v23, %v1140_v47  ;;  %v1154_v4 = vor.u32 %v1153_v17, %v1152_v24 }
 0x143   :  { %vm8676_vm1 = vcmp.le.f32.partialorder %v12511_v1, 0.7853982  ;;  %v989_v37 = vsub.s32 32, %v988_v22  ;;  %v993_v10 = vsub.s32 4294967266, %v988_v22  ;;  %vm1155_vm2 = vcmp.lt.s32.totalorder %v8631_v44, 1 }
 0x144   :  { %vm1158_vm3 = vcmp.lt.s32.totalorder %v8631_v44, 4  ;;  %v1083_v6 = vshll.u32 %v8672_v31, 30  ;;  %vm1156_vm4 = vcmp.lt.s32.totalorder %v8631_v44, 2  ;;  %vm1157_vm5 = vcmp.lt.s32.totalorder %v8631_v44, 3 }
 0x145   :  { %v1164_v26 = vsel %vm1158_vm3, %v1151_v16, 920167782  ;;  %v990_v24 = vshll.u32 %v8615_v58, %v988_v22  ;;  %v991_v59 = vshrl.u32 %v973_v52, %v989_v37  ;;  %v994_v1 = vadd.s32 127, %v993_v10 }
 0x146   :  { %v1167_v45 = vsel %vm1155_vm2, %v1145_v57, %v1148_v32  ;;  %v8688_v23 = vsub.s32 %v1080_v49, %v1083_v6  ;;  %v1163_v18 = vsel %vm1155_vm2, %v1142_v30, %v1145_v57  ;;  %v1165_v20 = vsel %vm1157_vm5, %v1148_v32, %v1164_v26 }
 0x147   :  { %v1168_v25 = vsel %vm1158_vm3, %v1154_v4, 1326507024  ;;  %v992_v17 = vor.u32 %v991_v59, %v990_v24  ;;  %v995_v33 = vshll.u32 %v994_v1, 23  ;;  %v1160_v47 = vsel %vm1158_vm3, %v1148_v32, 2102212464 }
 0x148   :  { %v1169_v22 = vsel %vm1157_vm5, %v1151_v16, %v1168_v25  ;;  %v1343_v58 = vand.u32 31, %v8637_v39  ;;  %v1086_v52 = vsub.s32 0, %v8688_v23  ;;  %v1139_v49 = vshrl.u32 %v12510_v48, %v8623_v8 }
 0x149   :  { %v1170_v37 = vsel %vm1156_vm4, %v1167_v45, %v1169_v22  ;;  %v996_v10 = vor.u32 4788187, %v995_v33  ;;  %v1004_v4 = vsel %vm919_vm14, %v1003_v55, %v8599_v56  ;;  %v1166_v32 = vsel %vm1156_vm4, %v1163_v18, %v1165_v20 }
 0x14a   :  { %v1171_v6 = vshll.u32 %v1131_v46, 8  ;;  %v1539_v16 = vshrl.u32 %v1538_v19, 23  ;;  %v6998_v26 = vmin.u32 %v1086_v52, %v8688_v23  ;;  %v1159_v24 = vsel %vm1155_vm2, %v1139_v49, %v1142_v30 }
 0x14b   :  { %v1161_v8 = vsel %vm1157_vm5, %v1145_v57, %v1160_v47  ;;  %v997_v59 = vand.u32 2147483647, %v996_v10  ;;  %v999_v1 = vcvt.s32.f32 %v992_v17  ;;  %v1006_v56 = vsel %vm8676_vm1, 0, %v1004_v4 }
 0x14c   :  { %v8712_v45 = vmul.u32.u64.low %v1171_v6, %v1170_v37  ;;  %v8713_v25 = vmul.u32.u64.high %v1171_v6, %v1170_v37, %v8712_v45  ;;  %v1088_v55 = vclz %v6998_v26  ;;  %v8724_v30 = vsel %vm1237_vm0, %v8625_v21, 0 }
 0x14d   :  { %v8717_v18 = vmul.u32.u64.low %v1171_v6, %v1166_v32  ;;  %v8718_v46 = vmul.u32.u64.high %v1171_v6, %v1166_v32, %v8717_v18  ;;  %v12514_v57 = vand.u32 2139095040, %v8563_v53  ;;  %v1000_v20 = vmul.f32 %v999_v1, %v997_v59 }
 0x14e   :  { %v8730_v17 = vsub.s32 32, %v1343_v58  ;;  %v8733_v33 = vmul.f32 1.5707964, %v8634_v35  ;;  %v6999_v47 = vadd.s32 4294967294, %v1088_v55  ;;  %v1162_v22 = vsel %vm1156_vm4, %v1159_v24, %v1161_v8 }
 0x14f   :  { %v8728_v19 = vshrl.u32 %v12514_v57, 23  ;;  %v8738_v52 = vshrl.u32 %v8637_v39, 5  ;;  %v7017_v49 = vadd.s32 4294967169, %v1539_v16  ;;  %v1001_v21 = vxor.u32 2147483648, %v1000_v20 }
 0x150   :  { %12515 = vst [vmem:[#allocation23_spill] sm:$0xff] %v8733_v33  ;;  %v8740_v37 = vand.u32 3, %v1006_v56  ;;  %v1076_v10 = vadd.s32 %v8608_v34, %v8619_v3  ;;  %vm7000_vm6 = vcmp.lt.s32.totalorder %v6999_v47, 0  ;;  %vm1180_vm7 = vc.u32 %v8713_v25, %v8717_v18 }
 0x151   :  { %v1181_v4 = vadd.s32 1, %v8718_v46  ;;  %v1002_v44 = vsel %vm919_vm14, %v1001_v21, %v1000_v20  ;;  %v1091_v32 = vsel %vm7000_vm6, 0, %v6999_v47  ;;  %v1178_v26 = vmul.u32 %v1171_v6, %v1162_v22 }
 0x152   :  { %v12346_v39 = vand.u32 2147483647, %v8540_v62  ;;  %v1005_v16 = vsel %vm8676_vm1, %v8493_v38, %v1002_v44  ;;  %v1092_v24 = vsub.s32 32, %v1091_v32  ;;  %v1096_v8 = vsub.s32 4294967266, %v1091_v32 }
 0x153   :  { %v1347_v34 = vshrl.u32 %v12509_v61, %v8730_v17  ;;  %8024 = vcosq.f32 %v1005_v16  ;;  %v1093_v3 = vshll.u32 %v8688_v23, %v1091_v32  ;;  %v1182_v59 = vsel %vm1180_vm7, %v1181_v4, %v8718_v46 }
 0x154   :  { %v12516_v1 = vmov 2131351028   ;;  %8026 = vsinq.f32 %v1005_v16  ;;  %v1094_v6 = vshrl.u32 %v1076_v10, %v1092_v24  ;;  %v1097_v56 = vadd.s32 127, %v1096_v8 }
 0x155   :  { %v1350_v45 = vshrl.u32 %v12516_v1, %v8730_v17  ;;  %v1183_v55 = vadd.s32 %v1182_v59, %v1178_v26  ;;  %v1353_v57 = vshrl.u32 %v12517_v0, %v8730_v17  ;;  %v1355_v20 = vshll.u32 %v12517_v0, %v1343_v58 }
 0x156   :  { %v1356_v47 = vshrl.u32 %v12505_v2, %v8730_v17  ;;  %v1358_v22 = vshll.u32 %v12505_v2, %v1343_v58  ;;  %v1095_v23 = vor.u32 %v1094_v6, %v1093_v3  ;;  %v1098_v21 = vshll.u32 %v1097_v56, 23 }
 0x157   :  { %v1184_v46 = vadd.s32 536870912, %v1183_v55  ;;  %v1359_v4 = vshrl.u32 %v12507_v51, %v8730_v17  ;;  %vm1022_vm8 = vcmp.lt.s32.totalorder %v8500_v43, 0  ;;  %v1346_v10 = vshll.u32 %v12510_v48, %v1343_v58 }
 0x158   :  { %v1349_v44 = vshll.u32 %v12509_v61, %v1343_v58  ;;  %v1352_v32 = vshll.u32 %v12516_v1, %v1343_v58  ;;  %v1357_v26 = vor.u32 %v1356_v47, %v1355_v20  ;;  %v8771_v16 = vadd.s32 1, %v7017_v49 }
 0x159   :  { %v12518_v24 = vand.u32 2147483647, %v8500_v43  ;;  %v1099_v3 = vor.u32 4788187, %v1098_v21  ;;  %v8779_v59 = vshrl.u32 %v1184_v46, 30  ;;  %v1360_v6 = vor.u32 %v1359_v4, %v1358_v22 }
 0x15a   :  { %v1336_v56 = vand.u32 8388607, %v12346_v39  ;;  %v1348_v13 = vor.u32 %v1347_v34, %v1346_v10  ;;  %v1351_v35 = vor.u32 %v1350_v45, %v1349_v44  ;;  %v1354_v7 = vor.u32 %v1353_v57, %v1352_v32 }
 0x15b   :  { %vm8775_vm9 = vcmp.le.f32.partialorder %v12518_v24, 0.7853982  ;;  %vm1012_vm10 = vcmp.eq.s32.totalorder %v8740_v37, 0  ;;  %v1100_v58 = vand.u32 2147483647, %v1099_v3  ;;  %v1102_v49 = vcvt.s32.f32 %v1095_v23 }
 0x15c   :  { %v1186_v20 = vshll.u32 %v8779_v59, 30  ;;  %vm1364_vm11 = vcmp.lt.s32.totalorder %v8738_v52, 4  ;;  %vm1015_vm12 = vcmp.eq.s32.totalorder %v8740_v37, 2  ;;  %v1106_v47 = vsub.s32 4, %v8672_v31 }
 0x15d   :  { %v1370_v22 = vsel %vm1364_vm11, %v1357_v26, 920167782  ;;  %v1374_v34 = vsel %vm1364_vm11, %v1360_v6, 1326507024  ;;  %v1103_v45 = vmul.f32 %v1102_v49, %v1100_v58  ;;  %vm1361_vm13 = vcmp.lt.s32.totalorder %v8738_v52, 1  ;;  %v8025_v23 = vpop.eup %8024 }
 0x15e   :  { %v8792_v57 = vsub.s32 %v1183_v55, %v1186_v20  ;;  %vm1363_vm14 = vcmp.lt.s32.totalorder %v8738_v52, 3  ;;  %v1337_v21 = vor.u32 8388608, %v1336_v56  ;;  %v1369_v46 = vsel %vm1361_vm13, %v1348_v13, %v1351_v35  ;;  %v8027_v44 = vpop.eup %8026 }
 0x15f   :  { %v1373_v4 = vsel %vm1361_vm13, %v1351_v35, %v1354_v7  ;;  %v1375_v10 = vsel %vm1363_vm14, %v1357_v26, %v1374_v34  ;;  %v1016_v32 = vxor.u32 2147483648, %v8025_v23  ;;  %v1104_v24 = vxor.u32 2147483648, %v1103_v45 }
 0x160   :  { %v1189_v55 = vsub.s32 0, %v8792_v57  ;;  %v1371_v3 = vsel %vm1363_vm14, %v1354_v7, %v1370_v22  ;;  %v1013_v6 = vxor.u32 2147483648, %v8027_v44  ;;  %v1345_v56 = vshrl.u32 %v12510_v48, %v8730_v17 }
 0x161   :  { %vm1362_vm15 = vcmp.lt.s32.totalorder %v8738_v52, 2  ;;  %v1366_v58 = vsel %vm1364_vm11, %v1354_v7, 2102212464  ;;  %vm885_vm0 = vcmp.gt.f32.partialorder %v8490_v36, -1.0  ;;  %v1105_v26 = vsel %vm1022_vm8, %v1104_v24, %v1103_v45 }
 0x162   :  { %v1107_v49 = vsel %vm1022_vm8, %v1106_v47, %v8672_v31  ;;  %v7002_v20 = vmin.u32 %v1189_v55, %v8792_v57  ;;  %v1376_v22 = vsel %vm1362_vm15, %v1373_v4, %v1375_v10  ;;  %v1108_v17 = vsel %vm8775_vm9, %v8500_v43, %v1105_v26 }
 0x163   :  { %v1365_v7 = vsel %vm1361_vm13, %v1345_v56, %v1348_v13  ;;  %v1372_v34 = vsel %vm1362_vm15, %v1369_v46, %v1371_v3  ;;  %v1377_v45 = vshll.u32 %v1337_v21, 8  ;;  %v1017_v24 = vsel %vm1015_vm12, %v1016_v32, %v8027_v44 }
 0x164   :  { %8028 = vcosq.f32 %v1108_v17  ;;  %v1191_v31 = vclz %v7002_v20  ;;  %v1367_v47 = vsel %vm1363_vm14, %v1351_v35, %v1366_v58  ;;  %v1014_v4 = vsel %vm1012_vm10, %v8025_v23, %v1013_v6 }
 0x165   :  { %8030 = vsinq.f32 %v1108_v17  ;;  %v8832_v10 = vmul.u32.u64.low %v1377_v45, %v1376_v22  ;;  %v8833_v55 = vmul.u32.u64.high %v1377_v45, %v1376_v22, %v8832_v10  ;;  %vm893_vm1 = vcmp.lt.f32.partialorder %v8490_v36, 1.0 }
 0x166   :  { %v7003_v13 = vadd.s32 4294967294, %v1191_v31  ;;  %v8836_v46 = vmul.u32.u64.low %v1377_v45, %v1372_v34  ;;  %v8837_v21 = vmul.u32.u64.high %v1377_v45, %v1372_v34, %v8836_v46  ;;  %v1240_v44 = vand.u32 31, %v8724_v30  ;;  %vm8876_vm10 = vmand %vm885_vm0, %vm893_vm1 }
 0x167   :  { %vm1546_vm2 = vcmp.gt.s32.totalorder %v8771_v16, 0  ;;  %vm1011_vm3 = vcmp.lt.s32.totalorder %v8740_v37, 2  ;;  %v1109_v35 = vsel %vm8775_vm9, 0, %v1107_v49  ;;  %v7013_v23 = vadd.s32 4294967169, %v8728_v19 }
 0x168   :  { %v1641_v32 = vand.u32 2139095040, %v8733_v33  ;;  %v1018_v3 = vsel %vm1011_vm3, %v1014_v4, %v1017_v24  ;;  %v1368_v6 = vsel %vm1362_vm15, %v1365_v7, %v1367_v47  ;;  %vm1009_vm4 = vweird.f32 %v8493_v38 }
 0x169   :  { %vm886_vm5 = vcmp.gt.f32.partialorder %v8497_v41, -1.0  ;;  %vm894_vm6 = vcmp.lt.f32.partialorder %v8497_v41, 1.0  ;;  %vm1386_vm7 = vc.u32 %v8833_v55, %v8836_v46  ;;  %v8855_v37 = vsel %vm1546_vm2, %v8771_v16, 0 }
 0x16a   :  { %v1113_v8 = vand.u32 3, %v1109_v35  ;;  %vm7004_vm8 = vcmp.lt.s32.totalorder %v7003_v13, 0  ;;  %v1387_v19 = vadd.s32 1, %v8837_v21  ;;  %v8858_v56 = vsub.s32 32, %v1240_v44  ;;  %vm902_vm14 = vmand %vm886_vm5, %vm894_vm6 }
 0x16b   :  { %v1019_v52 = vsel %vm1009_vm4, nan, %v1018_v3  ;;  %vm1112_vm9 = vweird.f32 %v8500_v43  ;;  %v1384_v38 = vmul.u32 %v1377_v45, %v1368_v6  ;;  %v8862_v58 = vshrl.u32 %v8724_v30, 5 }
 0x16c   :  { %v8864_v26 = vadd.s32 1, %v7013_v23  ;;  %v8866_v49 = vshrl.u32 %v1641_v32, 23  ;;  %v1388_v16 = vsel %vm1386_vm7, %v1387_v19, %v8837_v21  ;;  %v8870_v20 = vand.u32 31, %v8855_v37 }
 0x16d   :  { %v8880_v17 = vsel %vm7004_vm8, 0, %v7003_v13  ;;  %v1389_v30 = vadd.s32 %v1388_v16, %v1384_v38  ;;  %v12345_v7 = vand.u32 2147483647, %v8519_v11  ;;  %v1741_v45 = vsel %vm8876_vm10, %v1019_v52, 0.0 }
 0x16e   :  { %v8029_v34 = vpop.eup %8028  ;;  %vm1114_vm11 = vcmp.lt.s32.totalorder %v1113_v8, 2  ;;  %vm1115_vm12 = vcmp.eq.s32.totalorder %v1113_v8, 0  ;;  %vm1118_vm13 = vcmp.eq.s32.totalorder %v1113_v8, 2  ;;  %v1243_v36 = vshll.u32 %v12510_v48, %v1240_v44 }
 0x16f   :  { %v8031_v24 = vpop.eup %8030  ;;  %v1119_v31 = vxor.u32 2147483648, %v8029_v34  ;;  %v1390_v47 = vadd.s32 536870912, %v1389_v30  ;;  %v1244_v4 = vshrl.u32 %v12509_v61, %v8858_v56  ;;  %v1199_v13 = vsub.s32 4294967266, %v8880_v17 }
 0x170   :  { %v1116_v10 = vxor.u32 2147483648, %v8031_v24  ;;  %v1247_v21 = vshrl.u32 %v12516_v1, %v8858_v56  ;;  %v1253_v35 = vshrl.u32 %v12505_v2, %v8858_v56  ;;  %v1233_v3 = vand.u32 8388607, %v12345_v7 }
 0x171   :  { %v1120_v23 = vsel %vm1118_vm13, %v1119_v31, %v8031_v24  ;;  %v8893_v32 = vshrl.u32 %v1390_v47, 30  ;;  %v1250_v6 = vshrl.u32 %v12517_v0, %v8858_v56  ;;  %v1246_v52 = vshll.u32 %v12509_v61, %v1240_v44 }
 0x172   :  { %v1117_v19 = vsel %vm1115_vm12, %v8029_v34, %v1116_v10  ;;  %v1252_v38 = vshll.u32 %v12517_v0, %v1240_v44  ;;  %v1256_v16 = vshrl.u32 %v12507_v51, %v8858_v56  ;;  %v1245_v31 = vor.u32 %v1244_v4, %v1243_v36 }
 0x173   :  { %v1121_v22 = vsel %vm1114_vm11, %v1117_v19, %v1120_v23  ;;  %v1392_v24 = vshll.u32 %v8893_v32, 30  ;;  %v1249_v47 = vshll.u32 %v12516_v1, %v1240_v44  ;;  %v1248_v10 = vor.u32 %v1247_v21, %v1246_v52  ;;  %v1765_v23 = vpop.permute.xlu0 %1764 }
 0x174   :  { %v1122_v34 = vsel %vm1112_vm9, nan, %v1121_v22  ;;  %v1254_v7 = vor.u32 %v1253_v35, %v1252_v38  ;;  %v1255_v39 = vshll.u32 %v12505_v2, %v1240_v44  ;;  %v1200_v19 = vadd.s32 127, %v1199_v13 }
 0x175   :  { %v1742_v8 = vsel %vm902_vm14, %v1122_v34, 0.0  ;;  %v8913_v12 = vsub.s32 %v1389_v30, %v1392_v24  ;;  %v1251_v36 = vor.u32 %v1250_v6, %v1249_v47  ;;  %v1797_v4 = vmul.f32 %v1760_v63, %v1741_v45 }
 0x176   :  { %v1798_v40 = vmul.f32 %v1765_v23, %v1742_v8  ;;  %v1179_v41 = vadd.s32 %v8717_v18, %v8713_v25  ;;  %v1257_v60 = vor.u32 %v1256_v16, %v1255_v39  ;;  %v1195_v43 = vsub.s32 32, %v8880_v17 }
 0x177   :  { %v1395_v21 = vsub.s32 0, %v8913_v12  ;;  %vm1258_vm15 = vcmp.lt.s32.totalorder %v8862_v58, 1  ;;  %vm1261_vm0 = vcmp.lt.s32.totalorder %v8862_v58, 4  ;;  %v1234_v13 = vor.u32 8388608, %v1233_v3 }
 0x178   :  { %v8921_v44 = vpack.c.bf16 %v1798_v40, %v1797_v4  ;;  %v1266_v30 = vsel %vm1258_vm15, %v1245_v31, %v1248_v10  ;;  %v1267_v63 = vsel %vm1261_vm0, %v1254_v7, 920167782  ;;  %v1201_v45 = vshll.u32 %v1200_v19, 23 }
 0x179   :  { %v7010_v35 = vmin.u32 %v1395_v21, %v8913_v12  ;;  %vm1260_vm1 = vcmp.lt.s32.totalorder %v8862_v58, 3  ;;  %v1270_v25 = vsel %vm1258_vm15, %v1248_v10, %v1251_v36  ;;  %vm1259_vm2 = vcmp.lt.s32.totalorder %v8862_v58, 2 }
 0x17a   :  { %v1263_v18 = vsel %vm1261_vm0, %v1251_v36, 2102212464  ;;  %v1268_v40 = vsel %vm1260_vm1, %v1251_v36, %v1267_v63  ;;  %v1271_v39 = vsel %vm1261_vm0, %v1257_v60, 1326507024  ;;  %v1242_v6 = vshrl.u32 %v12510_v48, %v8858_v56 }
 0x17b   :  { %v1397_v3 = vclz %v7010_v35  ;;  %v1269_v52 = vsel %vm1259_vm2, %v1266_v30, %v1268_v40  ;;  %v1272_v38 = vsel %vm1260_vm1, %v1254_v7, %v1271_v39  ;;  %v1196_v16 = vshll.u32 %v8792_v57, %v8880_v17  ;;  %v8956_v57 = vld [vmem:[%s12303_s0 + $0x28] sm:$0xff] }
 0x17c   :  { %v1197_v22 = vshrl.u32 %v1179_v41, %v1195_v43  ;;  %v1273_v24 = vsel %vm1259_vm2, %v1270_v25, %v1272_v38  ;;  %v1274_v47 = vshll.u32 %v1234_v13, 8  ;;  %v1202_v34 = vor.u32 4788187, %v1201_v45  ;;  %v8981_v45 = vld [vmem:[%s12303_s0 + $0x30] sm:$0xff] }
 0x17d   :  { %v7011_v60 = vadd.s32 4294967294, %v1397_v3  ;;  %v1262_v8 = vsel %vm1258_vm15, %v1242_v6, %v1245_v31  ;;  %v1264_v56 = vsel %vm1260_vm1, %v1248_v10, %v1263_v18  ;;  %v8960_v17 = vmul.f32 %v8956_v57, %v8384_v5 }
 0x17e   :  { %v8946_v23 = vmul.u32.u64.low %v1274_v47, %v1273_v24  ;;  %v8947_v19 = vmul.u32.u64.high %v1274_v47, %v1273_v24, %v8946_v23  ;;  %v8949_v7 = vmul.u32.u64.low %v1274_v47, %v1269_v52  ;;  %v8950_v36 = vmul.u32.u64.high %v1274_v47, %v1269_v52, %v8949_v7 }
 0x17f   :  { %vm7012_vm3 = vcmp.lt.s32.totalorder %v7011_v60, 0  ;;  %v1198_v31 = vor.u32 %v1197_v22, %v1196_v16  ;;  %v1265_v10 = vsel %vm1259_vm2, %v1262_v8, %v1264_v56  ;;  %v8965_v4 = vmul.f32 1.7320508, %v8425_v9 }
 0x180   :  { %vm1443_vm4 = vcmp.gt.s32.totalorder %v8864_v26, 0  ;;  %v1550_v41 = vsub.s32 32, %v8870_v20  ;;  %v7021_v43 = vadd.s32 4294967169, %v8866_v49  ;;  %v1203_v21 = vand.u32 2147483647, %v1202_v34 }
 0x181   :  { %v1400_v13 = vsel %vm7012_vm3, 0, %v7011_v60  ;;  %vm1283_vm5 = vc.u32 %v8947_v19, %v8949_v7  ;;  %v1284_v5 = vadd.s32 1, %v8950_v36  ;;  %v12354_v30 = vand.u32 2147483647, %v8613_v42 }
 0x182   :  { %v1281_v58 = vmul.u32 %v1274_v47, %v1265_v10  ;;  %v8976_v63 = vmul.f32 %v8960_v17, %v8960_v17  ;;  %v8985_v49 = vmul.f32 %v8981_v45, %v8389_v15  ;;  %v8988_v35 = vmul.f32 1.7320508, %v8437_v14 }
 0x183   :  { %v1205_v25 = vcvt.s32.f32 %v1198_v31  ;;  %v1285_v18 = vsel %vm1283_vm5, %v1284_v5, %v8950_v36  ;;  %v8992_v40 = vmul.f32 1.7320508, %v8449_v27  ;;  %v8995_v39 = vmul.f32 1.7320508, %v8461_v28 }
 0x184   :  { %12523 = vst [vmem:[#allocation24_spill] sm:$0xff] %v8976_v63  ;;  %12524 = vst [vmem:[#allocation25_spill] sm:$0xff] %v8985_v49  ;;  %v1444_v3 = vsel %vm1443_vm4, %v8864_v26, 0  ;;  %v9000_v6 = vadd.s32 1, %v7021_v43  ;;  %v1405_v15 = vsub.s32 4294967266, %v1400_v13  ;;  %v1286_v52 = vadd.s32 %v1285_v18, %v1281_v58 }
 0x185   :  { %12525 = vst [vmem:[#allocation26_spill] sm:$0xff] %v8992_v40  ;;  %12526 = vst [vmem:[#allocation27_spill] sm:$0xff] %v8995_v39  ;;  %v9003_v38 = vshrl.u32 %v8855_v37, 5  ;;  %v9005_v16 = vmul.f32 %v1205_v25, %v1203_v21  ;;  %v1542_v22 = vand.u32 8388607, %v12354_v30  ;;  %v1562_v24 = vshrl.u32 %v12505_v2, %v1550_v41 }
 0x186   :  { %v1287_v47 = vadd.s32 536870912, %v1286_v52  ;;  %v1553_v34 = vshrl.u32 %v12509_v61, %v1550_v41  ;;  %v1556_v60 = vshrl.u32 %v12516_v1, %v1550_v41  ;;  %v1559_v26 = vshrl.u32 %v12517_v0, %v1550_v41 }
 0x187   :  { %v1401_v8 = vsub.s32 32, %v1400_v13  ;;  %v1552_v56 = vshll.u32 %v12510_v48, %v8870_v20  ;;  %v1561_v37 = vshll.u32 %v12517_v0, %v8870_v20  ;;  %v1565_v23 = vshrl.u32 %v12507_v51, %v1550_v41 }
 0x188   :  { %v1406_v36 = vadd.s32 127, %v1405_v15  ;;  %v9018_v31 = vshrl.u32 %v1287_v47, 30  ;;  %v1555_v10 = vshll.u32 %v12509_v61, %v8870_v20  ;;  %v1558_v43 = vshll.u32 %v12516_v1, %v8870_v20 }
 0x189   :  { %v9024_v21 = vand.u32 31, %v1444_v3  ;;  %v1385_v5 = vadd.s32 %v8836_v46, %v8833_v55  ;;  %v1563_v58 = vor.u32 %v1562_v24, %v1561_v37  ;;  %v1564_v25 = vshll.u32 %v12505_v2, %v8870_v20 }
 0x18a   :  { %v1289_v18 = vshll.u32 %v9018_v31, 30  ;;  %v1554_v15 = vor.u32 %v1553_v34, %v1552_v56  ;;  %v1557_v47 = vor.u32 %v1556_v60, %v1555_v10  ;;  %v1560_v30 = vor.u32 %v1559_v26, %v1558_v43 }
 0x18b   :  { %vm1649_vm6 = vcmp.gt.s32.totalorder %v9000_v6, 0  ;;  %v1207_v28 = vxor.u32 2147483648, %v9005_v16  ;;  %v1403_v27 = vshrl.u32 %v1385_v5, %v1401_v8  ;;  %v1566_v14 = vor.u32 %v1565_v23, %v1564_v25 }
 0x18c   :  { %v1407_v9 = vshll.u32 %v1406_v36, 23  ;;  %v9033_v39 = vsub.s32 %v1286_v52, %v1289_v18  ;;  %v1543_v40 = vor.u32 8388608, %v1542_v22  ;;  %vm1570_vm7 = vcmp.lt.s32.totalorder %v9003_v38, 4 }
 0x18d   :  { %v1402_v55 = vshll.u32 %v8913_v12, %v1400_v13  ;;  %v1551_v46 = vshrl.u32 %v12510_v48, %v1550_v41  ;;  %vm1567_vm8 = vcmp.lt.s32.totalorder %v9003_v38, 1  ;;  %v1576_v20 = vsel %vm1570_vm7, %v1563_v58, 920167782 }
 0x18e   :  { %v1292_v24 = vsub.s32 0, %v9033_v39  ;;  %vm1569_vm9 = vcmp.lt.s32.totalorder %v9003_v38, 3  ;;  %v1572_v34 = vsel %vm1570_vm7, %v1560_v30, 2102212464  ;;  %v1575_v60 = vsel %vm1567_vm8, %v1554_v15, %v1557_v47 }
 0x18f   :  { %v1404_v26 = vor.u32 %v1403_v27, %v1402_v55  ;;  %v1577_v8 = vsel %vm1569_vm9, %v1560_v30, %v1576_v20  ;;  %v1579_v52 = vsel %vm1567_vm8, %v1557_v47, %v1560_v30  ;;  %v1580_v56 = vsel %vm1570_vm7, %v1566_v14, 1326507024 }
 0x190   :  { %v1408_v22 = vor.u32 4788187, %v1407_v9  ;;  %v7006_v37 = vmin.u32 %v1292_v24, %v9033_v39  ;;  %vm1568_vm10 = vcmp.lt.s32.totalorder %v9003_v38, 2  ;;  %v1583_v12 = vshll.u32 %v1543_v40, 8 }
 0x191   :  { %v1571_v41 = vsel %vm1567_vm8, %v1551_v46, %v1554_v15  ;;  %v1573_v13 = vsel %vm1569_vm9, %v1557_v47, %v1572_v34  ;;  %v1578_v23 = vsel %vm1568_vm10, %v1575_v60, %v1577_v8  ;;  %v1581_v36 = vsel %vm1569_vm9, %v1563_v58, %v1580_v56  ;;  %v9071_v46 = vpop.permute.xlu1 %1769 }
 0x192   :  { %v1294_v10 = vclz %v7006_v37  ;;  %v1582_v43 = vsel %vm1568_vm10, %v1579_v52, %v1581_v36  ;;  %v9043_v5 = vmul.u32.u64.low %v1583_v12, %v1578_v23  ;;  %v9044_v25 = vmul.u32.u64.high %v1583_v12, %v1578_v23, %v9043_v5 }
 0x193   :  { %v9047_v27 = vshrl.u32 %v1444_v3, 5  ;;  %v9049_v30 = vmul.u32.u64.low %v1583_v12, %v1582_v43  ;;  %v9050_v14 = vmul.u32.u64.high %v1583_v12, %v1582_v43, %v9049_v30  ;;  %v9053_v9 = vmul.f32 1.7320508, %v8470_v29 }
 0x194   :  { %v9056_v40 = vsub.s32 32, %v9024_v21  ;;  %v1409_v38 = vand.u32 2147483647, %v1408_v22  ;;  %v7007_v18 = vadd.s32 4294967294, %v1294_v10  ;;  %v1574_v58 = vsel %vm1568_vm10, %v1571_v41, %v1573_v13 }
 0x195   :  { %12527 = vst [vmem:[#allocation28_spill] sm:$0xff] %v9053_v9  ;;  %v9061_v15 = vsel %vm1649_vm6, %v9000_v6, 0  ;;  %v12528_v3 = vand.u32 2147483647, %v8507_v54  ;;  %vm1125_vm12 = vcmp.lt.s32.totalorder %v8507_v54, 0  ;;  %v1209_v55 = vsub.s32 4, %v8779_v59  ;;  %v9098_v36 = vpop.permute.xlu1 %1774 }
 0x196   :  { %v1208_v20 = vsel %vm1125_vm12, %v1207_v28, %v9005_v16  ;;  %v1411_v24 = vcvt.s32.f32 %v1404_v26  ;;  %vm7008_vm13 = vcmp.lt.s32.totalorder %v7007_v18, 0  ;;  %v1593_v6 = vadd.s32 1, %v9044_v25 }
 0x197   :  { %vm9065_vm11 = vcmp.le.f32.partialorder %v12528_v3, 0.7853982  ;;  %v1282_v34 = vadd.s32 %v8949_v7, %v8947_v19  ;;  %v1297_v60 = vsel %vm7008_vm13, 0, %v7007_v18  ;;  %v1590_v8 = vmul.u32 %v1583_v12, %v1574_v58  ;;  %v9089_v7 = vpop.permute.xlu0 %1779 }
 0x198   :  { %vm1592_vm14 = vc.u32 %v9050_v14, %v9043_v5  ;;  %v1412_v52 = vmul.f32 %v1411_v24, %v1409_v38  ;;  %v1298_v56 = vsub.s32 32, %v1297_v60  ;;  %v1302_v22 = vsub.s32 4294967266, %v1297_v60  ;;  %12531 = vst [vmem:[#allocation29_spill] sm:$0xff] %v9089_v7 }
 0x199   :  { %v1594_v37 = vsel %vm1592_vm14, %v1593_v6, %v9044_v25  ;;  %v9083_v41 = vand.u32 31, %v9061_v15  ;;  %v1211_v28 = vsel %vm9065_vm11, %v8507_v54, %v1208_v20  ;;  %vm1331_vm15 = vcmp.lt.s32.totalorder %v8540_v62, 0 }
 0x19a   :  { %v1595_v19 = vadd.s32 %v1594_v37, %v1590_v8  ;;  %v1299_v16 = vshll.u32 %v9033_v39, %v1297_v60  ;;  %v1300_v26 = vshrl.u32 %v1282_v34, %v1298_v56  ;;  %v1303_v12 = vadd.s32 127, %v1302_v22 }
 0x19b   :  { %v12359_v13 = vand.u32 2147483647, %v8563_v53  ;;  %v9096_v23 = vsel %vm1125_vm12, %v1209_v55, %v8779_v59  ;;  %v1450_v43 = vshrl.u32 %v12509_v61, %v9056_v40  ;;  %v1453_v25 = vshrl.u32 %v12516_v1, %v9056_v40 }
 0x19c   :  { %v1596_v10 = vadd.s32 536870912, %v1595_v19  ;;  %8032 = vcosq.f32 %v1211_v28  ;;  %v1413_v39 = vxor.u32 2147483648, %v1412_v52  ;;  %v1301_v30 = vor.u32 %v1300_v26, %v1299_v16  ;;  %v9121_v16 = vpop.permute.xlu0 %1789 }
 0x19d   :  { %v1304_v38 = vshll.u32 %v1303_v12, 23  ;;  %v1449_v58 = vshll.u32 %v12510_v48, %v9024_v21  ;;  %v1452_v59 = vshll.u32 %v12509_v61, %v9024_v21  ;;  %v1459_v3 = vshrl.u32 %v12505_v2, %v9056_v40  ;;  %12532 = vst [vmem:[#allocation30_spill] sm:$0xff] %v9121_v16 }
 0x19e   :  { %v9104_v18 = vshrl.u32 %v1596_v10, 30  ;;  %v1439_v20 = vand.u32 8388607, %v12359_v13  ;;  %v1456_v24 = vshrl.u32 %v12517_v0, %v9056_v40  ;;  %v1458_v6 = vshll.u32 %v12517_v0, %v9024_v21 }
 0x19f   :  { %v1305_v55 = vor.u32 4788187, %v1304_v38  ;;  %v1451_v60 = vor.u32 %v1450_v43, %v1449_v58  ;;  %v1454_v8 = vor.u32 %v1453_v25, %v1452_v59  ;;  %v1455_v56 = vshll.u32 %v12516_v1, %v9024_v21 }
 0x1a0   :  { %v1598_v34 = vshll.u32 %v9104_v18, 30  ;;  %v1308_v37 = vcvt.s32.f32 %v1301_v30  ;;  %v1460_v26 = vor.u32 %v1459_v3, %v1458_v6  ;;  %v1462_v12 = vshrl.u32 %v12507_v51, %v9056_v40  ;;  %v9136_v30 = vpop.permute.xlu1 %1784 }
 0x1a1   :  { %v1306_v22 = vand.u32 2147483647, %v1305_v55  ;;  %v1212_v10 = vsel %vm9065_vm11, 0, %v9096_v23  ;;  %8034 = vsinq.f32 %v1211_v28  ;;  %v12533_v38 = vand.u32 2147483647, %v8540_v62  ;;  %12536 = vst [vmem:[#allocation31_spill] sm:$0xff] %v9136_v30 }
 0x1a2   :  { %v9134_v25 = vsub.s32 %v1595_v19, %v1598_v34  ;;  %v1414_v58 = vsel %vm1331_vm15, %v1413_v39, %v1412_v52  ;;  %v1457_v3 = vor.u32 %v1456_v24, %v1455_v56  ;;  %v1461_v47 = vshll.u32 %v12505_v2, %v9024_v21 }
 0x1a3   :  { %vm9130_vm0 = vcmp.le.f32.partialorder %v12533_v38, 0.7853982  ;;  %v1309_v59 = vmul.f32 %v1308_v37, %v1306_v22  ;;  %v1440_v23 = vor.u32 8388608, %v1439_v20  ;;  %vm1464_vm1 = vcmp.lt.s32.totalorder %v9047_v27, 1  ;;  %v201_v22 = vpop.permute.xlu0 %200 }
 0x1a4   :  { %v1601_v28 = vsub.s32 0, %v9134_v25  ;;  %vm1467_vm2 = vcmp.lt.s32.totalorder %v9047_v27, 4  ;;  %v1463_v19 = vor.u32 %v1462_v12, %v1461_v47  ;;  %v1472_v6 = vsel %vm1464_vm1, %v1451_v60, %v1454_v8  ;;  %v9169_v47 = vpop.permute.xlu1 %1794 }
 0x1a5   :  { %v1310_v55 = vxor.u32 2147483648, %v1309_v59  ;;  %v1473_v52 = vsel %vm1467_vm2, %v1460_v26, 920167782  ;;  %v1415_v39 = vsub.s32 4, %v8893_v32  ;;  %vm1228_vm3 = vcmp.lt.s32.totalorder %v8519_v11, 0  ;;  %12537 = vst [vmem:[#allocation32_spill] sm:$0xff] %v9169_v47 }
 0x1a6   :  { %v7018_v21 = vmin.u32 %v1601_v28, %v9134_v25  ;;  %vm1466_vm4 = vcmp.lt.s32.totalorder %v9047_v27, 3  ;;  %v9153_v20 = vpop.eup %8032  ;;  %v1448_v24 = vshrl.u32 %v12510_v48, %v9056_v40  ;;  %vm1465_vm5 = vcmp.lt.s32.totalorder %v9047_v27, 2 }
 0x1a7   :  { %v1469_v34 = vsel %vm1467_vm2, %v1457_v3, 2102212464  ;;  %v1474_v56 = vsel %vm1466_vm4, %v1457_v3, %v1473_v52  ;;  %v1417_v37 = vsel %vm9130_vm0, %v8540_v62, %v1414_v58  ;;  %v1476_v40 = vsel %vm1464_vm1, %v1454_v8, %v1457_v3  ;;  %v9184_v3 = vld [vmem:[%s12303_s0] sm:$0xff] }
 0x1a8   :  { %v1603_v12 = vclz %v7018_v21  ;;  %v1475_v38 = vsel %vm1465_vm5, %v1472_v6, %v1474_v56  ;;  %v1311_v28 = vsel %vm1228_vm3, %v1310_v55, %v1309_v59  ;;  %v1468_v52 = vsel %vm1464_vm1, %v1448_v24, %v1451_v60 }
 0x1a9   :  { %v1477_v13 = vsel %vm1467_vm2, %v1463_v19, 1326507024  ;;  %v1480_v29 = vshll.u32 %v1440_v23, 8  ;;  %v1470_v21 = vsel %vm1466_vm4, %v1454_v8, %v1469_v34  ;;  %v9187_v59 = vmul.f32 %v9184_v3, %v201_v22 }
 0x1aa   :  { %v7019_v58 = vadd.s32 4294967294, %v1603_v12  ;;  %v1478_v6 = vsel %vm1466_vm4, %v1460_v26, %v1477_v13  ;;  %v12538_v60 = vand.u32 2147483647, %v8519_v11  ;;  %v1312_v26 = vsub.s32 4, %v9018_v31 }
 0x1ab   :  { %v1479_v8 = vsel %vm1465_vm5, %v1476_v40, %v1478_v6  ;;  %v9197_v23 = vmul.u32.u64.low %v1480_v29, %v1475_v38  ;;  %v9198_v19 = vmul.u32.u64.high %v1480_v29, %v1475_v38, %v9197_v23  ;;  %v8035_v13 = vpop.eup %8034  ;;  %272 = vrot.lane.b32.xlu0 %v9187_v59, %s8194_s25  ;;  %8036 = vcosq.f32 %v1417_v37 }
 0x1ac   :  { %vm9191_vm6 = vcmp.le.f32.partialorder %v12538_v60, 0.7853982  ;;  %vm7020_vm7 = vcmp.lt.s32.totalorder %v7019_v58, 0  ;;  %v9202_v24 = vmul.u32.u64.low %v1480_v29, %v1479_v8  ;;  %v9203_v34 = vmul.u32.u64.high %v1480_v29, %v1479_v8, %v9202_v24  ;;  %v9217_v60 = vpop.permute.xlu1 %202 }
 0x1ad   :  { %v1314_v56 = vsel %vm9191_vm6, %v8519_v11, %v1311_v28  ;;  %v1606_v22 = vsel %vm7020_vm7, 0, %v7019_v58  ;;  %v1471_v12 = vsel %vm1465_vm5, %v1468_v52, %v1470_v21  ;;  %v9212_v38 = vand.u32 3, %v1212_v10 }
 0x1ae   :  { %v1416_v40 = vsel %vm1331_vm15, %v1415_v39, %v8893_v32  ;;  %8038 = vsinq.f32 %v1417_v37  ;;  %v1611_v6 = vsub.s32 4294967266, %v1606_v22  ;;  %v9220_v8 = vsub.s32 32, %v9083_v41  ;;  %v9229_v32 = vpop.permute.xlu0 %204 }
 0x1af   :  { %v1219_v24 = vxor.u32 2147483648, %v8035_v13  ;;  %v1222_v28 = vxor.u32 2147483648, %v9153_v20  ;;  %v1490_v58 = vadd.s32 1, %v9198_v19  ;;  %v1313_v27 = vsel %vm1228_vm3, %v1312_v26, %v9018_v31 }
 0x1b0   :  { %8040 = vcosq.f32 %v1314_v56  ;;  %v1487_v10 = vmul.u32 %v1480_v29, %v1471_v12  ;;  %vm1489_vm8 = vc.u32 %v9203_v34, %v9197_v23  ;;  %v1418_v39 = vsel %vm9130_vm0, 0, %v1416_v40 }
 0x1b1   :  { %v1607_v37 = vsub.s32 32, %v1606_v22  ;;  %v1612_v52 = vadd.s32 127, %v1611_v6  ;;  %v1491_v21 = vsel %vm1489_vm8, %v1490_v58, %v9198_v19  ;;  %v9235_v47 = vshrl.u32 %v9061_v15, 5  ;;  %v9248_v6 = vpop.permute.xlu1 %206 }
 0x1b2   :  { %vm1217_vm9 = vcmp.lt.s32.totalorder %v9212_v38, 2  ;;  %vm1218_vm10 = vcmp.eq.s32.totalorder %v9212_v38, 0  ;;  %v1492_v29 = vadd.s32 %v1491_v21, %v1487_v10  ;;  %vm1221_vm11 = vcmp.eq.s32.totalorder %v9212_v38, 2 }
 0x1b3   :  { %v1315_v31 = vsel %vm9191_vm6, 0, %v1313_v27  ;;  %v1591_v43 = vadd.s32 %v9043_v5, %v9050_v14  ;;  %v12361_v26 = vand.u32 2147483647, %v8733_v33  ;;  %v1220_v19 = vsel %vm1218_vm10, %v9153_v20, %v1219_v24  ;;  %v9260_v20 = vpop.permute.xlu0 %208 }
 0x1b4   :  { %v1223_v12 = vsel %vm1221_vm11, %v1222_v28, %v8035_v13  ;;  %v9246_v15 = vand.u32 3, %v1418_v39  ;;  %v1493_v40 = vadd.s32 536870912, %v1492_v29  ;;  %8042 = vsinq.f32 %v1314_v56 }
 0x1b5   :  { %v1609_v58 = vshrl.u32 %v1591_v43, %v1607_v37  ;;  %v1613_v10 = vshll.u32 %v1612_v52, 23  ;;  %v1656_v55 = vshrl.u32 %v12509_v61, %v9220_v8  ;;  %v9252_v27 = vand.u32 3, %v1315_v31  ;;  %v9262_v13 = vpop.eup %8036  ;;  %v9292_v9 = vpop.permute.xlu1 %210 }
 0x1b6   :  { %v9254_v21 = vshrl.u32 %v1493_v40, 30  ;;  %v1659_v5 = vshrl.u32 %v12516_v1, %v9220_v8  ;;  %v1662_v14 = vshrl.u32 %v12517_v0, %v9220_v8  ;;  %v1608_v56 = vshll.u32 %v9134_v25, %v1606_v22 }
 0x1b7   :  { %v1645_v24 = vand.u32 8388607, %v12361_v26  ;;  %v1655_v28 = vshll.u32 %v12510_v48, %v9083_v41  ;;  %v1665_v39 = vshrl.u32 %v12505_v2, %v9220_v8  ;;  %v1658_v31 = vshll.u32 %v12509_v61, %v9083_v41 }
 0x1b8   :  { %v9271_v37 = vpop.eup %8038  ;;  %v1495_v52 = vshll.u32 %v9254_v21, 30  ;;  %v1661_v43 = vshll.u32 %v12516_v1, %v9083_v41  ;;  %v1668_v25 = vshrl.u32 %v12507_v51, %v9220_v8  ;;  %v9280_v22 = vor.u32 %v1609_v58, %v1608_v56 }
 0x1b9   :  { %v9282_v40 = vor.u32 4788187, %v1613_v10  ;;  %v1657_v26 = vor.u32 %v1656_v55, %v1655_v28  ;;  %v1664_v16 = vshll.u32 %v12517_v0, %v9083_v41  ;;  %v1660_v7 = vor.u32 %v1659_v5, %v1658_v31  ;;  %v9305_v5 = vpop.permute.xlu0 %212 }
 0x1ba   :  { %v9286_v33 = vpop.eup %8040  ;;  %v9288_v30 = vsub.s32 %v1492_v29, %v1495_v52  ;;  %v1663_v61 = vor.u32 %v1662_v14, %v1661_v43  ;;  %v1667_v1 = vshll.u32 %v12505_v2, %v9083_v41  ;;  %v9296_v51 = vsel %vm1217_vm9, %v1220_v19, %v1223_v12  ;;  %v9317_v43 = vpop.permute.xlu1 %214 }
 0x1bb   :  { %v1425_v58 = vxor.u32 2147483648, %v9271_v37  ;;  %vm1427_vm12 = vcmp.eq.s32.totalorder %v9246_v15, 2  ;;  %v1428_v0 = vxor.u32 2147483648, %v9262_v13  ;;  %v1666_v10 = vor.u32 %v1665_v39, %v1664_v16 }
 0x1bc   :  { %vm1424_vm13 = vcmp.eq.s32.totalorder %v9246_v15, 0  ;;  %v1498_v29 = vsub.s32 0, %v9288_v30  ;;  %v1646_v55 = vor.u32 8388608, %v1645_v24  ;;  %v1654_v2 = vshrl.u32 %v12510_v48, %v9220_v8 }
 0x1bd   :  { %v1669_v41 = vor.u32 %v1668_v25, %v1667_v1  ;;  %vm1324_vm14 = vcmp.eq.s32.totalorder %v9252_v27, 2  ;;  %v1325_v38 = vxor.u32 2147483648, %v9286_v33  ;;  %v1617_v19 = vcvt.s32.f32 %v9280_v22 }
 0x1be   :  { %vm1670_vm15 = vcmp.lt.s32.totalorder %v9235_v47, 1  ;;  %vm1673_vm0 = vcmp.lt.s32.totalorder %v9235_v47, 4  ;;  %vm1321_vm1 = vcmp.eq.s32.totalorder %v9252_v27, 0  ;;  %v1615_v16 = vand.u32 2147483647, %v9282_v40  ;;  %v8043_v14 = vpop.eup %8042 }
 0x1bf   :  { %v7014_v12 = vmin.u32 %v1498_v29, %v9288_v30  ;;  %v1675_v48 = vsel %vm1673_vm0, %v1663_v61, 2102212464  ;;  %v1678_v8 = vsel %vm1670_vm15, %v1657_v26, %v1660_v7  ;;  %vm1671_vm2 = vcmp.lt.s32.totalorder %v9235_v47, 2 }
 0x1c0   :  { %vm1672_vm3 = vcmp.lt.s32.totalorder %v9235_v47, 3  ;;  %v1674_v56 = vsel %vm1670_vm15, %v1654_v2, %v1657_v26  ;;  %v1679_v24 = vsel %vm1673_vm0, %v1666_v10, 920167782  ;;  %v1682_v52 = vsel %vm1670_vm15, %v1660_v7, %v1663_v61  ;;  %v169_v2 = vpop.permute.xlu0 %168 }
 0x1c1   :  { %v1500_v28 = vclz %v7014_v12  ;;  %v1680_v39 = vsel %vm1672_vm3, %v1663_v61, %v1679_v24  ;;  %v1683_v31 = vsel %vm1673_vm0, %v1669_v41, 1326507024  ;;  %vm1320_vm4 = vcmp.lt.s32.totalorder %v9252_v27, 2  ;;  %v9328_v61 = vld [vmem:[%s12303_s0 + $0x8] sm:$0xff]  ;;  %v9355_v24 = vld [vmem:[%s12303_s0 + $0x18] sm:$0xff] }
 0x1c2   :  { %v1676_v25 = vsel %vm1672_vm3, %v1660_v7, %v1675_v48  ;;  %v1681_v22 = vsel %vm1671_vm2, %v1678_v8, %v1680_v39  ;;  %v1684_v40 = vsel %vm1672_vm3, %v1666_v10, %v1683_v31  ;;  %v1686_v1 = vshll.u32 %v1646_v55, 8  ;;  %v12541_v8 = vld [vmem:[#allocation18_spill] sm:$0xff] }
 0x1c3   :  { %vm1215_vm5 = vweird.f32 %v8507_v54  ;;  %v1322_v29 = vxor.u32 2147483648, %v8043_v14  ;;  %v7015_v63 = vadd.s32 4294967294, %v1500_v28  ;;  %v1685_v26 = vsel %vm1671_vm2, %v1682_v52, %v1684_v40 }
 0x1c4   :  { %v9332_v7 = vmul.f32 %v9328_v61, %v9217_v60  ;;  %vm887_vm6 = vcmp.gt.f32.partialorder %v8504_v50, -1.0  ;;  %vm895_vm7 = vcmp.lt.f32.partialorder %v8504_v50, 1.0  ;;  %v1429_v48 = vsel %vm1427_vm12, %v1428_v0, %v9271_v37 }
 0x1c5   :  { %v9336_v10 = vmul.u32.u64.low %v1686_v1, %v1685_v26  ;;  %v9337_v55 = vmul.u32.u64.high %v1686_v1, %v1685_v26, %v9336_v10  ;;  %v9339_v41 = vmul.u32.u64.low %v1686_v1, %v1681_v22  ;;  %v9340_v12 = vmul.u32.u64.high %v1686_v1, %v1681_v22, %v9339_v41  ;;  %v171_v22 = vpop.permute.xlu1 %170  ;;  %vm9422_vm0 = vmand %vm887_vm6, %vm895_vm7 }
 0x1c6   :  { %vm888_vm8 = vcmp.gt.f32.partialorder %v12541_v8, -1.0  ;;  %vm896_vm9 = vcmp.lt.f32.partialorder %v12541_v8, 1.0  ;;  %vm7016_vm10 = vcmp.lt.s32.totalorder %v7015_v63, 0  ;;  %v1677_v60 = vsel %vm1671_vm2, %v1674_v56, %v1676_v25  ;;  %274 = vrot.lane.b32.xlu0 %v9332_v7, %s8194_s25 }
 0x1c7   :  { %v9359_v28 = vmul.f32 %v9355_v24, %v9248_v6  ;;  %v1426_v37 = vsel %vm1424_vm13, %v9262_v13, %v1425_v58  ;;  %v1618_v0 = vmul.f32 %v1617_v19, %v1615_v16  ;;  %v1503_v39 = vsel %vm7016_vm10, 0, %v7015_v63  ;;  %vm9440_vm3 = vmand %vm888_vm8, %vm896_vm9 }
 0x1c8   :  { %v9365_v47 = vmul.f32 %v9184_v3, %v169_v2  ;;  %v1326_v56 = vsel %vm1324_vm14, %v1325_v38, %v8043_v14  ;;  %v1488_v52 = vadd.s32 %v9197_v23, %v9203_v34  ;;  %v1504_v31 = vsub.s32 32, %v1503_v39 }
 0x1c9   :  { %v1508_v25 = vsub.s32 4294967266, %v1503_v39  ;;  %v1323_v6 = vsel %vm1321_vm1, %v9286_v33, %v1322_v29  ;;  %v1693_v40 = vmul.u32 %v1686_v1, %v1677_v60  ;;  %vm1695_vm11 = vc.u32 %v9337_v55, %v9339_v41 }
 0x1ca   :  { %v1696_v63 = vadd.s32 1, %v9340_v12  ;;  %312 = vrot.lane.b32.xlu1 %v9365_v47, %s8195_s26  ;;  %v1505_v13 = vshll.u32 %v9288_v30, %v1503_v39  ;;  %v1506_v58 = vshrl.u32 %v1488_v52, %v1504_v31  ;;  %278 = vrot.lane.b32.xlu0 %v9359_v28, %s8194_s25  ;;  %v9384_v34 = vmul.f32 %v8956_v57, %v9292_v9  ;;  %v175_v39 = vpop.permute.xlu1 %174 }
 0x1cb   :  { %v1509_v23 = vadd.s32 127, %v1508_v25  ;;  %v1619_v33 = vxor.u32 2147483648, %v1618_v0  ;;  %v1518_v38 = vsub.s32 4, %v9254_v21  ;;  %v9389_v16 = vmul.f32 %v9328_v61, %v171_v22 }
 0x1cc   :  { %v1697_v19 = vsel %vm1695_vm11, %v1696_v63, %v9340_v12  ;;  %v1327_v30 = vsel %vm1320_vm4, %v1323_v6, %v1326_v56  ;;  %v1507_v14 = vor.u32 %v1506_v58, %v1505_v13  ;;  %v1225_v26 = vsel %vm1215_vm5, nan, %v9296_v51  ;;  %v12544_v56 = vld [vmem:[#allocation19_spill] sm:$0xff] }
 0x1cd   :  { %v1510_v1 = vshll.u32 %v1509_v23, 23  ;;  %v1698_v29 = vadd.s32 %v1697_v19, %v1693_v40  ;;  %vm1423_vm12 = vcmp.lt.s32.totalorder %v9246_v15, 2  ;;  %vm1318_vm13 = vweird.f32 %v8519_v11  ;;  %v9412_v15 = vld [vmem:[%s12303_s0 + $0x10] sm:$0xff] }
 0x1ce   :  { %vm1537_vm14 = vcmp.lt.s32.totalorder %v8613_v42, 0  ;;  %314 = vrot.lane.b32.xlu1 %v9389_v16, %s8195_s26  ;;  %v1430_v9 = vsel %vm1423_vm12, %v1426_v37, %v1429_v48  ;;  %vm1434_vm15 = vcmp.lt.s32.totalorder %v8563_v53, 0  ;;  %282 = vrot.lane.b32.xlu0 %v9384_v34, %s8194_s25  ;;  %v1328_v10 = vsel %vm1318_vm13, nan, %v1327_v30  ;;  %v173_v37 = vpop.permute.xlu0 %172 }
 0x1cf   :  { %v1511_v27 = vor.u32 4788187, %v1510_v1  ;;  %v1699_v2 = vadd.s32 536870912, %v1698_v29  ;;  %v1620_v54 = vsel %vm1537_vm14, %v1619_v33, %v1618_v0  ;;  %v1519_v11 = vsel %vm1434_vm15, %v1518_v38, %v9254_v21  ;;  %v9476_v33 = vld [vmem:[%s12303_s0 + $0x20] sm:$0xff] }
 0x1d0   :  { %v9416_v51 = vmul.f32 %v9412_v15, %v9229_v32  ;;  %v1514_v60 = vcvt.s32.f32 %v1507_v14  ;;  %v9430_v0 = vmul.f32 %v9187_v59, %v9187_v59  ;;  %v1743_v32 = vsel %vm9422_vm0, %v1225_v26, 0.0 }
 0x1d1   :  { %v1512_v48 = vand.u32 2147483647, %v1511_v27  ;;  %v9426_v21 = vshrl.u32 %v1699_v2, 30  ;;  %vm889_vm1 = vcmp.gt.f32.partialorder %v12544_v56, -1.0  ;;  %vm1421_vm2 = vweird.f32 %v8540_v62  ;;  %v179_v2 = vpop.permute.xlu1 %178 }
 0x1d2   :  { %v12547_v52 = vand.u32 2147483647, %v8613_v42  ;;  %472 = vrot.lane.b32.xlu1 %v9187_v59, %s8195_s26  ;;  %v1744_v62 = vsel %vm9440_vm3, %v1328_v10, 0.0  ;;  %v12550_v25 = vand.u32 2147483647, %v8563_v53  ;;  %376 = vrot.lane.b32.xlu0 %v9430_v0, %s8194_s25  ;;  %vm897_vm6 = vcmp.lt.f32.partialorder %v12544_v56, 1.0  ;;  %v177_v27 = vpop.permute.xlu0 %176 }
 0x1d3   :  { %v1515_v22 = vmul.f32 %v1514_v60, %v1512_v48  ;;  %v1701_v6 = vshll.u32 %v9426_v21, 30  ;;  %v9464_v40 = vsel %vm1421_vm2, nan, %v1430_v9  ;;  %v9480_v38 = vmul.f32 %v9476_v33, %v9260_v20  ;;  %v7867_v20 = vld [vmem:[%s12306_s3 + $0x4] ss:$12 sps:$4 sm:$0x1f]   ;;  %vm9504_vm7 = vmand %vm889_vm1, %vm897_vm6 }
 0x1d4   :  { %vm9446_vm4 = vcmp.le.f32.partialorder %v12547_v52, 0.7853982  ;;  %vm9456_vm5 = vcmp.le.f32.partialorder %v12550_v25, 0.7853982  ;;  %v9484_v19 = vmul.f32 %v9416_v51, %v9416_v51  ;;  %v1799_v30 = vmul.f32 %v9071_v46, %v1743_v32 }
 0x1d5   :  { %v1623_v63 = vsel %vm9446_vm4, %v8613_v42, %v1620_v54  ;;  %v1521_v13 = vsel %vm9456_vm5, 0, %v1519_v11  ;;  %v1516_v58 = vxor.u32 2147483648, %v1515_v22  ;;  %v9471_v23 = vsub.s32 %v1698_v29, %v1701_v6  ;;  %v7869_v10 = vld [vmem:[%s12306_s3] ss:$12 sps:$4 sm:$0x1f]   ;;  %v9520_v54 = vld [vmem:[%s12303_s0 + $0x38] sm:$0xff] }
 0x1d6   :  { %v1800_v14 = vmul.f32 %v9098_v36, %v1744_v62  ;;  %276 = vrot.lane.b32.xlu1 %v9416_v51, %s8194_s25  ;;  %v9492_v1 = vmul.f32 %v8985_v49, %v8985_v49  ;;  %v9498_v29 = vmul.f32 1.7320508, %v8960_v17  ;;  %380 = vrot.lane.b32.xlu0 %v9484_v19, %s8194_s25  ;;  %v12555_v11 = vld [vmem:[#allocation5_spill] sm:$0xff]  ;;  %8044 = vcosq.f32 %v1623_v63 }
 0x1d7   :  { %v1517_v26 = vsel %vm1434_vm15, %v1516_v58, %v1515_v22  ;;  %v1704_v9 = vsub.s32 0, %v9471_v23  ;;  %v9524_v12 = vmul.f32 %v9520_v54, %v12555_v11  ;;  %v9532_v32 = vand.u32 3, %v1521_v13  ;;  %v7870_v56 = vld [vmem:[%s12306_s3 + $0x8] ss:$12 sps:$4 sm:$0x1f]   ;;  %s8224_s3 = smov 72  }
 0x1d8   :  { %v1520_v60 = vsel %vm9456_vm5, %v8563_v53, %v1517_v26  ;;  %v9540_v52 = vmul.f32 %v8981_v45, %v9305_v5  ;;  %v9544_v62 = vmul.f32 %v9480_v38, %v9480_v38  ;;  %v9546_v25 = vpack.c.bf16 %v1800_v14, %v1799_v30  ;;  %v12558_v14 = vld [vmem:[#allocation20_spill] sm:$0xff] }
 0x1d9   :  { %8046 = vcosq.f32 %v1520_v60  ;;  %v7022_v50 = vmin.u32 %v1704_v9, %v9471_v23  ;;  %v9549_v8 = vmul.f32 %v9412_v15, %v173_v37  ;;  %v9552_v22 = vmul.f32 %v9476_v33, %v177_v27 }
 0x1da   :  { %12556 = vst [vmem:[#allocation18_spill] sm:$0xff] %v9540_v52  ;;  %8048 = vsinq.f32 %v1520_v60  ;;  %474 = vrot.lane.b32.xlu1 %v9332_v7, %s8195_s26  ;;  %v9557_v45 = vmul.f32 %v9355_v24, %v175_v39  ;;  %384 = vrot.lane.b32.xlu0 %v9544_v62, %s8194_s25  ;;  %vm1839_vm8 = vcmask 1044480   ;;  %vm1826_vm9 = vcmask 80896  }
 0x1db   :  { %v1706_v6 = vclz %v7022_v50  ;;  %8050 = vsinq.f32 %v1623_v63  ;;  %v240_v5 = vmul.f32 1.7320508, %v9365_v47  ;;  %7028 = vmatprep.subr.msk.bf16.mxu0 %vm1839_vm8, %v7867_v20  ;;  %v1841_v37 = vsel %vm1839_vm8, %v7869_v10, 0  ;;  %7492 = vmatprep.mubr.msk.bf16.mxu1 %vm1826_vm9, %v8921_v44  ;;  %v183_v63 = vpop.permute.xlu1 %182 }
 0x1dc   :  { %v1847_v13 = vsel %vm1839_vm8, %v7870_v56, 0  ;;  %vm1530_vm10 = vcmp.eq.s32.totalorder %v9532_v32, 2  ;;  %v9567_v39 = vmul.f32 %v9520_v54, %v9317_v43  ;;  %v9571_v30 = vmul.f32 %v9540_v52, %v9540_v52  ;;  %1850 = vmatpush1.bf16.msra.mxu0 %v1841_v37  ;;  %7786 = vmatprep.subr.msk.bf16.mxu1 %vm1839_vm8, %v7870_v56 }
 0x1dd   :  { %v7023_v58 = vadd.s32 4294967294, %v1706_v6  ;;  %vm890_vm11 = vcmp.gt.f32.partialorder %v12558_v14, -1.0  ;;  %vm898_vm12 = vcmp.lt.f32.partialorder %v12558_v14, 1.0  ;;  %v1694_v20 = vadd.s32 %v9339_v41, %v9337_v55  ;;  %7491 = vmatpush3.bf16.msra.mxu1 %v1847_v13 }
 0x1de   :  { %12557 = vst [vmem:[#allocation19_spill] sm:$0xff] %v9571_v30  ;;  %v242_v26 = vmul.f32 1.7320508, %v9549_v8  ;;  %v241_v9 = vmul.f32 1.7320508, %v9389_v16  ;;  %316 = vrot.lane.b32.xlu1 %v9549_v8, %s8195_s26  ;;  %v9584_v10 = vmul.f32 %v8956_v57, %v179_v2  ;;  %388 = vrot.lane.b32.xlu0 %v9571_v30, %s8194_s25  ;;  %vm712_vm15 = vcmask 7168   ;;  %vm906_vm5 = vmand %vm890_vm11, %vm898_vm12 }
 0x1df   :  { %v244_v43 = vmul.f32 1.7320508, %v9552_v22  ;;  %vm7024_vm13 = vcmp.lt.s32.totalorder %v7023_v58, 0  ;;  %v243_v27 = vmul.f32 1.7320508, %v9557_v45  ;;  %v9589_v41 = vmul.f32 %v9520_v54, %v183_v63  ;;  %7029 = vmatmul.mubr.msk.bf16.vlgmr.msra.gmra.mrb[0].mxu0 %vm1826_vm9, %v8921_v44  ;;  %v12562_v63 = vld [vmem:[#allocation26_spill] sm:$0xff] }
 0x1e0   :  { %v1709_v55 = vsel %vm7024_vm13, 0, %v7023_v58  ;;  %v248_v11 = vmul.f32 1.7320508, %v9187_v59  ;;  %v713_v60 = vsel %vm712_vm15, %v8965_v4, %v240_v5  ;;  %7493 = vmatmul.mubr.msk.bf16.vlgmr.msra.gmra.mrb[0].mxu1 %vm1826_vm9, %v9546_v25  ;;  %v12559_v50 = vmov 0   ;;  %v9600_v6 = vpop.eup %8044  ;;  %v12561_v58 = vld [vmem:[#allocation24_spill] sm:$0xff] }
 0x1e1   :  { %v1710_v56 = vsub.s32 32, %v1709_v55  ;;  %v1711_v57 = vshll.u32 %v9471_v23, %v1709_v55  ;;  %v1714_v2 = vsub.s32 4294967266, %v1709_v55  ;;  %1891 = vmatprep.mubr.bf16.mxu0 %v12559_v50  ;;  %vm721_vm0 = vcmask 15360  }
 0x1e2   :  { %318 = vrot.lane.b32.xlu1 %v9557_v45, %s8195_s26  ;;  %v9605_v44 = vsel %vm721_vm0, %v713_v60, %v248_v11  ;;  %v249_v4 = vmul.f32 1.7320508, %v9332_v7  ;;  %v714_v59 = vsel %vm712_vm15, %v8988_v35, %v241_v9  ;;  %v250_v23 = vmul.f32 1.7320508, %v9416_v51  ;;  %522 = vrot.lane.b32.xlu0 %v12561_v58, %s8198_s16  ;;  %v12563_v9 = vld [vmem:[#allocation27_spill] sm:$0xff] }
 0x1e3   :  { %12560 = vst [vmem:[#allocation5_spill] sm:$0xff] %v9605_v44  ;;  %v8047_v5 = vpop.eup %8046  ;;  %v1712_v37 = vshrl.u32 %v1694_v20, %v1710_v56  ;;  %v1715_v13 = vadd.s32 127, %v1714_v2  ;;  %v715_v55 = vsel %vm712_vm15, %v12562_v63, %v242_v26  ;;  %v251_v36 = vmul.f32 1.7320508, %v9359_v28 }
 0x1e4   :  { %v8049_v11 = vpop.eup %8048  ;;  %v1531_v60 = vxor.u32 2147483648, %v8047_v5  ;;  %v9617_v48 = vsel %vm721_vm0, %v714_v59, %v249_v4  ;;  %v9620_v35 = vsel %vm721_vm0, %v715_v55, %v250_v23  ;;  %v716_v20 = vsel %vm712_vm15, %v12563_v9, %v243_v27  ;;  %v12564_v59 = vld [vmem:[#allocation28_spill] sm:$0xff] }
 0x1e5   :  { %v1528_v56 = vxor.u32 2147483648, %v8049_v11  ;;  %v1713_v2 = vor.u32 %v1712_v37, %v1711_v57  ;;  %v1716_v44 = vshll.u32 %v1715_v13, 23  ;;  %v9625_v30 = vsel %vm721_vm0, %v716_v20, %v251_v36  ;;  %v8051_v26 = vpop.eup %8050 }
 0x1e6   :  { %vm1527_vm1 = vcmp.eq.s32.totalorder %v9532_v32, 0  ;;  %v1532_v63 = vsel %vm1530_vm10, %v1531_v60, %v8049_v11  ;;  %476 = vrot.lane.b32.xlu1 %v9416_v51, %s8195_s26  ;;  %v252_v4 = vmul.f32 1.7320508, %v9480_v38  ;;  %v717_v27 = vsel %vm712_vm15, %v12564_v59, %v244_v43  ;;  %286 = vrot.lane.b32.xlu0 %v9567_v39, %s8194_s25  ;;  %v12567_v43 = vld [vmem:[#allocation29_spill] sm:$0xff]  ;;  %v12569_v60 = vld [vmem:[#allocation31_spill] sm:$0xff] }
 0x1e7   :  { %vm1526_vm2 = vcmp.lt.s32.totalorder %v9532_v32, 2  ;;  %v1529_v57 = vsel %vm1527_vm1, %v8047_v5, %v1528_v56  ;;  %v1717_v23 = vor.u32 4788187, %v1716_v44  ;;  %v245_v36 = vmul.f32 1.7320508, %v9584_v10  ;;  %7030 = vmatmul.mubr.msk.bf16.gmra.mrb[4].mxu0 %vm1826_vm9, %v9546_v25 }
 0x1e8   :  { %vm1524_vm3 = vweird.f32 %v8563_v53  ;;  %v1533_v37 = vsel %vm1526_vm2, %v1529_v57, %v1532_v63  ;;  %v247_v13 = vmul.f32 1.7320508, %v9589_v41  ;;  %v9644_v51 = vsel %vm721_vm0, %v717_v27, %v252_v4  ;;  %1901 = vmatprep.mubr.bf16.mxu0 %v12559_v50  ;;  %v12571_v27 = vld [vmem:[#allocation23_spill] sm:$0xff] }
 0x1e9   :  { %12565 = vst [vmem:[#allocation20_spill] sm:$0xff] %v9644_v51  ;;  %v12566_v32 = vsel %vm9504_vm7, %v9464_v40, 0.0  ;;  %v1534_v53 = vsel %vm1524_vm3, nan, %v1533_v37  ;;  %v1718_v5 = vand.u32 2147483647, %v1717_v23  ;;  %v1720_v55 = vcvt.s32.f32 %v1713_v2 }
 0x1ea   :  { %v1801_v44 = vmul.f32 %v12567_v43, %v12566_v32  ;;  %v12568_v25 = vsub.s32 4, %v9104_v18  ;;  %v1746_v11 = vsel %vm906_vm5, %v1534_v53, 0.0  ;;  %280 = vrot.lane.b32.xlu1 %v9480_v38, %s8194_s25  ;;  %v239_v40 = vmul.f32 1.7320508, %v9524_v12  ;;  %524 = vrot.lane.b32.xlu0 %v9492_v1, %s8198_s16 }
 0x1eb   :  { %v1802_v14 = vmul.f32 %v12569_v60, %v1746_v11  ;;  %v1721_v9 = vmul.f32 %v1720_v55, %v1718_v5  ;;  %v9669_v20 = vsel %vm712_vm15, %v9498_v29, %v245_v36  ;;  %v255_v56 = vmul.f32 1.7320508, %v9567_v39  ;;  %v12576_v11 = vld [vmem:[#allocation21_spill] sm:$0xff] }
 0x1ec   :  { %v1622_v46 = vsel %vm1537_vm14, %v12568_v25, %v9104_v18  ;;  %12570 = vst [vmem:[#allocation24_spill] sm:$0xff] %v9669_v20  ;;  %v720_v18 = vsel %vm712_vm15, %v239_v40, %v247_v13  ;;  %v9677_v59 = vmul.f32 %v9524_v12, %v9524_v12  ;;  %vm1640_vm14 = vcmp.lt.s32.totalorder %v12571_v27, 0 }
 0x1ed   :  { %v1624_v2 = vsel %vm9446_vm4, 0, %v1622_v46  ;;  %v1807_v63 = vpack.c.bf16 %v1802_v14, %v1801_v44  ;;  %v1722_v4 = vxor.u32 2147483648, %v1721_v9  ;;  %v9683_v29 = vsel %vm721_vm0, %v720_v18, %v255_v56  ;;  %v181_v18 = vpop.permute.xlu0 %180 }
 0x1ee   :  { %478 = vrot.lane.b32.xlu1 %v9359_v28, %s8195_s26  ;;  %12572 = vst [vmem:[#allocation26_spill] sm:$0xff] %v9683_v29  ;;  %v12573_v57 = vand.u32 2147483647, %v12571_v27  ;;  %v1724_v36 = vsub.s32 4, %v9426_v21  ;;  %526 = vrot.lane.b32.xlu0 %v9677_v59, %s8198_s16  ;;  %v1628_v37 = vand.u32 3, %v1624_v2  ;;  %v1631_v32 = vxor.u32 2147483648, %v8051_v26 }
 0x1ef   :  { %v1723_v31 = vsel %vm1640_vm14, %v1722_v4, %v1721_v9  ;;  %7496 = vmatprep.mubr.msk.bf16.mxu1 %vm1826_vm9, %v1807_v63  ;;  %7031 = vmatmul.mubr.msk.bf16.gmra.mrb[8].mxu0 %vm1826_vm9, %v1807_v63  ;;  %v1634_v43 = vxor.u32 2147483648, %v9600_v6  ;;  %v9716_v46 = vmul.f32 %v9332_v7, %v9332_v7  ;;  %vm891_vm10 = vcmp.gt.f32.partialorder %v12576_v11, -1.0  ;;  %v12577_v7 = vld [vmem:[#allocation22_spill] sm:$0xff]  ;;  %s8225_s16 = smov 116  }
 0x1f0   :  { %vm9687_vm6 = vcmp.le.f32.partialorder %v12573_v57, 0.7853982  ;;  %1911 = vmatprep.mubr.bf16.mxu0 %v12559_v50  ;;  %v1725_v44 = vsel %vm1640_vm14, %v1724_v36, %v9426_v21  ;;  %vm1630_vm4 = vcmp.eq.s32.totalorder %v1628_v37, 0  ;;  %vm1633_vm7 = vcmp.eq.s32.totalorder %v1628_v37, 2  ;;  %v12578_v63 = vld [vmem:[#allocation30_spill] sm:$0xff] }
 0x1f1   :  { %v1726_v13 = vsel %vm9687_vm6, %v12571_v27, %v1723_v31  ;;  %v1632_v53 = vsel %vm1630_vm4, %v9600_v6, %v1631_v32  ;;  %v1635_v5 = vsel %vm1633_vm7, %v1634_v43, %v8051_v26  ;;  %v1727_v55 = vsel %vm9687_vm6, 0, %v1725_v44  ;;  %v12579_v31 = vld [vmem:[#allocation32_spill] sm:$0xff]  ;;  %v9765_v44 = vld [vmem:[%s12303_s0 + $0x30] sm:$0xff] }
 0x1f2   :  { %8052 = vcosq.f32 %v1726_v13  ;;  %320 = vrot.lane.b32.xlu1 %v9552_v22, %s8195_s26  ;;  %777 = vperm.xlu0 %7865, %v9184_v3   ;;  %vm1629_vm8 = vcmp.lt.s32.totalorder %v1628_v37, 2  ;;  %v1731_v21 = vand.u32 3, %v1727_v55  ;;  %vm899_vm11 = vcmp.lt.f32.partialorder %v12576_v11, 1.0  ;;  %v7871_v55 = vld [vmem:[%s12307_s4] ss:$12 sps:$4 sm:$0xff]  }
 0x1f3   :  { %8054 = vsinq.f32 %v1726_v13  ;;  %v1636_v25 = vsel %vm1629_vm8, %v1632_v53, %v1635_v5  ;;  %vm1627_vm12 = vweird.f32 %v8613_v42  ;;  %v9725_v60 = vmul.f32 %v9359_v28, %v9359_v28  ;;  %vm907_vm13 = vmand %vm891_vm10, %vm899_vm11  ;;  %v9746_v13 = vpop.permute.xlu0 %512 }
 0x1f4   :  { %v1637_v6 = vsel %vm1627_vm12, nan, %v1636_v25  ;;  %vm892_vm1 = vcmp.gt.f32.partialorder %v12577_v7, -1.0  ;;  %vm1736_vm2 = vcmp.eq.s32.totalorder %v1731_v21, 2  ;;  %vm900_vm3 = vcmp.lt.f32.partialorder %v12577_v7, 1.0  ;;  %v7873_v25 = vld [vmem:[%s12307_s4 + $0x4] ss:$12 sps:$4 sm:$0xff]  }
 0x1f5   :  { %v1747_v9 = vsel %vm907_vm13, %v1637_v6, 0.0  ;;  %vm1733_vm5 = vcmp.eq.s32.totalorder %v1731_v21, 0  ;;  %vm1732_vm14 = vcmp.lt.s32.totalorder %v1731_v21, 2  ;;  %vm1730_vm6 = vweird.f32 %v12571_v27  ;;  %vm908_vm4 = vmand %vm892_vm1, %vm900_vm3  ;;  %2647 = vmatprep.subr.bf16.mxu0 %v7873_v25  ;;  %v12580_v21 = vld [vmem:[#allocation6_spill] sm:$0xff]  ;;  %v7874_v6 = vld [vmem:[%s12307_s4 + $0x18] ss:$12 sps:$4 sm:$0xff]  }
 0x1f6   :  { %322 = vrot.lane.b32.xlu1 %v9584_v10, %s8195_s26  ;;  %v9734_v2 = vmul.f32 %v9384_v34, %v9384_v34  ;;  %v1803_v4 = vmul.f32 %v12578_v63, %v1747_v9  ;;  %v9744_v27 = vmul.f32 %v9567_v39, %v9567_v39  ;;  %v9768_v53 = vmul.f32 %v9765_v44, %v181_v18  ;;  %v7877_v7 = vld [vmem:[%s12307_s4 + $0x30] ss:$12 sps:$4 sm:$0xff]   ;;  %v7882_v9 = vld [vmem:[%s12307_s4 + $0x4c] ss:$12 sps:$4 sm:$0xff]   ;;  %v7891_v18 = vld [vmem:[%s12307_s4 + $0x94] ss:$12 sps:$4 sm:$0xff]  }
 0x1f7   :  { %v9754_v32 = vpop.permute.xlu0 %514  ;;  %v256_v11 = vmul.f32 3.8729835, %v12580_v21  ;;  %2648 = vmatpush1.bf16.msra.mxu0 %v7871_v55  ;;  %v7892_v55 = vld [vmem:[%s12307_s4 + $0xa8] ss:$12 sps:$4 sm:$0xff]   ;;  %v7894_v25 = vld [vmem:[%s12307_s4 + $0xac] ss:$12 sps:$4 sm:$0xff]  }
 0x1fa   :  { %378 = vrot.lane.b32.xlu1 %v9716_v46, %s8194_s25 }
 0x1fb   :  { %v9758_v43 = vpop.permute.xlu0 %516 }
 0x1fc   :  { %v8053_v3 = vpop.eup %8052 }
 0x1fd   :  { %v8055_v26 = vpop.eup %8054  ;;  %v1737_v40 = vxor.u32 2147483648, %v8053_v3 }
 0x1fe   :  { %v1734_v14 = vxor.u32 2147483648, %v8055_v26  ;;  %382 = vrot.lane.b32.xlu1 %v9725_v60, %s8194_s25 }
 0x1ff   :  { %v1738_v42 = vsel %vm1736_vm2, %v1737_v40, %v8055_v26  ;;  %v7876_v26 = vld [vmem:[%s12307_s4 + $0x1c] ss:$12 sps:$4 sm:$0xff]  }
 0x200   :  { %v1735_v56 = vsel %vm1733_vm5, %v8053_v3, %v1734_v14  ;;  %2649 = vmatprep.subr.bf16.mxu0 %v7876_v26  ;;  %v7879_v14 = vld [vmem:[%s12307_s4 + $0x34] ss:$12 sps:$4 sm:$0xff]  }
 0x201   :  { %v1739_v28 = vsel %vm1732_vm14, %v1735_v56, %v1738_v42  ;;  %2650 = vmatpush1.bf16.msra.mxu0 %v7874_v6  ;;  %v7883_v42 = vld [vmem:[%s12307_s4 + $0x60] ss:$12 sps:$4 sm:$0xff]   ;;  %v7888_v56 = vld [vmem:[%s12307_s4 + $0x7c] ss:$12 sps:$4 sm:$0xff]  }
 0x202   :  { %v1740_v57 = vsel %vm1730_vm6, nan, %v1739_v28  ;;  %386 = vrot.lane.b32.xlu1 %v9734_v2, %s8194_s25  ;;  %2651 = vmatprep.subr.bf16.mxu0 %v7879_v14  ;;  %v12581_v28 = vld [vmem:[#allocation8_spill] sm:$0xff]  ;;  %vm730_vm6 = vcmask 23552  }
 0x203   :  { %v1748_v23 = vsel %vm908_vm4, %v1740_v57, 0.0  ;;  %v257_v63 = vmul.f32 3.8729835, %v12581_v28  ;;  %v7889_v57 = vld [vmem:[%s12307_s4 + $0x90] ss:$12 sps:$4 sm:$0xff]   ;;  %vm12370_vm4 = vcmask 31744  }
 0x204   :  { %v1804_v36 = vmul.f32 %v12579_v31, %v1748_v23 }
 0x205   :  { %2652 = vmatpush1.bf16.msra.mxu0 %v7877_v7 }
 0x206   :  { %v1808_v37 = vpack.c.bf16 %v1804_v36, %v1803_v4  ;;  %390 = vrot.lane.b32.xlu1 %v9744_v27, %s8194_s25  ;;  %2653 = vmatprep.subr.bf16.mxu0 %v7882_v9  ;;  %v464_v9 = vmul.f32 3.8729835, %v9365_v47 }
 0x208   :  { %7497 = vmatmul.mubr.msk.bf16.gmra.mrb[4].mxu1 %vm1826_vm9, %v1808_v37  ;;  %7032 = vmatmul.mubr.msk.bf16.gmra.mrb[12].mxu0 %vm1826_vm9, %v1808_v37 }
 0x20a   :  { %480 = vrot.lane.b32.xlu1 %v9480_v38, %s8195_s26  ;;  %v9772_v38 = vpop.permute.xlu0 %518 }
 0x20e   :  { %284 = vrot.lane.b32.xlu1 %v9540_v52, %s8194_s25  ;;  %v9776_v5 = vpop.permute.xlu0 %520  ;;  %s8226_s25 = smov 12  }
 0x212   :  { %482 = vrot.lane.b32.xlu1 %v9384_v34, %s8195_s26 }
 0x216   :  { %324 = vrot.lane.b32.xlu1 %v9768_v53, %s8195_s26 }
 0x21a   :  { %326 = vrot.lane.b32.xlu1 %v9589_v41, %s8195_s26 }
 0x21d   :  { %v273_v3 = vpop.permute.xlu0 %272 }
 0x21e   :  { %484 = vrot.lane.b32.xlu1 %v9540_v52, %s8195_s26  ;;  %v296_v40 = vmul.f32 %v273_v3, %v256_v11 }
 0x220   :  { %560 = vrot.lane.b32.xlu0 %v296_v40, %s8206_s15  ;;  %v12582_v40 = vld [vmem:[#allocation7_spill] sm:$0xff] }
 0x222   :  { %486 = vrot.lane.b32.xlu1 %v9567_v39, %s8195_s26  ;;  %v7880_v39 = vld [vmem:[%s12307_s4 + $0x48] ss:$12 sps:$4 sm:$0xff]   ;;  %s8217_s26 = smov 60  }
 0x223   :  { %2654 = vmatpush1.bf16.msra.mxu0 %v7880_v39 }
 0x226   :  { %782 = vperm.xlu1 %7864, %v9328_v61   ;;  %v7885_v61 = vld [vmem:[%s12307_s4 + $0x64] ss:$12 sps:$4 sm:$0xff]  }
 0x227   :  { %2655 = vmatprep.subr.bf16.mxu0 %v7885_v61 }
 0x228   :  { %2656 = vmatpush1.bf16.msra.mxu0 %v7883_v42  ;;  %v465_v42 = vmul.f32 3.8729835, %v9389_v16 }
 0x229   :  { %2657 = vmatprep.subr.bf16.mxu0 %v7888_v56 }
 0x22a   :  { %787 = vperm.xlu1 %7864, %v9412_v15   ;;  %v7886_v15 = vld [vmem:[%s12307_s4 + $0x78] ss:$12 sps:$4 sm:$0xff]  }
 0x22c   :  { %2658 = vmatpush1.bf16.msra.mxu0 %v7886_v15 }
 0x22d   :  { %2659 = vmatprep.subr.bf16.mxu0 %v7891_v18  ;;  %v12583_v18 = vld [vmem:[#allocation10_spill] sm:$0xff] }
 0x22e   :  { %v258_v28 = vmul.f32 3.8729835, %v12583_v18  ;;  %v7912_v18 = vld [vmem:[%s12307_s4 + $0x10c] ss:$12 sps:$4 sm:$0xff]  }
 0x230   :  { %2660 = vmatpush1.bf16.msra.mxu0 %v7889_v57 }
 0x231   :  { %2661 = vmatprep.subr.bf16.mxu0 %v7894_v25  ;;  %v7897_v25 = vld [vmem:[%s12307_s4 + $0xc4] ss:$12 sps:$4 sm:$0xff]  }
 0x234   :  { %2662 = vmatpush1.bf16.msra.mxu0 %v7892_v55  ;;  %v7895_v55 = vld [vmem:[%s12307_s4 + $0xc0] ss:$12 sps:$4 sm:$0xff]  }
 0x235   :  { %2663 = vmatprep.subr.bf16.mxu0 %v7897_v25 }
 0x238   :  { %v275_v4 = vpop.permute.xlu0 %274  ;;  %2664 = vmatpush1.bf16.msra.mxu0 %v7895_v55  ;;  %v12585_v55 = vld [vmem:[#allocation14_spill] sm:$0xff] }
 0x239   :  { %v297_v23 = vmul.f32 %v275_v4, %v257_v63  ;;  %v536_v4 = vsub.f32 %v9430_v0, %v9746_v13  ;;  %v7898_v0 = vld [vmem:[%s12307_s4 + $0xc8] ss:$12 sps:$4 sm:$0xff]   ;;  %v260_v25 = vmul.f32 3.8729835, %v12585_v55  ;;  %v7923_v55 = vld [vmem:[%s12307_s4 + $0x140] ss:$12 sps:$4 sm:$0xff]  }
 0x23a   :  { %7317 = vmatprep.subr.bf16.mxu1 %v7898_v0  ;;  %v538_v0 = vsub.f32 %v9484_v19, %v9758_v43  ;;  %v7917_v19 = vld [vmem:[%s12307_s4 + $0x124] ss:$12 sps:$4 sm:$0xff]   ;;  %v7918_v43 = vld [vmem:[%s12307_s4 + $0x128] ss:$12 sps:$4 sm:$0xff]  }
 0x23b   :  { %562 = vrot.lane.b32.xlu1 %v297_v23, %s8206_s15  ;;  %v544_v13 = vmul.f32 1.9364917, %v536_v4 }
 0x23c   :  { %v313_v31 = vpop.permute.xlu1 %312  ;;  %v279_v36 = vpop.permute.xlu0 %278 }
 0x23d   :  { %v336_v37 = vmul.f32 %v313_v31, %v256_v11  ;;  %v537_v31 = vsub.f32 %v9716_v46, %v9754_v32  ;;  %v7899_v46 = vld [vmem:[%s12307_s4 + $0x8] ss:$12 sps:$4 sm:$0xff]  }
 0x23e   :  { %7318 = vmatpush3.bf16.msra.mxu1 %v7899_v46 }
 0x23f   :  { %592 = vrot.lane.b32.xlu0 %v336_v37, %s8207_s20  ;;  %v545_v32 = vmul.f32 1.9364917, %v537_v31 }
 0x240   :  { %v315_v21 = vpop.permute.xlu1 %314  ;;  %v9837_v3 = vpop.permute.xlu0 %282 }
 0x241   :  { %v337_v6 = vmul.f32 %v315_v21, %v257_v63 }
 0x243   :  { %792 = vperm.xlu0 %7865, %v9355_v24   ;;  %594 = vrot.lane.b32.xlu1 %v337_v6, %s8207_s20  ;;  %v12584_v24 = vld [vmem:[#allocation12_spill] sm:$0xff] }
 0x244   :  { %v473_v11 = vpop.permute.xlu1 %472  ;;  %v377_v26 = vpop.permute.xlu0 %376  ;;  %v259_v63 = vmul.f32 3.8729835, %v12584_v24  ;;  %v7903_v6 = vld [vmem:[%s12307_s4 + $0xe0] ss:$12 sps:$4 sm:$0xff]   ;;  %v7910_v24 = vld [vmem:[%s12307_s4 + $0x108] ss:$12 sps:$4 sm:$0xff]  }
 0x245   :  { %v400_v7 = vadd.f32 %v377_v26, %v12582_v40  ;;  %v496_v61 = vmul.f32 %v473_v11, %v464_v9  ;;  %v7900_v11 = vld [vmem:[%s12307_s4 + $0xd8] ss:$12 sps:$4 sm:$0xff]   ;;  %v7904_v26 = vld [vmem:[%s12307_s4 + $0x20] ss:$12 sps:$4 sm:$0xff]   ;;  %7319 = vmatprep.subr.bf16.mxu1 %v7903_v6 }
 0x246   :  { %v299_v37 = vmul.f32 %v279_v36, %v259_v63  ;;  %v7902_v36 = vld [vmem:[%s12307_s4 + $0xdc] ss:$12 sps:$4 sm:$0xff]   ;;  %7320 = vmatpush3.bf16.msra.mxu1 %v7904_v26  ;;  %v7907_v9 = vld [vmem:[%s12307_s4 + $0xf4] ss:$12 sps:$4 sm:$0xff]  }
 0x247   :  { %v408_v14 = vmul.f32 0.5, %v400_v7  ;;  %2665 = vmatprep.subr.bf16.mxu0 %v7902_v36  ;;  %v7915_v6 = vld [vmem:[%s12307_s4 + $0x120] ss:$12 sps:$4 sm:$0xff]  }
 0x248   :  { %v277_v39 = vpop.permute.xlu1 %276  ;;  %2666 = vmatpush1.bf16.msra.mxu0 %v7900_v11  ;;  %v12586_v11 = vld [vmem:[#allocation9_spill] sm:$0xff] }
 0x249   :  { %424 = vrot.lane.b32.xlu1 %v408_v14, %s8199_s17  ;;  %v298_v57 = vmul.f32 %v277_v39, %v258_v28  ;;  %v8169_v14 = vld [vmem:[%s12303_s0 + $0x28] sm:$0xff]  ;;  %v7905_v39 = vld [vmem:[%s12307_s4 + $0xf0] ss:$12 sps:$4 sm:$0xff]   ;;  %2667 = vmatprep.subr.bf16.mxu0 %v7907_v9 }
 0x24c   :  { %v475_v56 = vpop.permute.xlu1 %474  ;;  %2668 = vmatpush1.bf16.msra.mxu0 %v7905_v39 }
 0x24d   :  { %v497_v15 = vmul.f32 %v475_v56, %v465_v42  ;;  %656 = vrot.lane.b32.xlu1 %v496_v61, %s8208_s24  ;;  %v7908_v42 = vld [vmem:[%s12307_s4 + $0xf8] ss:$12 sps:$4 sm:$0xff]   ;;  %2669 = vmatprep.subr.bf16.mxu0 %v7912_v18 }
 0x24e   :  { %7321 = vmatprep.subr.bf16.mxu1 %v7908_v42 }
 0x24f   :  { %658 = vrot.lane.b32.xlu0 %v497_v15, %s8208_s24  ;;  %v7909_v15 = vld [vmem:[%s12307_s4 + $0x38] ss:$12 sps:$4 sm:$0xff]  }
 0x250   :  { %v317_v23 = vpop.permute.xlu1 %316  ;;  %7322 = vmatpush3.bf16.msra.mxu1 %v7909_v15  ;;  %2670 = vmatpush1.bf16.msra.mxu0 %v7910_v24  ;;  %v12588_v15 = vld [vmem:[#allocation13_spill] sm:$0xff] }
 0x251   :  { %564 = vrot.lane.b32.xlu1 %v298_v57, %s8206_s15  ;;  %v338_v40 = vmul.f32 %v317_v23, %v258_v28  ;;  %v7913_v28 = vld [vmem:[%s12307_s4 + $0x110] ss:$12 sps:$4 sm:$0xff]   ;;  %v466_v23 = vmul.f32 3.8729835, %v9549_v8  ;;  %2671 = vmatprep.subr.bf16.mxu0 %v7917_v19 }
 0x252   :  { %7323 = vmatprep.subr.bf16.mxu1 %v7913_v28 }
 0x253   :  { %566 = vrot.lane.b32.xlu0 %v299_v37, %s8206_s15 }
 0x254   :  { %v319_v21 = vpop.permute.xlu1 %318  ;;  %2672 = vmatpush1.bf16.msra.mxu0 %v7915_v6 }
 0x255   :  { %688 = vrot.lane.b32.xlu1 %v544_v13, %s8208_s24  ;;  %v339_v61 = vmul.f32 %v319_v21, %v259_v63  ;;  %v467_v63 = vmul.f32 3.8729835, %v9557_v45  ;;  %v7914_v13 = vld [vmem:[%s12307_s4 + $0x50] ss:$12 sps:$4 sm:$0xff]  }
 0x256   :  { %7324 = vmatpush3.bf16.msra.mxu1 %v7914_v13  ;;  %v468_v13 = vmul.f32 3.8729835, %v9552_v22 }
 0x257   :  { %690 = vrot.lane.b32.xlu0 %v545_v32, %s8208_s24  ;;  %v381_v32 = vpop.permute.xlu0 %380  ;;  %7325 = vmatprep.subr.bf16.mxu1 %v7918_v43  ;;  %v7925_v43 = vld [vmem:[%s12307_s4 + $0x150] ss:$12 sps:$4 sm:$0xff]  }
 0x258   :  { %v477_v7 = vpop.permute.xlu1 %476 }
 0x259   :  { %596 = vrot.lane.b32.xlu1 %v338_v40, %s8207_s20  ;;  %v498_v31 = vmul.f32 %v477_v7, %v466_v23  ;;  %v7919_v40 = vld [vmem:[%s12307_s4 + $0x68] ss:$12 sps:$4 sm:$0xff]   ;;  %v12587_v7 = vld [vmem:[#allocation11_spill] sm:$0xff] }
 0x25a   :  { %7326 = vmatpush3.bf16.msra.mxu1 %v7919_v40  ;;  %v540_v40 = vsub.f32 %v9544_v62, %v9776_v5  ;;  %v7934_v62 = vld [vmem:[%s12307_s4 + $0xb0] ss:$12 sps:$4 sm:$0xff]  }
 0x25b   :  { %802 = vperm.xlu0 %7865, %v8169_v14   ;;  %v402_v14 = vadd.f32 %v381_v32, %v12587_v7  ;;  %v385_v28 = vpop.permute.xlu0 %384  ;;  %7327 = vmatprep.subr.bf16.mxu1 %v7923_v55  ;;  %v7937_v5 = vld [vmem:[%s12307_s4 + $0x184] ss:$12 sps:$4 sm:$0xff]  }
 0x25c   :  { %v281_v56 = vpop.permute.xlu1 %280 }
 0x25d   :  { %598 = vrot.lane.b32.xlu1 %v339_v61, %s8207_s20  ;;  %v300_v21 = vmul.f32 %v281_v56, %v260_v25  ;;  %v9936_v61 = vmul.f32 3.8729835, %v8960_v17  ;;  %v410_v56 = vmul.f32 0.5, %v402_v14  ;;  %v7920_v17 = vld [vmem:[%s12307_s4 + $0x138] ss:$12 sps:$4 sm:$0xff]  }
 0x25e   :  { %v7932_v14 = vld [vmem:[%s12307_s4 + $0x16c] ss:$12 sps:$4 sm:$0xff]  }
 0x260   :  { %v479_v4 = vpop.permute.xlu1 %478 }
 0x261   :  { %v499_v57 = vmul.f32 %v479_v4, %v467_v63  ;;  %797 = vperm.xlu1 %7864, %v9476_v33   ;;  %v546_v33 = vmul.f32 1.9364917, %v538_v0  ;;  %v12589_v4 = vld [vmem:[#allocation15_spill] sm:$0xff] }
 0x263   :  { %662 = vrot.lane.b32.xlu0 %v499_v57, %s8208_s24  ;;  %v404_v57 = vadd.f32 %v385_v28, %v12589_v4  ;;  %v301_v4 = vmul.f32 %v9837_v3, %v9936_v61  ;;  %v469_v3 = vmul.f32 3.8729835, %v9584_v10 }
 0x264   :  { %v321_v37 = vpop.permute.xlu1 %320 }
 0x265   :  { %660 = vrot.lane.b32.xlu1 %v498_v31, %s8208_s24  ;;  %v340_v9 = vmul.f32 %v321_v37, %v260_v25  ;;  %v7922_v37 = vld [vmem:[%s12307_s4 + $0x13c] ss:$12 sps:$4 sm:$0xff]   ;;  %v412_v25 = vmul.f32 0.5, %v404_v57  ;;  %v263_v57 = vmul.f32 3.8729835, %v9524_v12 }
 0x266   :  { %2673 = vmatprep.subr.bf16.mxu0 %v7922_v37 }
 0x267   :  { %2674 = vmatpush1.bf16.msra.mxu0 %v7920_v17 }
 0x268   :  { %v323_v46 = vpop.permute.xlu1 %322 }
 0x269   :  { %568 = vrot.lane.b32.xlu1 %v300_v21, %s8206_s15  ;;  %v341_v24 = vmul.f32 %v323_v46, %v9936_v61  ;;  %v7924_v21 = vld [vmem:[%s12307_s4 + $0x80] ss:$12 sps:$4 sm:$0xff]   ;;  %v389_v46 = vpop.permute.xlu0 %388 }
 0x26a   :  { %7328 = vmatpush3.bf16.msra.mxu1 %v7924_v21  ;;  %v406_v6 = vadd.f32 %v389_v46, %v9492_v1  ;;  %v7930_v1 = vld [vmem:[%s12307_s4 + $0x168] ss:$12 sps:$4 sm:$0xff]   ;;  %v470_v46 = vmul.f32 3.8729835, %v9768_v53 }
 0x26c   :  { %v379_v36 = vpop.permute.xlu1 %378 }
 0x26d   :  { %v401_v26 = vadd.f32 %v379_v36, %v12586_v11  ;;  %692 = vrot.lane.b32.xlu1 %v546_v33, %s8208_s24  ;;  %v7928_v36 = vld [vmem:[%s12307_s4 + $0x158] ss:$12 sps:$4 sm:$0xff]   ;;  %v523_v55 = vpop.permute.xlu0 %522 }
 0x26e   :  { %v7929_v11 = vld [vmem:[%s12307_s4 + $0x98] ss:$12 sps:$4 sm:$0xff]   ;;  %7329 = vmatprep.subr.bf16.mxu1 %v7928_v36 }
 0x26f   :  { %v409_v39 = vmul.f32 0.5, %v401_v26  ;;  %7330 = vmatpush3.bf16.msra.mxu1 %v7929_v11 }
 0x270   :  { %v383_v42 = vpop.permute.xlu1 %382 }
 0x271   :  { %426 = vrot.lane.b32.xlu0 %v409_v39, %s8199_s17  ;;  %600 = vrot.lane.b32.xlu1 %v340_v9, %s8207_s20  ;;  %v403_v18 = vadd.f32 %v383_v42, %v12588_v15  ;;  %v7933_v39 = vld [vmem:[%s12307_s4 + $0x170] ss:$12 sps:$4 sm:$0xff]   ;;  %v414_v9 = vmul.f32 0.5, %v406_v6 }
 0x272   :  { %7331 = vmatprep.subr.bf16.mxu1 %v7933_v39 }
 0x273   :  { %v411_v23 = vmul.f32 0.5, %v403_v18  ;;  %v548_v18 = vmul.f32 1.9364917, %v540_v40  ;;  %7332 = vmatpush3.bf16.msra.mxu1 %v7934_v62 }
 0x274   :  { %v387_v63 = vpop.permute.xlu1 %386 }
 0x275   :  { %428 = vrot.lane.b32.xlu0 %v410_v56, %s8199_s17  ;;  %602 = vrot.lane.b32.xlu1 %v341_v24, %s8207_s20  ;;  %v405_v0 = vadd.f32 %v387_v63, %v12561_v58  ;;  %v7927_v58 = vld [vmem:[%s12307_s4 + $0x154] ss:$12 sps:$4 sm:$0xff]   ;;  %v539_v63 = vsub.f32 %v9725_v60, %v9772_v38  ;;  %v471_v60 = vmul.f32 3.8729835, %v9589_v41 }
 0x276   :  { %2675 = vmatprep.subr.bf16.mxu0 %v7927_v58  ;;  %v9999_v56 = vld [vmem:[%s12307_s4 + $0x188] ss:$12 sps:$4 sm:$0xff]  }
 0x277   :  { %v413_v19 = vmul.f32 0.5, %v405_v0  ;;  %2676 = vmatpush1.bf16.msra.mxu0 %v7925_v43  ;;  %7500 = vmatprep.subr.bf16.mxu1 %v9999_v56  ;;  %v547_v17 = vmul.f32 1.9364917, %v539_v63  ;;  %v541_v0 = vsub.f32 %v9734_v2, %v523_v55 }
 0x278   :  { %v391_v31 = vpop.permute.xlu1 %390  ;;  %2677 = vmatprep.subr.bf16.mxu0 %v7932_v14 }
 0x279   :  { %430 = vrot.lane.b32.xlu0 %v411_v23, %s8199_s17  ;;  %807 = vperm.xlu1 %7864, %v9765_v44   ;;  %v262_v44 = vmul.f32 3.8729835, %v8985_v49  ;;  %v407_v42 = vadd.f32 %v391_v31, %v9677_v59  ;;  %v549_v21 = vmul.f32 1.9364917, %v541_v0 }
 0x27b   :  { %2678 = vmatpush1.bf16.msra.mxu0 %v7930_v1  ;;  %v415_v28 = vmul.f32 0.5, %v407_v42 }
 0x27c   :  { %v481_v33 = vpop.permute.xlu1 %480  ;;  %2720 = vmatprep.subr.bf16.mxu0 %v7937_v5 }
 0x27d   :  { %v500_v32 = vmul.f32 %v481_v33, %v468_v13  ;;  %432 = vrot.lane.b32.xlu0 %v412_v25, %s8199_s17  ;;  %v287_v25 = vpop.permute.xlu0 %286 }
 0x27e   :  { %v303_v13 = vmul.f32 %v287_v25, %v263_v57 }
 0x27f   :  { %664 = vrot.lane.b32.xlu1 %v500_v32, %s8208_s24 }
 0x280   :  { %v285_v26 = vpop.permute.xlu1 %284 }
 0x281   :  { %v302_v7 = vmul.f32 %v285_v26, %v262_v44  ;;  %434 = vrot.lane.b32.xlu0 %v413_v19, %s8199_s17  ;;  %v10028_v58 = vpop.permute.xlu0 %524 }
 0x283   :  { %572 = vrot.lane.b32.xlu1 %v302_v7, %s8206_s15 }
 0x284   :  { %v483_v15 = vpop.permute.xlu1 %482 }
 0x285   :  { %436 = vrot.lane.b32.xlu0 %v414_v9, %s8199_s17  ;;  %v501_v12 = vmul.f32 %v483_v15, %v469_v3  ;;  %v10032_v36 = vpop.permute.xlu0 %526 }
 0x287   :  { %696 = vrot.lane.b32.xlu1 %v548_v18, %s8208_s24 }
 0x288   :  { %v325_v59 = vpop.permute.xlu1 %324 }
 0x289   :  { %v342_v24 = vmul.f32 %v325_v59, %v262_v44  ;;  %438 = vrot.lane.b32.xlu0 %v415_v28, %s8199_s17  ;;  %v10059_v28 = vpop.permute.xlu0 %777  ;;  %s8227_s17 = smov 104  }
 0x28a   :  { %12592 = vst [vmem:[#allocation29_spill] sm:$0xff] %v10059_v28 }
 0x28b   :  { %604 = vrot.lane.b32.xlu1 %v342_v24, %s8207_s20  ;;  %v344_v24 = vmul.f32 %v9365_v47, %v9365_v47 }
 0x28c   :  { %v327_v23 = vpop.permute.xlu1 %326 }
 0x28d   :  { %v343_v31 = vmul.f32 %v327_v23, %v263_v57  ;;  %570 = vrot.lane.b32.xlu0 %v301_v4, %s8206_s15 }
 0x28f   :  { %606 = vrot.lane.b32.xlu1 %v343_v31, %s8207_s20 }
 0x290   :  { %v485_v37 = vpop.permute.xlu1 %484 }
 0x291   :  { %694 = vrot.lane.b32.xlu0 %v547_v17, %s8208_s24  ;;  %v502_v33 = vmul.f32 %v485_v37, %v470_v46 }
 0x292   :  { %v10069_v31 = vpop.permute.xlu0 %560 }
 0x294   :  { %v487_v38 = vpop.permute.xlu1 %486 }
 0x295   :  { %v503_v61 = vmul.f32 %v487_v38, %v471_v60  ;;  %812 = vperm.xlu0 %7865, %v9520_v54   ;;  %v8209_v54 = vmov 4  }
 0x297   :  { %670 = vrot.lane.b32.xlu1 %v503_v61, %s8208_s24 }
 0x299   :  { %666 = vrot.lane.b32.xlu0 %v501_v12, %s8208_s24 }
 0x29a   :  { %7866 = vset.pattern.permute.xlu0 %v8209_v54 }
 0x29d   :  { %574 = vrot.lane.b32.xlu0 %v303_v13, %s8206_s15  ;;  %s8228_s15 = smov 44  }
 0x2a1   :  { %698 = vrot.lane.b32.xlu0 %v549_v21, %s8208_s24 }
 0x2a5   :  { %v10023_v32 = vpop.permute.xlu1 %782  ;;  %668 = vrot.lane.b32.xlu0 %v502_v33, %s8208_s24 }
 0x2a6   :  { %12590 = vst [vmem:[#allocation27_spill] sm:$0xff] %v10023_v32 }
 0x2a9   :  { %v10026_v44 = vpop.permute.xlu1 %787 }
 0x2aa   :  { %12591 = vst [vmem:[#allocation28_spill] sm:$0xff] %v10026_v44 }
 0x2ad   :  { %v10030_v2 = vpop.permute.xlu1 %562 }
 0x2b1   :  { %v10078_v25 = vpop.permute.xlu0 %592 }
 0x2b2   :  { %v10034_v6 = vpop.f32.mrb[0].mxu0 }
 0x2b3   :  { %v7037_v19 = vmul.f32 -1.442695, %v10034_v6  ;;  %v10037_v43 = vpop.f32.mrb[1].mxu0  ;;  %v10039_v11 = vpop.f32.mrb[0].mxu1 }
 0x2b4   :  { %v7038_v40 = vmul.f32 -1.442695, %v10037_v43  ;;  %v10044_v7 = vpop.f32.mrb[2].mxu0  ;;  %v7045_v39 = vmul.f32 -1.442695, %v10039_v11  ;;  %v10050_v62 = vpop.f32.mrb[1].mxu1 }
 0x2b5   :  { %v10041_v26 = vpop.permute.xlu1 %594  ;;  %8056 = vpow2.f32 %v7037_v19  ;;  %v7040_v1 = vmul.f32 -1.442695, %v10044_v7  ;;  %v10047_v14 = vpop.f32.mrb[3].mxu0  ;;  %v7039_v9 = vmul.f32 -1.442695, %v10050_v62 }
 0x2b6   :  { %8058 = vpow2.f32 %v7038_v40  ;;  %v7041_v5 = vmul.f32 -1.442695, %v10047_v14  ;;  %v10054_v42 = vpop.f32.mrb[2].mxu1 }
 0x2b7   :  { %8060 = vpow2.f32 %v7040_v1  ;;  %v7048_v15 = vmul.f32 -1.442695, %v10054_v42  ;;  %v10057_v18 = vpop.f32.mrb[3].mxu1 }
 0x2b8   :  { %8062 = vpow2.f32 %v7041_v5  ;;  %v7042_v59 = vmul.f32 -1.442695, %v10057_v18 }
 0x2b9   :  { %8064 = vpow2.f32 %v7045_v39 }
 0x2ba   :  { %8066 = vpow2.f32 %v7039_v9  ;;  %v10064_v63 = vpop.f32.mrb[4].mxu0 }
 0x2bb   :  { %v425_v4 = vpop.permute.xlu1 %424  ;;  %v7043_v57 = vmul.f32 -1.442695, %v10064_v63  ;;  %8068 = vpow2.f32 %v7048_v15  ;;  %v10067_v23 = vpop.f32.mrb[5].mxu0 }
 0x2bc   :  { %v448_v17 = vsub.f32 %v344_v24, %v425_v4  ;;  %v7044_v37 = vmul.f32 -1.442695, %v10067_v23  ;;  %8070 = vpow2.f32 %v7042_v59  ;;  %v10072_v55 = vpop.f32.mrb[6].mxu0 }
 0x2bd   :  { %8072 = vpow2.f32 %v7043_v57  ;;  %v7046_v47 = vmul.f32 -1.442695, %v10072_v55  ;;  %v10075_v60 = vpop.f32.mrb[7].mxu0 }
 0x2be   :  { %v456_v38 = vmul.f32 2.236068, %v448_v17  ;;  %8074 = vpow2.f32 %v7044_v37  ;;  %v7047_v3 = vmul.f32 -1.442695, %v10075_v60 }
 0x2bf   :  { %v8057_v61 = vpop.eup %8056  ;;  %8076 = vpow2.f32 %v7046_v47 }
 0x2c0   :  { %v8059_v12 = vpop.eup %8058  ;;  %v2059_v0 = vadd.f32 1.0, %v8057_v61  ;;  %624 = vrot.lane.b32.xlu0 %v456_v38, %s8207_s20  ;;  %8078 = vpow2.f32 %v7047_v3 }
 0x2c1   :  { %v8061_v13 = vpop.eup %8060  ;;  %v2060_v21 = vadd.f32 1.0, %v8059_v12 }
 0x2c2   :  { %v8063_v46 = vpop.eup %8062  ;;  %8080 = vrcp.f32 %v2059_v0  ;;  %v2062_v33 = vadd.f32 1.0, %v8061_v13  ;;  %v10081_v54 = vpop.f32.mrb[8].mxu0 }
 0x2c3   :  { %v8065_v19 = vpop.eup %8064  ;;  %8082 = vrcp.f32 %v2060_v21  ;;  %v2063_v40 = vadd.f32 1.0, %v8063_v46  ;;  %v10083_v1 = vpop.f32.mrb[9].mxu0  ;;  %v7049_v46 = vmul.f32 -1.442695, %v10081_v54 }
 0x2c4   :  { %v8067_v39 = vpop.eup %8066  ;;  %8084 = vrcp.f32 %v2062_v33  ;;  %v10085_v5 = vpop.permute.xlu0 %792  ;;  %v2067_v9 = vadd.f32 1.0, %v8065_v19  ;;  %v7050_v19 = vmul.f32 -1.442695, %v10083_v1 }
 0x2c5   :  { %12593 = vst [vmem:[#allocation31_spill] sm:$0xff] %v10085_v5  ;;  %v10087_v15 = vpop.f32.mrb[10].mxu0  ;;  %v8069_v59 = vpop.eup %8068  ;;  %8086 = vrcp.f32 %v2063_v40  ;;  %v2061_v24 = vadd.f32 1.0, %v8067_v39 }
 0x2c6   :  { %v10089_v4 = vpop.f32.mrb[11].mxu0  ;;  %v8071_v57 = vpop.eup %8070  ;;  %8088 = vrcp.f32 %v2067_v9  ;;  %v2070_v17 = vadd.f32 1.0, %v8069_v59  ;;  %v7052_v39 = vmul.f32 -1.442695, %v10087_v15 }
 0x2c7   :  { %v8073_v37 = vpop.eup %8072  ;;  %8090 = vrcp.f32 %v2061_v24  ;;  %v2064_v47 = vadd.f32 1.0, %v8071_v57  ;;  %v7053_v59 = vmul.f32 -1.442695, %v10089_v4 }
 0x2c8   :  { %v8075_v38 = vpop.eup %8074  ;;  %v2065_v3 = vadd.f32 1.0, %v8073_v37  ;;  %8092 = vrcp.f32 %v2070_v17  ;;  %v10091_v13 = vpop.permute.xlu0 %658 }
 0x2c9   :  { %v8077_v61 = vpop.eup %8076  ;;  %v2066_v12 = vadd.f32 1.0, %v8075_v38  ;;  %8094 = vrcp.f32 %v2064_v47 }
 0x2ca   :  { %v8079_v0 = vpop.eup %8078  ;;  %8096 = vrcp.f32 %v2065_v3  ;;  %v2068_v21 = vadd.f32 1.0, %v8077_v61 }
 0x2cb   :  { %8098 = vrcp.f32 %v2066_v12  ;;  %v2069_v33 = vadd.f32 1.0, %v8079_v0 }
 0x2cc   :  { %v8081_v40 = vpop.eup %8080  ;;  %8100 = vrcp.f32 %v2068_v21  ;;  %v10101_v61 = vpop.permute.xlu0 %566 }
 0x2cd   :  { %v8083_v9 = vpop.eup %8082  ;;  %8102 = vrcp.f32 %v2069_v33  ;;  %v2131_v17 = vmul.f32 %v8081_v40, %v10034_v6  ;;  %v7935_v6 = vld [vmem:[%s12307_s4 + $0x180] ss:$12 sps:$4 sm:$0xff]  }
 0x2ce   :  { %v8085_v24 = vpop.eup %8084  ;;  %8104 = vpow2.f32 %v7049_v46  ;;  %v2132_v38 = vmul.f32 %v8083_v9, %v10037_v43  ;;  %v7941_v43 = vld [vmem:[%s12307_s4 + $0x19c] ss:$12 sps:$4 sm:$0xff]  }
 0x2cf   :  { %v8087_v57 = vpop.eup %8086  ;;  %v2134_v37 = vmul.f32 %v8085_v24, %v10044_v7  ;;  %8106 = vpow2.f32 %v7050_v19 }
 0x2d0   :  { %v8089_v47 = vpop.eup %8088  ;;  %v2135_v3 = vmul.f32 %v8087_v57, %v10047_v14  ;;  %8108 = vpow2.f32 %v7052_v39  ;;  %v7942_v14 = vld [vmem:[%s12307_s4 + $0x1a0] ss:$12 sps:$4 sm:$0xff]   ;;  %v10120_v57 = vpop.permute.xlu0 %690 }
 0x2d1   :  { %v8091_v12 = vpop.eup %8090  ;;  %v2155_v0 = vpack.c.bf16 %v2134_v37, %v2131_v17  ;;  %8110 = vpow2.f32 %v7053_v59  ;;  %v2139_v7 = vmul.f32 %v8089_v47, %v10039_v11  ;;  %v7945_v47 = vld [vmem:[%s12307_s4 + $0x1b4] ss:$12 sps:$4 sm:$0xff]  }
 0x2d2   :  { %v8093_v21 = vpop.eup %8092  ;;  %v2156_v33 = vpack.c.bf16 %v2135_v3, %v2132_v38  ;;  %v2133_v39 = vmul.f32 %v8091_v12, %v10050_v62  ;;  %v7939_v62 = vld [vmem:[%s12307_s4 + $0x198] ss:$12 sps:$4 sm:$0xff]  }
 0x2d3   :  { %v8095_v46 = vpop.eup %8094  ;;  %v2142_v19 = vmul.f32 %v8093_v21, %v10054_v42  ;;  %v7946_v38 = vld [vmem:[%s12307_s4 + $0x1b8] ss:$12 sps:$4 sm:$0xff]  }
 0x2d4   :  { %v8097_v40 = vpop.eup %8096  ;;  %v2136_v9 = vmul.f32 %v8095_v46, %v10057_v18  ;;  %2679 = vmatprep.mubr.bf16.mxu0 %v2156_v33  ;;  %2825 = vmatprep.mubr.bf16.mxu1 %v2156_v33 }
 0x2d5   :  { %v8099_v59 = vpop.eup %8098  ;;  %v10116_v24 = vpack.c.bf16 %v2142_v19, %v2139_v7  ;;  %2680 = vmatmul.mubr.bf16.vlgmr.msra.gmra.mrb[16].mxu0 %v2155_v0  ;;  %2826 = vmatmul.mubr.bf16.vlgmr.msra.gmra.mrb[8].mxu1 %v2155_v0  ;;  %v2137_v17 = vmul.f32 %v8097_v40, %v10064_v63 }
 0x2d6   :  { %v8101_v11 = vpop.eup %8100  ;;  %v10118_v42 = vpack.c.bf16 %v2136_v9, %v2133_v39  ;;  %2721 = vmatpush1.bf16.msra.mxu0 %v7935_v6  ;;  %7501 = vmatpush3.bf16.msra.mxu1 %v9999_v56  ;;  %v2138_v3 = vmul.f32 %v8099_v59, %v10067_v23  ;;  %v7943_v6 = vld [vmem:[%s12307_s4 + $0x1b0] ss:$12 sps:$4 sm:$0xff]   ;;  %v7949_v23 = vld [vmem:[%s12307_s4 + $0x1cc] ss:$12 sps:$4 sm:$0xff]  }
 0x2d7   :  { %v8103_v18 = vpop.eup %8102  ;;  %v2140_v37 = vmul.f32 %v8101_v11, %v10072_v55  ;;  %2722 = vmatprep.subr.bf16.mxu0 %v7941_v43  ;;  %7502 = vmatprep.subr.bf16.mxu1 %v7942_v14 }
 0x2d8   :  { %v8105_v56 = vpop.eup %8104  ;;  %v2141_v12 = vmul.f32 %v8103_v18, %v10075_v60  ;;  %v7950_v60 = vld [vmem:[%s12307_s4 + $0x1d0] ss:$12 sps:$4 sm:$0xff]  }
 0x2d9   :  { %v8107_v0 = vpop.eup %8106  ;;  %v2158_v21 = vpack.c.bf16 %v2140_v37, %v2137_v17  ;;  %v2071_v63 = vadd.f32 1.0, %v8105_v56 }
 0x2da   :  { %v8109_v46 = vpop.eup %8108  ;;  %v2159_v7 = vpack.c.bf16 %v2141_v12, %v2138_v3  ;;  %v2072_v19 = vadd.f32 1.0, %v8107_v0  ;;  %v10145_v40 = vpop.permute.xlu0 %802  ;;  %2723 = vmatpush1.bf16.msra.mxu0 %v7939_v62  ;;  %7503 = vmatpush3.bf16.msra.mxu1 %v7942_v14  ;;  %v7947_v0 = vld [vmem:[%s12307_s4 + $0x1c8] ss:$12 sps:$4 sm:$0xff]  }
 0x2db   :  { %v10136_v33 = vpop.f32.mrb[4].mxu1  ;;  %v10138_v55 = vpop.f32.mrb[12].mxu0  ;;  %12594 = vst [vmem:[#allocation23_spill] sm:$0xff] %v10145_v40  ;;  %8112 = vrcp.f32 %v2071_v63  ;;  %v2074_v9 = vadd.f32 1.0, %v8109_v46  ;;  %2724 = vmatprep.subr.bf16.mxu0 %v7945_v47  ;;  %7504 = vmatprep.subr.bf16.mxu1 %v7946_v38  ;;  %v12595_v63 = vlaneseq }
 0x2dc   :  { %v10143_v43 = vpop.f32.mrb[5].mxu1  ;;  %v8111_v39 = vpop.eup %8110  ;;  %v7057_v59 = vmul.f32 -1.442695, %v10136_v33  ;;  %8114 = vrcp.f32 %v2072_v19  ;;  %2689 = vmatprep.mubr.bf16.mxu0 %v2159_v7  ;;  %2833 = vmatprep.mubr.bf16.mxu1 %v2159_v7  ;;  %v7055_v37 = vmul.f32 -1.442695, %v10138_v55 }
 0x2dd   :  { %v10154_v11 = vpop.f32.mrb[6].mxu1  ;;  %v10156_v18 = vpop.f32.mrb[13].mxu0  ;;  %v2075_v14 = vadd.f32 1.0, %v8111_v39  ;;  %v7051_v62 = vmul.f32 -1.442695, %v10143_v43  ;;  %8116 = vrcp.f32 %v2074_v9  ;;  %2690 = vmatmul.mubr.bf16.gmra.mrb[20].mxu0 %v2158_v21  ;;  %2834 = vmatmul.mubr.bf16.gmra.mrb[12].mxu1 %v2158_v21  ;;  %v10173_v46 = vshrl.u32 %v12595_v63, 7 }
 0x2de   :  { %v10159_v17 = vpop.f32.mrb[7].mxu1  ;;  %v10162_v56 = vpop.f32.mrb[14].mxu0  ;;  %v7060_v3 = vmul.f32 -1.442695, %v10154_v11  ;;  %2725 = vmatpush1.bf16.msra.mxu0 %v7943_v6  ;;  %7505 = vmatpush3.bf16.msra.mxu1 %v7946_v38  ;;  %v7056_v7 = vmul.f32 -1.442695, %v10156_v18  ;;  %v345_v39 = vmul.f32 %v9389_v16, %v9389_v16 }
 0x2df   :  { %8118 = vrcp.f32 %v2075_v14  ;;  %v10165_v47 = vpop.f32.mrb[15].mxu0  ;;  %v10167_v12 = vpop.permute.xlu0 %662  ;;  %2726 = vmatprep.subr.bf16.mxu0 %v7949_v23  ;;  %7506 = vmatprep.subr.bf16.mxu1 %v7950_v60  ;;  %v7953_v21 = vld [vmem:[%s12307_s4 + $0x1e4] ss:$12 sps:$4 sm:$0xff]   ;;  %v7954_v38 = vld [vmem:[%s12307_s4 + $0x1e8] ss:$12 sps:$4 sm:$0xff]   ;;  %v10191_v14 = vadd.s32 4294967293, %v10173_v46 }
 0x2e0   :  { %8120 = vpow2.f32 %v7057_v59  ;;  %v7054_v6 = vmul.f32 -1.442695, %v10159_v17  ;;  %v7058_v19 = vmul.f32 -1.442695, %v10162_v56  ;;  %v7059_v23 = vmul.f32 -1.442695, %v10165_v47 }
 0x2e1   :  { %8122 = vpow2.f32 %v7051_v62  ;;  %v7951_v59 = vld [vmem:[%s12307_s4 + $0x1e0] ss:$12 sps:$4 sm:$0xff]   ;;  %v7957_v16 = vld [vmem:[%s12307_s4 + $0x1fc] ss:$12 sps:$4 sm:$0xff]   ;;  %v2974_v40 = vmul.u32 4, %v10173_v46 }
 0x2e2   :  { %8124 = vpow2.f32 %v7055_v37  ;;  %2727 = vmatpush1.bf16.msra.mxu0 %v7947_v0  ;;  %7507 = vmatpush3.bf16.msra.mxu1 %v7950_v60  ;;  %v7958_v60 = vld [vmem:[%s12307_s4 + $0x200] ss:$12 sps:$4 sm:$0xff]   ;;  %v346_v0 = vmul.f32 %v9549_v8, %v9549_v8 }
 0x2e3   :  { %8126 = vpow2.f32 %v7060_v3  ;;  %v427_v9 = vpop.permute.xlu0 %426  ;;  %2728 = vmatprep.subr.bf16.mxu0 %v7953_v21  ;;  %7508 = vmatprep.subr.bf16.mxu1 %v7954_v38  ;;  %v7955_v21 = vld [vmem:[%s12307_s4 + $0x1f8] ss:$12 sps:$4 sm:$0xff]   ;;  %v7961_v8 = vld [vmem:[%s12307_s4 + $0x214] ss:$12 sps:$4 sm:$0xff]  }
 0x2e4   :  { %8128 = vpow2.f32 %v7056_v7  ;;  %v449_v62 = vsub.f32 %v345_v39, %v427_v9 }
 0x2e5   :  { %8130 = vpow2.f32 %v7054_v6  ;;  %v8113_v37 = vpop.eup %8112  ;;  %v10205_v6 = vadd.s32 1, %v10191_v14 }
 0x2e6   :  { %8132 = vpow2.f32 %v7058_v19  ;;  %v457_v3 = vmul.f32 2.236068, %v449_v62  ;;  %v8115_v63 = vpop.eup %8114  ;;  %2729 = vmatpush1.bf16.msra.mxu0 %v7951_v59  ;;  %7509 = vmatpush3.bf16.msra.mxu1 %v7954_v38  ;;  %v10212_v19 = vadd.s32 1, %v10173_v46  ;;  %v347_v62 = vmul.f32 %v9557_v45, %v9557_v45 }
 0x2e7   :  { %8134 = vpow2.f32 %v7059_v23  ;;  %v429_v7 = vpop.permute.xlu0 %428  ;;  %v8117_v39 = vpop.eup %8116  ;;  %2730 = vmatprep.subr.bf16.mxu0 %v7957_v16  ;;  %v2143_v23 = vmul.f32 %v8113_v37, %v10081_v54  ;;  %7510 = vmatprep.subr.bf16.mxu1 %v7958_v60  ;;  %v7962_v16 = vld [vmem:[%s12307_s4 + $0x218] ss:$12 sps:$4 sm:$0xff]   ;;  %v3338_v45 = vmul.u32 8, %v10191_v14 }
 0x2e8   :  { %v450_v9 = vsub.f32 %v346_v0, %v429_v7  ;;  %626 = vrot.lane.b32.xlu0 %v457_v3, %s8207_s20  ;;  %v2146_v59 = vmul.f32 %v8117_v39, %v10087_v15  ;;  %v2144_v0 = vmul.f32 %v8115_v63, %v10083_v1  ;;  %v3340_v39 = vmul.u32 8, %v10205_v6  ;;  %v7959_v1 = vld [vmem:[%s12307_s4 + $0x210] ss:$12 sps:$4 sm:$0xff]  }
 0x2e9   :  { %v8119_v38 = vpop.eup %8118 }
 0x2ea   :  { %v8121_v3 = vpop.eup %8120  ;;  %v2147_v7 = vmul.f32 %v8119_v38, %v10089_v4  ;;  %v458_v29 = vmul.f32 2.236068, %v450_v9  ;;  %v2161_v54 = vpack.c.bf16 %v2146_v59, %v2143_v23  ;;  %2731 = vmatpush1.bf16.msra.mxu0 %v7955_v21  ;;  %7511 = vmatpush3.bf16.msra.mxu1 %v7958_v60  ;;  %v2977_v4 = vmul.u32 4, %v10212_v19  ;;  %v12596_v23 = vld [vmem:[#allocation16_spill] sm:$0xff] }
 0x2eb   :  { %v8123_v52 = vpop.eup %8122  ;;  %v2079_v37 = vadd.f32 1.0, %v8121_v3  ;;  %v431_v15 = vpop.permute.xlu0 %430  ;;  %2732 = vmatprep.subr.bf16.mxu0 %v7961_v8  ;;  %v348_v21 = vmul.f32 %v9552_v22, %v9552_v22  ;;  %7512 = vmatprep.subr.bf16.mxu1 %v7962_v16  ;;  %v7966_v8 = vld [vmem:[%s12307_s4 + $0x230] ss:$12 sps:$4 sm:$0xff]   ;;  %vm10240_vm9 = vcmp.ge.s32.totalorder %v12596_v23, %v2974_v40  ;;  %vm10245_vm7 = vcmp.ge.s32.totalorder %v12596_v23, %v3338_v45 }
 0x2ec   :  { %v8125_v49 = vpop.eup %8124  ;;  %v2162_v5 = vpack.c.bf16 %v2147_v7, %v2144_v0  ;;  %v2073_v20 = vadd.f32 1.0, %v8123_v52  ;;  %v451_v51 = vsub.f32 %v347_v62, %v431_v15  ;;  %628 = vrot.lane.b32.xlu0 %v458_v29, %s8207_s20  ;;  %v7965_v52 = vld [vmem:[%s12307_s4 + $0x22c] ss:$12 sps:$4 sm:$0xff]   ;;  %vm10250_vm8 = vcmp.lt.s32.totalorder %v12596_v23, %v3340_v39  ;;  %v7963_v0 = vld [vmem:[%s12307_s4 + $0x228] ss:$12 sps:$4 sm:$0xff]  }
 0x2ed   :  { %v8127_v63 = vpop.eup %8126  ;;  %8136 = vrcp.f32 %v2079_v37  ;;  %v2077_v60 = vadd.f32 1.0, %v8125_v49  ;;  %vm10259_vm10 = vcmp.lt.s32.totalorder %v12596_v23, %v2977_v4  ;;  %v349_v15 = vmul.f32 %v9584_v10, %v9584_v10  ;;  %vm10269_vm11 = vmand %vm10245_vm7, %vm10250_vm8 }
 0x2ee   :  { %v8129_v9 = vpop.eup %8128  ;;  %8138 = vrcp.f32 %v2073_v20  ;;  %v2082_v29 = vadd.f32 1.0, %v8127_v63  ;;  %v459_v38 = vmul.f32 2.236068, %v451_v51  ;;  %2699 = vmatprep.mubr.bf16.mxu0 %v2162_v5  ;;  %2841 = vmatprep.mubr.bf16.mxu1 %v2162_v5  ;;  %vm2979_vm12 = vmand %vm10240_vm9, %vm10259_vm10  ;;  %v351_v51 = vmul.f32 %v9589_v41, %v9589_v41 }
 0x2ef   :  { %v8131_v22 = vpop.eup %8130  ;;  %8140 = vrcp.f32 %v2077_v60  ;;  %v2078_v59 = vadd.f32 1.0, %v8129_v9  ;;  %2700 = vmatmul.mubr.bf16.gmra.mrb[24].mxu0 %v2161_v54  ;;  %2842 = vmatmul.mubr.bf16.gmra.mrb[16].mxu1 %v2161_v54  ;;  %v433_v62 = vpop.permute.xlu0 %432  ;;  %v350_v60 = vmul.f32 %v9768_v53, %v9768_v53  ;;  %vm748_vm9 = vcmask 39936  }
 0x2f0   :  { %v8133_v5 = vpop.eup %8132  ;;  %8142 = vrcp.f32 %v2082_v29  ;;  %v2076_v40 = vadd.f32 1.0, %v8131_v22  ;;  %v452_v3 = vsub.f32 %v348_v21, %v433_v62  ;;  %630 = vrot.lane.b32.xlu0 %v459_v38, %s8207_s20  ;;  %2733 = vmatpush1.bf16.msra.mxu0 %v7959_v1  ;;  %v12607_v22 = vld [vmem:[#allocation19_spill] sm:$0xff]  ;;  %vm757_vm7 = vcmask 48128  }
 0x2f1   :  { %v8135_v54 = vpop.eup %8134  ;;  %8144 = vrcp.f32 %v2078_v59  ;;  %v2080_v37 = vadd.f32 1.0, %v8133_v5  ;;  %7513 = vmatpush3.bf16.msra.mxu1 %v7962_v16  ;;  %2734 = vmatprep.subr.bf16.mxu0 %v7965_v52  ;;  %v12371_v16 = vmov 1.0   ;;  %v542_v59 = vsub.f32 %v12607_v22, %v10028_v58 }
 0x2f2   :  { %8146 = vrcp.f32 %v2076_v40  ;;  %v2081_v45 = vadd.f32 1.0, %v8135_v54  ;;  %v460_v39 = vmul.f32 2.236068, %v452_v3  ;;  %7514 = vmatprep.subr.bf16.mxu1 %v7966_v8  ;;  %vm766_vm8 = vcmask 56320  }
 0x2f3   :  { %8148 = vrcp.f32 %v2080_v37  ;;  %v435_v4 = vpop.permute.xlu0 %434  ;;  %vm2982_vm10 = vcmask 64512  }
 0x2f4   :  { %8150 = vrcp.f32 %v2081_v45  ;;  %v453_v10 = vsub.f32 %v349_v15, %v435_v4  ;;  %632 = vrot.lane.b32.xlu0 %v460_v39, %s8207_s20  ;;  %2735 = vmatpush1.bf16.msra.mxu0 %v7963_v0  ;;  %v550_v4 = vmul.f32 1.9364917, %v542_v59  ;;  %v12373_v59 = vmov 0.0  }
 0x2f5   :  { %7515 = vmatpush3.bf16.msra.mxu1 %v7966_v8  ;;  %7566 = vmatprep.subr.msk.mxu0 %vm10269_vm11, %v12371_v16 }
 0x2f6   :  { %v461_v63 = vmul.f32 2.236068, %v453_v10  ;;  %7524 = vmatprep.subr.msk.mxu1 %vm2979_vm12, %v12371_v16 }
 0x2f7   :  { %v8137_v21 = vpop.eup %8136  ;;  %v437_v52 = vpop.permute.xlu0 %436 }
 0x2f8   :  { %v8139_v9 = vpop.eup %8138  ;;  %v454_v29 = vsub.f32 %v350_v60, %v437_v52  ;;  %634 = vrot.lane.b32.xlu0 %v461_v63, %s8207_s20  ;;  %v2151_v5 = vmul.f32 %v8137_v21, %v10136_v33  ;;  %v543_v21 = vsub.f32 %v9744_v27, %v10032_v36  ;;  %v3112_v27 = vmul.u32 8, %v10173_v46 }
 0x2f9   :  { %v8141_v38 = vpop.eup %8140  ;;  %v2145_v15 = vmul.f32 %v8139_v9, %v10143_v43  ;;  %v3114_v36 = vmul.u32 8, %v10212_v19  ;;  %v3225_v19 = vmul.u32 4, %v10191_v14  ;;  %v3536_v14 = vld [vmem:[%s12308_s5] sm:$0x3]  ;;  %s8213_s5 = smov 16  }
 0x2fa   :  { %v8143_v8 = vpop.eup %8142  ;;  %v462_v62 = vmul.f32 2.236068, %v454_v29  ;;  %v2149_v41 = vmul.f32 %v8141_v38, %v10138_v55  ;;  %v10310_v55 = vld [vmem:[%s12304_s1] sm:$0xff]  ;;  %vm10319_vm13 = vcmp.ge.s32.totalorder %v12596_v23, %v3112_v27  ;;  %v3228_v9 = vmul.u32 4, %v10205_v6 }
 0x2fb   :  { %v8145_v20 = vpop.eup %8144  ;;  %v2154_v40 = vmul.f32 %v8143_v8, %v10154_v11  ;;  %v439_v3 = vpop.permute.xlu0 %438  ;;  %vm10324_vm1 = vcmp.lt.s32.totalorder %v12596_v23, %v3114_v36  ;;  %vm10349_vm3 = vcmp.ge.s32.totalorder %v12596_v23, %v3225_v19 }
 0x2fc   :  { %v8147_v0 = vpop.eup %8146  ;;  %v455_v54 = vsub.f32 %v351_v51, %v439_v3  ;;  %636 = vrot.lane.b32.xlu0 %v462_v62, %s8207_s20  ;;  %v2150_v11 = vmul.f32 %v8145_v20, %v10156_v18  ;;  %v551_v18 = vmul.f32 1.9364917, %v543_v21  ;;  %vm3116_vm2 = vmand %vm10319_vm13, %vm10324_vm1  ;;  %vm10354_vm5 = vcmp.lt.s32.totalorder %v12596_v23, %v3228_v9  ;;  %v12618_v3 = vld [vmem:[#allocation5_spill] sm:$0xff] }
 0x2fd   :  { %v8149_v37 = vpop.eup %8148  ;;  %v2166_v45 = vpack.c.bf16 %v2154_v40, %v2151_v5  ;;  %v2148_v58 = vmul.f32 %v8147_v0, %v10159_v17  ;;  %vm3230_vm14 = vmand %vm10349_vm3, %vm10354_vm5  ;;  %v731_v0 = vsel %vm730_vm6, %v12618_v3, %v10069_v31 }
 0x2fe   :  { %v8151_v39 = vpop.eup %8150  ;;  %v2152_v10 = vmul.f32 %v8149_v37, %v10162_v56  ;;  %v463_v33 = vmul.f32 2.236068, %v455_v54  ;;  %v740_v37 = vsel %vm12370_vm4, %v731_v0, %v10078_v25  ;;  %v246_v56 = vmul.f32 1.7320508, %v9768_v53 }
 0x2ff   :  { %v2163_v63 = vpack.c.bf16 %v2148_v58, %v2145_v15  ;;  %v2153_v60 = vmul.f32 %v8151_v39, %v10165_v47  ;;  %v657_v47 = vpop.permute.xlu1 %656  ;;  %v10336_v29 = vpop.permute.xlu0 %570 }
 0x300   :  { %v2164_v52 = vpack.c.bf16 %v2152_v10, %v2149_v41  ;;  %700 = vrot.lane.b32.xlu0 %v550_v4, %s8208_s24  ;;  %638 = vrot.lane.b32.xlu1 %v463_v33, %s8207_s20 }
 0x301   :  { %v2165_v43 = vpack.c.bf16 %v2153_v60, %v2150_v11 }
 0x303   :  { %2709 = vmatprep.mubr.bf16.mxu0 %v2165_v43  ;;  %2849 = vmatprep.mubr.bf16.mxu1 %v2165_v43  ;;  %v565_v6 = vpop.permute.xlu1 %564  ;;  %v10368_v49 = vpop.permute.xlu0 %694 }
 0x304   :  { %2710 = vmatmul.mubr.bf16.gmra.mrb[28].mxu0 %v2164_v52  ;;  %2850 = vmatmul.mubr.bf16.gmra.mrb[20].mxu1 %v2164_v52  ;;  %v733_v27 = vsel %vm730_vm6, %v9620_v35, %v565_v6  ;;  %v734_v35 = vsel %vm730_vm6, %v9625_v30, %v10101_v61  ;;  %v253_v61 = vmul.f32 1.7320508, %v9384_v34  ;;  %v12621_v34 = vld [vmem:[#allocation24_spill] sm:$0xff] }
 0x305   :  { %7516 = vmatprep.mubr.bf16.mxu1 %v10118_v42  ;;  %2752 = vmatprep.mubr.bf16.mxu0 %v12559_v50 }
 0x306   :  { %702 = vrot.lane.b32.xlu1 %v551_v18, %s8208_s24  ;;  %3531 = vperm.xlu0 %7866, %v10310_v55   ;;  %v727_v0 = vsel %vm721_vm0, %v12621_v34, %v253_v61 }
 0x307   :  { %v689_v7 = vpop.permute.xlu1 %688 }
 0x30b   :  { %v597_v8 = vpop.permute.xlu1 %596 }
 0x30c   :  { %2753 = vmatmul.mubr.bf16.vlgmr.msra.gmra.mrb[16].mxu0 %v10118_v42  ;;  %7517 = vmatmul.mubr.bf16.vlgmr.msra.gmra.mrb[24].mxu1 %v10116_v24 }
 0x30d   :  { %7520 = vmatprep.mubr.bf16.mxu1 %v2163_v63  ;;  %2762 = vmatprep.mubr.bf16.mxu0 %v12559_v50 }
 0x30e   :  { %7525 = vmatpush3.msk.msra.mxu1 %vm2979_vm12, %v12371_v16  ;;  %7567 = vmatpush3.msk.msra.mxu0 %vm10269_vm11, %v12371_v16 }
 0x30f   :  { %7538 = vmatprep.subr.msk.mxu1 %vm3116_vm2, %v12371_v16  ;;  %7600 = vmatprep.subr.bf16.mxu0 %v12373_v59  ;;  %v599_v62 = vpop.permute.xlu1 %598 }
 0x314   :  { %2763 = vmatmul.mubr.bf16.gmra.mrb[20].mxu0 %v10116_v24  ;;  %7521 = vmatmul.mubr.bf16.gmra.mrb[28].mxu1 %v2166_v45  ;;  %v10372_v38 = vpop.permute.xlu0 %812  ;;  %v10380_v24 = vpop.permute.xlu1 %797 }
 0x315   :  { %2772 = vmatprep.mubr.bf16.mxu0 %v12559_v50  ;;  %12616 = vst [vmem:[#allocation21_spill] sm:$0xff] %v10372_v38  ;;  %12617 = vst [vmem:[#allocation22_spill] sm:$0xff] %v10380_v24 }
 0x318   :  { %v10375_v22 = vpop.permute.xlu0 %666  ;;  %v661_v5 = vpop.permute.xlu1 %660 }
 0x31c   :  { %2773 = vmatmul.mubr.bf16.gmra.mrb[24].mxu0 %v2163_v63  ;;  %v10378_v51 = vpop.permute.xlu0 %574  ;;  %v569_v54 = vpop.permute.xlu1 %568  ;;  %v732_v63 = vsel %vm730_vm6, %v9617_v48, %v10030_v2 }
 0x31d   :  { %2782 = vmatprep.mubr.bf16.mxu0 %v12559_v50  ;;  %v741_v60 = vsel %vm12370_vm4, %v732_v63, %v10041_v26  ;;  %v12624_v63 = vld [vmem:[#allocation18_spill] sm:$0xff] }
 0x320   :  { %v10382_v20 = vpop.permute.xlu0 %698  ;;  %v693_v41 = vpop.permute.xlu1 %692 }
 0x324   :  { %2783 = vmatmul.mubr.bf16.gmra.mrb[28].mxu0 %v2166_v45  ;;  %v10384_v40 = vpop.permute.xlu0 %668  ;;  %v601_v31 = vpop.permute.xlu1 %600 }
 0x328   :  { %v603_v25 = vpop.permute.xlu1 %602 }
 0x32c   :  { %v10401_v10 = vpop.permute.xlu1 %807 }
 0x32d   :  { %12619 = vst [vmem:[#allocation30_spill] sm:$0xff] %v10401_v10 }
 0x330   :  { %v665_v33 = vpop.permute.xlu1 %664 }
 0x332   :  { %v625_v15 = vpop.permute.xlu0 %624 }
 0x333   :  { %v749_v45 = vsel %vm748_vm9, %v740_v37, %v625_v15 }
 0x334   :  { %v758_v58 = vsel %vm757_vm7, %v749_v45, %v657_v47  ;;  %v573_v11 = vpop.permute.xlu1 %572  ;;  %v742_v47 = vsel %vm12370_vm4, %v733_v27, %v597_v8  ;;  %v12620_v8 = vld [vmem:[#allocation20_spill] sm:$0xff]  ;;  %v12623_v45 = vld [vmem:[#allocation25_spill] sm:$0xff] }
 0x335   :  { %v767_v39 = vsel %vm766_vm8, %v758_v58, %v689_v7  ;;  %v238_v58 = vmul.f32 1.7320508, %v12623_v45 }
 0x336   :  { %v10395_v4 = vmul.f32 %v10059_v28, %v767_v39  ;;  %v736_v39 = vsel %vm730_vm6, %v727_v0, %v10336_v29 }
 0x338   :  { %7526 = vmatprep.mubr.msk.f32.mxu1 %vm2982_vm10, %v10395_v4  ;;  %7568 = vmatprep.mubr.msk.f32.mxu0 %vm2982_vm10, %v10395_v4  ;;  %v697_v43 = vpop.permute.xlu1 %696 }
 0x33c   :  { %v605_v9 = vpop.permute.xlu1 %604 }
 0x35a   :  { %v627_v21 = vpop.permute.xlu0 %626 }
 0x35b   :  { %v750_v52 = vsel %vm748_vm9, %v741_v60, %v627_v21  ;;  %v254_v60 = vmul.f32 1.7320508, %v12624_v63 }
 0x35c   :  { %v759_v18 = vsel %vm757_vm7, %v750_v52, %v10091_v13  ;;  %v745_v52 = vsel %vm12370_vm4, %v736_v39, %v603_v25 }
 0x35d   :  { %v768_v36 = vsel %vm766_vm8, %v759_v18, %v10120_v57  ;;  %v743_v57 = vsel %vm12370_vm4, %v734_v35, %v599_v62  ;;  %v735_v62 = vsel %vm730_vm6, %v12620_v8, %v569_v54  ;;  %v12626_v35 = vld [vmem:[#allocation26_spill] sm:$0xff] }
 0x35e   :  { %v10417_v48 = vmul.f32 %v10023_v32, %v768_v36  ;;  %v629_v2 = vpop.permute.xlu0 %628  ;;  %v744_v3 = vsel %vm12370_vm4, %v735_v62, %v601_v31 }
 0x35f   :  { %v751_v26 = vsel %vm748_vm9, %v742_v47, %v629_v2  ;;  %v12625_v2 = vld [vmem:[#allocation23_spill] sm:$0xff] }
 0x360   :  { %v760_v19 = vsel %vm757_vm7, %v751_v26, %v661_v5  ;;  %7527 = vmatmul.mubr.msk.f32.vlgmr.msra.gmra.mrb[32].mxu1 %vm2982_vm10, %v10417_v48  ;;  %7569 = vmatmul.mubr.msk.f32.vlgmr.msra.gmra.mrb[32].mxu0 %vm2982_vm10, %v10417_v48 }
 0x361   :  { %v769_v13 = vsel %vm766_vm8, %v760_v19, %v693_v41  ;;  %7539 = vmatpush3.msk.msra.mxu1 %vm3116_vm2, %v12371_v16  ;;  %v607_v41 = vpop.permute.xlu1 %606 }
 0x362   :  { %v10437_v6 = vmul.f32 %v10026_v44, %v769_v13  ;;  %v631_v7 = vpop.permute.xlu0 %630  ;;  %7552 = vmatprep.subr.msk.mxu1 %vm3230_vm14, %v12371_v16  ;;  %v738_v13 = vsel %vm730_vm6, %v12626_v35, %v10378_v51 }
 0x363   :  { %v752_v30 = vsel %vm748_vm9, %v743_v57, %v631_v7 }
 0x364   :  { %v761_v17 = vsel %vm757_vm7, %v752_v30, %v10167_v12  ;;  %7529 = vmatprep.mubr.msk.f32.mxu1 %vm2982_vm10, %v10437_v6  ;;  %7571 = vmatprep.mubr.msk.f32.mxu0 %vm2982_vm10, %v10437_v6  ;;  %v12622_v12 = vld [vmem:[#allocation31_spill] sm:$0xff] }
 0x365   :  { %v770_v5 = vsel %vm766_vm8, %v761_v17, %v10368_v49  ;;  %v719_v49 = vsel %vm712_vm15, %v238_v58, %v246_v56  ;;  %v671_v25 = vpop.permute.xlu1 %670  ;;  %vm8212_vm15 = vmmov 0  }
 0x366   :  { %v818_v37 = vmul.f32 %v12622_v12, %v770_v5  ;;  %v633_v15 = vpop.permute.xlu0 %632  ;;  %v728_v27 = vsel %vm721_vm0, %v719_v49, %v254_v60  ;;  %vm3540_vm0 = vcmask 1041408  }
 0x367   :  { %v753_v53 = vsel %vm748_vm9, %v744_v3, %v633_v15 }
 0x368   :  { %v762_v54 = vsel %vm757_vm7, %v753_v53, %v665_v33  ;;  %7530 = vmatmul.mubr.msk.f32.gmra.mrb[34].mxu1 %vm2982_vm10, %v818_v37  ;;  %7572 = vmatmul.mubr.msk.f32.gmra.mrb[34].mxu0 %vm2982_vm10, %v818_v37 }
 0x369   :  { %v771_v31 = vsel %vm766_vm8, %v762_v54, %v697_v43  ;;  %v737_v43 = vsel %vm730_vm6, %v728_v27, %v573_v11  ;;  %v747_v11 = vsel %vm12370_vm4, %v738_v13, %v607_v41 }
 0x36a   :  { %v819_v21 = vmul.f32 %v10380_v24, %v771_v31  ;;  %v635_v29 = vpop.permute.xlu0 %634  ;;  %v746_v47 = vsel %vm12370_vm4, %v737_v43, %v605_v9 }
 0x36b   :  { %v754_v18 = vsel %vm748_vm9, %v745_v52, %v635_v29 }
 0x36c   :  { %v763_v33 = vsel %vm757_vm7, %v754_v18, %v10375_v22  ;;  %7532 = vmatprep.mubr.msk.f32.mxu1 %vm2982_vm10, %v819_v21  ;;  %7574 = vmatprep.mubr.msk.f32.mxu0 %vm2982_vm10, %v819_v21 }
 0x36d   :  { %v772_v36 = vsel %vm766_vm8, %v763_v33, %v10382_v20 }
 0x36e   :  { %v820_v26 = vmul.f32 %v12625_v2, %v772_v36  ;;  %v637_v19 = vpop.permute.xlu0 %636 }
 0x36f   :  { %v755_v22 = vsel %vm748_vm9, %v746_v47, %v637_v19 }
 0x370   :  { %7533 = vmatmul.mubr.msk.f32.gmra.mrb[36].mxu1 %vm2982_vm10, %v820_v26  ;;  %7575 = vmatmul.mubr.msk.f32.gmra.mrb[36].mxu0 %vm2982_vm10, %v820_v26  ;;  %v764_v57 = vsel %vm757_vm7, %v755_v22, %v10384_v40  ;;  %v3542_v40 = vsel %vm3540_vm0, %v3536_v14, 0 }
 0x371   :  { %7606 = vmatprep.mubr.msk.bf16.mxu0 %vm8212_vm15, %v12373_v59 }
 0x372   :  { %v639_v20 = vpop.permute.xlu1 %638  ;;  %v701_v9 = vpop.permute.xlu0 %700 }
 0x373   :  { %v756_v7 = vsel %vm748_vm9, %v747_v11, %v639_v20  ;;  %v773_v51 = vsel %vm766_vm8, %v764_v57, %v701_v9 }
 0x374   :  { %v821_v30 = vmul.f32 %v10401_v10, %v773_v51  ;;  %v765_v61 = vsel %vm757_vm7, %v756_v7, %v671_v25 }
 0x376   :  { %7535 = vmatprep.mubr.msk.f32.mxu1 %vm2982_vm10, %v821_v30 }
 0x378   :  { %v703_v17 = vpop.permute.xlu1 %702 }
 0x379   :  { %v774_v56 = vsel %vm766_vm8, %v765_v61, %v703_v17 }
 0x37a   :  { %v822_v8 = vmul.f32 %v10372_v38, %v774_v56 }
 0x37c   :  { %7536 = vmatmul.mubr.msk.f32.gmra.mrb[38].mxu1 %vm2982_vm10, %v822_v8 }
 0x37d   :  { %7540 = vmatprep.mubr.msk.f32.mxu1 %vm2982_vm10, %v10395_v4 }
 0x380   :  { %7541 = vmatmul.mubr.msk.f32.vlgmr.msra.gmra.mrb[40].mxu1 %vm2982_vm10, %v10417_v48 }
 0x381   :  { %7543 = vmatprep.mubr.msk.f32.mxu1 %vm2982_vm10, %v10437_v6  ;;  %7553 = vmatpush3.msk.msra.mxu1 %vm3230_vm14, %v12371_v16 }
 0x382   :  { %7768 = vmatprep.subr.msk.mxu1 %vm10269_vm11, %v12371_v16 }
 0x384   :  { %7544 = vmatmul.mubr.msk.f32.gmra.mrb[42].mxu1 %vm2982_vm10, %v818_v37 }
 0x385   :  { %7546 = vmatprep.mubr.msk.f32.mxu1 %vm2982_vm10, %v819_v21  ;;  %v10538_v42 = vpop.permute.xlu0 %3531 }
 0x386   :  { %12627 = vst [vmem:[#allocation32_spill] sm:$0xff] %v10538_v42  ;;  %v3534_v1 = vmul.f32 %v10538_v42, %v10310_v55 }
 0x388   :  { %7547 = vmatmul.mubr.msk.f32.gmra.mrb[44].mxu1 %vm2982_vm10, %v820_v26 }
 0x389   :  { %7549 = vmatprep.mubr.msk.f32.mxu1 %vm2982_vm10, %v821_v30 }
 0x38c   :  { %7550 = vmatmul.mubr.msk.f32.gmra.mrb[46].mxu1 %vm2982_vm10, %v822_v8 }
 0x38d   :  { %7554 = vmatprep.mubr.msk.f32.mxu1 %vm2982_vm10, %v10395_v4  ;;  %v3535_v4 = vpack.c.bf16 %v3534_v1, %v3534_v1 }
 0x390   :  { %7555 = vmatmul.mubr.msk.f32.vlgmr.msra.gmra.mrb[48].mxu1 %vm2982_vm10, %v10417_v48 }
 0x391   :  { %7557 = vmatprep.mubr.msk.f32.mxu1 %vm2982_vm10, %v10437_v6  ;;  %7769 = vmatpush3.msk.msra.mxu1 %vm10269_vm11, %v12371_v16 }
 0x392   :  { %7580 = vmatprep.subr.bf16.mxu1 %v12373_v59 }
 0x394   :  { %7558 = vmatmul.mubr.msk.f32.gmra.mrb[50].mxu1 %vm2982_vm10, %v818_v37 }
 0x395   :  { %7560 = vmatprep.mubr.msk.f32.mxu1 %vm2982_vm10, %v819_v21 }
 0x398   :  { %7561 = vmatmul.mubr.msk.f32.gmra.mrb[52].mxu1 %vm2982_vm10, %v820_v26 }
 0x399   :  { %7563 = vmatprep.mubr.msk.f32.mxu1 %vm2982_vm10, %v821_v30 }
 0x39c   :  { %7564 = vmatmul.mubr.msk.f32.gmra.mrb[54].mxu1 %vm2982_vm10, %v822_v8 }
 0x39d   :  { %7577 = vmatprep.mubr.msk.f32.mxu1 %vm2982_vm10, %v821_v30 }
 0x3a0   :  { %7578 = vmatmul.mubr.msk.f32.vlgmr.msra.gmra.mrb[56].mxu1 %vm2982_vm10, %v822_v8 }
 0x3a1   :  { %7581 = vmatpush3.bf16.msra.mxu1 %v3542_v40  ;;  %7582 = vmatprep.mubr.msk.bf16.mxu1 %vm8212_vm15, %v12373_v59 }
 0x3a4   :  { %7583 = vmatmul.mubr.msk.bf16.vlgmr.msra.gmra.mrb[60].mxu1 %vm12370_vm4, %v3535_v4 }
 0x3a8   :  { %v7333_v48 = vpop.f32.mrb[8].mxu1 }
 0x3a9   :  { %v7334_v6 = vpop.f32.mrb[9].mxu1 }
 0x3aa   :  { %v7335_v62 = vadd.f32 %v7334_v6, %v7333_v48  ;;  %v7336_v5 = vpop.f32.mrb[10].mxu1 }
 0x3ab   :  { %v7337_v3 = vpop.f32.mrb[11].mxu1 }
 0x3ac   :  { %v7338_v34 = vadd.f32 %v7337_v3, %v7336_v5 }
 0x3b0   :  { %v7339_v55 = vpop.f32.mrb[12].mxu1 }
 0x3b1   :  { %v7340_v0 = vpop.f32.mrb[13].mxu1 }
 0x3b2   :  { %v7341_v37 = vadd.f32 %v7340_v0, %v7339_v55  ;;  %v7342_v15 = vpop.f32.mrb[14].mxu1  ;;  %v12647_v55 = vld [vmem:[#allocation17_spill] sm:$0xff] }
 0x3b3   :  { %v7343_v45 = vpop.f32.mrb[15].mxu1  ;;  %v2941_v0 = vmul.u32 8, %v12647_v55 }
 0x3b4   :  { %v7344_v58 = vadd.f32 %v7343_v45, %v7342_v15  ;;  %v10603_v15 = vadd.s32 8, %v10173_v46  ;;  %v10606_v45 = vadd.s32 16, %v10173_v46 }
 0x3b5   :  { %vm2942_vm12 = vcmp.lt.s32.totalorder %v10173_v46, %v2941_v0 }
 0x3b6   :  { %vm2943_vm2 = vcmp.lt.s32.totalorder %v10603_v15, %v2941_v0  ;;  %vm2944_vm5 = vcmp.lt.s32.totalorder %v10606_v45, %v2941_v0 }
 0x3c2   :  { %v7345_v39 = vpop.f32.mrb[16].mxu1 }
 0x3c3   :  { %v7346_v53 = vpop.f32.mrb[17].mxu1 }
 0x3c4   :  { %v7347_v41 = vadd.f32 %v7346_v53, %v7345_v39  ;;  %v7348_v54 = vpop.f32.mrb[18].mxu1 }
 0x3c5   :  { %v7349_v49 = vpop.f32.mrb[19].mxu1 }
 0x3c6   :  { %v7350_v31 = vadd.f32 %v7349_v49, %v7348_v54  ;;  %v10633_v54 = vadd.s32 32, %v10173_v46 }
 0x3d7   :  { %v7351_v63 = vpop.f32.mrb[20].mxu1 }
 0x3d8   :  { %v7352_v60 = vpop.f32.mrb[21].mxu1 }
 0x3d9   :  { %v7353_v21 = vadd.f32 %v7352_v60, %v7351_v63  ;;  %v7354_v52 = vpop.f32.mrb[22].mxu1  ;;  %v7967_v60 = vld [vmem:[%s12311_s8] sm:$0xff]  }
 0x3da   :  { %v7355_v29 = vpop.f32.mrb[23].mxu1  ;;  %7601 = vmatpush3.bf16.msra.mxu0 %v7967_v60 }
 0x3db   :  { %v7356_v18 = vadd.f32 %v7355_v29, %v7354_v52  ;;  %v2931_v52 = vadd.s32 56, %v10173_v46  ;;  %v7968_v29 = vld [vmem:[%s12311_s8 + $0x8] sm:$0xff]  }
 0x3df   :  { %v10552_v27 = vpop.f32.mrb[16].mxu0  ;;  %v7518_v33 = vpop.f32.mrb[24].mxu1 }
 0x3e0   :  { %12628 = vst [vmem:[#allocation6_spill] sm:$0xff] %v10552_v27  ;;  %v10554_v43 = vadd.f32 %v7518_v33, %v7341_v37  ;;  %v10556_v36 = vpop.f32.mrb[17].mxu0  ;;  %v2892_v47 = vpop.f32.mrb[25].mxu1 }
 0x3e1   :  { %12630 = vst [vmem:[#allocation7_spill] sm:$0xff] %v10556_v36  ;;  %v10558_v25 = vadd.f32 %v7335_v62, %v2892_v47  ;;  %v10560_v26 = vpop.f32.mrb[18].mxu0  ;;  %v7519_v19 = vpop.f32.mrb[26].mxu1 }
 0x3e2   :  { %12629 = vst [vmem:[#allocation8_spill] sm:$0xff] %v10554_v43  ;;  %12632 = vst [vmem:[#allocation12_spill] sm:$0xff] %v10560_v26  ;;  %v10562_v35 = vadd.f32 %v7519_v19, %v7344_v58  ;;  %v10564_v13 = vpop.f32.mrb[19].mxu0  ;;  %v2895_v22 = vpop.f32.mrb[27].mxu1  ;;  %v10611_v58 = vadd.s32 24, %v10173_v46 }
 0x3e3   :  { %12631 = vst [vmem:[#allocation10_spill] sm:$0xff] %v10558_v25  ;;  %12634 = vst [vmem:[#allocation9_spill] sm:$0xff] %v10564_v13  ;;  %v10566_v20 = vadd.f32 %v7338_v34, %v2895_v22  ;;  %v2932_v34 = vmul.u32 8, %v12596_v23 }
 0x3e4   :  { %12633 = vst [vmem:[#allocation14_spill] sm:$0xff] %v10562_v35  ;;  %vm2945_vm9 = vcmp.lt.s32.totalorder %v10611_v58, %v2941_v0 }
 0x3e5   :  { %12635 = vst [vmem:[#allocation11_spill] sm:$0xff] %v10566_v20  ;;  %vm2933_vm11 = vcmp.ge.s32.totalorder %v10173_v46, %v2932_v34  ;;  %vm2934_vm1 = vcmp.ge.s32.totalorder %v10603_v15, %v2932_v34  ;;  %vm2935_vm3 = vcmp.ge.s32.totalorder %v10606_v45, %v2932_v34  ;;  %vm2936_vm6 = vcmp.ge.s32.totalorder %v10611_v58, %v2932_v34 }
 0x3e6   :  { %vm2950_vm13 = vmand %vm2933_vm11, %vm2942_vm12  ;;  %vm2937_vm11 = vcmp.ge.s32.totalorder %v10633_v54, %v2932_v34  ;;  %vm2946_vm12 = vcmp.lt.s32.totalorder %v10633_v54, %v2941_v0 }
 0x3e7   :  { %v10568_v11 = vpop.f32.mrb[20].mxu0  ;;  %v7522_v57 = vpop.f32.mrb[28].mxu1  ;;  %v10618_v39 = vsel %vm2950_vm13, 1.0, %v12373_v59  ;;  %vm10620_vm14 = vmand %vm2934_vm1, %vm2943_vm2 }
 0x3e8   :  { %v10570_v9 = vadd.f32 %v7522_v57, %v7353_v21  ;;  %v10572_v7 = vpop.f32.mrb[21].mxu0  ;;  %v2908_v51 = vpop.f32.mrb[29].mxu1  ;;  %12649 = vst [vmem:[#allocation34_spill] sm:$0xff] %v10618_v39  ;;  %7588 = vmatprep.mubr.msk.f32.mxu1 %vm2982_vm10, %v10618_v39  ;;  %vm10628_vm7 = vmand %vm2935_vm3, %vm2944_vm5  ;;  %v2930_v21 = vadd.s32 48, %v10173_v46 }
 0x3e9   :  { %12637 = vst [vmem:[#allocation15_spill] sm:$0xff] %v10572_v7  ;;  %v10574_v30 = vadd.f32 %v7347_v41, %v2908_v51  ;;  %v10576_v61 = vpop.f32.mrb[22].mxu0  ;;  %v7523_v17 = vpop.f32.mrb[30].mxu1  ;;  %vm10635_vm8 = vmand %vm2936_vm6, %vm2945_vm9 }
 0x3ea   :  { %12636 = vst [vmem:[#allocation13_spill] sm:$0xff] %v10570_v9  ;;  %12639 = vst [vmem:[#allocation19_spill] sm:$0xff] %v10576_v61  ;;  %v10578_v56 = vadd.f32 %v7523_v17, %v7356_v18  ;;  %v10580_v8 = vpop.f32.mrb[23].mxu0  ;;  %v2911_v14 = vpop.f32.mrb[31].mxu1  ;;  %vm2939_vm5 = vcmp.ge.s32.totalorder %v2930_v21, %v2932_v34  ;;  %vm2948_vm6 = vcmp.lt.s32.totalorder %v2930_v21, %v2941_v0 }
 0x3eb   :  { %12638 = vst [vmem:[#allocation16_spill] sm:$0xff] %v10574_v30  ;;  %12641 = vst [vmem:[#allocation20_spill] sm:$0xff] %v10580_v8  ;;  %v10582_v1 = vadd.f32 %v7350_v31, %v2911_v14  ;;  %v2929_v31 = vadd.s32 40, %v10173_v46  ;;  %v7969_v18 = vld [vmem:[%s12311_s8 + $0x10] ss:$0 sps:$4 sm:$0x33]  }
 0x3ec   :  { %12640 = vst [vmem:[#allocation5_spill] sm:$0xff] %v10578_v56  ;;  %vm10642_vm13 = vmand %vm2937_vm11, %vm2946_vm12  ;;  %vm2940_vm11 = vcmp.ge.s32.totalorder %v2931_v52, %v2932_v34  ;;  %vm2949_vm12 = vcmp.lt.s32.totalorder %v2931_v52, %v2941_v0  ;;  %s8214_s8 = smov 36  }
 0x3ed   :  { %12642 = vst [vmem:[#allocation24_spill] sm:$0xff] %v10582_v1  ;;  %vm2938_vm1 = vcmp.ge.s32.totalorder %v2929_v31, %v2932_v34  ;;  %vm2947_vm2 = vcmp.lt.s32.totalorder %v2929_v31, %v2941_v0  ;;  %vm10652_vm9 = vmand %vm2939_vm5, %vm2948_vm6  ;;  %vm12424_vm5 = vcmask 293888   ;;  %vm3515_vm6 = vcmp.eq.s32.totalorder %v12596_v23, %v10173_v46 }
 0x3ee   :  { %vm10646_vm3 = vmand %vm2938_vm1, %vm2947_vm2 }
 0x3ef   :  { %v10584_v40 = vpop.f32.mrb[24].mxu0  ;;  %vm10656_vm4 = vmand %vm2940_vm11, %vm2949_vm12  ;;  %vm3518_vm11 = vcmp.eq.s32.totalorder %v12596_v23, %v10606_v45  ;;  %vm3522_vm12 = vcmp.eq.s32.totalorder %v12596_v23, %v10611_v58 }
 0x3f0   :  { %v10586_v4 = vpop.f32.mrb[25].mxu0 }
 0x3f1   :  { %12643 = vst [vmem:[#allocation25_spill] sm:$0xff] %v10586_v4  ;;  %v10588_v48 = vpop.f32.mrb[26].mxu0 }
 0x3f2   :  { %12644 = vst [vmem:[#allocation18_spill] sm:$0xff] %v10588_v48  ;;  %v10590_v6 = vpop.f32.mrb[27].mxu0 }
 0x3f3   :  { %12645 = vst [vmem:[#allocation26_spill] sm:$0xff] %v10590_v6 }
 0x3f7   :  { %v10592_v62 = vpop.f32.mrb[28].mxu0 }
 0x3f8   :  { %v10594_v5 = vpop.f32.mrb[29].mxu0 }
 0x3f9   :  { %12646 = vst [vmem:[#allocation33_spill] sm:$0xff] %v10594_v5  ;;  %v10596_v3 = vpop.f32.mrb[30].mxu0 }
 0x3fa   :  { %v10600_v37 = vpop.f32.mrb[31].mxu0 }
 0x3fb   :  { %12648 = vst [vmem:[#allocation17_spill] sm:$0xff] %v10600_v37 }
 0x433   :  { %v7528_v33 = vpop.f32.mrb[32].mxu1  ;;  %v10660_v47 = vpop.f32.mrb[32].mxu0 }
 0x434   :  { %v10662_v19 = vpop.f32.mrb[33].mxu0  ;;  %3739 = vrot.lane.b32.xlu1 %v7528_v33, %s8207_s20  ;;  %v3073_v22 = vpop.f32.mrb[33].mxu1 }
 0x438   :  { %3737 = vrot.lane.b32.xlu1 %v3073_v22, %s8207_s20 }
 0x43b   :  { %v7531_v57 = vpop.f32.mrb[34].mxu1  ;;  %v10666_v51 = vpop.f32.mrb[34].mxu0 }
 0x43c   :  { %v10668_v17 = vpop.f32.mrb[35].mxu0  ;;  %3743 = vrot.lane.b32.xlu1 %v7531_v57, %s8207_s20  ;;  %v3083_v14 = vpop.f32.mrb[35].mxu1 }
 0x43d   :  { %3741 = vrot.lane.b32.xlu0 %v3083_v14, %s8207_s20 }
 0x443   :  { %v7534_v34 = vpop.f32.mrb[36].mxu1  ;;  %v10672_v55 = vpop.f32.mrb[36].mxu0 }
 0x444   :  { %v10674_v0 = vpop.f32.mrb[37].mxu0  ;;  %3747 = vrot.lane.b32.xlu1 %v7534_v34, %s8207_s20  ;;  %v3093_v31 = vpop.f32.mrb[37].mxu1 }
 0x445   :  { %12664 = vst [vmem:[#allocation35_spill] sm:$0xff] %v10674_v0  ;;  %3745 = vrot.lane.b32.xlu0 %v3093_v31, %s8207_s20 }
 0x44f   :  { %v7537_v21 = vpop.f32.mrb[38].mxu1 }
 0x450   :  { %3751 = vrot.lane.b32.xlu1 %v7537_v21, %s8207_s20  ;;  %v3103_v52 = vpop.f32.mrb[39].mxu1 }
 0x451   :  { %3749 = vrot.lane.b32.xlu0 %v3103_v52, %s8207_s20 }
 0x453   :  { %v10680_v33 = vpop.f32.mrb[40].mxu1 }
 0x454   :  { %v10682_v22 = vpop.f32.mrb[41].mxu1 }
 0x457   :  { %v10684_v57 = vpop.f32.mrb[42].mxu1 }
 0x458   :  { %v10686_v14 = vpop.f32.mrb[43].mxu1 }
 0x45b   :  { %v10688_v16 = vpop.f32.mrb[44].mxu1 }
 0x45c   :  { %v10690_v34 = vpop.f32.mrb[45].mxu1 }
 0x45f   :  { %v10692_v59 = vpop.f32.mrb[46].mxu1 }
 0x460   :  { %12665 = vst [vmem:[#allocation36_spill] sm:$0xff] %v10692_v59  ;;  %v10694_v31 = vpop.f32.mrb[47].mxu1 }
 0x461   :  { %12666 = vst [vmem:[#allocation37_spill] sm:$0xff] %v10694_v31 }
 0x463   :  { %v7556_v21 = vpop.f32.mrb[48].mxu1 }
 0x464   :  { %3779 = vrot.lane.b32.xlu1 %v7556_v21, %s8213_s5  ;;  %v3299_v52 = vpop.f32.mrb[49].mxu1  ;;  %v12669_v21 = vmov 0.0  }
 0x465   :  { %3777 = vrot.lane.b32.xlu0 %v3299_v52, %s8213_s5  ;;  %v10727_v53 = vsel %vm10642_vm13, 1.0, %v12669_v21  ;;  %v10736_v41 = vsel %vm10646_vm3, 1.0, %v12669_v21  ;;  %v10741_v49 = vsel %vm10652_vm9, 1.0, %v12669_v21  ;;  %v10750_v63 = vsel %vm10656_vm4, 1.0, %v12669_v21  ;;  %7602 = vmatprep.subr.bf16.mxu0 %v12669_v21 }
 0x466   :  { %12673 = vst [vmem:[#allocation43_spill] sm:$0xff] %v10727_v53  ;;  %12674 = vst [vmem:[#allocation44_spill] sm:$0xff] %v10736_v41  ;;  %7603 = vmatpush3.bf16.msra.mxu0 %v7968_v29  ;;  %v3860_v52 = vsel %vm3540_vm0, %v7969_v18, 0  ;;  %vm12677_vm4 = vcmask 31744   ;;  %vm3817_vm0 = vcmask 130048   ;;  %vm3516_vm9 = vcmp.eq.s32.totalorder %v12596_v23, %v10603_v15 }
 0x467   :  { %v7559_v9 = vpop.f32.mrb[50].mxu1  ;;  %12675 = vst [vmem:[#allocation45_spill] sm:$0xff] %v10741_v49  ;;  %12676 = vst [vmem:[#allocation46_spill] sm:$0xff] %v10750_v63  ;;  %7604 = vmatprep.subr.bf16.mxu0 %v12669_v21 }
 0x468   :  { %3783 = vrot.lane.b32.xlu1 %v7559_v9, %s8213_s5  ;;  %v3309_v1 = vpop.f32.mrb[51].mxu1  ;;  %v10705_v9 = vsel %vm10620_vm14, 1.0, %v12669_v21  ;;  %vm12678_vm14 = vmmov %vm12677_vm4 }
 0x469   :  { %3781 = vrot.lane.b32.xlu0 %v3309_v1, %s8213_s5  ;;  %12670 = vst [vmem:[#allocation40_spill] sm:$0xff] %v10705_v9  ;;  %vm12681_vm13 = vmmov %vm12677_vm4 }
 0x46a   :  { %7605 = vmatpush3.bf16.msra.mxu0 %v3860_v52  ;;  %vm12682_vm1 = vmmov %vm12677_vm4 }
 0x46b   :  { %v7562_v30 = vpop.f32.mrb[52].mxu1  ;;  %7610 = vmatprep.subr.mxu0 %v12669_v21  ;;  %vm12683_vm2 = vmmov %vm12682_vm1 }
 0x46c   :  { %3787 = vrot.lane.b32.xlu1 %v7562_v30, %s8213_s5  ;;  %v3319_v56 = vpop.f32.mrb[53].mxu1  ;;  %vm12684_vm3 = vmmov %vm12682_vm1 }
 0x46d   :  { %3785 = vrot.lane.b32.xlu0 %v3319_v56, %s8213_s5  ;;  %v10722_v56 = vsel %vm10635_vm8, 1.0, %v12669_v21  ;;  %vm12680_vm8 = vmmov %vm12677_vm4 }
 0x46e   :  { %12672 = vst [vmem:[#allocation42_spill] sm:$0xff] %v10722_v56 }
 0x46f   :  { %v7565_v35 = vpop.f32.mrb[54].mxu1 }
 0x470   :  { %3791 = vrot.lane.b32.xlu1 %v7565_v35, %s8213_s5  ;;  %v3329_v43 = vpop.f32.mrb[55].mxu1  ;;  %v10711_v35 = vsel %vm10628_vm7, 1.0, %v12669_v21  ;;  %vm12679_vm7 = vmmov %vm12677_vm4 }
 0x471   :  { %3789 = vrot.lane.b32.xlu0 %v3329_v43, %s8213_s5  ;;  %12671 = vst [vmem:[#allocation41_spill] sm:$0xff] %v10711_v35 }
 0x473   :  { %v10696_v20 = vpop.f32.mrb[56].mxu1 }
 0x474   :  { %12667 = vst [vmem:[#allocation38_spill] sm:$0xff] %v10696_v20  ;;  %v10698_v25 = vpop.f32.mrb[57].mxu1 }
 0x475   :  { %12668 = vst [vmem:[#allocation39_spill] sm:$0xff] %v10698_v25 }
 0x477   :  { %v10700_v5 = vpop.f32.mrb[60].mxu1 }
 0x478   :  { %v7584_v1 = vpop.f32.mrb[61].mxu1  ;;  %7586 = vmatprep.subr.mxu1 %v10700_v5 }
 0x479   :  { %v3581_v43 = vpop.f32.mrb[62].mxu1  ;;  %7587 = vmatpush3.msra.mxu1 %v10700_v5 }
 0x47a   :  { %v7585_v30 = vpop.f32.mrb[63].mxu1  ;;  %7589 = vmatmul.mubr.msk.f32.vlgmr.msra.gmra.mrb[58].mxu1 %vm2982_vm10, %v10705_v9  ;;  %7615 = vmatprep.subr.mxu1 %v12669_v21 }
 0x47b   :  { %7591 = vmatprep.mubr.msk.f32.mxu1 %vm2982_vm10, %v10711_v35 }
 0x47e   :  { %7592 = vmatmul.mubr.msk.f32.gmra.mrb[64].mxu1 %vm2982_vm10, %v10722_v56 }
 0x47f   :  { %7594 = vmatprep.mubr.msk.f32.mxu1 %vm2982_vm10, %v10727_v53 }
 0x482   :  { %7595 = vmatmul.mubr.msk.f32.gmra.mrb[66].mxu1 %vm2982_vm10, %v10736_v41 }
 0x483   :  { %7597 = vmatprep.mubr.msk.f32.mxu1 %vm2982_vm10, %v10741_v49 }
 0x486   :  { %7598 = vmatmul.mubr.msk.f32.gmra.mrb[68].mxu1 %vm2982_vm10, %v10750_v63 }
 0x487   :  { %7617 = vmatprep.mubr.msk.f32.mxu1 %vm8212_vm15, %v12669_v21 }
 0x4a6   :  { %v3740_v1 = vpop.permute.xlu1 %3739 }
 0x4aa   :  { %v3738_v43 = vpop.permute.xlu1 %3737 }
 0x4ae   :  { %v3744_v30 = vpop.permute.xlu1 %3743 }
 0x4af   :  { %v3742_v60 = vpop.permute.xlu0 %3741 }
 0x4b6   :  { %v3748_v4 = vpop.permute.xlu1 %3747 }
 0x4b7   :  { %v3746_v6 = vpop.permute.xlu0 %3745 }
 0x4c2   :  { %v3752_v7 = vpop.permute.xlu1 %3751 }
 0x4c3   :  { %v3750_v8 = vpop.permute.xlu0 %3749 }
 0x4d6   :  { %v3780_v36 = vpop.permute.xlu1 %3779 }
 0x4d7   :  { %v3778_v13 = vpop.permute.xlu0 %3777 }
 0x4da   :  { %v3784_v18 = vpop.permute.xlu1 %3783 }
 0x4db   :  { %v3782_v53 = vpop.permute.xlu0 %3781 }
 0x4df   :  { %v3786_v0 = vpop.permute.xlu0 %3785 }
 0x54d   :  { %v7590_v37 = vpop.f32.mrb[58].mxu1 }
 0x54e   :  { %v3714_v29 = vmul.f32 %v7590_v37, %v10560_v26  ;;  %v3674_v63 = vpop.f32.mrb[59].mxu1 }
 0x54f   :  { %v3713_v49 = vmul.f32 %v3674_v63, %v10552_v27 }
 0x550   :  { %v3722_v52 = vmul.f32 %v3714_v29, %v10023_v32  ;;  %v3762_v41 = vmul.f32 %v3740_v1, %v3714_v29  ;;  %v3802_v20 = vmul.f32 %v3780_v36, %v3714_v29  ;;  %v3788_v32 = vpop.permute.xlu1 %3787 }
 0x551   :  { %v3721_v56 = vmul.f32 %v3713_v49, %v10059_v28  ;;  %v3761_v35 = vmul.f32 %v3738_v43, %v3713_v49  ;;  %v7593_v9 = vpop.f32.mrb[64].mxu1  ;;  %v3801_v26 = vmul.f32 %v3778_v13, %v3713_v49 }
 0x552   :  { %v3716_v39 = vmul.f32 %v7593_v9, %v10576_v61  ;;  %v3684_v25 = vpop.f32.mrb[65].mxu1  ;;  %v3810_v37 = vsel %vm12677_vm4, %v3722_v52, %v3762_v41  ;;  %vm3517_vm4 = vmor %vm3515_vm6, %vm3516_vm9  ;;  %vm3450_vm6 = vcmp.eq.s32.totalorder %v10173_v46, %v12596_v23  ;;  %v3460_v46 = vadd.s32 16, %v12596_v23 }
 0x553   :  { %v3715_v31 = vmul.f32 %v3684_v25, %v10568_v11  ;;  %v3809_v63 = vsel %vm12678_vm14, %v3721_v56, %v3761_v35  ;;  %v3819_v9 = vsel %vm3817_vm0, %v3810_v37, %v3802_v20  ;;  %vm10816_vm14 = vmor %vm3517_vm4, %vm3518_vm11  ;;  %vm3452_vm4 = vcmp.eq.s32.totalorder %v10606_v45, %v12596_v23 }
 0x554   :  { %v3724_v1 = vmul.f32 %v3716_v39, %v12622_v12  ;;  %v3764_v59 = vmul.f32 %v3744_v30, %v3716_v39  ;;  %v3818_v13 = vsel %vm3817_vm0, %v3809_v63, %v3801_v26  ;;  %v3804_v29 = vmul.f32 %v3784_v18, %v3716_v39  ;;  %v3792_v39 = vpop.permute.xlu1 %3791 }
 0x555   :  { %v7596_v27 = vpop.f32.mrb[66].mxu1  ;;  %v3723_v36 = vmul.f32 %v3715_v31, %v10026_v44  ;;  %v3763_v25 = vmul.f32 %v3742_v60, %v3715_v31  ;;  %v3803_v20 = vmul.f32 %v3782_v53, %v3715_v31  ;;  %v3790_v53 = vpop.permute.xlu0 %3789 }
 0x556   :  { %v3718_v43 = vmul.f32 %v7596_v27, %v10588_v48  ;;  %v3694_v28 = vpop.f32.mrb[67].mxu1  ;;  %v3812_v61 = vsel %vm12679_vm7, %v3724_v1, %v3764_v59  ;;  %vm3523_vm7 = vmor %vm10816_vm14, %vm3522_vm12 }
 0x557   :  { %v3717_v41 = vmul.f32 %v3694_v28, %v10584_v40  ;;  %v3811_v26 = vsel %vm12681_vm13, %v3723_v36, %v3763_v25  ;;  %vm4148_vm13 = vcmask 1043456  }
 0x558   :  { %v3726_v35 = vmul.f32 %v3718_v43, %v12625_v2  ;;  %v3766_v56 = vmul.f32 %v3748_v4, %v3718_v43  ;;  %v3806_v49 = vmul.f32 %v3788_v32, %v3718_v43 }
 0x559   :  { %v3725_v30 = vmul.f32 %v3717_v41, %v10380_v24  ;;  %v3765_v52 = vmul.f32 %v3746_v6, %v3717_v41  ;;  %v3805_v27 = vmul.f32 %v3786_v0, %v3717_v41  ;;  %v7599_v48 = vpop.f32.mrb[68].mxu1  ;;  %v3821_v41 = vsel %vm3817_vm0, %v3812_v61, %v3804_v29 }
 0x55a   :  { %v3814_v37 = vsel %vm12680_vm8, %v3726_v35, %v3766_v56  ;;  %v3720_v60 = vmul.f32 %v7599_v48, %v10596_v3  ;;  %v3704_v28 = vpop.f32.mrb[69].mxu1  ;;  %v3820_v56 = vsel %vm3817_vm0, %v3811_v26, %v3803_v20  ;;  %v12687_v26 = vmov 1.0  }
 0x55b   :  { %v3823_v63 = vsel %vm3817_vm0, %v3814_v37, %v3806_v49  ;;  %v3813_v32 = vsel %vm12682_vm1, %v3725_v30, %v3765_v52  ;;  %v3719_v4 = vmul.f32 %v3704_v28, %v10592_v62  ;;  %vm12426_vm1 = vcmask 261120  }
 0x55c   :  { %v3827_v6 = vadd.f32 %v3823_v63, %v3819_v9  ;;  %v3822_v0 = vsel %vm3817_vm0, %v3813_v32, %v3805_v27  ;;  %v3728_v59 = vmul.f32 %v3720_v60, %v10372_v38  ;;  %v3768_v31 = vmul.f32 %v3752_v7, %v3720_v60 }
 0x55d   :  { %v3826_v18 = vadd.f32 %v3822_v0, %v3818_v13  ;;  %v3808_v1 = vmul.f32 %v3792_v39, %v3720_v60  ;;  %v3727_v48 = vmul.f32 %v3719_v4, %v10401_v10  ;;  %v3767_v43 = vmul.f32 %v3750_v8, %v3719_v4 }
 0x55e   :  { %v3816_v36 = vsel %vm12683_vm2, %v3728_v59, %v3768_v31  ;;  %v3807_v25 = vmul.f32 %v3790_v53, %v3719_v4  ;;  %vm12425_vm2 = vcmask 588800  }
 0x55f   :  { %v3825_v35 = vsel %vm3817_vm0, %v3816_v36, %v3808_v1  ;;  %v3815_v9 = vsel %vm12684_vm3, %v3727_v48, %v3767_v43  ;;  %v7970_v36 = vld [vmem:[%s12309_s6] ss:$8 sps:$4 sm:$0xff]   ;;  %vm3451_vm3 = vcmp.eq.s32.totalorder %v10603_v15, %v12596_v23 }
 0x560   :  { %v3829_v49 = vadd.f32 %v3825_v35, %v3821_v41  ;;  %v3824_v7 = vsel %vm3817_vm0, %v3815_v9, %v3807_v25  ;;  %vm3524_vm0 = vcmp.eq.s32.totalorder %v12596_v23, %v10633_v54  ;;  %v7972_v25 = vld [vmem:[%s12309_s6 + $0x4] ss:$8 sps:$4 sm:$0xff]   ;;  %v7975_v41 = vld [vmem:[%s12309_s6 + $0x14] ss:$8 sps:$4 sm:$0xff]   ;;  %v7973_v35 = vld [vmem:[%s12309_s6 + $0x10] ss:$8 sps:$4 sm:$0xff]  }
 0x561   :  { %v3828_v30 = vadd.f32 %v3824_v7, %v3820_v56  ;;  %vm3525_vm8 = vmor %vm3523_vm7, %vm3524_vm0  ;;  %v7978_v9 = vld [vmem:[%s12309_s6 + $0x24] ss:$8 sps:$4 sm:$0xff]   ;;  %v7976_v56 = vld [vmem:[%s12309_s6 + $0x20] ss:$8 sps:$4 sm:$0xff]   ;;  %vm3473_vm7 = vcmp.eq.s32.totalorder %v10611_v58, %v12596_v23 }
 0x562   :  { %v3831_v13 = vadd.f32 %v3829_v49, %v3827_v6  ;;  %v10826_v63 = vsel %vm3525_vm8, 1.0, %v12669_v21  ;;  %v7981_v49 = vld [vmem:[%s12309_s6 + $0x34] ss:$8 sps:$4 sm:$0xff]   ;;  %v7979_v7 = vld [vmem:[%s12309_s6 + $0x30] ss:$8 sps:$4 sm:$0xff]  }
 0x563   :  { %v3830_v52 = vadd.f32 %v3828_v30, %v3826_v18  ;;  %12688 = vst [vmem:[#allocation47_spill] sm:$0xff] %v10826_v63  ;;  %7616 = vmatpush3.msra.mxu1 %v10826_v63  ;;  %v4098_v30 = vld [vmem:[%s12309_s6 + $0x40] sm:$0xff]  ;;  %s8220_s6 = smov 32  }
 0x565   :  { %v3832_v27 = vadd.f32 %v3831_v13, %v3830_v52  ;;  %v7218_v13 = vcombine.high %v4098_v30, %v4098_v30  ;;  %v7217_v52 = vcombine.low %v4098_v30, %v4098_v30  ;;  %v12702_v30 = vld [vmem:[#allocation46_spill] sm:$0xff] }
 0x567   :  { %v3833_v8 = vmul.f32 %v3832_v27, %v10538_v42  ;;  %v4150_v27 = vsel %vm4148_vm13, %v7217_v52, 0  ;;  %v12703_v52 = vmov 0 }
 0x569   :  { %v3834_v37 = vpack.c.bf16 %v3833_v8, %v3833_v8 }
 0x56b   :  { %7607 = vmatmul.mubr.msk.bf16.vlgmr.msra.gmra.mrb[40].mxu0 %vm12424_vm5, %v3834_v37 }
 0x56c   :  { %7612 = vmatprep.mubr.msk.f32.mxu0 %vm8212_vm15, %v12669_v21  ;;  %7611 = vmatpush3.msk.msra.mxu0 %vm10816_vm14, %v12687_v26 }
 0x56d   :  { %4155 = vmatprep.subr.bf16.mxu0 %v7972_v25  ;;  %v12695_v25 = vld [vmem:[#allocation34_spill] sm:$0xff] }
 0x63e   :  { %v3896_v61 = vpop.f32.mrb[40].mxu0 }
 0x63f   :  { %3903 = vrot.lane.b32.xlu0 %v3896_v61, %s8214_s8  ;;  %v7608_v29 = vpop.f32.mrb[41].mxu0 }
 0x640   :  { %v3899_v20 = vpop.f32.mrb[42].mxu0 }
 0x641   :  { %v7609_v60 = vpop.f32.mrb[43].mxu0  ;;  %v12689_v20 = vld [vmem:[#allocation35_spill] sm:$0xff] }
 0x642   :  { %v12690_v60 = vld [vmem:[#allocation36_spill] sm:$0xff] }
 0x6b1   :  { %v3904_v32 = vpop.permute.xlu0 %3903 }
 0x6b2   :  { %v3906_v4 = vadd.f32 %v3904_v32, %v10700_v5  ;;  %v12691_v32 = vld [vmem:[#allocation37_spill] sm:$0xff] }
 0x6b4   :  { %v7205_v39 = vmul.f32 -1.442695, %v3906_v4 }
 0x6b6   :  { %8152 = vpow2.f32 %v7205_v39  ;;  %v12693_v39 = vld [vmem:[#allocation39_spill] sm:$0xff] }
 0x6c0   :  { %v8153_v6 = vpop.eup %8152 }
 0x6c1   :  { %v3910_v0 = vadd.f32 1.0, %v8153_v6 }
 0x6c3   :  { %8154 = vrcp.f32 %v3910_v0 }
 0x6cd   :  { %v8155_v59 = vpop.eup %8154 }
 0x6ce   :  { %3988 = vrot.lane.b32.xlu0 %v8155_v59, %s8215_s21  ;;  %3914 = vrot.lane.b32.xlu1 %v8155_v59, %s8216_s22  ;;  %v4062_v43 = vmul.f32 %v8155_v59, %v3906_v4 }
 0x740   :  { %v3989_v31 = vpop.permute.xlu0 %3988  ;;  %v3915_v53 = vpop.permute.xlu1 %3914 }
 0x741   :  { %7613 = vmatmul.mubr.msk.f32.vlgmr.msra.gmra.mrb[38].mxu0 %vm2982_vm10, %v3915_v53  ;;  %7618 = vmatmul.mubr.msk.f32.vlgmr.msra.gmra.mrb[70].mxu1 %vm2982_vm10, %v3989_v31 }
 0x742   :  { %4187 = vmatprep.mubr.bf16.mxu0 %v12559_v50  ;;  %4260 = vmatprep.mubr.f32.mxu1 %v12669_v21 }
 0x743   :  { %4156 = vmatpush1.bf16.msra.mxu0 %v7970_v36 }
 0x744   :  { %4157 = vmatprep.subr.bf16.mxu0 %v7975_v41  ;;  %v12696_v41 = vld [vmem:[#allocation40_spill] sm:$0xff] }
 0x747   :  { %4158 = vmatpush1.bf16.msra.mxu0 %v7973_v35  ;;  %v12697_v35 = vld [vmem:[#allocation41_spill] sm:$0xff] }
 0x748   :  { %4159 = vmatprep.subr.bf16.mxu0 %v7978_v9  ;;  %v12698_v9 = vld [vmem:[#allocation42_spill] sm:$0xff] }
 0x74b   :  { %4160 = vmatpush1.bf16.msra.mxu0 %v7976_v56  ;;  %v12699_v56 = vld [vmem:[#allocation43_spill] sm:$0xff] }
 0x74c   :  { %4161 = vmatprep.subr.bf16.mxu0 %v7981_v49  ;;  %v12700_v49 = vld [vmem:[#allocation44_spill] sm:$0xff] }
 0x74f   :  { %4162 = vmatpush1.bf16.msra.mxu0 %v7979_v7  ;;  %v12701_v7 = vld [vmem:[#allocation45_spill] sm:$0xff] }
 0x750   :  { %7219 = vmatprep.subr.msk.bf16.mxu0 %vm4148_vm13, %v7218_v13  ;;  %v3453_v13 = vadd.s32 8, %v12596_v23 }
 0x752   :  { %vm3455_vm9 = vcmp.eq.s32.totalorder %v10603_v15, %v3453_v13  ;;  %vm3456_vm0 = vcmp.eq.s32.totalorder %v10606_v45, %v3453_v13  ;;  %v3483_v15 = vadd.s32 24, %v12596_v23 }
 0x753   :  { %4164 = vmatpush1.bf16.msra.mxu0 %v4150_v27  ;;  %vm3458_vm11 = vmor %vm3451_vm3, %vm3455_vm9  ;;  %v12427_v27 = vmov 1.0|1.0   ;;  %vm3475_vm3 = vcmp.eq.s32.totalorder %v10611_v58, %v3453_v13 }
 0x754   :  { %vm10936_vm12 = vmpackc.low %vm3458_vm11, %vm3450_vm6  ;;  %vm3463_vm6 = vcmp.eq.s32.totalorder %v10606_v45, %v3460_v46  ;;  %vm3479_vm11 = vcmp.eq.s32.totalorder %v10611_v58, %v3460_v46  ;;  %v12710_v45 = vmov 0 }
 0x755   :  { %v12704_v52 = vsel %vm10936_vm12, 4294967295, %v12703_v52  ;;  %7745 = vmatprep.subr.msk.bf16.mxu0 %vm10936_vm12, %v12427_v27  ;;  %vm3459_vm8 = vmor %vm3452_vm4, %vm3456_vm0 }
 0x756   :  { %12705 = vst [vmem:[#allocation36_spill] sm:$0xff] %v12704_v52  ;;  %vm3477_vm9 = vmor %vm3473_vm7, %vm3475_vm3  ;;  %vm3480_vm7 = vcmp.eq.s32.totalorder %v10633_v54, %v3460_v46  ;;  %vm3488_vm3 = vcmp.eq.s32.totalorder %v10633_v54, %v3483_v15 }
 0x757   :  { %vm10964_vm5 = vmor %vm3459_vm8, %vm3463_vm6 }
 0x814   :  { %v3984_v5 = vpop.f32.mrb[38].mxu0  ;;  %v4058_v18 = vpop.f32.mrb[70].mxu1 }
 0x815   :  { %4069 = vrot.lane.b32.xlu0 %v4058_v18, %s8216_s22  ;;  %v7619_v1 = vpop.f32.mrb[71].mxu1  ;;  %4064 = vrot.lane.b32.xlu1 %v3984_v5, %s8217_s26  ;;  %v7614_v48 = vpop.f32.mrb[39].mxu0  ;;  %s8223_s22 = smov 96  }
 0x819   :  { %4074 = vrot.lane.b32.xlu1 %v4062_v43, %s8218_s23 }
 0x887   :  { %v4070_v8 = vpop.permute.xlu0 %4069  ;;  %v4065_v37 = vpop.permute.xlu1 %4064 }
 0x888   :  { %v4072_v61 = vmul.f32 %v4070_v8, %v3906_v4  ;;  %v4067_v29 = vmul.f32 %v4065_v37, %v3906_v4  ;;  %v12692_v4 = vld [vmem:[#allocation38_spill] sm:$0xff]  ;;  %v12707_v37 = vmov 0 }
 0x889   :  { %v12708_v37 = vsel %vm10964_vm5, 4294967295, %v12707_v37 }
 0x88a   :  { %4082 = vrot.lane.b32.xlu1 %v4072_v61, %s8215_s21  ;;  %4078 = vrot.lane.b32.xlu0 %v4067_v29, %s8215_s21  ;;  %12709 = vst [vmem:[#allocation38_spill] sm:$0xff] %v12708_v37  ;;  %v3494_v29 = vadd.s32 32, %v12596_v23 }
 0x88b   :  { %v4075_v6 = vpop.permute.xlu1 %4074 }
 0x88e   :  { %4319 = vrot.lane.b32.xlu1 %v10680_v33, %s8219_s18  ;;  %4317 = vrot.lane.b32.xlu0 %v10682_v22, %s8219_s18 }
 0x892   :  { %4359 = vrot.lane.b32.xlu1 %v10660_v47, %s8220_s6  ;;  %4357 = vrot.lane.b32.xlu0 %v10662_v19, %s8220_s6 }
 0x896   :  { %4323 = vrot.lane.b32.xlu1 %v10684_v57, %s8219_s18  ;;  %4321 = vrot.lane.b32.xlu0 %v10686_v14, %s8219_s18 }
 0x89a   :  { %4363 = vrot.lane.b32.xlu1 %v10666_v51, %s8220_s6  ;;  %4361 = vrot.lane.b32.xlu0 %v10668_v17, %s8220_s6 }
 0x89e   :  { %4327 = vrot.lane.b32.xlu1 %v10688_v16, %s8219_s18  ;;  %4325 = vrot.lane.b32.xlu0 %v10690_v34, %s8219_s18 }
 0x8a2   :  { %4367 = vrot.lane.b32.xlu1 %v10672_v55, %s8220_s6  ;;  %4365 = vrot.lane.b32.xlu0 %v12689_v20, %s8220_s6 }
 0x8a6   :  { %4331 = vrot.lane.b32.xlu1 %v12690_v60, %s8219_s18  ;;  %4329 = vrot.lane.b32.xlu0 %v12691_v32, %s8219_s18 }
 0x8aa   :  { %4371 = vrot.lane.b32.xlu1 %v12692_v4, %s8220_s6  ;;  %4369 = vrot.lane.b32.xlu0 %v12693_v39, %s8220_s6 }
 0x8fc   :  { %v4079_v0 = vpop.permute.xlu0 %4078  ;;  %v4083_v59 = vpop.permute.xlu1 %4082 }
 0x8fd   :  { %v4085_v31 = vsel %vm2982_vm10, %v4075_v6, %v4079_v0 }
 0x8fe   :  { %v4087_v53 = vsel %vm12426_vm1, %v4085_v31, %v4083_v59  ;;  %vm3481_vm1 = vmor %vm3477_vm9, %vm3479_vm11  ;;  %vm3499_vm11 = vcmp.eq.s32.totalorder %v10633_v54, %v3494_v29 }
 0x8ff   :  { %v4088_v5 = vmul.f32 %v4087_v53, %v10538_v42 }
 0x900   :  { %v10962_v8 = vpop.permute.xlu0 %4317  ;;  %v10982_v61 = vpop.permute.xlu1 %4319 }
 0x901   :  { %v4089_v18 = vpack.c.bf16 %v4088_v5, %v4088_v5  ;;  %12706 = vst [vmem:[#allocation37_spill] sm:$0xff] %v10962_v8  ;;  %12713 = vst [vmem:[#allocation48_spill] sm:$0xff] %v10982_v61 }
 0x903   :  { %7220 = vmatmul.mubr.msk.bf16.vlgmr.msra.gmra.mrb[44].mxu0 %vm12425_vm2, %v4089_v18  ;;  %vm3487_vm2 = vcmp.eq.s32.totalorder %v10611_v58, %v3483_v15 }
 0x904   :  { %7747 = vmatpush3.bf16.msk.msra.mxu0 %vm10936_vm12, %v12427_v27  ;;  %vm3492_vm4 = vmor %vm3481_vm1, %vm3487_vm2  ;;  %v10990_v58 = vpop.permute.xlu0 %4357  ;;  %vm3474_vm1 = vcmp.eq.s32.totalorder %v10633_v54, %v12596_v23  ;;  %vm3476_vm2 = vcmp.eq.s32.totalorder %v10633_v54, %v3453_v13  ;;  %v10998_v6 = vpop.permute.xlu1 %4359 }
 0x905   :  { %7624 = vmatprep.subr.msk.mxu0 %vm10964_vm5, %v12687_v26  ;;  %vm10977_vm0 = vmpackc.low %vm3492_vm4, %vm10964_vm5  ;;  %12714 = vst [vmem:[#allocation49_spill] sm:$0xff] %v10990_v58 }
 0x906   :  { %v12711_v45 = vsel %vm10977_vm0, 4294967295, %v12710_v45  ;;  %vm3478_vm8 = vmor %vm3474_vm1, %vm3476_vm2  ;;  %12715 = vst [vmem:[#allocation50_spill] sm:$0xff] %v10998_v6  ;;  %vm4413_vm1 = vcmask 195584   ;;  %vm4559_vm2 = vcmask 326656  }
 0x907   :  { %12712 = vst [vmem:[#allocation39_spill] sm:$0xff] %v12711_v45  ;;  %vm3482_vm6 = vmor %vm3478_vm8, %vm3480_vm7  ;;  %vm5354_vm7 = vcmask 424960   ;;  %vm12759_vm8 = vcmask 261120  }
 0x908   :  { %7625 = vmatpush3.msk.msra.mxu0 %vm10964_vm5, %v12687_v26  ;;  %vm3493_vm9 = vmor %vm3482_vm6, %vm3488_vm3  ;;  %v11001_v0 = vpop.permute.xlu0 %4321  ;;  %v11014_v5 = vpop.permute.xlu1 %4323 }
 0x909   :  { %7660 = vmatprep.subr.bf16.mxu0 %v12669_v21  ;;  %12716 = vst [vmem:[#allocation51_spill] sm:$0xff] %v11001_v0  ;;  %vm3504_vm4 = vmor %vm3493_vm9, %vm3499_vm11 }
 0x90a   :  { %v11004_v59 = vsel %vm3504_vm4, 1.0, %v12669_v21  ;;  %12718 = vst [vmem:[#allocation53_spill] sm:$0xff] %v11014_v5  ;;  %vm12760_vm3 = vmmov %vm12759_vm8 }
 0x90b   :  { %12717 = vst [vmem:[#allocation52_spill] sm:$0xff] %v11004_v59  ;;  %vm12761_vm6 = vmmov %vm12760_vm3 }
 0x90c   :  { %v11018_v54 = vpop.permute.xlu0 %4361  ;;  %v11030_v13 = vpop.permute.xlu1 %4363  ;;  %vm12762_vm9 = vmmov %vm12760_vm3 }
 0x90d   :  { %12719 = vst [vmem:[#allocation54_spill] sm:$0xff] %v11018_v54  ;;  %12720 = vst [vmem:[#allocation55_spill] sm:$0xff] %v11030_v13 }
 0x90e   :  { %vm12763_vm11 = vmmov %vm12760_vm3 }
 0x90f   :  { %vm12764_vm4 = vmmov %vm12760_vm3 }
 0x9d6   :  { %v4189_v1 = vpop.f32.mrb[44].mxu0 }
 0x9d7   :  { %v10904_v48 = vpop.f32.mrb[45].mxu0 }
 0x9d8   :  { %12694 = vst [vmem:[#allocation35_spill] sm:$0xff] %v10904_v48  ;;  %v4193_v43 = vpop.f32.mrb[46].mxu0  ;;  %4196 = vmatprep.subr.mxu1 %v10904_v48 }
 0x9d9   :  { %v4194_v36 = vpop.f32.mrb[47].mxu0  ;;  %4197 = vmatpush1.msra.mxu1 %v4189_v1 }
 0x9da   :  { %7221 = vmatmul.mubr.msk.f32.vlgmr.msra.gmra.mrb[72].mxu1 %vm2982_vm10, %v12695_v25  ;;  %7749 = vmatprep.subr.msk.bf16.mxu1 %vm10936_vm12, %v12427_v27 }
 0x9db   :  { %4266 = vmatprep.mubr.f32.mxu1 %v12669_v21  ;;  %7751 = vmatpush3.bf16.msk.msra.mxu1 %vm10936_vm12, %v12427_v27 }
 0x9dc   :  { %7753 = vmatprep.subr.msk.bf16.mxu1 %vm10977_vm0, %v12427_v27 }
 0x9de   :  { %7222 = vmatmul.mubr.msk.f32.gmra.mrb[74].mxu1 %vm2982_vm10, %v12696_v41 }
 0x9df   :  { %4272 = vmatprep.mubr.f32.mxu1 %v12669_v21  ;;  %7755 = vmatpush3.bf16.msk.msra.mxu1 %vm10977_vm0, %v12427_v27  ;;  %v11040_v27 = vpop.permute.xlu0 %4325 }
 0x9e0   :  { %7646 = vmatprep.subr.mxu1 %v11004_v59  ;;  %12721 = vst [vmem:[#allocation56_spill] sm:$0xff] %v11040_v27 }
 0x9e2   :  { %7223 = vmatmul.mubr.msk.f32.gmra.mrb[76].mxu1 %vm2982_vm10, %v12697_v35 }
 0x9e3   :  { %4278 = vmatprep.mubr.f32.mxu1 %v12669_v21  ;;  %7647 = vmatpush3.msra.mxu1 %v11004_v59  ;;  %v12750_v59 = vld [vmem:[#allocation17_spill] sm:$0xff] }
 0x9e4   :  { %7674 = vmatprep.subr.mxu1 %v12669_v21 }
 0x9e6   :  { %7224 = vmatmul.mubr.msk.f32.gmra.mrb[78].mxu1 %vm2982_vm10, %v12698_v9 }
 0x9e7   :  { %4284 = vmatprep.mubr.f32.mxu1 %v12669_v21 }
 0x9ea   :  { %7225 = vmatmul.mubr.msk.f32.gmra.mrb[80].mxu1 %vm2982_vm10, %v12699_v56 }
 0x9eb   :  { %4290 = vmatprep.mubr.f32.mxu1 %v12669_v21 }
 0x9ee   :  { %7226 = vmatmul.mubr.msk.f32.gmra.mrb[82].mxu1 %vm2982_vm10, %v12700_v49 }
 0x9ef   :  { %4296 = vmatprep.mubr.f32.mxu1 %v12669_v21 }
 0x9f2   :  { %7227 = vmatmul.mubr.msk.f32.gmra.mrb[84].mxu1 %vm2982_vm10, %v12701_v7 }
 0x9f3   :  { %4302 = vmatprep.mubr.f32.mxu1 %v12669_v21 }
 0x9f6   :  { %7228 = vmatmul.mubr.msk.f32.gmra.mrb[86].mxu1 %vm2982_vm10, %v12702_v30 }
 0xaad   :  { %v11006_v31 = vpop.f32.mrb[72].mxu1 }
 0xaae   :  { %v11009_v53 = vpop.f32.mrb[73].mxu1  ;;  %v4341_v23 = vmul.f32 %v10962_v8, %v11006_v31  ;;  %v4381_v43 = vmul.f32 %v10990_v58, %v11006_v31 }
 0xab0   :  { %4397 = vrot.lane.b32.xlu0 %v4341_v23, %s8222_s19 }
 0xab1   :  { %v11020_v18 = vpop.f32.mrb[74].mxu1 }
 0xab2   :  { %v11022_v1 = vpop.f32.mrb[75].mxu1  ;;  %v4342_v36 = vmul.f32 %v10982_v61, %v11020_v18  ;;  %v4382_v29 = vmul.f32 %v10998_v6, %v11020_v18  ;;  %v11052_v6 = vpop.permute.xlu1 %4327 }
 0xab3   :  { %12722 = vst [vmem:[#allocation57_spill] sm:$0xff] %v11052_v6 }
 0xab4   :  { %4543 = vrot.lane.b32.xlu0 %v4381_v43, %s8223_s22  ;;  %4399 = vrot.lane.b32.xlu1 %v4342_v36, %s8222_s19 }
 0xab5   :  { %v11032_v46 = vpop.f32.mrb[76].mxu1 }
 0xab6   :  { %v11034_v15 = vpop.f32.mrb[77].mxu1  ;;  %v4343_v23 = vmul.f32 %v11001_v0, %v11032_v46  ;;  %v4383_v61 = vmul.f32 %v11018_v54, %v11032_v46  ;;  %v11056_v0 = vpop.permute.xlu0 %4365 }
 0xab7   :  { %12723 = vst [vmem:[#allocation58_spill] sm:$0xff] %v11056_v0 }
 0xab8   :  { %4545 = vrot.lane.b32.xlu1 %v4382_v29, %s8223_s22  ;;  %4401 = vrot.lane.b32.xlu0 %v4343_v23, %s8222_s19 }
 0xab9   :  { %v11044_v43 = vpop.f32.mrb[78].mxu1 }
 0xaba   :  { %v11046_v36 = vpop.f32.mrb[79].mxu1  ;;  %v4344_v58 = vmul.f32 %v11014_v5, %v11044_v43  ;;  %v4384_v8 = vmul.f32 %v11030_v13, %v11044_v43  ;;  %v11068_v5 = vpop.permute.xlu1 %4367 }
 0xabb   :  { %12724 = vst [vmem:[#allocation59_spill] sm:$0xff] %v11068_v5  ;;  %v11078_v13 = vpop.permute.xlu0 %4329 }
 0xabc   :  { %4547 = vrot.lane.b32.xlu0 %v4383_v61, %s8223_s22  ;;  %4403 = vrot.lane.b32.xlu1 %v4344_v58, %s8222_s19  ;;  %12725 = vst [vmem:[#allocation60_spill] sm:$0xff] %v11078_v13 }
 0xabd   :  { %v11058_v29 = vpop.f32.mrb[80].mxu1 }
 0xabe   :  { %v11060_v23 = vpop.f32.mrb[81].mxu1  ;;  %v4345_v54 = vmul.f32 %v11040_v27, %v11058_v29  ;;  %v4385_v30 = vmul.f32 %v11056_v0, %v11058_v29  ;;  %v11090_v0 = vpop.permute.xlu1 %4331 }
 0xabf   :  { %12726 = vst [vmem:[#allocation61_spill] sm:$0xff] %v11090_v0 }
 0xac0   :  { %4549 = vrot.lane.b32.xlu1 %v4384_v8, %s8223_s22  ;;  %4405 = vrot.lane.b32.xlu0 %v4345_v54, %s8222_s19 }
 0xac1   :  { %v11070_v61 = vpop.f32.mrb[82].mxu1 }
 0xac2   :  { %v11072_v58 = vpop.f32.mrb[83].mxu1  ;;  %v4346_v7 = vmul.f32 %v11052_v6, %v11070_v61  ;;  %v4386_v27 = vmul.f32 %v11068_v5, %v11070_v61  ;;  %v11094_v6 = vpop.permute.xlu0 %4369 }
 0xac3   :  { %12727 = vst [vmem:[#allocation62_spill] sm:$0xff] %v11094_v6 }
 0xac4   :  { %4551 = vrot.lane.b32.xlu0 %v4385_v30, %s8223_s22  ;;  %4407 = vrot.lane.b32.xlu1 %v4346_v7, %s8222_s19 }
 0xac5   :  { %v11082_v8 = vpop.f32.mrb[84].mxu1 }
 0xac6   :  { %v11084_v54 = vpop.f32.mrb[85].mxu1  ;;  %v4347_v49 = vmul.f32 %v11078_v13, %v11082_v8  ;;  %v4387_v56 = vmul.f32 %v11094_v6, %v11082_v8  ;;  %v11106_v13 = vpop.permute.xlu1 %4371 }
 0xac7   :  { %12728 = vst [vmem:[#allocation63_spill] sm:$0xff] %v11106_v13 }
 0xac8   :  { %4553 = vrot.lane.b32.xlu1 %v4386_v27, %s8223_s22  ;;  %4409 = vrot.lane.b32.xlu0 %v4347_v49, %s8222_s19 }
 0xac9   :  { %v11096_v30 = vpop.f32.mrb[86].mxu1 }
 0xaca   :  { %v11098_v7 = vpop.f32.mrb[87].mxu1  ;;  %v4348_v5 = vmul.f32 %v11090_v0, %v11096_v30  ;;  %v4388_v49 = vmul.f32 %v11106_v13, %v11096_v30 }
 0xacc   :  { %4555 = vrot.lane.b32.xlu0 %v4387_v56, %s8223_s22  ;;  %4411 = vrot.lane.b32.xlu1 %v4348_v5, %s8222_s19 }
 0xad0   :  { %5033 = vrot.lane.b32.xlu0 %v10662_v19, %s8223_s22  ;;  %4557 = vrot.lane.b32.xlu1 %v4388_v49, %s8223_s22 }
 0xad4   :  { %5037 = vrot.lane.b32.xlu0 %v10668_v17, %s8223_s22  ;;  %5035 = vrot.lane.b32.xlu1 %v10660_v47, %s8223_s22  ;;  %v12729_v47 = vld [vmem:[#allocation29_spill] sm:$0xff]  ;;  %v12730_v17 = vld [vmem:[#allocation27_spill] sm:$0xff] }
 0xad5   :  { %v4681_v19 = vmul.f32 %v11006_v31, %v12729_v47 }
 0xad8   :  { %5041 = vrot.lane.b32.xlu0 %v12689_v20, %s8223_s22  ;;  %5039 = vrot.lane.b32.xlu1 %v10666_v51, %s8223_s22  ;;  %v4683_v51 = vmul.f32 %v11032_v46, %v10026_v44 }
 0xadc   :  { %5045 = vrot.lane.b32.xlu0 %v12693_v39, %s8223_s22  ;;  %5043 = vrot.lane.b32.xlu1 %v10672_v55, %s8223_s22  ;;  %v4682_v55 = vmul.f32 %v11020_v18, %v12730_v17 }
 0xae0   :  { %4889 = vrot.lane.b32.xlu0 %v10682_v22, %s8224_s3  ;;  %5047 = vrot.lane.b32.xlu1 %v12692_v4, %s8223_s22  ;;  %v4687_v22 = vmul.f32 %v11082_v8, %v10401_v10 }
 0xae4   :  { %4893 = vrot.lane.b32.xlu0 %v10686_v14, %s8224_s3  ;;  %4891 = vrot.lane.b32.xlu1 %v10680_v33, %s8224_s3  ;;  %v4684_v33 = vmul.f32 %v11044_v43, %v12622_v12 }
 0xae8   :  { %4897 = vrot.lane.b32.xlu0 %v10690_v34, %s8224_s3  ;;  %4895 = vrot.lane.b32.xlu1 %v10684_v57, %s8224_s3  ;;  %v4686_v57 = vmul.f32 %v11070_v61, %v12625_v2 }
 0xaec   :  { %4901 = vrot.lane.b32.xlu0 %v12691_v32, %s8224_s3  ;;  %4899 = vrot.lane.b32.xlu1 %v10688_v16, %s8224_s3  ;;  %v4685_v16 = vmul.f32 %v11058_v29, %v10380_v24 }
 0xaf0   :  { %4961 = vrot.lane.b32.xlu0 %v4681_v19, %s8215_s21  ;;  %4903 = vrot.lane.b32.xlu1 %v12690_v60, %s8224_s3 }
 0xaf4   :  { %4965 = vrot.lane.b32.xlu0 %v4683_v51, %s8215_s21  ;;  %4963 = vrot.lane.b32.xlu1 %v4682_v55, %s8215_s21 }
 0xaf8   :  { %4969 = vrot.lane.b32.xlu0 %v4685_v16, %s8215_s21  ;;  %4967 = vrot.lane.b32.xlu1 %v4684_v33, %s8215_s21 }
 0xafc   :  { %4973 = vrot.lane.b32.xlu0 %v4687_v22, %s8215_s21  ;;  %4971 = vrot.lane.b32.xlu1 %v4686_v57, %s8215_s21 }
 0xb00   :  { %5162 = vrot.lane.b32.xlu0 %v4681_v19, %s8225_s16  ;;  %5164 = vrot.lane.b32.xlu1 %v4682_v55, %s8225_s16 }
 0xb04   :  { %5166 = vrot.lane.b32.xlu0 %v4683_v51, %s8225_s16  ;;  %5168 = vrot.lane.b32.xlu1 %v4684_v33, %s8225_s16 }
 0xb08   :  { %5170 = vrot.lane.b32.xlu0 %v4685_v16, %s8225_s16  ;;  %5172 = vrot.lane.b32.xlu1 %v4686_v57, %s8225_s16 }
 0xb0c   :  { %5174 = vrot.lane.b32.xlu0 %v4687_v22, %s8225_s16  ;;  %4699 = vrot.lane.b32.xlu1 %v4682_v55, %s8214_s8 }
 0xb10   :  { %4697 = vrot.lane.b32.xlu0 %v4681_v19, %s8214_s8  ;;  %4703 = vrot.lane.b32.xlu1 %v4684_v33, %s8214_s8 }
 0xb14   :  { %4701 = vrot.lane.b32.xlu0 %v4683_v51, %s8214_s8  ;;  %4707 = vrot.lane.b32.xlu1 %v4686_v57, %s8214_s8 }
 0xb18   :  { %4705 = vrot.lane.b32.xlu0 %v4685_v16, %s8214_s8 }
 0xb1c   :  { %4709 = vrot.lane.b32.xlu0 %v4687_v22, %s8214_s8 }
 0xb22   :  { %v4398_v14 = vpop.permute.xlu0 %4397 }
 0xb23   :  { %7626 = vmatprep.mubr.msk.f32.mxu0 %vm4413_vm1, %v4398_v14 }
 0xb26   :  { %v4544_v34 = vpop.permute.xlu0 %4543  ;;  %v4400_v20 = vpop.permute.xlu1 %4399 }
 0xb27   :  { %7627 = vmatmul.mubr.msk.f32.vlgmr.msra.gmra.mrb[48].mxu0 %vm4413_vm1, %v4400_v20  ;;  %7648 = vmatprep.mubr.msk.f32.mxu1 %vm4559_vm2, %v4544_v34 }
 0xb2a   :  { %v4546_v60 = vpop.permute.xlu1 %4545  ;;  %v4402_v32 = vpop.permute.xlu0 %4401 }
 0xb2b   :  { %7629 = vmatprep.mubr.msk.f32.mxu0 %vm4413_vm1, %v4402_v32  ;;  %7649 = vmatmul.mubr.msk.f32.vlgmr.msra.gmra.mrb[88].mxu1 %vm4559_vm2, %v4546_v60 }
 0xb2c   :  { %7675 = vmatpush3.msk.msra.mxu1 %vm10816_vm14, %v12687_v26  ;;  %vm5121_vm14 = vcmask 97280  }
 0xb2e   :  { %v4548_v4 = vpop.permute.xlu0 %4547  ;;  %v4404_v39 = vpop.permute.xlu1 %4403 }
 0xb2f   :  { %7630 = vmatmul.mubr.msk.f32.gmra.mrb[50].mxu0 %vm4413_vm1, %v4404_v39  ;;  %7651 = vmatprep.mubr.msk.f32.mxu1 %vm4559_vm2, %v4548_v4 }
 0xb32   :  { %v4550_v56 = vpop.permute.xlu1 %4549  ;;  %v4406_v27 = vpop.permute.xlu0 %4405 }
 0xb33   :  { %7632 = vmatprep.mubr.msk.f32.mxu0 %vm4413_vm1, %v4406_v27  ;;  %7652 = vmatmul.mubr.msk.f32.gmra.mrb[90].mxu1 %vm4559_vm2, %v4550_v56 }
 0xb36   :  { %v4552_v5 = vpop.permute.xlu0 %4551  ;;  %v4408_v49 = vpop.permute.xlu1 %4407 }
 0xb37   :  { %7633 = vmatmul.mubr.msk.f32.gmra.mrb[52].mxu0 %vm4413_vm1, %v4408_v49  ;;  %7654 = vmatprep.mubr.msk.f32.mxu1 %vm4559_vm2, %v4552_v5 }
 0xb3a   :  { %v4554_v28 = vpop.permute.xlu1 %4553  ;;  %v4410_v19 = vpop.permute.xlu0 %4409 }
 0xb3b   :  { %7635 = vmatprep.mubr.msk.f32.mxu0 %vm4413_vm1, %v4410_v19  ;;  %7655 = vmatmul.mubr.msk.f32.gmra.mrb[92].mxu1 %vm4559_vm2, %v4554_v28 }
 0xb3e   :  { %v4556_v51 = vpop.permute.xlu0 %4555  ;;  %v4412_v55 = vpop.permute.xlu1 %4411 }
 0xb3f   :  { %7636 = vmatmul.mubr.msk.f32.gmra.mrb[54].mxu0 %vm4413_vm1, %v4412_v55  ;;  %7657 = vmatprep.mubr.msk.f32.mxu1 %vm4559_vm2, %v4556_v51 }
 0xb40   :  { %7670 = vmatprep.mubr.msk.bf16.mxu0 %vm8212_vm15, %v12669_v21 }
 0xb42   :  { %v11190_v16 = vpop.permute.xlu0 %5033  ;;  %v4558_v33 = vpop.permute.xlu1 %4557 }
 0xb43   :  { %12731 = vst [vmem:[#allocation64_spill] sm:$0xff] %v11190_v16  ;;  %7658 = vmatmul.mubr.msk.f32.gmra.mrb[94].mxu1 %vm4559_vm2, %v4558_v33  ;;  %v5057_v22 = vmul.f32 %v11190_v16, %v11006_v31  ;;  %v5058_v57 = vmul.f32 %v11190_v16, %v11009_v53 }
 0xb44   :  { %7676 = vmatprep.mubr.msk.f32.mxu1 %vm8212_vm15, %v12669_v21 }
 0xb45   :  { %5089 = vrot.lane.b32.xlu0 %v5057_v22, %s8226_s25  ;;  %5091 = vrot.lane.b32.xlu1 %v5058_v57, %s8226_s25 }
 0xb46   :  { %v11201_v14 = vpop.permute.xlu0 %5037  ;;  %v11203_v34 = vpop.permute.xlu1 %5035 }
 0xb47   :  { %12732 = vst [vmem:[#allocation65_spill] sm:$0xff] %v11201_v14  ;;  %12733 = vst [vmem:[#allocation66_spill] sm:$0xff] %v11203_v34  ;;  %v5060_v20 = vmul.f32 %v11203_v34, %v11022_v1  ;;  %v5059_v60 = vmul.f32 %v11203_v34, %v11020_v18  ;;  %v5062_v4 = vmul.f32 %v11201_v14, %v11034_v15 }
 0xb48   :  { %v5061_v39 = vmul.f32 %v11201_v14, %v11032_v46 }
 0xb49   :  { %5095 = vrot.lane.b32.xlu1 %v5060_v20, %s8226_s25  ;;  %5093 = vrot.lane.b32.xlu0 %v5059_v60, %s8226_s25 }
 0xb4a   :  { %v11211_v53 = vpop.permute.xlu0 %5041  ;;  %v11213_v32 = vpop.permute.xlu1 %5039 }
 0xb4b   :  { %12734 = vst [vmem:[#allocation67_spill] sm:$0xff] %v11211_v53  ;;  %12735 = vst [vmem:[#allocation68_spill] sm:$0xff] %v11213_v32  ;;  %v5064_v56 = vmul.f32 %v11213_v32, %v11046_v36  ;;  %v5063_v27 = vmul.f32 %v11213_v32, %v11044_v43  ;;  %v5066_v49 = vmul.f32 %v11211_v53, %v11060_v23 }
 0xb4c   :  { %v5065_v28 = vmul.f32 %v11211_v53, %v11058_v29 }
 0xb4d   :  { %5099 = vrot.lane.b32.xlu1 %v5062_v4, %s8226_s25  ;;  %5097 = vrot.lane.b32.xlu0 %v5061_v39, %s8226_s25 }
 0xb4e   :  { %v11221_v1 = vpop.permute.xlu1 %5043  ;;  %v11227_v5 = vpop.permute.xlu0 %5045 }
 0xb4f   :  { %12736 = vst [vmem:[#allocation69_spill] sm:$0xff] %v11221_v1  ;;  %12737 = vst [vmem:[#allocation70_spill] sm:$0xff] %v11227_v5  ;;  %v5068_v19 = vmul.f32 %v11221_v1, %v11072_v58  ;;  %v5067_v51 = vmul.f32 %v11221_v1, %v11070_v61  ;;  %v5070_v23 = vmul.f32 %v11227_v5, %v11084_v54 }
 0xb50   :  { %v5069_v33 = vmul.f32 %v11227_v5, %v11082_v8 }
 0xb51   :  { %5103 = vrot.lane.b32.xlu1 %v5064_v56, %s8226_s25  ;;  %5101 = vrot.lane.b32.xlu0 %v5063_v27, %s8226_s25  ;;  %v12746_v27 = vld [vmem:[#allocation6_spill] sm:$0xff] }
 0xb52   :  { %v11231_v15 = vpop.permute.xlu1 %5047  ;;  %v11239_v36 = vpop.permute.xlu0 %4889 }
 0xb53   :  { %12738 = vst [vmem:[#allocation71_spill] sm:$0xff] %v11231_v15  ;;  %12739 = vst [vmem:[#allocation72_spill] sm:$0xff] %v11239_v36  ;;  %v4913_v57 = vmul.f32 %v11239_v36, %v11006_v31 }
 0xb55   :  { %5107 = vrot.lane.b32.xlu1 %v5066_v49, %s8226_s25  ;;  %5105 = vrot.lane.b32.xlu0 %v5065_v28, %s8226_s25 }
 0xb56   :  { %v11245_v55 = vpop.permute.xlu1 %4891  ;;  %v11253_v22 = vpop.permute.xlu0 %4893 }
 0xb57   :  { %12740 = vst [vmem:[#allocation73_spill] sm:$0xff] %v11245_v55  ;;  %12741 = vst [vmem:[#allocation74_spill] sm:$0xff] %v11253_v22  ;;  %v4914_v20 = vmul.f32 %v11245_v55, %v11020_v18  ;;  %v4915_v60 = vmul.f32 %v11253_v22, %v11032_v46 }
 0xb59   :  { %5111 = vrot.lane.b32.xlu1 %v5068_v19, %s8226_s25  ;;  %5109 = vrot.lane.b32.xlu0 %v5067_v51, %s8226_s25 }
 0xb5a   :  { %v11257_v58 = vpop.permute.xlu1 %4895  ;;  %v11265_v54 = vpop.permute.xlu0 %4897 }
 0xb5b   :  { %12742 = vst [vmem:[#allocation75_spill] sm:$0xff] %v11257_v58  ;;  %12743 = vst [vmem:[#allocation76_spill] sm:$0xff] %v11265_v54  ;;  %v4916_v4 = vmul.f32 %v11257_v58, %v11044_v43  ;;  %v4917_v31 = vmul.f32 %v11265_v54, %v11058_v29  ;;  %v4688_v43 = vmul.f32 %v11096_v30, %v10372_v38 }
 0xb5d   :  { %5115 = vrot.lane.b32.xlu1 %v5070_v23, %s8226_s25  ;;  %5113 = vrot.lane.b32.xlu0 %v5069_v33, %s8226_s25  ;;  %v5072_v33 = vmul.f32 %v11231_v15, %v11098_v7 }
 0xb5e   :  { %v11271_v39 = vpop.permute.xlu1 %4899  ;;  %v11279_v56 = vpop.permute.xlu0 %4901 }
 0xb5f   :  { %12744 = vst [vmem:[#allocation77_spill] sm:$0xff] %v11271_v39  ;;  %v4918_v18 = vmul.f32 %v11271_v39, %v11070_v61  ;;  %12745 = vst [vmem:[#allocation78_spill] sm:$0xff] %v11279_v56  ;;  %v4919_v46 = vmul.f32 %v11279_v56, %v11082_v8  ;;  %v5071_v61 = vmul.f32 %v11231_v15, %v11096_v30 }
 0xb61   :  { %4929 = vrot.lane.b32.xlu0 %v4913_v57, %s8225_s16  ;;  %4931 = vrot.lane.b32.xlu1 %v4914_v20, %s8225_s16  ;;  %v12748_v20 = vld [vmem:[#allocation12_spill] sm:$0xff] }
 0xb62   :  { %v4962_v29 = vpop.permute.xlu0 %4961  ;;  %v11294_v28 = vpop.permute.xlu1 %4903 }
 0xb63   :  { %v4985_v49 = vmul.f32 %v4962_v29, %v12746_v27  ;;  %12747 = vst [vmem:[#allocation6_spill] sm:$0xff] %v11294_v28  ;;  %v4920_v19 = vmul.f32 %v11294_v28, %v11096_v30  ;;  %v12749_v30 = vld [vmem:[#allocation19_spill] sm:$0xff] }
 0xb65   :  { %4933 = vrot.lane.b32.xlu0 %v4915_v60, %s8225_s16  ;;  %4935 = vrot.lane.b32.xlu1 %v4916_v4, %s8225_s16 }
 0xb66   :  { %v4966_v8 = vpop.permute.xlu0 %4965  ;;  %v4964_v23 = vpop.permute.xlu1 %4963 }
 0xb67   :  { %v4987_v51 = vmul.f32 %v4966_v8, %v10568_v11  ;;  %v4986_v60 = vmul.f32 %v4964_v23, %v12748_v20 }
 0xb69   :  { %4937 = vrot.lane.b32.xlu0 %v4917_v31, %s8225_s16  ;;  %4939 = vrot.lane.b32.xlu1 %v4918_v18, %s8225_s16 }
 0xb6a   :  { %v11305_v57 = vpop.permute.xlu0 %4969  ;;  %v4968_v4 = vpop.permute.xlu1 %4967 }
 0xb6b   :  { %v4988_v31 = vmul.f32 %v4968_v4, %v12749_v30 }
 0xb6d   :  { %4941 = vrot.lane.b32.xlu0 %v4919_v46, %s8225_s16  ;;  %4975 = vrot.lane.b32.xlu1 %v4688_v43, %s8215_s21 }
 0xb6e   :  { %v11311_v18 = vpop.permute.xlu0 %4973 }
 0xb71   :  { %5117 = vrot.lane.b32.xlu0 %v5071_v61, %s8226_s25  ;;  %5176 = vrot.lane.b32.xlu1 %v4688_v43, %s8225_s16 }
 0xb72   :  { %v11314_v46 = vpop.permute.xlu0 %5162 }
 0xb75   :  { %5001 = vrot.lane.b32.xlu0 %v4985_v49, %s8227_s17  ;;  %4711 = vrot.lane.b32.xlu1 %v4688_v43, %s8214_s8  ;;  %v11316_v43 = vpop.permute.xlu1 %4971 }
 0xb76   :  { %v11318_v7 = vpop.permute.xlu0 %5166 }
 0xb79   :  { %5005 = vrot.lane.b32.xlu0 %v4987_v51, %s8227_s17  ;;  %4943 = vrot.lane.b32.xlu1 %v4920_v19, %s8225_s16  ;;  %v11320_v29 = vpop.permute.xlu1 %5164 }
 0xb7a   :  { %v11322_v61 = vpop.permute.xlu0 %5170 }
 0xb7d   :  { %5119 = vrot.lane.b32.xlu1 %v5072_v33, %s8226_s25  ;;  %v11324_v49 = vpop.permute.xlu1 %5168 }
 0xb7e   :  { %v11326_v8 = vpop.permute.xlu0 %5174 }
 0xb81   :  { %5003 = vrot.lane.b32.xlu1 %v4986_v60, %s8227_s17  ;;  %v11328_v19 = vpop.permute.xlu1 %5172 }
 0xb82   :  { %v11330_v51 = vpop.permute.xlu0 %4697 }
 0xb85   :  { %5007 = vrot.lane.b32.xlu1 %v4988_v31, %s8227_s17  ;;  %v11332_v23 = vpop.permute.xlu1 %4699 }
 0xb86   :  { %v11334_v33 = vpop.permute.xlu0 %4701 }
 0xb89   :  { %v11336_v60 = vpop.permute.xlu1 %4703 }
 0xb8a   :  { %v11338_v4 = vpop.permute.xlu0 %4705 }
 0xb8d   :  { %v11340_v31 = vpop.permute.xlu1 %4707 }
 0xb8e   :  { %v11342_v28 = vpop.permute.xlu0 %4709 }
 0xbb7   :  { %v11344_v15 = vpop.permute.xlu0 %5089  ;;  %v11346_v38 = vpop.permute.xlu1 %5091 }
 0xbbb   :  { %v11348_v5 = vpop.permute.xlu0 %5093  ;;  %v11350_v1 = vpop.permute.xlu1 %5095 }
 0xbbf   :  { %v11352_v53 = vpop.permute.xlu0 %5097  ;;  %v11354_v32 = vpop.permute.xlu1 %5099 }
 0xbc3   :  { %v11356_v56 = vpop.permute.xlu0 %5101  ;;  %v11358_v14 = vpop.permute.xlu1 %5103 }
 0xbc7   :  { %v11360_v54 = vpop.permute.xlu0 %5105  ;;  %v11362_v34 = vpop.permute.xlu1 %5107 }
 0xbcb   :  { %v11364_v22 = vpop.permute.xlu0 %5109  ;;  %v11366_v16 = vpop.permute.xlu1 %5111 }
 0xbcf   :  { %v11368_v39 = vpop.permute.xlu1 %5115  ;;  %v11370_v36 = vpop.permute.xlu0 %5113 }
 0xbd3   :  { %v11372_v58 = vpop.permute.xlu1 %4931  ;;  %v11374_v55 = vpop.permute.xlu0 %4929 }
 0xbd7   :  { %v11376_v2 = vpop.permute.xlu1 %4935  ;;  %v11380_v12 = vpop.permute.xlu0 %4933 }
 0xbdb   :  { %v11378_v10 = vpop.permute.xlu1 %4939  ;;  %v11382_v17 = vpop.permute.xlu0 %4937 }
 0xbdf   :  { %v4976_v24 = vpop.permute.xlu1 %4975  ;;  %v11388_v47 = vpop.permute.xlu0 %4941 }
 0xbe3   :  { %v11384_v44 = vpop.permute.xlu1 %5176  ;;  %v11392_v6 = vpop.permute.xlu0 %5117 }
 0xbe7   :  { %v11386_v13 = vpop.permute.xlu1 %4711 }
 0xbeb   :  { %v11390_v0 = vpop.permute.xlu1 %4943 }
 0xbef   :  { %v5120_v9 = vpop.permute.xlu1 %5119 }
 0xbf0   :  { %v5129_v35 = vsel %vm5121_vm14, %v11392_v6, %v5120_v9 }
 0xbf1   :  { %v11397_v41 = vmul.f32 %v5129_v35, %v12750_v59 }
 0xbfa   :  { %v7628_v45 = vpop.f32.mrb[48].mxu0 }
 0xbfb   :  { %4739 = vrot.lane.b32.xlu1 %v7628_v45, %s8228_s15  ;;  %v4496_v25 = vpop.f32.mrb[49].mxu0 }
 0xbfc   :  { %4737 = vrot.lane.b32.xlu0 %v4496_v25, %s8228_s15 }
 0xbfe   :  { %v7650_v37 = vpop.f32.mrb[88].mxu1 }
 0xbff   :  { %v4642_v26 = vpop.f32.mrb[89].mxu1  ;;  %4819 = vrot.lane.b32.xlu1 %v7650_v37, %s8229_s27 }
 0xc00   :  { %4817 = vrot.lane.b32.xlu0 %v4642_v26, %s8229_s27 }
 0xc02   :  { %v7631_v52 = vpop.f32.mrb[50].mxu0 }
 0xc03   :  { %4743 = vrot.lane.b32.xlu1 %v7631_v52, %s8228_s15  ;;  %v4506_v50 = vpop.f32.mrb[51].mxu0 }
 0xc04   :  { %4741 = vrot.lane.b32.xlu0 %v4506_v50, %s8228_s15 }
 0xc06   :  { %v7653_v9 = vpop.f32.mrb[90].mxu1 }
 0xc07   :  { %v4652_v48 = vpop.f32.mrb[91].mxu1  ;;  %4823 = vrot.lane.b32.xlu1 %v7653_v9, %s8229_s27 }
 0xc08   :  { %4821 = vrot.lane.b32.xlu0 %v4652_v48, %s8229_s27  ;;  %v12751_v48 = vld [vmem:[#allocation18_spill] sm:$0xff] }
 0xc09   :  { %v4990_v9 = vmul.f32 %v11316_v43, %v12751_v48  ;;  %v12753_v43 = vld [vmem:[#allocation7_spill] sm:$0xff] }
 0xc0a   :  { %v7634_v35 = vpop.f32.mrb[52].mxu0 }
 0xc0b   :  { %4747 = vrot.lane.b32.xlu1 %v7634_v35, %s8228_s15  ;;  %v4516_v25 = vpop.f32.mrb[53].mxu0  ;;  %v4989_v35 = vmul.f32 %v11305_v57, %v10584_v40  ;;  %v12754_v57 = vld [vmem:[#allocation20_spill] sm:$0xff] }
 0xc0c   :  { %4745 = vrot.lane.b32.xlu0 %v4516_v25, %s8228_s15  ;;  %v4991_v25 = vmul.f32 %v11311_v18, %v10592_v62 }
 0xc0e   :  { %v7656_v45 = vpop.f32.mrb[92].mxu1 }
 0xc0f   :  { %v4662_v63 = vpop.f32.mrb[93].mxu1  ;;  %4827 = vrot.lane.b32.xlu1 %v7656_v45, %s8229_s27  ;;  %v12752_v45 = vld [vmem:[#allocation9_spill] sm:$0xff] }
 0xc10   :  { %4825 = vrot.lane.b32.xlu0 %v4662_v63, %s8229_s27  ;;  %v4992_v63 = vmul.f32 %v4976_v24, %v10596_v3  ;;  %v5189_v24 = vmul.f32 %v11324_v49, %v12754_v57  ;;  %v5193_v49 = vmul.f32 %v11384_v44, %v12750_v59 }
 0xc12   :  { %v7637_v26 = vpop.f32.mrb[54].mxu0 }
 0xc13   :  { %4751 = vrot.lane.b32.xlu1 %v7637_v26, %s8228_s15  ;;  %v4526_v52 = vpop.f32.mrb[55].mxu0  ;;  %v5187_v26 = vmul.f32 %v11320_v29, %v12752_v45 }
 0xc14   :  { %4749 = vrot.lane.b32.xlu0 %v4526_v52, %s8228_s15  ;;  %v5186_v52 = vmul.f32 %v11314_v46, %v12753_v43 }
 0xc16   :  { %v7659_v50 = vpop.f32.mrb[94].mxu1 }
 0xc17   :  { %v4672_v37 = vpop.f32.mrb[95].mxu1  ;;  %4831 = vrot.lane.b32.xlu1 %v7659_v50, %s8229_s27  ;;  %v12755_v50 = vld [vmem:[#allocation15_spill] sm:$0xff] }
 0xc18   :  { %4829 = vrot.lane.b32.xlu0 %v4672_v37, %s8229_s27  ;;  %v5188_v18 = vmul.f32 %v11318_v7, %v12755_v50  ;;  %v12756_v37 = vld [vmem:[#allocation26_spill] sm:$0xff] }
 0xc19   :  { %v5191_v29 = vmul.f32 %v11328_v19, %v12756_v37 }
 0xc1b   :  { %5011 = vrot.lane.b32.xlu1 %v4990_v9, %s8227_s17  ;;  %v12757_v9 = vld [vmem:[#allocation25_spill] sm:$0xff] }
 0xc1c   :  { %5009 = vrot.lane.b32.xlu0 %v4989_v35, %s8227_s17  ;;  %v5190_v46 = vmul.f32 %v11322_v61, %v12757_v9  ;;  %v12758_v35 = vld [vmem:[#allocation33_spill] sm:$0xff]  ;;  %v4953_v61 = vmul.f32 %v11374_v55, %v12746_v27 }
 0xc1d   :  { %v5192_v7 = vmul.f32 %v11326_v8, %v12758_v35 }
 0xc1f   :  { %5015 = vrot.lane.b32.xlu1 %v4992_v63, %s8227_s17  ;;  %v5004_v63 = vpop.permute.xlu1 %5003 }
 0xc20   :  { %5013 = vrot.lane.b32.xlu0 %v4991_v25, %s8227_s17  ;;  %v4954_v25 = vmul.f32 %v11372_v58, %v12748_v20 }
 0xc22   :  { %v5026_v19 = vadd.f32 %v5004_v63, %v4954_v25 }
 0xc23   :  { %5204 = vrot.lane.b32.xlu1 %v5187_v26, %s8230_s28  ;;  %v5002_v26 = vpop.permute.xlu0 %5001  ;;  %v5008_v44 = vpop.permute.xlu1 %5007 }
 0xc24   :  { %5202 = vrot.lane.b32.xlu0 %v5186_v52, %s8230_s28  ;;  %v5025_v52 = vadd.f32 %v5002_v26, %v4953_v61 }
 0xc27   :  { %5208 = vrot.lane.b32.xlu1 %v5189_v24, %s8230_s28  ;;  %v5006_v8 = vpop.permute.xlu0 %5005 }
 0xc28   :  { %5206 = vrot.lane.b32.xlu0 %v5188_v18, %s8230_s28 }
 0xc2b   :  { %5212 = vrot.lane.b32.xlu1 %v5191_v29, %s8230_s28 }
 0xc2c   :  { %5210 = vrot.lane.b32.xlu0 %v5190_v46, %s8230_s28 }
 0xc2f   :  { %5216 = vrot.lane.b32.xlu1 %v5193_v49, %s8230_s28 }
 0xc30   :  { %5214 = vrot.lane.b32.xlu0 %v5192_v7, %s8230_s28 }
 0xc33   :  { %5284 = vrot.lane.b32.xlu1 %v5026_v19, %s8215_s21 }
 0xc34   :  { %5282 = vrot.lane.b32.xlu0 %v5025_v52, %s8215_s21 }
 0xc6d   :  { %v4740_v24 = vpop.permute.xlu1 %4739 }
 0xc6e   :  { %v4762_v18 = vmul.f32 %v4740_v24, %v12748_v20  ;;  %v4738_v58 = vpop.permute.xlu0 %4737 }
 0xc6f   :  { %v4761_v29 = vmul.f32 %v4738_v58, %v12746_v27 }
 0xc70   :  { %4779 = vrot.lane.b32.xlu1 %v4762_v18, %s8222_s19 }
 0xc71   :  { %v4820_v46 = vpop.permute.xlu1 %4819  ;;  %4777 = vrot.lane.b32.xlu0 %v4761_v29, %s8222_s19 }
 0xc72   :  { %v4842_v55 = vmul.f32 %v4820_v46, %v12748_v20  ;;  %v4818_v49 = vpop.permute.xlu0 %4817 }
 0xc73   :  { %v4841_v7 = vmul.f32 %v4818_v49, %v12746_v27 }
 0xc74   :  { %4859 = vrot.lane.b32.xlu1 %v4842_v55, %s8231_s29 }
 0xc75   :  { %v4744_v63 = vpop.permute.xlu1 %4743  ;;  %4857 = vrot.lane.b32.xlu0 %v4841_v7, %s8231_s29 }
 0xc76   :  { %v4764_v25 = vmul.f32 %v4744_v63, %v12749_v30  ;;  %v4742_v26 = vpop.permute.xlu0 %4741 }
 0xc77   :  { %v4763_v61 = vmul.f32 %v4742_v26, %v10568_v11 }
 0xc78   :  { %4783 = vrot.lane.b32.xlu1 %v4764_v25, %s8222_s19 }
 0xc79   :  { %v4824_v19 = vpop.permute.xlu1 %4823  ;;  %4781 = vrot.lane.b32.xlu0 %v4763_v61, %s8222_s19 }
 0xc7a   :  { %v4844_v52 = vmul.f32 %v4824_v19, %v12749_v30  ;;  %v4822_v24 = vpop.permute.xlu0 %4821 }
 0xc7b   :  { %v4843_v18 = vmul.f32 %v4822_v24, %v10568_v11 }
 0xc7c   :  { %4863 = vrot.lane.b32.xlu1 %v4844_v52, %s8231_s29 }
 0xc7d   :  { %v4748_v58 = vpop.permute.xlu1 %4747  ;;  %4861 = vrot.lane.b32.xlu0 %v4843_v18, %s8231_s29 }
 0xc7e   :  { %v4766_v29 = vmul.f32 %v4748_v58, %v12751_v48  ;;  %v4746_v46 = vpop.permute.xlu0 %4745 }
 0xc7f   :  { %v4765_v55 = vmul.f32 %v4746_v46, %v10584_v40  ;;  %v4956_v46 = vmul.f32 %v11376_v2, %v12749_v30 }
 0xc80   :  { %4787 = vrot.lane.b32.xlu1 %v4766_v29, %s8222_s19 }
 0xc81   :  { %v4828_v49 = vpop.permute.xlu1 %4827  ;;  %4785 = vrot.lane.b32.xlu0 %v4765_v55, %s8222_s19  ;;  %v4955_v55 = vmul.f32 %v11380_v12, %v10568_v11 }
 0xc82   :  { %v4846_v7 = vmul.f32 %v4828_v49, %v12751_v48  ;;  %v4826_v63 = vpop.permute.xlu0 %4825 }
 0xc83   :  { %v4845_v25 = vmul.f32 %v4826_v63, %v10584_v40 }
 0xc84   :  { %4867 = vrot.lane.b32.xlu1 %v4846_v7, %s8231_s29  ;;  %v5028_v7 = vadd.f32 %v5008_v44, %v4956_v46  ;;  %v4959_v44 = vmul.f32 %v11388_v47, %v10592_v62 }
 0xc85   :  { %v4752_v26 = vpop.permute.xlu1 %4751  ;;  %4865 = vrot.lane.b32.xlu0 %v4845_v25, %s8231_s29  ;;  %v5027_v25 = vadd.f32 %v5006_v8, %v4955_v55 }
 0xc86   :  { %v4768_v61 = vmul.f32 %v4752_v26, %v10596_v3  ;;  %v4750_v19 = vpop.permute.xlu0 %4749  ;;  %v4958_v26 = vmul.f32 %v11378_v10, %v12751_v48  ;;  %v5122_v10 = vsel %vm5121_vm14, %v11344_v15, %v11346_v38 }
 0xc87   :  { %v4767_v52 = vmul.f32 %v4750_v19, %v10592_v62 }
 0xc88   :  { %4791 = vrot.lane.b32.xlu1 %v4768_v61, %s8222_s19  ;;  %v4957_v61 = vmul.f32 %v11382_v17, %v10584_v40 }
 0xc89   :  { %v4832_v24 = vpop.permute.xlu1 %4831  ;;  %4789 = vrot.lane.b32.xlu0 %v4767_v52, %s8222_s19 }
 0xc8a   :  { %v4848_v18 = vmul.f32 %v4832_v24, %v10596_v3  ;;  %v4830_v58 = vpop.permute.xlu0 %4829  ;;  %v4960_v24 = vmul.f32 %v11390_v0, %v10596_v3  ;;  %v5146_v0 = vmul.f32 %v11344_v15, %v12746_v27  ;;  %v5124_v15 = vsel %vm5121_vm14, %v11352_v53, %v11354_v32 }
 0xc8b   :  { %v4847_v29 = vmul.f32 %v4830_v58, %v10592_v62  ;;  %v5147_v58 = vmul.f32 %v5122_v10, %v12753_v43 }
 0xc8c   :  { %4871 = vrot.lane.b32.xlu1 %v4848_v18, %s8231_s29 }
 0xc8d   :  { %v5012_v49 = vpop.permute.xlu1 %5011  ;;  %4869 = vrot.lane.b32.xlu0 %v4847_v29, %s8231_s29  ;;  %v5123_v29 = vsel %vm5121_vm14, %v11348_v5, %v11350_v1 }
 0xc8e   :  { %v5010_v63 = vpop.permute.xlu0 %5009  ;;  %v5030_v2 = vadd.f32 %v5012_v49, %v4958_v26  ;;  %v5149_v55 = vmul.f32 %v5123_v29, %v12752_v45  ;;  %v5148_v49 = vmul.f32 %v11348_v5, %v12748_v20  ;;  %v5150_v26 = vmul.f32 %v11352_v53, %v10568_v11 }
 0xc8f   :  { %v5029_v52 = vadd.f32 %v5010_v63, %v4957_v61  ;;  %v5125_v5 = vsel %vm5121_vm14, %v11356_v56, %v11358_v14  ;;  %v5126_v53 = vsel %vm5121_vm14, %v11360_v54, %v11362_v34 }
 0xc90   :  { %5288 = vrot.lane.b32.xlu1 %v5028_v7, %s8215_s21  ;;  %v5155_v10 = vmul.f32 %v5126_v53, %v12757_v9 }
 0xc91   :  { %5286 = vrot.lane.b32.xlu0 %v5027_v25, %s8215_s21  ;;  %v5016_v12 = vpop.permute.xlu1 %5015  ;;  %v5151_v25 = vmul.f32 %v5124_v15, %v12755_v50 }
 0xc92   :  { %v5014_v19 = vpop.permute.xlu0 %5013  ;;  %v5032_v17 = vadd.f32 %v5016_v12, %v4960_v24 }
 0xc93   :  { %v5031_v8 = vadd.f32 %v5014_v19, %v4959_v44  ;;  %v5153_v19 = vmul.f32 %v5125_v5, %v12754_v57  ;;  %v5154_v44 = vmul.f32 %v11360_v54, %v10584_v40  ;;  %v5128_v54 = vsel %vm5121_vm14, %v11370_v36, %v11368_v39 }
 0xc94   :  { %5292 = vrot.lane.b32.xlu1 %v5030_v2, %s8215_s21 }
 0xc95   :  { %5290 = vrot.lane.b32.xlu0 %v5029_v52, %s8215_s21  ;;  %v5205_v47 = vpop.permute.xlu1 %5204  ;;  %v5152_v52 = vmul.f32 %v11356_v56, %v12749_v30  ;;  %v5127_v56 = vsel %vm5121_vm14, %v11364_v22, %v11366_v16  ;;  %vm12765_vm14 = vmmov %vm12760_vm3 }
 0xc96   :  { %v5203_v18 = vpop.permute.xlu0 %5202  ;;  %v5229_v7 = vadd.f32 %v5205_v47, %v5149_v55  ;;  %v5228_v1 = vadd.f32 %v5205_v47, %v5148_v49  ;;  %v5158_v47 = vmul.f32 %v11370_v36, %v10592_v62  ;;  %v4721_v36 = vmul.f32 %v11330_v51, %v12746_v27 }
 0xc97   :  { %v5227_v38 = vadd.f32 %v5203_v18, %v5147_v58  ;;  %v5226_v46 = vadd.f32 %v5203_v18, %v5146_v0  ;;  %v5157_v18 = vmul.f32 %v5127_v56, %v12756_v37  ;;  %v5156_v58 = vmul.f32 %v11364_v22, %v12751_v48 }
 0xc98   :  { %5296 = vrot.lane.b32.xlu1 %v5032_v17, %s8215_s21 }
 0xc99   :  { %5294 = vrot.lane.b32.xlu0 %v5031_v8, %s8215_s21  ;;  %v5209_v32 = vpop.permute.xlu1 %5208 }
 0xc9a   :  { %v5207_v63 = vpop.permute.xlu0 %5206  ;;  %v5233_v12 = vadd.f32 %v5209_v32, %v5153_v19  ;;  %v5232_v14 = vadd.f32 %v5209_v32, %v5152_v52  ;;  %v4724_v19 = vmul.f32 %v11336_v60, %v12749_v30 }
 0xc9b   :  { %v5231_v61 = vadd.f32 %v5207_v63, %v5151_v25  ;;  %v5230_v2 = vadd.f32 %v5207_v63, %v5150_v26 }
 0xc9c   :  { %5324 = vrot.lane.b32.xlu1 %v5227_v38, %s8229_s27  ;;  %v5159_v38 = vmul.f32 %v5128_v54, %v12758_v35 }
 0xc9d   :  { %5322 = vrot.lane.b32.xlu0 %v5226_v46, %s8229_s27  ;;  %v5213_v34 = vpop.permute.xlu1 %5212 }
 0xc9e   :  { %v5211_v24 = vpop.permute.xlu0 %5210  ;;  %v5237_v0 = vadd.f32 %v5213_v34, %v5157_v18  ;;  %v5236_v16 = vadd.f32 %v5213_v34, %v5156_v58  ;;  %v7985_v18 = vld [vmem:[%s12312_s9 + $0x8] sm:$0xff]  }
 0xc9f   :  { %v5235_v17 = vadd.f32 %v5211_v24, %v5155_v10  ;;  %v5234_v8 = vadd.f32 %v5211_v24, %v5154_v44 }
 0xca0   :  { %5328 = vrot.lane.b32.xlu1 %v5229_v7, %s8229_s27  ;;  %v4722_v7 = vmul.f32 %v11332_v23, %v12748_v20  ;;  %v4723_v20 = vmul.f32 %v11334_v33, %v10568_v11  ;;  %v4726_v11 = vmul.f32 %v11340_v31, %v12751_v48  ;;  %v4725_v33 = vmul.f32 %v11338_v4, %v10584_v40 }
 0xca1   :  { %5326 = vrot.lane.b32.xlu0 %v5228_v1, %s8229_s27  ;;  %v5217_v39 = vpop.permute.xlu1 %5216  ;;  %v4728_v31 = vmul.f32 %v11386_v13, %v10596_v3  ;;  %v4727_v40 = vmul.f32 %v11342_v28, %v10592_v62  ;;  %v7986_v62 = vld [vmem:[%s12312_s9 + $0x10] sm:$0xff]  }
 0xca2   :  { %v5215_v29 = vpop.permute.xlu0 %5214  ;;  %v5241_v13 = vadd.f32 %v5217_v39, %v11397_v41 }
 0xca3   :  { %v5239_v46 = vadd.f32 %v5215_v29, %v5159_v38  ;;  %v5238_v22 = vadd.f32 %v5215_v29, %v5158_v47  ;;  %v5160_v47 = vmul.f32 %v11392_v6, %v10596_v3  ;;  %v7988_v3 = vld [vmem:[%s12312_s9 + $0x20] ss:$0 sps:$4 sm:$0xff]  }
 0xca4   :  { %5332 = vrot.lane.b32.xlu1 %v5231_v61, %s8229_s27  ;;  %v5436_v41 = vsel %vm4148_vm13, %v7988_v3, 0 }
 0xca5   :  { %5330 = vrot.lane.b32.xlu0 %v5230_v2, %s8229_s27  ;;  %v11554_v55 = vpop.permute.xlu1 %5284  ;;  %v5240_v28 = vadd.f32 %v5217_v39, %v5160_v47 }
 0xca6   :  { %v11556_v49 = vpop.permute.xlu0 %5282 }
 0xca8   :  { %5336 = vrot.lane.b32.xlu1 %v5233_v12, %s8229_s27 }
 0xca9   :  { %5334 = vrot.lane.b32.xlu0 %v5232_v14, %s8229_s27  ;;  %v7984_v14 = vld [vmem:[%s12312_s9] sm:$0xff]  }
 0xcaa   :  { %7661 = vmatpush3.bf16.msra.mxu0 %v7984_v14 }
 0xcab   :  { %7662 = vmatprep.subr.bf16.mxu0 %v12669_v21 }
 0xcac   :  { %5340 = vrot.lane.b32.xlu1 %v5235_v17, %s8229_s27 }
 0xcad   :  { %5338 = vrot.lane.b32.xlu0 %v5234_v8, %s8229_s27 }
 0xcae   :  { %7663 = vmatpush3.bf16.msra.mxu0 %v7985_v18 }
 0xcaf   :  { %7664 = vmatprep.subr.bf16.mxu0 %v12669_v21 }
 0xcb0   :  { %5344 = vrot.lane.b32.xlu1 %v5237_v0, %s8229_s27 }
 0xcb1   :  { %5342 = vrot.lane.b32.xlu0 %v5236_v16, %s8229_s27 }
 0xcb2   :  { %7665 = vmatpush3.bf16.msra.mxu0 %v7986_v62 }
 0xcb3   :  { %7666 = vmatprep.subr.bf16.mxu0 %v12669_v21 }
 0xcb4   :  { %5348 = vrot.lane.b32.xlu1 %v5239_v46, %s8229_s27  ;;  %v7987_v46 = vld [vmem:[%s12312_s9 + $0x18] sm:$0xff]  }
 0xcb5   :  { %5346 = vrot.lane.b32.xlu0 %v5238_v22, %s8229_s27 }
 0xcb6   :  { %7667 = vmatpush3.bf16.msra.mxu0 %v7987_v46 }
 0xcb7   :  { %7668 = vmatprep.subr.bf16.mxu0 %v12669_v21 }
 0xcba   :  { %7669 = vmatpush3.bf16.msra.mxu0 %v5436_v41 }
 0xcbb   :  { %7679 = vmatprep.subr.mxu0 %v12669_v21 }
 0xce2   :  { %v4780_v15 = vpop.permute.xlu1 %4779 }
 0xce3   :  { %v4778_v1 = vpop.permute.xlu0 %4777  ;;  %v4802_v63 = vadd.f32 %v4780_v15, %v4722_v7 }
 0xce4   :  { %v4801_v25 = vadd.f32 %v4778_v1, %v4721_v36 }
 0xce6   :  { %v4860_v26 = vpop.permute.xlu1 %4859 }
 0xce7   :  { %v4882_v5 = vadd.f32 %v4860_v26, %v4802_v63  ;;  %v4858_v61 = vpop.permute.xlu0 %4857 }
 0xce8   :  { %v4881_v32 = vadd.f32 %v4858_v61, %v4801_v25 }
 0xce9   :  { %5252 = vrot.lane.b32.xlu1 %v4882_v5, %s8218_s23 }
 0xcea   :  { %v4784_v2 = vpop.permute.xlu1 %4783  ;;  %5250 = vrot.lane.b32.xlu0 %v4881_v32, %s8218_s23 }
 0xceb   :  { %v4782_v52 = vpop.permute.xlu0 %4781  ;;  %v4804_v23 = vadd.f32 %v4784_v2, %v4724_v19 }
 0xcec   :  { %v4803_v27 = vadd.f32 %v4782_v52, %v4723_v20 }
 0xcee   :  { %v4864_v51 = vpop.permute.xlu1 %4863 }
 0xcef   :  { %v4884_v53 = vadd.f32 %v4864_v51, %v4804_v23  ;;  %v4862_v12 = vpop.permute.xlu0 %4861 }
 0xcf0   :  { %v4883_v24 = vadd.f32 %v4862_v12, %v4803_v27 }
 0xcf1   :  { %5256 = vrot.lane.b32.xlu1 %v4884_v53, %s8218_s23 }
 0xcf2   :  { %v4788_v10 = vpop.permute.xlu1 %4787  ;;  %5254 = vrot.lane.b32.xlu0 %v4883_v24, %s8218_s23 }
 0xcf3   :  { %v4786_v30 = vpop.permute.xlu0 %4785  ;;  %v4806_v60 = vadd.f32 %v4788_v10, %v4726_v11 }
 0xcf4   :  { %v4805_v44 = vadd.f32 %v4786_v30, %v4725_v33 }
 0xcf6   :  { %v4868_v56 = vpop.permute.xlu1 %4867 }
 0xcf7   :  { %v4886_v17 = vadd.f32 %v4868_v56, %v4806_v60  ;;  %v4866_v34 = vpop.permute.xlu0 %4865 }
 0xcf8   :  { %v4885_v8 = vadd.f32 %v4866_v34, %v4805_v44 }
 0xcf9   :  { %5260 = vrot.lane.b32.xlu1 %v4886_v17, %s8218_s23 }
 0xcfa   :  { %v4792_v58 = vpop.permute.xlu1 %4791  ;;  %5258 = vrot.lane.b32.xlu0 %v4885_v8, %s8218_s23 }
 0xcfb   :  { %v4790_v48 = vpop.permute.xlu0 %4789  ;;  %v4808_v4 = vadd.f32 %v4792_v58, %v4728_v31 }
 0xcfc   :  { %v4807_v54 = vadd.f32 %v4790_v48, %v4727_v40 }
 0xcfe   :  { %v4872_v0 = vpop.permute.xlu1 %4871 }
 0xcff   :  { %v4888_v16 = vadd.f32 %v4872_v0, %v4808_v4  ;;  %v4870_v29 = vpop.permute.xlu0 %4869 }
 0xd00   :  { %v4887_v38 = vadd.f32 %v4870_v29, %v4807_v54 }
 0xd01   :  { %5264 = vrot.lane.b32.xlu1 %v4888_v16, %s8218_s23 }
 0xd02   :  { %5262 = vrot.lane.b32.xlu0 %v4887_v38, %s8218_s23  ;;  %v5289_v6 = vpop.permute.xlu1 %5288  ;;  %s8232_s23 = smov 56  }
 0xd03   :  { %v5287_v22 = vpop.permute.xlu0 %5286 }
 0xd05   :  { %5352 = vrot.lane.b32.xlu1 %v5241_v13, %s8229_s27 }
 0xd06   :  { %5350 = vrot.lane.b32.xlu0 %v5240_v28, %s8229_s27  ;;  %v5293_v39 = vpop.permute.xlu1 %5292 }
 0xd07   :  { %v5291_v15 = vpop.permute.xlu0 %5290 }
 0xd0a   :  { %v5297_v7 = vpop.permute.xlu1 %5296 }
 0xd0b   :  { %v5295_v1 = vpop.permute.xlu0 %5294 }
 0xd0e   :  { %v5325_v36 = vpop.permute.xlu1 %5324 }
 0xd0f   :  { %v5323_v63 = vpop.permute.xlu0 %5322 }
 0xd10   :  { %v5355_v8 = vsel %vm5354_vm7, %v5323_v63, %v5325_v36 }
 0xd12   :  { %v5329_v25 = vpop.permute.xlu1 %5328 }
 0xd13   :  { %v5327_v26 = vpop.permute.xlu0 %5326 }
 0xd14   :  { %v5356_v16 = vsel %vm5354_vm7, %v5327_v26, %v5329_v25  ;;  %v12768_v26 = vld [vmem:[#allocation47_spill] sm:$0xff] }
 0xd16   :  { %v5333_v5 = vpop.permute.xlu1 %5332 }
 0xd17   :  { %v5331_v61 = vpop.permute.xlu0 %5330 }
 0xd18   :  { %v5357_v18 = vsel %vm5354_vm7, %v5331_v61, %v5333_v5 }
 0xd1a   :  { %v5337_v32 = vpop.permute.xlu1 %5336 }
 0xd1b   :  { %v5335_v2 = vpop.permute.xlu0 %5334 }
 0xd1c   :  { %v5358_v62 = vsel %vm5354_vm7, %v5335_v2, %v5337_v32 }
 0xd1e   :  { %v5341_v19 = vpop.permute.xlu1 %5340 }
 0xd1f   :  { %v5339_v52 = vpop.permute.xlu0 %5338 }
 0xd20   :  { %v5359_v58 = vsel %vm5354_vm7, %v5339_v52, %v5341_v19  ;;  %v12769_v52 = vld [vmem:[#allocation35_spill] sm:$0xff] }
 0xd22   :  { %v5345_v20 = vpop.permute.xlu1 %5344 }
 0xd23   :  { %v5343_v23 = vpop.permute.xlu0 %5342 }
 0xd24   :  { %v5360_v48 = vsel %vm5354_vm7, %v5343_v23, %v5345_v20 }
 0xd26   :  { %v5349_v27 = vpop.permute.xlu1 %5348 }
 0xd27   :  { %v5347_v51 = vpop.permute.xlu0 %5346 }
 0xd28   :  { %v5361_v33 = vsel %vm5354_vm7, %v5347_v51, %v5349_v27 }
 0xd5b   :  { %v5253_v53 = vpop.permute.xlu1 %5252 }
 0xd5c   :  { %v5251_v12 = vpop.permute.xlu0 %5250  ;;  %v5372_v40 = vsel %vm2982_vm10, %v5253_v53, %v11554_v55 }
 0xd5d   :  { %v5371_v4 = vsel %vm2982_vm10, %v5251_v12, %v11556_v49  ;;  %v5380_v49 = vsel %vm12763_vm11, %v5372_v40, %v5356_v16  ;;  %v12796_v16 = vld [vmem:[#allocation56_spill] sm:$0xff] }
 0xd5e   :  { %v5379_v3 = vsel %vm12764_vm4, %v5371_v4, %v5355_v8 }
 0xd63   :  { %v5257_v14 = vpop.permute.xlu1 %5256 }
 0xd64   :  { %v5255_v24 = vpop.permute.xlu0 %5254  ;;  %v5374_v54 = vsel %vm2982_vm10, %v5257_v14, %v5289_v6 }
 0xd65   :  { %v5373_v44 = vsel %vm2982_vm10, %v5255_v24, %v5287_v22  ;;  %v5382_v41 = vsel %vm12765_vm14, %v5374_v54, %v5358_v62  ;;  %v12770_v24 = vmov 0  }
 0xd66   :  { %v5381_v29 = vsel %vm12760_vm3, %v5373_v44, %v5357_v18  ;;  %v7995_v44 = vld [vmem:[%s12310_s7 + $0x20] ss:$8 sps:$4 sm:$0xff]  }
 0xd6b   :  { %v5261_v10 = vpop.permute.xlu1 %5260 }
 0xd6c   :  { %v5259_v11 = vpop.permute.xlu0 %5258  ;;  %v5376_v56 = vsel %vm2982_vm10, %v5261_v10, %v5293_v39  ;;  %v7989_v10 = vld [vmem:[%s12310_s7] ss:$8 sps:$4 sm:$0xff]  }
 0xd6d   :  { %v5375_v17 = vsel %vm2982_vm10, %v5259_v11, %v5291_v15  ;;  %v5384_v38 = vsel %vm12761_vm6, %v5376_v56, %v5360_v48  ;;  %v7991_v11 = vld [vmem:[%s12310_s7 + $0x4] ss:$8 sps:$4 sm:$0xff]   ;;  %v8000_v56 = vld [vmem:[%s12310_s7 + $0x34] ss:$8 sps:$4 sm:$0xff]  }
 0xd6e   :  { %v5383_v47 = vsel %vm12762_vm9, %v5375_v17, %v5359_v58  ;;  %v5388_v22 = vadd.f32 %v5384_v38, %v5380_v49  ;;  %5728 = vmatprep.subr.bf16.mxu1 %v7991_v11  ;;  %v7998_v58 = vld [vmem:[%s12310_s7 + $0x30] ss:$8 sps:$4 sm:$0xff]   ;;  %v5673_v48 = vld [vmem:[%s12310_s7 + $0x40] sm:$0xff] }
 0xd6f   :  { %v5387_v39 = vadd.f32 %v5383_v47, %v5379_v3  ;;  %v7271_v40 = vcombine.high %v5673_v48, %v5673_v48  ;;  %v7270_v4 = vcombine.low %v5673_v48, %v5673_v48 }
 0xd71   :  { %v5723_v54 = vsel %vm4148_vm13, %v7270_v4, 0 }
 0xd73   :  { %v5265_v30 = vpop.permute.xlu1 %5264 }
 0xd74   :  { %v5263_v60 = vpop.permute.xlu0 %5262  ;;  %v5378_v28 = vsel %vm2982_vm10, %v5265_v30, %v5297_v7  ;;  %v7994_v30 = vld [vmem:[%s12310_s7 + $0x14] ss:$8 sps:$4 sm:$0xff]  }
 0xd75   :  { %v5377_v34 = vsel %vm2982_vm10, %v5263_v60, %v5295_v1  ;;  %v7997_v60 = vld [vmem:[%s12310_s7 + $0x24] ss:$8 sps:$4 sm:$0xff]  }
 0xd76   :  { %v5385_v31 = vsel %vm12759_vm8, %v5377_v34, %v5361_v33  ;;  %vm12766_vm8 = vmmov %vm12760_vm3  ;;  %vm12767_vm3 = vcmask 588800   ;;  %v7992_v33 = vld [vmem:[%s12310_s7 + $0x10] ss:$8 sps:$4 sm:$0xff]   ;;  %s8233_s7 = smov 100  }
 0xd77   :  { %v5353_v0 = vpop.permute.xlu1 %5352  ;;  %v5389_v55 = vadd.f32 %v5385_v31, %v5381_v29  ;;  %vm12774_vm6 = vmmov %vm12767_vm3 }
 0xd78   :  { %v5351_v13 = vpop.permute.xlu0 %5350 }
 0xd79   :  { %v5362_v46 = vsel %vm5354_vm7, %v5351_v13, %v5353_v0  ;;  %v5391_v1 = vadd.f32 %v5389_v55, %v5387_v39  ;;  %v12771_v0 = vmov 1.0|1.0   ;;  %vm12773_vm7 = vmmov %vm12764_vm4 }
 0xd7a   :  { %v5386_v6 = vsel %vm12766_vm8, %v5378_v28, %v5362_v46  ;;  %vm12844_vm14 = vmmov %vm12773_vm7 }
 0xd7b   :  { %v5390_v15 = vadd.f32 %v5386_v6, %v5382_v41  ;;  %v12775_v6 = vmov 1.0   ;;  %vm12845_vm8 = vmmov %vm12773_vm7 }
 0xd7d   :  { %v5392_v36 = vadd.f32 %v5390_v15, %v5388_v22 }
 0xd7f   :  { %v5393_v63 = vadd.f32 %v5392_v36, %v5391_v1 }
 0xd81   :  { %v5394_v25 = vmul.f32 %v5393_v63, %v10538_v42  ;;  %v12778_v63 = vld [vmem:[#allocation34_spill] sm:$0xff] }
 0xd83   :  { %v5395_v7 = vpack.c.bf16 %v5394_v25, %v5394_v25  ;;  %v12802_v25 = vld [vmem:[#allocation61_spill] sm:$0xff] }
 0xd85   :  { %7671 = vmatmul.mubr.msk.bf16.vlgmr.msra.gmra.mrb[56].mxu0 %vm12767_vm3, %v5395_v7  ;;  %v12780_v7 = vld [vmem:[#allocation40_spill] sm:$0xff]  ;;  %vm12846_vm3 = vmmov %vm12773_vm7 }
 0xd86   :  { %7680 = vmatpush3.msra.mxu0 %v12768_v26  ;;  %7681 = vmatprep.mubr.msk.f32.mxu0 %vm8212_vm15, %v12669_v21  ;;  %v12781_v26 = vld [vmem:[#allocation52_spill] sm:$0xff] }
 0xe58   :  { %v5472_v5 = vpop.f32.mrb[56].mxu0 }
 0xe59   :  { %5479 = vrot.lane.b32.xlu0 %v5472_v5, %s8219_s18  ;;  %v7672_v61 = vpop.f32.mrb[57].mxu0  ;;  %v12782_v5 = vld [vmem:[#allocation41_spill] sm:$0xff] }
 0xe5a   :  { %v5475_v32 = vpop.f32.mrb[58].mxu0  ;;  %v12783_v61 = vld [vmem:[#allocation42_spill] sm:$0xff] }
 0xe5b   :  { %v7673_v2 = vpop.f32.mrb[59].mxu0  ;;  %v12784_v32 = vld [vmem:[#allocation43_spill] sm:$0xff] }
 0xe5c   :  { %v12785_v2 = vld [vmem:[#allocation44_spill] sm:$0xff] }
 0xecb   :  { %v5480_v19 = vpop.permute.xlu0 %5479 }
 0xecc   :  { %v5482_v20 = vadd.f32 %v5480_v19, %v12769_v52  ;;  %v12786_v19 = vld [vmem:[#allocation45_spill] sm:$0xff]  ;;  %v12787_v52 = vld [vmem:[#allocation46_spill] sm:$0xff] }
 0xece   :  { %v7258_v23 = vmul.f32 -1.442695, %v5482_v20 }
 0xed0   :  { %8156 = vpow2.f32 %v7258_v23 }
 0xeda   :  { %v8157_v27 = vpop.eup %8156 }
 0xedb   :  { %v5486_v51 = vadd.f32 1.0, %v8157_v27  ;;  %v12788_v27 = vld [vmem:[#allocation37_spill] sm:$0xff] }
 0xedd   :  { %8158 = vrcp.f32 %v5486_v51 }
 0xee7   :  { %v8159_v53 = vpop.eup %8158 }
 0xee8   :  { %5564 = vrot.lane.b32.xlu0 %v8159_v53, %s8227_s17  ;;  %5490 = vrot.lane.b32.xlu1 %v8159_v53, %s8231_s29  ;;  %v5638_v31 = vmul.f32 %v8159_v53, %v5482_v20 }
 0xf5a   :  { %v5565_v12 = vpop.permute.xlu0 %5564  ;;  %v5491_v14 = vpop.permute.xlu1 %5490 }
 0xf5b   :  { %7677 = vmatmul.mubr.msk.f32.vlgmr.msra.gmra.mrb[96].mxu1 %vm2982_vm10, %v5491_v14  ;;  %7682 = vmatmul.mubr.msk.f32.vlgmr.msra.gmra.mrb[60].mxu0 %vm2982_vm10, %v5565_v12  ;;  %v12789_v14 = vld [vmem:[#allocation49_spill] sm:$0xff] }
 0xf5c   :  { %5760 = vmatprep.mubr.bf16.mxu1 %v12770_v24  ;;  %5833 = vmatprep.mubr.f32.mxu0 %v12669_v21 }
 0xf5d   :  { %5729 = vmatpush1.bf16.msra.mxu1 %v7989_v10  ;;  %v12790_v10 = vld [vmem:[#allocation48_spill] sm:$0xff] }
 0xf5e   :  { %5730 = vmatprep.subr.bf16.mxu1 %v7994_v30 }
 0xf61   :  { %5731 = vmatpush1.bf16.msra.mxu1 %v7992_v33 }
 0xf62   :  { %5732 = vmatprep.subr.bf16.mxu1 %v7997_v60  ;;  %v12791_v60 = vld [vmem:[#allocation50_spill] sm:$0xff] }
 0xf65   :  { %5733 = vmatpush1.bf16.msra.mxu1 %v7995_v44 }
 0xf66   :  { %5734 = vmatprep.subr.bf16.mxu1 %v8000_v56  ;;  %v12792_v56 = vld [vmem:[#allocation51_spill] sm:$0xff] }
 0xf69   :  { %5735 = vmatpush1.bf16.msra.mxu1 %v7998_v58 }
 0xf6a   :  { %7272 = vmatprep.subr.msk.bf16.mxu1 %vm4148_vm13, %v7271_v40 }
 0xf6d   :  { %5737 = vmatpush1.bf16.msra.mxu1 %v5723_v54  ;;  %v12795_v54 = vld [vmem:[#allocation55_spill] sm:$0xff] }
 0xf6e   :  { %7757 = vmatprep.subr.msk.bf16.mxu1 %vm10936_vm12, %v12771_v0 }
0x102e   :  { %v5560_v17 = vpop.f32.mrb[96].mxu1  ;;  %v5634_v34 = vpop.f32.mrb[60].mxu0 }
0x102f   :  { %5640 = vrot.lane.b32.xlu1 %v5560_v17, %s8220_s6  ;;  %v7678_v8 = vpop.f32.mrb[97].mxu1  ;;  %5645 = vrot.lane.b32.xlu0 %v5634_v34, %s8232_s23  ;;  %v7683_v18 = vpop.f32.mrb[61].mxu0 }
0x1030   :  { %v12793_v18 = vld [vmem:[#allocation54_spill] sm:$0xff] }
0x1033   :  { %5650 = vrot.lane.b32.xlu1 %v5638_v31, %s8222_s19  ;;  %v12794_v31 = vld [vmem:[#allocation53_spill] sm:$0xff] }
0x10a1   :  { %v5641_v29 = vpop.permute.xlu1 %5640  ;;  %v5646_v38 = vpop.permute.xlu0 %5645 }
0x10a2   :  { %v5643_v47 = vmul.f32 %v5641_v29, %v5482_v20  ;;  %v5648_v13 = vmul.f32 %v5646_v38, %v5482_v20 }
0x10a4   :  { %5654 = vrot.lane.b32.xlu0 %v5643_v47, %s8227_s17  ;;  %5658 = vrot.lane.b32.xlu1 %v5648_v13, %s8227_s17  ;;  %v12797_v13 = vld [vmem:[#allocation58_spill] sm:$0xff] }
0x10a5   :  { %v5651_v62 = vpop.permute.xlu1 %5650 }
0x1116   :  { %v5659_v28 = vpop.permute.xlu1 %5658  ;;  %v5655_v55 = vpop.permute.xlu0 %5654 }
0x1117   :  { %v5661_v46 = vsel %vm2982_vm10, %v5651_v62, %v5655_v55 }
0x1118   :  { %v5662_v49 = vsel %vm12773_vm7, %v5661_v46, %v5659_v28  ;;  %v12798_v28 = vld [vmem:[#allocation57_spill] sm:$0xff]  ;;  %vm12847_vm7 = vmmov %vm12846_vm3 }
0x1119   :  { %v5663_v3 = vmul.f32 %v5662_v49, %v10538_v42 }
0x111b   :  { %v5664_v41 = vpack.c.bf16 %v5663_v3, %v5663_v3  ;;  %v12799_v3 = vld [vmem:[#allocation59_spill] sm:$0xff] }
0x111d   :  { %7273 = vmatmul.mubr.msk.bf16.vlgmr.msra.gmra.mrb[100].mxu1 %vm12774_vm6, %v5664_v41  ;;  %vm12848_vm6 = vmmov %vm12846_vm3 }
0x111e   :  { %7759 = vmatpush3.bf16.msk.msra.mxu1 %vm10936_vm12, %v12771_v0 }
0x111f   :  { %7688 = vmatprep.subr.msk.mxu1 %vm10964_vm5, %v12775_v6 }
0x1122   :  { %7689 = vmatpush3.msk.msra.mxu1 %vm10964_vm5, %v12775_v6  ;;  %v12800_v6 = vld [vmem:[#allocation60_spill] sm:$0xff] }
0x1123   :  { %7724 = vmatprep.subr.bf16.mxu1 %v12669_v21 }
0x11f0   :  { %v5762_v39 = vpop.f32.mrb[100].mxu1 }
0x11f1   :  { %v11697_v15 = vpop.f32.mrb[101].mxu1 }
0x11f2   :  { %12777 = vst [vmem:[#allocation12_spill] sm:$0xff] %v11697_v15  ;;  %v5766_v1 = vpop.f32.mrb[102].mxu1  ;;  %5769 = vmatprep.subr.mxu0 %v11697_v15 }
0x11f3   :  { %v5767_v36 = vpop.f32.mrb[103].mxu1  ;;  %5770 = vmatpush1.msra.mxu0 %v5762_v39 }
0x11f4   :  { %7274 = vmatmul.mubr.msk.f32.vlgmr.msra.gmra.mrb[62].mxu0 %vm2982_vm10, %v12778_v63  ;;  %7761 = vmatprep.subr.msk.bf16.mxu0 %vm10936_vm12, %v12771_v0  ;;  %v12801_v36 = vld [vmem:[#allocation62_spill] sm:$0xff] }
0x11f5   :  { %5839 = vmatprep.mubr.f32.mxu0 %v12669_v21  ;;  %7763 = vmatpush3.bf16.msk.msra.mxu0 %vm10936_vm12, %v12771_v0 }
0x11f6   :  { %7765 = vmatprep.subr.msk.bf16.mxu0 %vm10977_vm0, %v12771_v0 }
0x11f8   :  { %7275 = vmatmul.mubr.msk.f32.gmra.mrb[64].mxu0 %vm2982_vm10, %v12780_v7 }
0x11f9   :  { %5845 = vmatprep.mubr.f32.mxu0 %v12669_v21  ;;  %7767 = vmatpush3.bf16.msk.msra.mxu0 %vm10977_vm0, %v12771_v0 }
0x11fa   :  { %7710 = vmatprep.subr.mxu0 %v12781_v26 }
0x11fc   :  { %7276 = vmatmul.mubr.msk.f32.gmra.mrb[66].mxu0 %vm2982_vm10, %v12782_v5 }
0x11fd   :  { %5851 = vmatprep.mubr.f32.mxu0 %v12669_v21  ;;  %7711 = vmatpush3.msra.mxu0 %v12781_v26  ;;  %v12803_v26 = vld [vmem:[#allocation29_spill] sm:$0xff] }
0x11fe   :  { %7738 = vmatprep.subr.bf16.mxu0 %v12669_v21 }
0x1200   :  { %7277 = vmatmul.mubr.msk.f32.gmra.mrb[68].mxu0 %vm2982_vm10, %v12783_v61  ;;  %v12804_v61 = vld [vmem:[#allocation63_spill] sm:$0xff] }
0x1201   :  { %5857 = vmatprep.mubr.f32.mxu0 %v12669_v21 }
0x1204   :  { %7278 = vmatmul.mubr.msk.f32.gmra.mrb[70].mxu0 %vm2982_vm10, %v12784_v32 }
0x1205   :  { %5863 = vmatprep.mubr.f32.mxu0 %v12669_v21 }
0x1208   :  { %7279 = vmatmul.mubr.msk.f32.gmra.mrb[72].mxu0 %vm2982_vm10, %v12785_v2  ;;  %v12805_v2 = vld [vmem:[#allocation28_spill] sm:$0xff] }
0x1209   :  { %5869 = vmatprep.mubr.f32.mxu0 %v12669_v21 }
0x120c   :  { %7280 = vmatmul.mubr.msk.f32.gmra.mrb[74].mxu0 %vm2982_vm10, %v12786_v19 }
0x120d   :  { %5875 = vmatprep.mubr.f32.mxu0 %v12669_v21 }
0x1210   :  { %7281 = vmatmul.mubr.msk.f32.gmra.mrb[76].mxu0 %vm2982_vm10, %v12787_v52  ;;  %v12806_v52 = vld [vmem:[#allocation27_spill] sm:$0xff] }
0x12c7   :  { %v11738_v20 = vpop.f32.mrb[62].mxu0 }
0x12c8   :  { %v11740_v23 = vpop.f32.mrb[63].mxu0  ;;  %v5882_v51 = vmul.f32 %v11738_v20, %v12788_v27  ;;  %v5890_v24 = vmul.f32 %v11738_v20, %v12789_v14  ;;  %v6188_v5 = vmul.f32 %v11738_v20, %v12803_v26  ;;  %v12822_v26 = vld [vmem:[#allocation67_spill] sm:$0xff] }
0x12ca   :  { %5906 = vrot.lane.b32.xlu0 %v5882_v51, %s8222_s19  ;;  %v12807_v51 = vld [vmem:[#allocation22_spill] sm:$0xff] }
0x12cb   :  { %v11745_v53 = vpop.f32.mrb[64].mxu0 }
0x12cc   :  { %v11747_v12 = vpop.f32.mrb[65].mxu0  ;;  %v5883_v11 = vmul.f32 %v11745_v53, %v12790_v10  ;;  %v5891_v44 = vmul.f32 %v11745_v53, %v12791_v60  ;;  %v6189_v27 = vmul.f32 %v11745_v53, %v12806_v52 }
0x12ce   :  { %6051 = vrot.lane.b32.xlu0 %v5890_v24, %s8223_s22  ;;  %5908 = vrot.lane.b32.xlu1 %v5883_v11, %s8222_s19  ;;  %v12808_v24 = vld [vmem:[#allocation31_spill] sm:$0xff]  ;;  %v12809_v11 = vld [vmem:[#allocation30_spill] sm:$0xff] }
0x12cf   :  { %v11755_v30 = vpop.f32.mrb[66].mxu0 }
0x12d0   :  { %v11757_v33 = vpop.f32.mrb[67].mxu0  ;;  %v5884_v17 = vmul.f32 %v11755_v30, %v12792_v56  ;;  %v5892_v58 = vmul.f32 %v11755_v30, %v12793_v18  ;;  %v6190_v19 = vmul.f32 %v11755_v30, %v12805_v2  ;;  %v12825_v2 = vld [vmem:[#allocation21_spill] sm:$0xff] }
0x12d2   :  { %6053 = vrot.lane.b32.xlu1 %v5891_v44, %s8223_s22  ;;  %5910 = vrot.lane.b32.xlu0 %v5884_v17, %s8222_s19  ;;  %v12810_v44 = vld [vmem:[#allocation23_spill] sm:$0xff]  ;;  %v12811_v17 = vld [vmem:[#allocation73_spill] sm:$0xff] }
0x12d3   :  { %v11765_v34 = vpop.f32.mrb[68].mxu0  ;;  %v6397_v18 = vmul.f32 %v11745_v53, %v12811_v17 }
0x12d4   :  { %v11767_v8 = vpop.f32.mrb[69].mxu0  ;;  %v5885_v48 = vmul.f32 %v11765_v34, %v12794_v31  ;;  %v5893_v0 = vmul.f32 %v11765_v34, %v12795_v54  ;;  %v6191_v10 = vmul.f32 %v11765_v34, %v12808_v24  ;;  %v12827_v24 = vld [vmem:[#allocation6_spill] sm:$0xff] }
0x12d6   :  { %6055 = vrot.lane.b32.xlu0 %v5892_v58, %s8223_s22  ;;  %5912 = vrot.lane.b32.xlu1 %v5885_v48, %s8222_s19  ;;  %v12812_v58 = vld [vmem:[#allocation75_spill] sm:$0xff]  ;;  %v12813_v48 = vld [vmem:[#allocation72_spill] sm:$0xff] }
0x12d7   :  { %v11775_v40 = vpop.f32.mrb[70].mxu0  ;;  %v6399_v31 = vmul.f32 %v11765_v34, %v12812_v58  ;;  %v6396_v54 = vmul.f32 %v11738_v20, %v12813_v48 }
0x12d8   :  { %v11777_v4 = vpop.f32.mrb[71].mxu0  ;;  %v5886_v29 = vmul.f32 %v11775_v40, %v12796_v16  ;;  %v5894_v62 = vmul.f32 %v11775_v40, %v12797_v13  ;;  %v6192_v14 = vmul.f32 %v11775_v40, %v12807_v51  ;;  %v12826_v51 = vld [vmem:[#allocation71_spill] sm:$0xff] }
0x12da   :  { %6057 = vrot.lane.b32.xlu1 %v5893_v0, %s8223_s22  ;;  %5914 = vrot.lane.b32.xlu0 %v5886_v29, %s8222_s19  ;;  %v12814_v0 = vld [vmem:[#allocation77_spill] sm:$0xff]  ;;  %v12815_v29 = vld [vmem:[#allocation64_spill] sm:$0xff] }
0x12db   :  { %v11785_v38 = vpop.f32.mrb[72].mxu0  ;;  %v6558_v13 = vmul.f32 %v11740_v23, %v12815_v29 }
0x12dc   :  { %v11787_v47 = vpop.f32.mrb[73].mxu0  ;;  %v5887_v55 = vmul.f32 %v11785_v38, %v12798_v28  ;;  %v5895_v41 = vmul.f32 %v11785_v38, %v12799_v3  ;;  %v6193_v56 = vmul.f32 %v11785_v38, %v12810_v44  ;;  %v6401_v16 = vmul.f32 %v11785_v38, %v12814_v0 }
0x12de   :  { %6059 = vrot.lane.b32.xlu0 %v5894_v62, %s8223_s22  ;;  %5916 = vrot.lane.b32.xlu1 %v5887_v55, %s8222_s19  ;;  %v12816_v62 = vld [vmem:[#allocation74_spill] sm:$0xff] }
0x12df   :  { %v11795_v46 = vpop.f32.mrb[74].mxu0  ;;  %v6398_v28 = vmul.f32 %v11755_v30, %v12816_v62  ;;  %v12817_v55 = vld [vmem:[#allocation66_spill] sm:$0xff] }
0x12e0   :  { %v11797_v49 = vpop.f32.mrb[75].mxu0  ;;  %v5888_v22 = vmul.f32 %v11795_v46, %v12800_v6  ;;  %v5896_v63 = vmul.f32 %v11795_v46, %v12801_v36  ;;  %v6194_v60 = vmul.f32 %v11795_v46, %v12809_v11  ;;  %v6560_v3 = vmul.f32 %v11747_v12, %v12817_v55  ;;  %v12820_v36 = vld [vmem:[#allocation78_spill] sm:$0xff] }
0x12e2   :  { %6061 = vrot.lane.b32.xlu1 %v5895_v41, %s8223_s22  ;;  %5918 = vrot.lane.b32.xlu0 %v5888_v22, %s8222_s19  ;;  %v12818_v41 = vld [vmem:[#allocation76_spill] sm:$0xff]  ;;  %v12819_v22 = vld [vmem:[#allocation65_spill] sm:$0xff] }
0x12e3   :  { %v11805_v39 = vpop.f32.mrb[76].mxu0  ;;  %v6400_v6 = vmul.f32 %v11775_v40, %v12818_v41  ;;  %v6562_v23 = vmul.f32 %v11757_v33, %v12819_v22  ;;  %v6566_v33 = vmul.f32 %v11777_v4, %v12822_v26 }
0x12e4   :  { %v11807_v1 = vpop.f32.mrb[77].mxu0  ;;  %v5889_v7 = vmul.f32 %v11805_v39, %v12802_v25  ;;  %v5897_v32 = vmul.f32 %v11805_v39, %v12804_v61  ;;  %v12821_v25 = vld [vmem:[#allocation68_spill] sm:$0xff]  ;;  %v12823_v61 = vld [vmem:[#allocation69_spill] sm:$0xff] }
0x12e5   :  { %v6564_v12 = vmul.f32 %v11767_v8, %v12821_v25  ;;  %v6568_v8 = vmul.f32 %v11787_v47, %v12823_v61  ;;  %v6565_v47 = vmul.f32 %v11775_v40, %v12822_v26 }
0x12e6   :  { %6063 = vrot.lane.b32.xlu0 %v5896_v63, %s8223_s22  ;;  %5920 = vrot.lane.b32.xlu1 %v5889_v7, %s8222_s19  ;;  %v6402_v63 = vmul.f32 %v11795_v46, %v12820_v36  ;;  %v6557_v7 = vmul.f32 %v11738_v20, %v12815_v29  ;;  %v6561_v20 = vmul.f32 %v11755_v30, %v12819_v22 }
0x12e7   :  { %v6195_v30 = vmul.f32 %v11805_v39, %v12825_v2 }
0x12ea   :  { %6444 = vrot.lane.b32.xlu0 %v6188_v5, %s8233_s7  ;;  %6065 = vrot.lane.b32.xlu1 %v5897_v32, %s8223_s22  ;;  %v12824_v32 = vld [vmem:[#allocation70_spill] sm:$0xff] }
0x12eb   :  { %v6570_v4 = vmul.f32 %v11797_v49, %v12824_v32  ;;  %v6567_v49 = vmul.f32 %v11785_v38, %v12823_v61  ;;  %v6569_v40 = vmul.f32 %v11795_v46, %v12824_v32  ;;  %v6572_v46 = vmul.f32 %v11807_v1, %v12826_v51 }
0x12ee   :  { %6448 = vrot.lane.b32.xlu0 %v6190_v19, %s8233_s7  ;;  %6446 = vrot.lane.b32.xlu1 %v6189_v27, %s8233_s7 }
0x12f2   :  { %6452 = vrot.lane.b32.xlu0 %v6192_v14, %s8233_s7  ;;  %6450 = vrot.lane.b32.xlu1 %v6191_v10, %s8233_s7 }
0x12f6   :  { %6456 = vrot.lane.b32.xlu0 %v6194_v60, %s8233_s7  ;;  %6454 = vrot.lane.b32.xlu1 %v6193_v56, %s8233_s7 }
0x12fa   :  { %6645 = vrot.lane.b32.xlu0 %v6188_v5, %s8226_s25  ;;  %6647 = vrot.lane.b32.xlu1 %v6189_v27, %s8226_s25 }
0x12fe   :  { %6649 = vrot.lane.b32.xlu0 %v6190_v19, %s8226_s25  ;;  %6651 = vrot.lane.b32.xlu1 %v6191_v10, %s8226_s25 }
0x1302   :  { %6653 = vrot.lane.b32.xlu0 %v6192_v14, %s8226_s25  ;;  %6655 = vrot.lane.b32.xlu1 %v6193_v56, %s8226_s25 }
0x1306   :  { %6657 = vrot.lane.b32.xlu0 %v6194_v60, %s8226_s25  ;;  %6206 = vrot.lane.b32.xlu1 %v6189_v27, %s8217_s26 }
0x130a   :  { %6204 = vrot.lane.b32.xlu0 %v6188_v5, %s8217_s26  ;;  %6210 = vrot.lane.b32.xlu1 %v6191_v10, %s8217_s26  ;;  %v6559_v5 = vmul.f32 %v11745_v53, %v12817_v55  ;;  %v6563_v53 = vmul.f32 %v11765_v34, %v12821_v25  ;;  %v6403_v10 = vmul.f32 %v11805_v39, %v12827_v24  ;;  %v12829_v55 = vld [vmem:[#allocation11_spill] sm:$0xff] }
0x130e   :  { %6208 = vrot.lane.b32.xlu0 %v6190_v19, %s8217_s26  ;;  %6214 = vrot.lane.b32.xlu1 %v6193_v56, %s8217_s26 }
0x1312   :  { %6212 = vrot.lane.b32.xlu0 %v6192_v14, %s8217_s26  ;;  %6414 = vrot.lane.b32.xlu1 %v6397_v18, %s8226_s25  ;;  %v6571_v14 = vmul.f32 %v11805_v39, %v12826_v51 }
0x1316   :  { %6216 = vrot.lane.b32.xlu0 %v6194_v60, %s8217_s26  ;;  %6418 = vrot.lane.b32.xlu1 %v6399_v31, %s8226_s25 }
0x131a   :  { %6412 = vrot.lane.b32.xlu0 %v6396_v54, %s8226_s25  ;;  %6422 = vrot.lane.b32.xlu1 %v6401_v16, %s8226_s25  ;;  %v12828_v16 = vld [vmem:[#allocation10_spill] sm:$0xff] }
0x131e   :  { %6416 = vrot.lane.b32.xlu0 %v6398_v28, %s8226_s25  ;;  %6591 = vrot.lane.b32.xlu1 %v6558_v13, %s8214_s8 }
0x1322   :  { %6420 = vrot.lane.b32.xlu0 %v6400_v6, %s8226_s25  ;;  %6595 = vrot.lane.b32.xlu1 %v6560_v3, %s8214_s8 }
0x1326   :  { %6424 = vrot.lane.b32.xlu0 %v6402_v63, %s8226_s25  ;;  %6599 = vrot.lane.b32.xlu1 %v6562_v23, %s8214_s8  ;;  %v12830_v23 = vld [vmem:[#allocation8_spill] sm:$0xff] }
0x132a   :  { %6589 = vrot.lane.b32.xlu0 %v6557_v7, %s8214_s8  ;;  %6603 = vrot.lane.b32.xlu1 %v6564_v12, %s8214_s8  ;;  %v12831_v7 = vld [vmem:[#allocation14_spill] sm:$0xff] }
0x132e   :  { %6593 = vrot.lane.b32.xlu0 %v6559_v5, %s8214_s8  ;;  %6607 = vrot.lane.b32.xlu1 %v6566_v33, %s8214_s8 }
0x1332   :  { %6597 = vrot.lane.b32.xlu0 %v6561_v20, %s8214_s8  ;;  %6611 = vrot.lane.b32.xlu1 %v6568_v8, %s8214_s8 }
0x1336   :  { %6601 = vrot.lane.b32.xlu0 %v6563_v53, %s8214_s8  ;;  %6615 = vrot.lane.b32.xlu1 %v6570_v4, %s8214_s8 }
0x133a   :  { %6605 = vrot.lane.b32.xlu0 %v6565_v47, %s8214_s8  ;;  %6458 = vrot.lane.b32.xlu1 %v6195_v30, %s8233_s7 }
0x133c   :  { %v5907_v19 = vpop.permute.xlu0 %5906 }
0x133d   :  { %7690 = vmatprep.mubr.msk.f32.mxu1 %vm4413_vm1, %v5907_v19 }
0x133e   :  { %6609 = vrot.lane.b32.xlu0 %v6567_v49, %s8214_s8  ;;  %6659 = vrot.lane.b32.xlu1 %v6195_v30, %s8226_s25 }
0x1340   :  { %v6052_v34 = vpop.permute.xlu0 %6051  ;;  %v5909_v52 = vpop.permute.xlu1 %5908 }
0x1341   :  { %7691 = vmatmul.mubr.msk.f32.vlgmr.msra.gmra.mrb[98].mxu1 %vm4413_vm1, %v5909_v52  ;;  %7712 = vmatprep.mubr.msk.f32.mxu0 %vm4559_vm2, %v6052_v34 }
0x1342   :  { %6613 = vrot.lane.b32.xlu0 %v6569_v40, %s8214_s8  ;;  %6218 = vrot.lane.b32.xlu1 %v6195_v30, %s8217_s26 }
0x1344   :  { %v6054_v38 = vpop.permute.xlu1 %6053  ;;  %v5911_v27 = vpop.permute.xlu0 %5910 }
0x1345   :  { %7693 = vmatprep.mubr.msk.f32.mxu1 %vm4413_vm1, %v5911_v27  ;;  %7713 = vmatmul.mubr.msk.f32.vlgmr.msra.gmra.mrb[78].mxu0 %vm4559_vm2, %v6054_v38 }
0x1346   :  { %6617 = vrot.lane.b32.xlu0 %v6571_v14, %s8214_s8  ;;  %6426 = vrot.lane.b32.xlu1 %v6403_v10, %s8226_s25 }
0x1348   :  { %v6056_v11 = vpop.permute.xlu0 %6055  ;;  %v5913_v60 = vpop.permute.xlu1 %5912 }
0x1349   :  { %7694 = vmatmul.mubr.msk.f32.gmra.mrb[104].mxu1 %vm4413_vm1, %v5913_v60  ;;  %7715 = vmatprep.mubr.msk.f32.mxu0 %vm4559_vm2, %v6056_v11 }
0x134a   :  { %6619 = vrot.lane.b32.xlu1 %v6572_v46, %s8214_s8  ;;  %s8234_s8 = smov 68  }
0x134c   :  { %v6058_v39 = vpop.permute.xlu1 %6057  ;;  %v5915_v44 = vpop.permute.xlu0 %5914 }
0x134d   :  { %7696 = vmatprep.mubr.msk.f32.mxu1 %vm4413_vm1, %v5915_v44  ;;  %7716 = vmatmul.mubr.msk.f32.gmra.mrb[80].mxu0 %vm4559_vm2, %v6058_v39 }
0x1350   :  { %v6060_v56 = vpop.permute.xlu0 %6059  ;;  %v5917_v17 = vpop.permute.xlu1 %5916 }
0x1351   :  { %7697 = vmatmul.mubr.msk.f32.gmra.mrb[106].mxu1 %vm4413_vm1, %v5917_v17  ;;  %7718 = vmatprep.mubr.msk.f32.mxu0 %vm4559_vm2, %v6060_v56 }
0x1354   :  { %v6062_v1 = vpop.permute.xlu1 %6061  ;;  %v5919_v18 = vpop.permute.xlu0 %5918 }
0x1355   :  { %7699 = vmatprep.mubr.msk.f32.mxu1 %vm4413_vm1, %v5919_v18  ;;  %7719 = vmatmul.mubr.msk.f32.gmra.mrb[82].mxu0 %vm4559_vm2, %v6062_v1 }
0x1358   :  { %v6064_v58 = vpop.permute.xlu0 %6063  ;;  %v5921_v31 = vpop.permute.xlu1 %5920 }
0x1359   :  { %7700 = vmatmul.mubr.msk.f32.gmra.mrb[108].mxu1 %vm4413_vm1, %v5921_v31  ;;  %7721 = vmatprep.mubr.msk.f32.mxu0 %vm4559_vm2, %v6064_v58  ;;  %vm6532_vm1 = vcmask 850944  }
0x135a   :  { %7734 = vmatprep.mubr.msk.bf16.mxu1 %vm8212_vm15, %v12669_v21 }
0x135c   :  { %v6445_v48 = vpop.permute.xlu0 %6444  ;;  %v6066_v54 = vpop.permute.xlu1 %6065 }
0x135d   :  { %v6468_v0 = vmul.f32 %v6445_v48, %v12753_v43  ;;  %v6469_v29 = vmul.f32 %v6445_v48, %v12828_v16  ;;  %7722 = vmatmul.mubr.msk.f32.gmra.mrb[84].mxu0 %vm4559_vm2, %v6066_v54 }
0x135e   :  { %7740 = vmatprep.mubr.msk.bf16.mxu0 %vm8212_vm15, %v12669_v21  ;;  %vm12832_vm15 = vcmask 293888  }
0x135f   :  { %6500 = vrot.lane.b32.xlu0 %v6468_v0, %s8227_s17  ;;  %6502 = vrot.lane.b32.xlu1 %v6469_v29, %s8227_s17  ;;  %vm12833_vm5 = vmmov %vm12832_vm15 }
0x1360   :  { %v6449_v13 = vpop.permute.xlu0 %6448  ;;  %v6447_v62 = vpop.permute.xlu1 %6446  ;;  %vm12835_vm12 = vmmov %vm12833_vm5 }
0x1361   :  { %v6470_v28 = vmul.f32 %v6447_v62, %v12752_v45  ;;  %v6471_v3 = vmul.f32 %v6447_v62, %v12829_v55  ;;  %v6472_v22 = vmul.f32 %v6449_v13, %v12755_v50  ;;  %v6473_v36 = vmul.f32 %v6449_v13, %v12830_v23  ;;  %v12834_v62 = vld [vmem:[#allocation5_spill] sm:$0xff]  ;;  %vm12836_vm0 = vmmov %vm12833_vm5 }
0x1362   :  { %vm12840_vm2 = vmmov %vm12836_vm0 }
0x1363   :  { %6504 = vrot.lane.b32.xlu0 %v6470_v28, %s8227_s17  ;;  %6506 = vrot.lane.b32.xlu1 %v6471_v3, %s8227_s17  ;;  %vm12841_vm9 = vmmov %vm12836_vm0 }
0x1364   :  { %v11958_v41 = vpop.permute.xlu0 %6452  ;;  %v6451_v6 = vpop.permute.xlu1 %6450  ;;  %vm12842_vm11 = vmmov %vm12836_vm0 }
0x1365   :  { %v6474_v12 = vmul.f32 %v6451_v6, %v12754_v57  ;;  %v6475_v26 = vmul.f32 %v6451_v6, %v12831_v7  ;;  %vm12843_vm4 = vmmov %vm12836_vm0 }
0x1367   :  { %6508 = vrot.lane.b32.xlu0 %v6472_v22, %s8227_s17  ;;  %6510 = vrot.lane.b32.xlu1 %v6473_v36, %s8227_s17 }
0x1368   :  { %v11964_v63 = vpop.permute.xlu0 %6456  ;;  %v11966_v25 = vpop.permute.xlu1 %6454 }
0x136b   :  { %6512 = vrot.lane.b32.xlu0 %v6474_v12, %s8227_s17  ;;  %6514 = vrot.lane.b32.xlu1 %v6475_v26, %s8227_s17 }
0x136c   :  { %v11972_v33 = vpop.permute.xlu0 %6645  ;;  %v11974_v5 = vpop.permute.xlu1 %6647 }
0x1370   :  { %v11976_v61 = vpop.permute.xlu0 %6649  ;;  %v11978_v8 = vpop.permute.xlu1 %6651 }
0x1374   :  { %v11980_v20 = vpop.permute.xlu0 %6653  ;;  %v11982_v32 = vpop.permute.xlu1 %6655 }
0x1378   :  { %v11984_v4 = vpop.permute.xlu0 %6657  ;;  %v11986_v53 = vpop.permute.xlu1 %6206 }
0x137c   :  { %v11988_v47 = vpop.permute.xlu0 %6204  ;;  %v11990_v2 = vpop.permute.xlu1 %6210 }
0x1380   :  { %v11992_v30 = vpop.permute.xlu0 %6208  ;;  %v11994_v19 = vpop.permute.xlu1 %6214 }
0x1384   :  { %v11996_v49 = vpop.permute.xlu0 %6212  ;;  %v11998_v34 = vpop.permute.xlu1 %6414 }
0x1388   :  { %v12000_v52 = vpop.permute.xlu0 %6216  ;;  %v12002_v40 = vpop.permute.xlu1 %6418 }
0x138c   :  { %v12004_v38 = vpop.permute.xlu0 %6412  ;;  %v12006_v27 = vpop.permute.xlu1 %6422 }
0x1390   :  { %v12008_v51 = vpop.permute.xlu0 %6416  ;;  %v12010_v14 = vpop.permute.xlu1 %6591 }
0x1394   :  { %v12012_v24 = vpop.permute.xlu0 %6420  ;;  %v12014_v10 = vpop.permute.xlu1 %6595 }
0x1398   :  { %v12016_v46 = vpop.permute.xlu0 %6424  ;;  %v12018_v11 = vpop.permute.xlu1 %6599 }
0x139c   :  { %v12020_v60 = vpop.permute.xlu0 %6589  ;;  %v12022_v39 = vpop.permute.xlu1 %6603 }
0x13a0   :  { %v12024_v44 = vpop.permute.xlu0 %6593  ;;  %v6608_v56 = vpop.permute.xlu1 %6607 }
0x13a4   :  { %v12026_v17 = vpop.permute.xlu0 %6597  ;;  %v6612_v1 = vpop.permute.xlu1 %6611 }
0x13a8   :  { %v12028_v18 = vpop.permute.xlu0 %6601  ;;  %v6616_v58 = vpop.permute.xlu1 %6615 }
0x13ac   :  { %v6606_v31 = vpop.permute.xlu0 %6605  ;;  %v6459_v48 = vpop.permute.xlu1 %6458 }
0x13ad   :  { %v12031_v54 = vsel %vm12832_vm15, %v6606_v31, %v6608_v56  ;;  %vm12849_vm15 = vmmov %vm12846_vm3 }
0x13b0   :  { %v6610_v0 = vpop.permute.xlu0 %6609  ;;  %v6660_v29 = vpop.permute.xlu1 %6659 }
0x13b1   :  { %v12034_v13 = vsel %vm12833_vm5, %v6610_v0, %v6612_v1  ;;  %v12037_v28 = vmul.f32 %v6660_v29, %v12834_v62  ;;  %vm12850_vm5 = vmmov %vm12846_vm3 }
0x13b4   :  { %v6614_v3 = vpop.permute.xlu0 %6613  ;;  %v6219_v6 = vpop.permute.xlu1 %6218 }
0x13b5   :  { %v12040_v22 = vsel %vm12835_vm12, %v6614_v3, %v6616_v58  ;;  %v12043_v36 = vmul.f32 %v6219_v6, %v12750_v59  ;;  %vm12851_vm12 = vmmov %vm12846_vm3 }
0x13b8   :  { %v6427_v12 = vpop.permute.xlu1 %6426  ;;  %v6618_v56 = vpop.permute.xlu0 %6617 }
0x13b9   :  { %v12046_v26 = vmul.f32 %v6427_v12, %v12750_v59 }
0x13bc   :  { %v6620_v31 = vpop.permute.xlu1 %6619 }
0x13bd   :  { %v6628_v1 = vsel %vm12836_vm0, %v6618_v56, %v6620_v31  ;;  %vm12853_vm0 = vcmask 588800  }
0x13be   :  { %v12050_v0 = vmul.f32 %v6628_v1, %v12834_v62 }
0x1414   :  { %v7692_v29 = vpop.f32.mrb[98].mxu1 }
0x1415   :  { %v6004_v15 = vpop.f32.mrb[99].mxu1  ;;  %6246 = vrot.lane.b32.xlu1 %v7692_v29, %s8234_s8 }
0x1416   :  { %6244 = vrot.lane.b32.xlu0 %v6004_v15, %s8234_s8 }
0x1418   :  { %v7714_v58 = vpop.f32.mrb[78].mxu0 }
0x1419   :  { %6326 = vrot.lane.b32.xlu1 %v7714_v58, %s8215_s21  ;;  %v6149_v3 = vpop.f32.mrb[79].mxu0 }
0x141a   :  { %6324 = vrot.lane.b32.xlu0 %v6149_v3, %s8215_s21 }
0x141c   :  { %v7695_v6 = vpop.f32.mrb[104].mxu1 }
0x141d   :  { %v6014_v12 = vpop.f32.mrb[105].mxu1  ;;  %6250 = vrot.lane.b32.xlu1 %v7695_v6, %s8234_s8 }
0x141e   :  { %6248 = vrot.lane.b32.xlu0 %v6014_v12, %s8234_s8 }
0x1420   :  { %v7717_v56 = vpop.f32.mrb[80].mxu0 }
0x1421   :  { %6330 = vrot.lane.b32.xlu1 %v7717_v56, %s8215_s21  ;;  %v6159_v31 = vpop.f32.mrb[81].mxu0 }
0x1422   :  { %6328 = vrot.lane.b32.xlu0 %v6159_v31, %s8215_s21  ;;  %v12837_v31 = vld [vmem:[#allocation16_spill] sm:$0xff] }
0x1424   :  { %v7698_v1 = vpop.f32.mrb[106].mxu1 }
0x1425   :  { %v6024_v15 = vpop.f32.mrb[107].mxu1  ;;  %6254 = vrot.lane.b32.xlu1 %v7698_v1, %s8234_s8  ;;  %v6477_v1 = vmul.f32 %v11958_v41, %v12837_v31 }
0x1426   :  { %6252 = vrot.lane.b32.xlu0 %v6024_v15, %s8234_s8  ;;  %v6476_v15 = vmul.f32 %v11958_v41, %v12757_v9  ;;  %v6480_v41 = vmul.f32 %v11964_v63, %v12758_v35 }
0x1428   :  { %v7720_v29 = vpop.f32.mrb[82].mxu0 }
0x1429   :  { %6334 = vrot.lane.b32.xlu1 %v7720_v29, %s8215_s21  ;;  %v6169_v58 = vpop.f32.mrb[83].mxu0  ;;  %v12838_v29 = vld [vmem:[#allocation24_spill] sm:$0xff] }
0x142a   :  { %6332 = vrot.lane.b32.xlu0 %v6169_v58, %s8215_s21  ;;  %v6479_v58 = vmul.f32 %v11966_v25, %v12838_v29 }
0x142c   :  { %v7701_v3 = vpop.f32.mrb[108].mxu1 }
0x142d   :  { %v6034_v6 = vpop.f32.mrb[109].mxu1  ;;  %6258 = vrot.lane.b32.xlu1 %v7701_v3, %s8234_s8  ;;  %v6478_v3 = vmul.f32 %v11966_v25, %v12756_v37  ;;  %v6670_v25 = vmul.f32 %v11974_v5, %v12829_v55  ;;  %v6674_v5 = vmul.f32 %v11982_v32, %v12838_v29 }
0x142e   :  { %6256 = vrot.lane.b32.xlu0 %v6034_v6, %s8234_s8  ;;  %v12839_v6 = vld [vmem:[#allocation13_spill] sm:$0xff] }
0x1430   :  { %v7723_v12 = vpop.f32.mrb[84].mxu0 }
0x1431   :  { %6338 = vrot.lane.b32.xlu1 %v7723_v12, %s8215_s21  ;;  %v6179_v56 = vpop.f32.mrb[85].mxu0  ;;  %v6481_v12 = vmul.f32 %v11964_v63, %v12839_v6  ;;  %v6672_v63 = vmul.f32 %v11978_v8, %v12831_v7  ;;  %v6501_v8 = vpop.permute.xlu0 %6500 }
0x1432   :  { %6336 = vrot.lane.b32.xlu0 %v6179_v56, %s8215_s21  ;;  %v6483_v56 = vmul.f32 %v6459_v48, %v12834_v62  ;;  %v12108_v62 = vpop.permute.xlu1 %6502  ;;  %s8235_s21 = smov 28  }
0x1435   :  { %6518 = vrot.lane.b32.xlu1 %v6477_v1, %s8227_s17  ;;  %v6482_v1 = vmul.f32 %v6459_v48, %v12750_v59  ;;  %v6671_v48 = vmul.f32 %v11976_v61, %v12830_v23 }
0x1436   :  { %6516 = vrot.lane.b32.xlu0 %v6476_v15, %s8227_s17  ;;  %v6669_v15 = vmul.f32 %v11972_v33, %v12828_v16  ;;  %v6673_v33 = vmul.f32 %v11980_v20, %v12837_v31 }
0x1439   :  { %6522 = vrot.lane.b32.xlu1 %v6479_v58, %s8227_s17  ;;  %v6507_v58 = vpop.permute.xlu1 %6506 }
0x143a   :  { %6520 = vrot.lane.b32.xlu0 %v6478_v3, %s8227_s17  ;;  %v6505_v3 = vpop.permute.xlu0 %6504 }
0x143d   :  { %6526 = vrot.lane.b32.xlu1 %v6481_v12, %s8227_s17  ;;  %v12110_v61 = vpop.permute.xlu1 %6510 }
0x143e   :  { %6524 = vrot.lane.b32.xlu0 %v6480_v41, %s8227_s17  ;;  %v12112_v12 = vpop.permute.xlu0 %6508 }
0x1441   :  { %6530 = vrot.lane.b32.xlu1 %v6483_v56, %s8227_s17  ;;  %v12114_v41 = vpop.permute.xlu1 %6514 }
0x1442   :  { %6528 = vrot.lane.b32.xlu0 %v6482_v1, %s8227_s17  ;;  %v12116_v56 = vpop.permute.xlu0 %6512 }
0x1445   :  { %6687 = vrot.lane.b32.xlu1 %v6670_v25, %s8230_s28 }
0x1446   :  { %6685 = vrot.lane.b32.xlu0 %v6669_v15, %s8230_s28 }
0x1449   :  { %6691 = vrot.lane.b32.xlu1 %v6672_v63, %s8230_s28 }
0x144a   :  { %6689 = vrot.lane.b32.xlu0 %v6671_v48, %s8230_s28 }
0x144d   :  { %6695 = vrot.lane.b32.xlu1 %v6674_v5, %s8230_s28 }
0x144e   :  { %6693 = vrot.lane.b32.xlu0 %v6673_v33, %s8230_s28 }
0x1487   :  { %v6247_v32 = vpop.permute.xlu1 %6246 }
0x1488   :  { %v6269_v20 = vmul.f32 %v6247_v32, %v12752_v45  ;;  %v6245_v1 = vpop.permute.xlu0 %6244 }
0x1489   :  { %v6268_v25 = vmul.f32 %v6245_v1, %v12753_v43 }
0x148a   :  { %6286 = vrot.lane.b32.xlu1 %v6269_v20, %s8222_s19 }
0x148b   :  { %v6327_v15 = vpop.permute.xlu1 %6326  ;;  %6284 = vrot.lane.b32.xlu0 %v6268_v25, %s8222_s19 }
0x148c   :  { %v6349_v63 = vmul.f32 %v6327_v15, %v12752_v45  ;;  %v6325_v48 = vpop.permute.xlu0 %6324 }
0x148d   :  { %v6348_v5 = vmul.f32 %v6325_v48, %v12753_v43 }
0x148e   :  { %6366 = vrot.lane.b32.xlu1 %v6349_v63, %s8231_s29 }
0x148f   :  { %v6251_v33 = vpop.permute.xlu1 %6250  ;;  %6364 = vrot.lane.b32.xlu0 %v6348_v5, %s8231_s29 }
0x1490   :  { %v6271_v32 = vmul.f32 %v6251_v33, %v12754_v57  ;;  %v6249_v42 = vpop.permute.xlu0 %6248 }
0x1491   :  { %v6270_v1 = vmul.f32 %v6249_v42, %v12755_v50 }
0x1492   :  { %6290 = vrot.lane.b32.xlu1 %v6271_v32, %s8222_s19 }
0x1493   :  { %v6331_v20 = vpop.permute.xlu1 %6330  ;;  %6288 = vrot.lane.b32.xlu0 %v6270_v1, %s8222_s19 }
0x1494   :  { %v6351_v25 = vmul.f32 %v6331_v20, %v12754_v57  ;;  %v6329_v15 = vpop.permute.xlu0 %6328 }
0x1495   :  { %v6350_v48 = vmul.f32 %v6329_v15, %v12755_v50 }
0x1496   :  { %6370 = vrot.lane.b32.xlu1 %v6351_v25, %s8231_s29 }
0x1497   :  { %v6255_v63 = vpop.permute.xlu1 %6254  ;;  %6368 = vrot.lane.b32.xlu0 %v6350_v48, %s8231_s29 }
0x1498   :  { %v6273_v5 = vmul.f32 %v6255_v63, %v12756_v37  ;;  %v6253_v33 = vpop.permute.xlu0 %6252 }
0x1499   :  { %v6272_v42 = vmul.f32 %v6253_v33, %v12757_v9 }
0x149a   :  { %6294 = vrot.lane.b32.xlu1 %v6273_v5, %s8222_s19 }
0x149b   :  { %v6335_v32 = vpop.permute.xlu1 %6334  ;;  %6292 = vrot.lane.b32.xlu0 %v6272_v42, %s8222_s19 }
0x149c   :  { %v6353_v1 = vmul.f32 %v6335_v32, %v12756_v37  ;;  %v6333_v20 = vpop.permute.xlu0 %6332 }
0x149d   :  { %v6352_v15 = vmul.f32 %v6333_v20, %v12757_v9 }
0x149e   :  { %6374 = vrot.lane.b32.xlu1 %v6353_v1, %s8231_s29 }
0x149f   :  { %v6259_v25 = vpop.permute.xlu1 %6258  ;;  %6372 = vrot.lane.b32.xlu0 %v6352_v15, %s8231_s29 }
0x14a0   :  { %v6275_v48 = vmul.f32 %v6259_v25, %v12750_v59  ;;  %v6257_v63 = vpop.permute.xlu0 %6256  ;;  %v6675_v25 = vmul.f32 %v11984_v4, %v12839_v6 }
0x14a1   :  { %v6274_v33 = vmul.f32 %v6257_v63, %v12758_v35  ;;  %v6437_v63 = vmul.f32 %v11998_v34, %v12752_v45  ;;  %v6439_v34 = vmul.f32 %v12002_v40, %v12754_v57  ;;  %v6441_v40 = vmul.f32 %v12006_v27, %v12756_v37 }
0x14a2   :  { %6298 = vrot.lane.b32.xlu1 %v6275_v48, %s8222_s19  ;;  %v6534_v48 = vsel %vm6532_vm1, %v6505_v3, %v6507_v58  ;;  %v6536_v58 = vsel %vm6532_vm1, %v12116_v56, %v12114_v41  ;;  %v6442_v27 = vmul.f32 %v12016_v46, %v12758_v35  ;;  %v6624_v46 = vsel %vm12842_vm11, %v12028_v18, %v12022_v39 }
0x14a3   :  { %v6339_v5 = vpop.permute.xlu1 %6338  ;;  %6296 = vrot.lane.b32.xlu0 %v6274_v33, %s8222_s19  ;;  %v6436_v33 = vmul.f32 %v12004_v38, %v12753_v43  ;;  %v6438_v38 = vmul.f32 %v12008_v51, %v12755_v50 }
0x14a4   :  { %v6355_v42 = vmul.f32 %v6339_v5, %v12750_v59  ;;  %v6337_v32 = vpop.permute.xlu0 %6336  ;;  %v6533_v59 = vsel %vm6532_vm1, %v6501_v8, %v12108_v62  ;;  %v6552_v8 = vadd.f32 %v6536_v58, %v6439_v34  ;;  %v6642_v34 = vmul.f32 %v12034_v13, %v12838_v29 }
0x14a5   :  { %v6354_v20 = vmul.f32 %v6337_v32, %v12758_v35  ;;  %v6549_v4 = vadd.f32 %v6533_v59, %v6436_v33  ;;  %v6228_v13 = vmul.f32 %v11988_v47, %v12753_v43 }
0x14a6   :  { %6378 = vrot.lane.b32.xlu1 %v6355_v42, %s8231_s29  ;;  %v6550_v42 = vadd.f32 %v6534_v48, %v6437_v63 }
0x14a7   :  { %v6519_v1 = vpop.permute.xlu1 %6518  ;;  %6376 = vrot.lane.b32.xlu0 %v6354_v20, %s8231_s29 }
0x14a8   :  { %v6517_v15 = vpop.permute.xlu0 %6516 }
0x14a9   :  { %v6537_v56 = vsel %vm6532_vm1, %v6517_v15, %v6519_v1  ;;  %v6622_v1 = vsel %vm12840_vm2, %v12024_v44, %v12014_v10  ;;  %v6621_v15 = vsel %vm12841_vm9, %v12020_v60, %v12010_v14  ;;  %v6623_v14 = vsel %vm12843_vm4, %v12026_v17, %v12018_v11 }
0x14aa   :  { %6699 = vrot.lane.b32.xlu1 %v12037_v28, %s8230_s28  ;;  %v6535_v28 = vsel %vm6532_vm1, %v12112_v12, %v12110_v61  ;;  %v6440_v61 = vmul.f32 %v12012_v24, %v12757_v9  ;;  %v6637_v10 = vmul.f32 %v6621_v15, %v12828_v16  ;;  %v6639_v58 = vmul.f32 %v6623_v14, %v12830_v23  ;;  %v8005_v14 = vld [vmem:[%s12313_s10 + $0x10] sm:$0xff]  }
0x14ab   :  { %v6523_v5 = vpop.permute.xlu1 %6522  ;;  %6697 = vrot.lane.b32.xlu0 %v6675_v25, %s8230_s28  ;;  %v6551_v20 = vadd.f32 %v6535_v28, %v6438_v38  ;;  %v6641_v11 = vmul.f32 %v12031_v54, %v12837_v31  ;;  %v6229_v38 = vmul.f32 %v11986_v53, %v12752_v45  ;;  %v6230_v45 = vmul.f32 %v11992_v30, %v12755_v50 }
0x14ac   :  { %v6521_v32 = vpop.permute.xlu0 %6520  ;;  %v6553_v48 = vadd.f32 %v6537_v56, %v6440_v61 }
0x14ad   :  { %v6538_v41 = vsel %vm6532_vm1, %v6521_v32, %v6523_v5  ;;  %v6638_v32 = vmul.f32 %v6622_v1, %v12829_v55  ;;  %v6640_v55 = vmul.f32 %v6624_v46, %v12831_v7 }
0x14ae   :  { %6759 = vrot.lane.b32.xlu1 %v6550_v42, %s8229_s27  ;;  %v6554_v51 = vadd.f32 %v6538_v41, %v6441_v40  ;;  %v6231_v40 = vmul.f32 %v11990_v2, %v12754_v57  ;;  %v6233_v57 = vmul.f32 %v11994_v19, %v12756_v37  ;;  %v6232_v2 = vmul.f32 %v11996_v49, %v12757_v9 }
0x14af   :  { %v6527_v62 = vpop.permute.xlu1 %6526  ;;  %6757 = vrot.lane.b32.xlu0 %v6549_v4, %s8229_s27  ;;  %v6234_v9 = vmul.f32 %v12000_v52, %v12758_v35 }
0x14b0   :  { %v6525_v3 = vpop.permute.xlu0 %6524 }
0x14b1   :  { %v6539_v59 = vsel %vm6532_vm1, %v6525_v3, %v6527_v62 }
0x14b2   :  { %6763 = vrot.lane.b32.xlu1 %v6552_v8, %s8229_s27  ;;  %v6555_v42 = vadd.f32 %v6539_v59, %v6442_v27 }
0x14b3   :  { %v6531_v12 = vpop.permute.xlu1 %6530  ;;  %6761 = vrot.lane.b32.xlu0 %v6551_v20, %s8229_s27 }
0x14b4   :  { %v6529_v25 = vpop.permute.xlu0 %6528 }
0x14b5   :  { %v6540_v63 = vsel %vm6532_vm1, %v6529_v25, %v6531_v12  ;;  %vm6976_vm1 = vcmask 162816  }
0x14b6   :  { %6767 = vrot.lane.b32.xlu1 %v6554_v51, %s8229_s27  ;;  %v6556_v33 = vadd.f32 %v6540_v63, %v12046_v26  ;;  %v8003_v51 = vld [vmem:[%s12313_s10] sm:$0xff]   ;;  %v8004_v63 = vld [vmem:[%s12313_s10 + $0x8] sm:$0xff]  }
0x14b7   :  { %v6688_v24 = vpop.permute.xlu1 %6687  ;;  %6765 = vrot.lane.b32.xlu0 %v6553_v48, %s8229_s27  ;;  %7725 = vmatpush3.bf16.msra.mxu1 %v8003_v51 }
0x14b8   :  { %v6686_v5 = vpop.permute.xlu0 %6685  ;;  %v6710_v60 = vadd.f32 %v6688_v24, %v6638_v32  ;;  %7726 = vmatprep.subr.bf16.mxu1 %v12669_v21 }
0x14b9   :  { %v6709_v4 = vadd.f32 %v6686_v5, %v6637_v10 }
0x14ba   :  { %6771 = vrot.lane.b32.xlu1 %v6556_v33, %s8229_s27 }
0x14bb   :  { %v6692_v44 = vpop.permute.xlu1 %6691  ;;  %6769 = vrot.lane.b32.xlu0 %v6555_v42, %s8229_s27  ;;  %7727 = vmatpush3.bf16.msra.mxu1 %v8004_v63 }
0x14bc   :  { %v6690_v26 = vpop.permute.xlu0 %6689  ;;  %v6712_v16 = vadd.f32 %v6692_v44, %v6640_v55  ;;  %7728 = vmatprep.subr.bf16.mxu1 %v12669_v21  ;;  %v6643_v44 = vmul.f32 %v12040_v22, %v12839_v6  ;;  %v8007_v22 = vld [vmem:[%s12313_s10 + $0x20] ss:$0 sps:$4 sm:$0xff]  }
0x14bd   :  { %v6711_v39 = vadd.f32 %v6690_v26, %v6639_v58 }
0x14be   :  { %6791 = vrot.lane.b32.xlu1 %v6710_v60, %s8235_s21  ;;  %v8006_v60 = vld [vmem:[%s12313_s10 + $0x18] sm:$0xff]  }
0x14bf   :  { %6789 = vrot.lane.b32.xlu0 %v6709_v4, %s8235_s21  ;;  %v6696_v18 = vpop.permute.xlu1 %6695  ;;  %7729 = vmatpush3.bf16.msra.mxu1 %v8005_v14 }
0x14c0   :  { %v6694_v28 = vpop.permute.xlu0 %6693  ;;  %v6714_v7 = vadd.f32 %v6696_v18, %v6642_v34  ;;  %7730 = vmatprep.subr.bf16.mxu1 %v12669_v21 }
0x14c1   :  { %v6713_v17 = vadd.f32 %v6694_v28, %v6641_v11 }
0x14c2   :  { %6795 = vrot.lane.b32.xlu1 %v6712_v16, %s8235_s21 }
0x14c3   :  { %6793 = vrot.lane.b32.xlu0 %v6711_v39, %s8235_s21  ;;  %7731 = vmatpush3.bf16.msra.mxu1 %v8006_v60 }
0x14c4   :  { %7732 = vmatprep.subr.bf16.mxu1 %v12669_v21 }
0x14c6   :  { %6799 = vrot.lane.b32.xlu1 %v6714_v7, %s8235_s21 }
0x14c7   :  { %6797 = vrot.lane.b32.xlu0 %v6713_v17, %s8235_s21 }
0x14fc   :  { %v6287_v23 = vpop.permute.xlu1 %6286 }
0x14fd   :  { %v6285_v62 = vpop.permute.xlu0 %6284  ;;  %v6309_v29 = vadd.f32 %v6287_v23, %v6229_v38 }
0x14fe   :  { %v6308_v8 = vadd.f32 %v6285_v62, %v6228_v13 }
0x1500   :  { %v6367_v3 = vpop.permute.xlu1 %6366 }
0x1501   :  { %v6389_v54 = vadd.f32 %v6367_v3, %v6309_v29  ;;  %v6365_v31 = vpop.permute.xlu0 %6364 }
0x1502   :  { %v6388_v20 = vadd.f32 %v6365_v31, %v6308_v8 }
0x1503   :  { %6727 = vrot.lane.b32.xlu1 %v6389_v54, %s8234_s8 }
0x1504   :  { %v6291_v41 = vpop.permute.xlu1 %6290  ;;  %6725 = vrot.lane.b32.xlu0 %v6388_v20, %s8234_s8 }
0x1505   :  { %v6289_v56 = vpop.permute.xlu0 %6288  ;;  %v6311_v53 = vadd.f32 %v6291_v41, %v6231_v40 }
0x1506   :  { %v6310_v43 = vadd.f32 %v6289_v56, %v6230_v45 }
0x1508   :  { %v6371_v47 = vpop.permute.xlu1 %6370 }
0x1509   :  { %v6391_v61 = vadd.f32 %v6371_v47, %v6311_v53  ;;  %v6369_v12 = vpop.permute.xlu0 %6368 }
0x150a   :  { %v6390_v25 = vadd.f32 %v6369_v12, %v6310_v43 }
0x150b   :  { %6731 = vrot.lane.b32.xlu1 %v6391_v61, %s8234_s8 }
0x150c   :  { %v6295_v48 = vpop.permute.xlu1 %6294  ;;  %6729 = vrot.lane.b32.xlu0 %v6390_v25, %s8234_s8 }
0x150d   :  { %v6293_v50 = vpop.permute.xlu0 %6292  ;;  %v6313_v30 = vadd.f32 %v6295_v48, %v6233_v57 }
0x150e   :  { %v6312_v59 = vadd.f32 %v6293_v50, %v6232_v2 }
0x1510   :  { %v6375_v27 = vpop.permute.xlu1 %6374 }
0x1511   :  { %v6393_v1 = vadd.f32 %v6375_v27, %v6313_v30  ;;  %v6373_v24 = vpop.permute.xlu0 %6372 }
0x1512   :  { %v6392_v15 = vadd.f32 %v6373_v24, %v6312_v59 }
0x1513   :  { %6735 = vrot.lane.b32.xlu1 %v6393_v1, %s8234_s8 }
0x1514   :  { %v6299_v37 = vpop.permute.xlu1 %6298  ;;  %6733 = vrot.lane.b32.xlu0 %v6392_v15, %s8234_s8 }
0x1515   :  { %v6297_v19 = vpop.permute.xlu0 %6296  ;;  %v6315_v49 = vadd.f32 %v6299_v37, %v12043_v36 }
0x1516   :  { %v6314_v33 = vadd.f32 %v6297_v19, %v6234_v9  ;;  %v12852_v19 = vld [vmem:[#allocation32_spill] sm:$0xff] }
0x1518   :  { %v6379_v5 = vpop.permute.xlu1 %6378 }
0x1519   :  { %v6395_v42 = vadd.f32 %v6379_v5, %v6315_v49  ;;  %v6377_v32 = vpop.permute.xlu0 %6376 }
0x151a   :  { %v6394_v46 = vadd.f32 %v6377_v32, %v6314_v33 }
0x151b   :  { %6739 = vrot.lane.b32.xlu1 %v6395_v42, %s8234_s8 }
0x151c   :  { %v6700_v10 = vpop.permute.xlu1 %6699  ;;  %6737 = vrot.lane.b32.xlu0 %v6394_v46, %s8234_s8 }
0x151d   :  { %v6716_v35 = vadd.f32 %v6700_v10, %v12050_v0  ;;  %v6698_v52 = vpop.permute.xlu0 %6697  ;;  %v6878_v0 = vsel %vm4148_vm13, %v8007_v22, 0  ;;  %v12854_v10 = vld [vmem:[#allocation12_spill] sm:$0xff] }
0x151e   :  { %v6715_v36 = vadd.f32 %v6698_v52, %v6643_v44  ;;  %7733 = vmatpush3.bf16.msra.mxu1 %v6878_v0 }
0x151f   :  { %6803 = vrot.lane.b32.xlu1 %v6716_v35, %s8235_s21 }
0x1520   :  { %6801 = vrot.lane.b32.xlu0 %v6715_v36, %s8235_s21  ;;  %v6760_v6 = vpop.permute.xlu1 %6759  ;;  %v6925_v36 = vld [vmem:[%s12305_s2] sm:$0xf] }
0x1521   :  { %v6758_v26 = vpop.permute.xlu0 %6757 }
0x1524   :  { %v6764_v4 = vpop.permute.xlu1 %6763 }
0x1525   :  { %v6762_v55 = vpop.permute.xlu0 %6761 }
0x1528   :  { %v6768_v58 = vpop.permute.xlu1 %6767 }
0x1529   :  { %v6766_v16 = vpop.permute.xlu0 %6765 }
0x152c   :  { %v6772_v39 = vpop.permute.xlu1 %6771 }
0x152d   :  { %v6770_v18 = vpop.permute.xlu0 %6769 }
0x1530   :  { %v6792_v34 = vpop.permute.xlu1 %6791 }
0x1531   :  { %v6790_v28 = vpop.permute.xlu0 %6789 }
0x1534   :  { %v6796_v11 = vpop.permute.xlu1 %6795 }
0x1535   :  { %v6794_v7 = vpop.permute.xlu0 %6793 }
0x1538   :  { %v6800_v17 = vpop.permute.xlu1 %6799 }
0x1539   :  { %v6798_v23 = vpop.permute.xlu0 %6797 }
0x1575   :  { %v6728_v38 = vpop.permute.xlu1 %6727 }
0x1576   :  { %v6726_v62 = vpop.permute.xlu0 %6725  ;;  %v6814_v31 = vsel %vm2982_vm10, %v6728_v38, %v6760_v6 }
0x1577   :  { %v6813_v40 = vsel %vm2982_vm10, %v6726_v62, %v6758_v26  ;;  %v6822_v43 = vsel %vm12845_vm8, %v6814_v31, %v6792_v34 }
0x1578   :  { %v6821_v51 = vsel %vm12847_vm7, %v6813_v40, %v6790_v28 }
0x157d   :  { %v6732_v21 = vpop.permute.xlu1 %6731 }
0x157e   :  { %v6730_v13 = vpop.permute.xlu0 %6729  ;;  %v6816_v56 = vsel %vm2982_vm10, %v6732_v21, %v6764_v4 }
0x157f   :  { %v6815_v45 = vsel %vm2982_vm10, %v6730_v13, %v6762_v55  ;;  %v6824_v48 = vsel %vm12848_vm6, %v6816_v56, %v6796_v11 }
0x1580   :  { %v6823_v63 = vsel %vm12850_vm5, %v6815_v45, %v6794_v7 }
0x1585   :  { %v6736_v29 = vpop.permute.xlu1 %6735 }
0x1586   :  { %v6734_v8 = vpop.permute.xlu0 %6733  ;;  %v6818_v3 = vsel %vm2982_vm10, %v6736_v29, %v6768_v58 }
0x1587   :  { %v6817_v20 = vsel %vm2982_vm10, %v6734_v8, %v6766_v16  ;;  %v6826_v53 = vsel %vm12844_vm14, %v6818_v3, %v6800_v17 }
0x1588   :  { %v6825_v47 = vsel %vm12846_vm3, %v6817_v20, %v6798_v23  ;;  %v6830_v2 = vadd.f32 %v6826_v53, %v6822_v43 }
0x1589   :  { %v6829_v27 = vadd.f32 %v6825_v47, %v6821_v51 }
0x158d   :  { %v6740_v54 = vpop.permute.xlu1 %6739 }
0x158e   :  { %v6738_v41 = vpop.permute.xlu0 %6737  ;;  %v6820_v61 = vsel %vm2982_vm10, %v6740_v54, %v6772_v39 }
0x158f   :  { %v6819_v25 = vsel %vm2982_vm10, %v6738_v41, %v6770_v18 }
0x1591   :  { %v6804_v12 = vpop.permute.xlu1 %6803 }
0x1592   :  { %v6828_v57 = vsel %vm12849_vm15, %v6820_v61, %v6804_v12  ;;  %v6802_v50 = vpop.permute.xlu0 %6801 }
0x1593   :  { %v6832_v30 = vadd.f32 %v6828_v57, %v6824_v48  ;;  %v6827_v59 = vsel %vm12851_vm12, %v6819_v25, %v6802_v50 }
0x1594   :  { %v6831_v1 = vadd.f32 %v6827_v59, %v6823_v63 }
0x1595   :  { %v6834_v24 = vadd.f32 %v6832_v30, %v6830_v2 }
0x1596   :  { %v6833_v15 = vadd.f32 %v6831_v1, %v6829_v27 }
0x1598   :  { %v6835_v37 = vadd.f32 %v6834_v24, %v6833_v15 }
0x159a   :  { %v6836_v9 = vmul.f32 %v6835_v37, %v12852_v19 }
0x159c   :  { %v6837_v49 = vpack.c.bf16 %v6836_v9, %v6836_v9 }
0x159e   :  { %7735 = vmatmul.mubr.msk.bf16.vlgmr.msra.gmra.mrb[112].mxu1 %vm12853_vm0, %v6837_v49 }
0x1671   :  { %v6914_v33 = vpop.f32.mrb[112].mxu1 }
0x1672   :  { %6921 = vrot.lane.b32.xlu0 %v6914_v33, %s8219_s18  ;;  %v7736_v5 = vpop.f32.mrb[113].mxu1  ;;  %s8236_s18 = smov [#allocation2]  }
0x1673   :  { %v6917_v42 = vpop.f32.mrb[114].mxu1  ;;  %s6985_s12 = sshll.u32 %s8236_s18, 4  ;;  %s6986_s12 = int_to_ptr.vmem [resolvable:$true] %s6985_s12 }
0x1674   :  { %v7737_v32 = vpop.f32.mrb[115].mxu1  ;;  %p8175_p1 = scmp.lt.s32.totalorder %s6986_s12, %s6986_s12 }
0x16e4   :  { %v6922_v46 = vpop.permute.xlu0 %6921 }
0x16e5   :  { %v6924_v44 = vadd.f32 %v6922_v46, %v12854_v10 }
0x16e7   :  { %v6926_v14 = vpack.c.bf16 %v6924_v44, %v6924_v44 }
0x16e9   :  { %6928 = vrot.lane.b32.xlu1 %v6926_v14, %s8222_s19  ;;  %s8170_s19 = scalar_lea.vmem %s6986_s12, 128 }
0x16ea   :  { %p8171_p0 = scmp.ne.s32.totalorder %s6986_s12, %s8170_s19  ;;  %p8176_p2 = scmp.lt.s32.totalorder %s8170_s19, %s8170_s19 }
0x16ec   :  { %p8177_p3 = por %p8176_p2, %p8175_p1 }
0x16ee   :  { %p8178_p4 = pnand %p8177_p3, %p8171_p0 }
0x175b   :  { %v6929_v35 = vpop.permute.xlu1 %6928 }
0x175c   :  { %v6934_v52 = vsel %vm4148_vm13, %v6929_v35, 0 }
0x175d   :  { %7739 = vmatpush3.bf16.msra.mxu0 %v6934_v52 }
0x1760   :  { %7741 = vmatmul.mubr.msk.bf16.vlgmr.msra.gmra.mrb[88].mxu0 %vm2982_vm10, %v6925_v36 }
0x1833   :  { %v6970_v60 = vpop.f32.mrb[88].mxu0 }
0x1834   :  { %v6977_v22 = vsel %vm6976_vm1, %v6970_v60, 0.0  ;;  %v7742_v0 = vpop.f32.mrb[89].mxu0 }
0x1835   :  { %6978 = vst [vmem:[#allocation2] sm:$0xff] %v6977_v22  ;;  %v6973_v6 = vpop.f32.mrb[90].mxu0 }
0x1836   :  { %v7743_v26 = vpop.f32.mrb[91].mxu0 }
0x1837   :  { %8181 = shalt.err (!%p8178_p4)
}
0x1838   :  { %s8182_s24 = scalar_lea.hbm %s12314_s11, 128 }
0x1839   :  { %p8183_p5 = scmp.ne.s32.totalorder %s12314_s11, %s8182_s24  ;;  %p8186_p6 = scmp.lt.u32.totalorder %s8182_s24, %s12314_s11 }
0x183b   :  { %p8188_p7 = pnand %p8186_p6, %p8183_p5 }
0x183d   :  { %8191 = shalt.err (!%p8188_p7)
}
0x183e   :  { %6988 = dma.vmem_to_hbm [thread:$0]  %s6986_s12, 128, %s12314_s11, [#allocation3]  }
0x183f   :  { %8192 = dma.done.wait [#allocation3], 128  }
0x1840   :  { %8193 = vsyncadd [#allocation3], 4294967168 }
0x1841   :  { %6992 = vsyncpa [#allocation3], 1 }

</bundles_post_ra>
